<compile_context>
chip_gen: v5e
topology: v5e:2x2
jax: 0.10.0
libtpu: 0.0.40
codegen_flags: <defaults>
</compile_context>

<pallas_src>
import numpy as np
import jax
import jax.numpy as jnp
from jax.experimental import pallas as pl
from jax.experimental.pallas import tpu as pltpu


# --------------------------------------------------------------------------- glue constants

def _interior_mask(H, W, B):
    """(1, B*(H+2)*(W+2)) 0/1 mask: 1 on the HxW interior of each image's padded slab."""
    m = np.zeros((H + 2, W + 2), np.float32)
    m[1:H + 1, 1:W + 1] = 1.0
    return jnp.asarray(np.tile(m.reshape(1, -1), (1, B)))


def _scatter_mats(H, W):
    """(4, PS, PB) 0/1 matrices scattering a padded-flat HxW slab into the padded-flat
    2Hx2W slab for each ConvTranspose2d(k=2,s=2) tap (kh, kw); tap index = 2*kh + kw."""
    Ws, Wb = W + 2, 2 * W + 2
    P = np.zeros((4, (H + 2) * Ws, (2 * H + 2) * Wb), np.float32)
    for kh in range(2):
        for kw in range(2):
            for h in range(H):
                for w in range(W):
                    P[2 * kh + kw,
                      (h + 1) * Ws + (w + 1),
                      (2 * h + kh + 1) * Wb + (2 * w + kw + 1)] = 1.0
    return jnp.asarray(P, jnp.bfloat16)


def _const_spec(shape):
    nd = len(shape)
    return pl.BlockSpec(shape, lambda n, _nd=nd: (0,) * _nd)


# --------------------------------------------------------------------------- parameters

def _fold_bn(gamma, beta, mean, var, eps=1e-5):
    scale = gamma / jnp.sqrt(var + eps)
    return scale, beta - mean * scale


def _init_bn(key, c):
    k0, k1, k2, k3 = jax.random.split(key, 4)
    gamma = 0.5 + jax.random.uniform(k0, (c,), jnp.float32)
    beta = 0.1 * jax.random.normal(k1, (c,), jnp.float32)
    mean = 0.1 * jax.random.normal(k2, (c,), jnp.float32)
    var = 0.5 + jax.random.uniform(k3, (c,), jnp.float32)
    return _fold_bn(gamma, beta, mean, var)              # eval-mode (scale, bias)


def _init_conv3(key, cin, cout):                         # PyTorch Conv2d weight: OIHW
    return 0.1 * jax.random.normal(key, (cout, cin, 3, 3), jnp.float32)


def _init_convT(key, cin, cout):                         # PyTorch ConvTranspose2d: (Cin,Cout,2,2)
    return 0.1 * jax.random.normal(key, (cin, cout, 2, 2), jnp.float32)


def init_params(key, g_ch, x_ch, out_ch):
    ks = list(jax.random.split(key, 20))
    return {
        "g0_w1": _init_conv3(ks[0], g_ch, g_ch),   "g0_bn1": _init_bn(ks[1], g_ch),
        "g0_w2": _init_conv3(ks[2], g_ch, g_ch),   "g0_bn2": _init_bn(ks[3], g_ch),
        "g1_w1": _init_conv3(ks[4], g_ch, out_ch), "g1_bn1": _init_bn(ks[5], out_ch),
        "g1_wt2": _init_convT(ks[6], out_ch, out_ch), "g1_bn2": _init_bn(ks[7], out_ch),
        "g1_wup": _init_convT(ks[8], g_ch, out_ch),   "g1_bnup": _init_bn(ks[9], out_ch),
        "x0_w1": _init_conv3(ks[10], x_ch, x_ch),  "x0_bn1": _init_bn(ks[11], x_ch),
        "x0_w2": _init_conv3(ks[12], x_ch, x_ch),  "x0_bn2": _init_bn(ks[13], x_ch),
        "x1_w1": _init_conv3(ks[14], x_ch, out_ch), "x1_bn1": _init_bn(ks[15], out_ch),
        "x1_w2": _init_conv3(ks[16], out_ch, out_ch), "x1_bn2": _init_bn(ks[17], out_ch),
        "gf_w": _init_conv3(ks[18], out_ch, out_ch),
        "xf_w": _init_conv3(ks[19], out_ch, out_ch),
    }


# ---- PyTorch-layout weights (+ folded BN scale) -> kernel-layout bf16 stacks ----

def _w3_taps(w_oihw, scale, C):
    """Conv2d OIHW (co,ci,3,3) -> (9, C, C) per-tap matrices (ghost-padded to C),
    tap k = 3*dh + dw."""
    co, ci = w_oihw.shape[:2]
    w = w_oihw if scale is None else w_oihw * scale[:, None, None, None]
    wf = jnp.zeros((C, C, 3, 3), jnp.float32).at[:co, :ci].set(w)
    return jnp.transpose(wf, (2, 3, 0, 1)).reshape(9, C, C)


def _wT_taps(w_iohw, scale, C):
    """ConvTranspose2d (Cin,Cout,2,2) -> (4, C, C) per-tap matrices, tap = 2*kh + kw."""
    ci, co = w_iohw.shape[:2]
    w = w_iohw * scale[None, :, None, None]
    wf = jnp.zeros((C, C, 2, 2), jnp.float32).at[:ci, :co].set(w)
    return jnp.transpose(wf, (2, 3, 1, 0)).reshape(4, C, C)


def _pack_params(p, C):
    g0s1, g0b1 = p["g0_bn1"]; g0s2, g0b2 = p["g0_bn2"]
    g1s1, g1b1 = p["g1_bn1"]; g1s2, g1b2 = p["g1_bn2"]; g1su, g1bu = p["g1_bnup"]
    x0s1, x0b1 = p["x0_bn1"]; x0s2, x0b2 = p["x0_bn2"]
    x1s1, x1b1 = p["x1_bn1"]; x1s2, x1b2 = p["x1_bn2"]

    # one stacked tap-weight constant: conv i occupies rows [9*i, 9*i+9)
    w3 = jnp.concatenate([
        _w3_taps(p["g0_w1"], g0s1, C), _w3_taps(p["g0_w2"], g0s2, C),
        _w3_taps(p["g1_w1"], g1s1, C),
        _w3_taps(p["x0_w1"], x0s1, C), _w3_taps(p["x0_w2"], x0s2, C),
        _w3_taps(p["x1_w1"], x1s1, C), _w3_taps(p["x1_w2"], x1s2, C),
        _w3_taps(p["gf_w"], None, C), _w3_taps(p["xf_w"], None, C),
    ], axis=0).astype(jnp.bfloat16)                                # (81, C, C)

    # ConvTranspose taps: rows 0..3 = conv2 branch, rows 4..7 = up branch
    wt = jnp.concatenate([
        _wT_taps(p["g1_wt2"], g1s2, C), _wT_taps(p["g1_wup"], g1su, C),
    ], axis=0).astype(jnp.bfloat16)                                # (8, C, C)

    def pad_b(b):
        return jnp.zeros((C,), jnp.float32).at[:b.shape[0]].set(b)

    biases = jnp.stack([
        pad_b(g0b1), pad_b(g0b2), pad_b(g1b1), pad_b(g1b2 + g1bu),  # both ConvT branches are BN'd then summed
        pad_b(x0b1), pad_b(x0b2), pad_b(x1b1), pad_b(x1b2),
    ], axis=0)[:, :, None]                                         # (8, C, 1) f32
    return w3, wt, biases


# --------------------------------------------------------------------------- fused kernel

def _build_kernel(HG, WG, HX, WX, C, B):
    WS, WB = WG + 2, WX + 2                   # padded row widths
    PS, PB = (HG + 2) * WS, (HX + 2) * WB     # per-image padded-flat sizes
    LS, LB = B * PS, B * PB                   # lane-batched payload lanes
    MS, MB = WS + 1, WB + 1                   # tap-slice margins (max |tap offset|)
    f32, bf16 = jnp.float32, jnp.bfloat16

    # row offsets into the stacked tap weights (w3: 9 rows per conv)
    W_G0_1, W_G0_2, W_G1_1 = 0, 9, 18
    W_X0_1, W_X0_2, W_X1_1, W_X1_2 = 27, 36, 45, 54
    W_GF, W_XF = 63, 72
    (B_G0_1, B_G0_2, B_G1_1, B_G1_UP,
     B_X0_1, B_X0_2, B_X1_1, B_X1_2) = range(8)

    def kernel(g_ref, x_ref, ms_ref, mb_ref, p_ref, w3_ref, wt_ref, b_ref,
               o_ref, g_in, g_t, x_in, x_t, g_big):

        def conv3x3(src, w_base, margin, row_w, lanes):
            """3x3 conv over a zero-haloed bf16 slab: 9 accumulated
            (C,C)x(C,lanes) MXU dots from static lane-offset slices."""
            acc = None
            for k in range(9):
                dh, dw = divmod(k, 3)
                d = (dh - 1) * row_w + (dw - 1)
                part = jnp.dot(w3_ref[w_base + k],
                               src[:, margin + d:margin + d + lanes],
                               preferred_element_type=f32)
                acc = part if acc is None else acc + part
            return acc                                          # (C, lanes) f32

        conv_s = lambda src, wb: conv3x3(src, wb, MS, WS, LS)
        conv_b = lambda src, wb: conv3x3(src, wb, MB, WB, LB)

        # Margins are never written by payload stores but ARE read by edge tap
        # slices -> keep them a deterministic zero (cheap: 10 tiny stores/step).
        for slab, M, L in ((g_in, MS, LS), (g_t, MS, LS),
                           (x_in, MB, LB), (x_t, MB, LB), (g_big, MB, LB)):
            slab[:, :M] = jnp.zeros((C, M), bf16)
            slab[:, M + L:2 * M + L] = jnp.zeros((C, M), bf16)

        ms = ms_ref[...]                                        # (1, LS)
        mb = mb_ref[...]                                        # (1, LB)

        # ---------------- g_rcu0 : BasicBlock(C, C) on the small grid ----------
        g_res = g_ref[...]                                      # f32 residual identity
        g_in[:, MS:MS + LS] = g_res.astype(bf16)
        t = jnp.maximum(conv_s(g_in, W_G0_1) + b_ref[B_G0_1], 0.0) * ms
        g_t[:, MS:MS + LS] = t.astype(bf16)
        g0 = jnp.maximum(conv_s(g_t, W_G0_2) + b_ref[B_G0_2] + g_res, 0.0) * ms
        g_in[:, MS:MS + LS] = g0.astype(bf16)                   # slab now holds g0

        # ---------------- g_rcu1 : BasicBlock(C, C, upsample=True) -------------
        # CBR1 output feeds only 1x1 ConvT taps -> no slab / halo masking needed
        # (the scatter matrices have all-zero rows at halo positions).
        t1 = jnp.maximum(conv_s(g_in, W_G1_1) + b_ref[B_G1_1], 0.0).astype(bf16)
        g0b = g0.astype(bf16)
        acts = []
        for tap in range(4):                                    # ConvT(k=2,s=2): 4 1x1 taps
            pre = (jnp.dot(wt_ref[tap], t1, preferred_element_type=f32)
                   + jnp.dot(wt_ref[4 + tap], g0b, preferred_element_type=f32)
                   + b_ref[B_G1_UP])
            acts.append(jnp.maximum(pre, 0.0).astype(bf16))
        for bi in range(B):                                     # scatter into 2x-upsampled slab
            s0 = bi * PS
            up = None
            for tap in range(4):
                part = jnp.dot(acts[tap][:, s0:s0 + PS], p_ref[tap],
                               preferred_element_type=f32)
                up = part if up is None else up + part
            g_big[:, MB + bi * PB:MB + (bi + 1) * PB] = up.astype(bf16)

        # ---------------- x_rcu0 : BasicBlock(C, C) on the big grid ------------
        x_res = x_ref[...]
        x_in[:, MB:MB + LB] = x_res.astype(bf16)
        t = jnp.maximum(conv_b(x_in, W_X0_1) + b_ref[B_X0_1], 0.0) * mb
        x_t[:, MB:MB + LB] = t.astype(bf16)
        x0 = jnp.maximum(conv_b(x_t, W_X0_2) + b_ref[B_X0_2] + x_res, 0.0) * mb
        x_in[:, MB:MB + LB] = x0.astype(bf16)                   # slab now holds x0

        # ---------------- x_rcu1 : BasicBlock(C, C) ----------------------------
        t = jnp.maximum(conv_b(x_in, W_X1_1) + b_ref[B_X1_1], 0.0) * mb
        x_t[:, MB:MB + LB] = t.astype(bf16)
        x1 = jnp.maximum(conv_b(x_t, W_X1_2) + b_ref[B_X1_2] + x0, 0.0) * mb
        x_in[:, MB:MB + LB] = x1.astype(bf16)                   # slab now holds x1

        # ---------------- fuse: relu(g_conv2(g1) + x_conv2(x1)) ----------------
        y = jnp.maximum(conv_b(g_big, W_GF) + conv_b(x_in, W_XF), 0.0)
        o_ref[...] = y          # padded slab, one lane-dense store; halo stripped in wrapper

    return kernel


# --------------------------------------------------------------------------- wrapper

def fuse_block_forward(g_nchw, x_nchw, params, images_per_step=None):
    N, GC, HG, WG = g_nchw.shape
    _, XC, HX, WX = x_nchw.shape
    OC = XC                                   # x_rcu1 residual requires x_ch == out_ch
    C = OC
    assert GC <= C, "kernel ghost-pads g channels up to out_ch"
    assert HX == 2 * HG and WX == 2 * WG, "g must be at half the spatial size of x"

    if images_per_step is None:               # modest lane-batch (vreg pressure grows with B);
        images_per_step = 1                   # keep >= 2 grid steps so both v7x TCs get work
        for cand in (4, 3, 2):
            if N % cand == 0 and N // cand >= 2:
                images_per_step = cand
                break
    B = images_per_step
    assert N % B == 0
    steps = N // B

    WS, WB = WG + 2, WX + 2
    PS, PB = (HG + 2) * WS, (HX + 2) * WB
    LS, LB = B * PS, B * PB
    MS, MB = WS + 1, WB + 1

    # Host-side prep (cheap XLA on tiny tensors): ghost-pad g channels, zero-pad
    # the 1-px conv halo, flatten spatial, and pack B images per grid step along
    # the lane axis so every in-kernel load/store/dot is lane-dense.
    g_p = jnp.pad(g_nchw, ((0, 0), (0, C - GC), (1, 1), (1, 1)))
    x_p = jnp.pad(x_nchw, ((0, 0), (0, 0), (1, 1), (1, 1)))

    def pack(a, P):
        a = a.reshape(steps, B, C, P)
        return jnp.transpose(a, (0, 2, 1, 3)).reshape(steps, C, B * P)

    g_flat = pack(g_p.reshape(N, C, PS), PS)
    x_flat = pack(x_p.reshape(N, C, PB), PB)

    w3, wt, biases = _pack_params(params, C)
    consts = [_interior_mask(HG, WG, B), _interior_mask(HX, WX, B),
              _scatter_mats(HG, WG), w3, wt, biases]

    kernel = _build_kernel(HG, WG, HX, WX, C, B)

    out = pl.pallas_call(
        kernel,
        out_shape=jax.ShapeDtypeStruct((steps, C, LB), jnp.float32),
        grid=(steps,),
        in_specs=[
            pl.BlockSpec((None, C, LS), lambda s: (s, 0, 0)),
            pl.BlockSpec((None, C, LB), lambda s: (s, 0, 0)),
        ] + [_const_spec(a.shape) for a in consts],
        out_specs=pl.BlockSpec((None, C, LB), lambda s: (s, 0, 0)),
        scratch_shapes=[
            pltpu.VMEM((C, 2 * MS + LS), jnp.bfloat16),   # g-path tap slab (input / g0)
            pltpu.VMEM((C, 2 * MS + LS), jnp.bfloat16),   # g-path tap slab (CBR1 output)
            pltpu.VMEM((C, 2 * MB + LB), jnp.bfloat16),   # x-path tap slab (input / x0 / x1)
            pltpu.VMEM((C, 2 * MB + LB), jnp.bfloat16),   # x-path tap slab (CBR1 outputs)
            pltpu.VMEM((C, 2 * MB + LB), jnp.bfloat16),   # upsampled g1 tap slab
        ],
        compiler_params=pltpu.CompilerParams(
            dimension_semantics=("parallel",)),           # v7x: split grid steps across TCs
    )(g_flat, x_flat, *consts)

    # Un-pack images and strip the 1-px halo (cheap XLA; keeps the kernel store lane-dense).
    out = out.reshape(steps, C, B, HX + 2, WX + 2)
    out = jnp.transpose(out, (0, 2, 1, 3, 4)).reshape(N, C, HX + 2, WX + 2)
    return out[:, :, 1:HX + 1, 1:WX + 1]                  # NCHW, like PyTorch


# --------------------------------------------------------------------------- main

if __name__ == "__main__":
    N = 4                    # 2 grid steps x 2 lane-batched images per step
    G_CH = 4                 # channels of g input
    X_CH = OUT_CH = 8        # x_rcu1 residual requires x_ch == out_ch
    HG = WG = 8              # g spatial (half of x: g_rcu1 upsamples 2x)
    HX = WX = 16             # x spatial

    key = jax.random.PRNGKey(0)
    kg, kx, kp = jax.random.split(key, 3)
    g = jax.random.normal(kg, (N, G_CH, HG, WG), jnp.float32)   # NCHW, PyTorch convention
    x = jax.random.normal(kx, (N, X_CH, HX, WX), jnp.float32)   # NCHW

    params = init_params(kp, G_CH, X_CH, OUT_CH)
    out = fuse_block_forward(g, x, params)                      # (N, OUT_CH, HX, WX)
    jax.block_until_ready(out)
    assert out.shape == (N, OUT_CH, HX, WX)
    assert bool(jnp.isfinite(out).all())
    print("KERNEL_OK")
</pallas_src>

<mosaic_0001>
module attributes {stable_mosaic.version = 11 : i64} {
  func.func @kernel(%arg0: i32, %arg1: memref<1x8x200xf32, #tpu.memory_space<vmem>>, %arg2: memref<1x8x648xf32, #tpu.memory_space<vmem>>, %arg3: memref<1x200xf32, #tpu.memory_space<vmem>>, %arg4: memref<1x648xf32, #tpu.memory_space<vmem>>, %arg5: memref<4x100x324xbf16, #tpu.memory_space<vmem>>, %arg6: memref<81x8x8xbf16, #tpu.memory_space<vmem>>, %arg7: memref<8x8x8xbf16, #tpu.memory_space<vmem>>, %arg8: memref<8x8x1xf32, #tpu.memory_space<vmem>>, %arg9: memref<1x8x648xf32, #tpu.memory_space<vmem>>, %arg10: memref<8x222xbf16, #tpu.memory_space<vmem>>, %arg11: memref<8x222xbf16, #tpu.memory_space<vmem>>, %arg12: memref<8x686xbf16, #tpu.memory_space<vmem>>, %arg13: memref<8x686xbf16, #tpu.memory_space<vmem>>, %arg14: memref<8x686xbf16, #tpu.memory_space<vmem>>) attributes {dimension_semantics = [#tpu.dimension_semantics<parallel>], iteration_bounds = array<i64: 2>, scalar_prefetch = 0 : i64, scratch_operands = 5 : i64, tpu.core_type = #tpu.core_type<tc>, window_params = [{transform_indices = @transform_0, window_bounds = array<i64: 1, 8, 200>}, {transform_indices = @transform_1, window_bounds = array<i64: 1, 8, 648>}, {pipeline_mode = #tpu.pipeline_mode<synchronous>, transform_indices = @transform_2, window_bounds = array<i64: 1, 200>}, {pipeline_mode = #tpu.pipeline_mode<synchronous>, transform_indices = @transform_3, window_bounds = array<i64: 1, 648>}, {pipeline_mode = #tpu.pipeline_mode<synchronous>, transform_indices = @transform_4, window_bounds = array<i64: 4, 100, 324>}, {pipeline_mode = #tpu.pipeline_mode<synchronous>, transform_indices = @transform_5, window_bounds = array<i64: 81, 8, 8>}, {pipeline_mode = #tpu.pipeline_mode<synchronous>, transform_indices = @transform_6, window_bounds = array<i64: 8, 8, 8>}, {pipeline_mode = #tpu.pipeline_mode<synchronous>, transform_indices = @transform_7, window_bounds = array<i64: 8, 8, 1>}, {transform_indices = @transform_8, window_bounds = array<i64: 1, 8, 648>}]} {
    %cst = arith.constant 0.000000e+00 : bf16
    %0 = vector.broadcast %cst : bf16 to vector<8x11xbf16>
    %c0 = arith.constant 0 : index
    %c0_0 = arith.constant 0 : index
    %1 = vector.load %arg10[%c0, %c0_0] : memref<8x222xbf16, #tpu.memory_space<vmem>>, vector<8x11xbf16>
    tpu.vector_store %arg10[%c0, %c0_0], %0 {strides = array<i32>} : memref<8x222xbf16, #tpu.memory_space<vmem>>, vector<8x11xbf16>,
    %cst_1 = arith.constant 0.000000e+00 : bf16
    %2 = vector.broadcast %cst_1 : bf16 to vector<8x11xbf16>
    %c0_2 = arith.constant 0 : index
    %c211 = arith.constant 211 : index
    %3 = vector.load %arg10[%c0_2, %c211] : memref<8x222xbf16, #tpu.memory_space<vmem>>, vector<8x11xbf16>
    tpu.vector_store %arg10[%c0_2, %c211], %2 {strides = array<i32>} : memref<8x222xbf16, #tpu.memory_space<vmem>>, vector<8x11xbf16>,
    %cst_3 = arith.constant 0.000000e+00 : bf16
    %4 = vector.broadcast %cst_3 : bf16 to vector<8x11xbf16>
    %c0_4 = arith.constant 0 : index
    %c0_5 = arith.constant 0 : index
    %5 = vector.load %arg11[%c0_4, %c0_5] : memref<8x222xbf16, #tpu.memory_space<vmem>>, vector<8x11xbf16>
    tpu.vector_store %arg11[%c0_4, %c0_5], %4 {strides = array<i32>} : memref<8x222xbf16, #tpu.memory_space<vmem>>, vector<8x11xbf16>,
    %cst_6 = arith.constant 0.000000e+00 : bf16
    %6 = vector.broadcast %cst_6 : bf16 to vector<8x11xbf16>
    %c0_7 = arith.constant 0 : index
    %c211_8 = arith.constant 211 : index
    %7 = vector.load %arg11[%c0_7, %c211_8] : memref<8x222xbf16, #tpu.memory_space<vmem>>, vector<8x11xbf16>
    tpu.vector_store %arg11[%c0_7, %c211_8], %6 {strides = array<i32>} : memref<8x222xbf16, #tpu.memory_space<vmem>>, vector<8x11xbf16>,
    %cst_9 = arith.constant 0.000000e+00 : bf16
    %8 = vector.broadcast %cst_9 : bf16 to vector<8x19xbf16>
    %c0_10 = arith.constant 0 : index
    %c0_11 = arith.constant 0 : index
    %9 = vector.load %arg12[%c0_10, %c0_11] : memref<8x686xbf16, #tpu.memory_space<vmem>>, vector<8x19xbf16>
    tpu.vector_store %arg12[%c0_10, %c0_11], %8 {strides = array<i32>} : memref<8x686xbf16, #tpu.memory_space<vmem>>, vector<8x19xbf16>,
    %cst_12 = arith.constant 0.000000e+00 : bf16
    %10 = vector.broadcast %cst_12 : bf16 to vector<8x19xbf16>
    %c0_13 = arith.constant 0 : index
    %c667 = arith.constant 667 : index
    %11 = vector.load %arg12[%c0_13, %c667] : memref<8x686xbf16, #tpu.memory_space<vmem>>, vector<8x19xbf16>
    tpu.vector_store %arg12[%c0_13, %c667], %10 {strides = array<i32>} : memref<8x686xbf16, #tpu.memory_space<vmem>>, vector<8x19xbf16>,
    %cst_14 = arith.constant 0.000000e+00 : bf16
    %12 = vector.broadcast %cst_14 : bf16 to vector<8x19xbf16>
    %c0_15 = arith.constant 0 : index
    %c0_16 = arith.constant 0 : index
    %13 = vector.load %arg13[%c0_15, %c0_16] : memref<8x686xbf16, #tpu.memory_space<vmem>>, vector<8x19xbf16>
    tpu.vector_store %arg13[%c0_15, %c0_16], %12 {strides = array<i32>} : memref<8x686xbf16, #tpu.memory_space<vmem>>, vector<8x19xbf16>,
    %cst_17 = arith.constant 0.000000e+00 : bf16
    %14 = vector.broadcast %cst_17 : bf16 to vector<8x19xbf16>
    %c0_18 = arith.constant 0 : index
    %c667_19 = arith.constant 667 : index
    %15 = vector.load %arg13[%c0_18, %c667_19] : memref<8x686xbf16, #tpu.memory_space<vmem>>, vector<8x19xbf16>
    tpu.vector_store %arg13[%c0_18, %c667_19], %14 {strides = array<i32>} : memref<8x686xbf16, #tpu.memory_space<vmem>>, vector<8x19xbf16>,
    %cst_20 = arith.constant 0.000000e+00 : bf16
    %16 = vector.broadcast %cst_20 : bf16 to vector<8x19xbf16>
    %c0_21 = arith.constant 0 : index
    %c0_22 = arith.constant 0 : index
    %17 = vector.load %arg14[%c0_21, %c0_22] : memref<8x686xbf16, #tpu.memory_space<vmem>>, vector<8x19xbf16>
    tpu.vector_store %arg14[%c0_21, %c0_22], %16 {strides = array<i32>} : memref<8x686xbf16, #tpu.memory_space<vmem>>, vector<8x19xbf16>,
    %cst_23 = arith.constant 0.000000e+00 : bf16
    %18 = vector.broadcast %cst_23 : bf16 to vector<8x19xbf16>
    %c0_24 = arith.constant 0 : index
    %c667_25 = arith.constant 667 : index
    %19 = vector.load %arg14[%c0_24, %c667_25] : memref<8x686xbf16, #tpu.memory_space<vmem>>, vector<8x19xbf16>
    tpu.vector_store %arg14[%c0_24, %c667_25], %18 {strides = array<i32>} : memref<8x686xbf16, #tpu.memory_space<vmem>>, vector<8x19xbf16>,
    %c0_26 = arith.constant 0 : index
    %c0_27 = arith.constant 0 : index
    %20 = vector.load %arg3[%c0_26, %c0_27] : memref<1x200xf32, #tpu.memory_space<vmem>>, vector<1x200xf32>
    %c0_28 = arith.constant 0 : index
    %c0_29 = arith.constant 0 : index
    %21 = vector.load %arg4[%c0_28, %c0_29] : memref<1x648xf32, #tpu.memory_space<vmem>>, vector<1x648xf32>
    %c0_30 = arith.constant 0 : index
    %c0_31 = arith.constant 0 : index
    %c0_32 = arith.constant 0 : index
    %22 = vector.load %arg1[%c0_30, %c0_31, %c0_32] : memref<1x8x200xf32, #tpu.memory_space<vmem>>, vector<1x8x200xf32>
    %23 = vector.shape_cast %22 : vector<1x8x200xf32> to vector<8x200xf32>
    %24 = arith.truncf %23 : vector<8x200xf32> to vector<8x200xbf16>
    %c0_33 = arith.constant 0 : index
    %c11 = arith.constant 11 : index
    %25 = vector.load %arg10[%c0_33, %c11] : memref<8x222xbf16, #tpu.memory_space<vmem>>, vector<8x200xbf16>
    tpu.vector_store %arg10[%c0_33, %c11], %24 {strides = array<i32>} : memref<8x222xbf16, #tpu.memory_space<vmem>>, vector<8x200xbf16>,
    %c0_34 = arith.constant 0 : index
    %c0_35 = arith.constant 0 : index
    %c0_36 = arith.constant 0 : index
    %26 = vector.load %arg6[%c0_34, %c0_35, %c0_36] : memref<81x8x8xbf16, #tpu.memory_space<vmem>>, vector<1x8x8xbf16>
    %27 = vector.shape_cast %26 : vector<1x8x8xbf16> to vector<8x8xbf16>
    %c0_37 = arith.constant 0 : index
    %c0_38 = arith.constant 0 : index
    %28 = vector.load %arg10[%c0_37, %c0_38] : memref<8x222xbf16, #tpu.memory_space<vmem>>, vector<8x200xbf16>
    %cst_39 = arith.constant dense<0.000000e+00> : vector<8x200xf32>
    %29 = tpu.matmul %27, %28, %cst_39 {dimension_numbers = #tpu.dot_dimension_numbers<[1], [0], [0], [1], [0, 0, 1, 1], [], []>} : vector<8x8xbf16>, vector<8x200xbf16>, vector<8x200xf32> -> vector<8x200xf32>
    %c1 = arith.constant 1 : index
    %c0_40 = arith.constant 0 : index
    %c0_41 = arith.constant 0 : index
    %30 = vector.load %arg6[%c1, %c0_40, %c0_41] : memref<81x8x8xbf16, #tpu.memory_space<vmem>>, vector<1x8x8xbf16>
    %31 = vector.shape_cast %30 : vector<1x8x8xbf16> to vector<8x8xbf16>
    %c0_42 = arith.constant 0 : index
    %c1_43 = arith.constant 1 : index
    %32 = vector.load %arg10[%c0_42, %c1_43] : memref<8x222xbf16, #tpu.memory_space<vmem>>, vector<8x200xbf16>
    %cst_44 = arith.constant dense<0.000000e+00> : vector<8x200xf32>
    %33 = tpu.matmul %31, %32, %cst_44 {dimension_numbers = #tpu.dot_dimension_numbers<[1], [0], [0], [1], [0, 0, 1, 1], [], []>} : vector<8x8xbf16>, vector<8x200xbf16>, vector<8x200xf32> -> vector<8x200xf32>
    %34 = arith.addf %29, %33 : vector<8x200xf32>
    %c2 = arith.constant 2 : index
    %c0_45 = arith.constant 0 : index
    %c0_46 = arith.constant 0 : index
    %35 = vector.load %arg6[%c2, %c0_45, %c0_46] : memref<81x8x8xbf16, #tpu.memory_space<vmem>>, vector<1x8x8xbf16>
    %36 = vector.shape_cast %35 : vector<1x8x8xbf16> to vector<8x8xbf16>
    %c0_47 = arith.constant 0 : index
    %c2_48 = arith.constant 2 : index
    %37 = vector.load %arg10[%c0_47, %c2_48] : memref<8x222xbf16, #tpu.memory_space<vmem>>, vector<8x200xbf16>
    %cst_49 = arith.constant dense<0.000000e+00> : vector<8x200xf32>
    %38 = tpu.matmul %36, %37, %cst_49 {dimension_numbers = #tpu.dot_dimension_numbers<[1], [0], [0], [1], [0, 0, 1, 1], [], []>} : vector<8x8xbf16>, vector<8x200xbf16>, vector<8x200xf32> -> vector<8x200xf32>
    %39 = arith.addf %34, %38 : vector<8x200xf32>
    %c3 = arith.constant 3 : index
    %c0_50 = arith.constant 0 : index
    %c0_51 = arith.constant 0 : index
    %40 = vector.load %arg6[%c3, %c0_50, %c0_51] : memref<81x8x8xbf16, #tpu.memory_space<vmem>>, vector<1x8x8xbf16>
    %41 = vector.shape_cast %40 : vector<1x8x8xbf16> to vector<8x8xbf16>
    %c0_52 = arith.constant 0 : index
    %c10 = arith.constant 10 : index
    %42 = vector.load %arg10[%c0_52, %c10] : memref<8x222xbf16, #tpu.memory_space<vmem>>, vector<8x200xbf16>
    %cst_53 = arith.constant dense<0.000000e+00> : vector<8x200xf32>
    %43 = tpu.matmul %41, %42, %cst_53 {dimension_numbers = #tpu.dot_dimension_numbers<[1], [0], [0], [1], [0, 0, 1, 1], [], []>} : vector<8x8xbf16>, vector<8x200xbf16>, vector<8x200xf32> -> vector<8x200xf32>
    %44 = arith.addf %39, %43 : vector<8x200xf32>
    %c4 = arith.constant 4 : index
    %c0_54 = arith.constant 0 : index
    %c0_55 = arith.constant 0 : index
    %45 = vector.load %arg6[%c4, %c0_54, %c0_55] : memref<81x8x8xbf16, #tpu.memory_space<vmem>>, vector<1x8x8xbf16>
    %46 = vector.shape_cast %45 : vector<1x8x8xbf16> to vector<8x8xbf16>
    %c0_56 = arith.constant 0 : index
    %c11_57 = arith.constant 11 : index
    %47 = vector.load %arg10[%c0_56, %c11_57] : memref<8x222xbf16, #tpu.memory_space<vmem>>, vector<8x200xbf16>
    %cst_58 = arith.constant dense<0.000000e+00> : vector<8x200xf32>
    %48 = tpu.matmul %46, %47, %cst_58 {dimension_numbers = #tpu.dot_dimension_numbers<[1], [0], [0], [1], [0, 0, 1, 1], [], []>} : vector<8x8xbf16>, vector<8x200xbf16>, vector<8x200xf32> -> vector<8x200xf32>
    %49 = arith.addf %44, %48 : vector<8x200xf32>
    %c5 = arith.constant 5 : index
    %c0_59 = arith.constant 0 : index
    %c0_60 = arith.constant 0 : index
    %50 = vector.load %arg6[%c5, %c0_59, %c0_60] : memref<81x8x8xbf16, #tpu.memory_space<vmem>>, vector<1x8x8xbf16>
    %51 = vector.shape_cast %50 : vector<1x8x8xbf16> to vector<8x8xbf16>
    %c0_61 = arith.constant 0 : index
    %c12 = arith.constant 12 : index
    %52 = vector.load %arg10[%c0_61, %c12] : memref<8x222xbf16, #tpu.memory_space<vmem>>, vector<8x200xbf16>
    %cst_62 = arith.constant dense<0.000000e+00> : vector<8x200xf32>
    %53 = tpu.matmul %51, %52, %cst_62 {dimension_numbers = #tpu.dot_dimension_numbers<[1], [0], [0], [1], [0, 0, 1, 1], [], []>} : vector<8x8xbf16>, vector<8x200xbf16>, vector<8x200xf32> -> vector<8x200xf32>
    %54 = arith.addf %49, %53 : vector<8x200xf32>
    %c6 = arith.constant 6 : index
    %c0_63 = arith.constant 0 : index
    %c0_64 = arith.constant 0 : index
    %55 = vector.load %arg6[%c6, %c0_63, %c0_64] : memref<81x8x8xbf16, #tpu.memory_space<vmem>>, vector<1x8x8xbf16>
    %56 = vector.shape_cast %55 : vector<1x8x8xbf16> to vector<8x8xbf16>
    %c0_65 = arith.constant 0 : index
    %c20 = arith.constant 20 : index
    %57 = vector.load %arg10[%c0_65, %c20] : memref<8x222xbf16, #tpu.memory_space<vmem>>, vector<8x200xbf16>
    %cst_66 = arith.constant dense<0.000000e+00> : vector<8x200xf32>
    %58 = tpu.matmul %56, %57, %cst_66 {dimension_numbers = #tpu.dot_dimension_numbers<[1], [0], [0], [1], [0, 0, 1, 1], [], []>} : vector<8x8xbf16>, vector<8x200xbf16>, vector<8x200xf32> -> vector<8x200xf32>
    %59 = arith.addf %54, %58 : vector<8x200xf32>
    %c7 = arith.constant 7 : index
    %c0_67 = arith.constant 0 : index
    %c0_68 = arith.constant 0 : index
    %60 = vector.load %arg6[%c7, %c0_67, %c0_68] : memref<81x8x8xbf16, #tpu.memory_space<vmem>>, vector<1x8x8xbf16>
    %61 = vector.shape_cast %60 : vector<1x8x8xbf16> to vector<8x8xbf16>
    %c0_69 = arith.constant 0 : index
    %c21 = arith.constant 21 : index
    %62 = vector.load %arg10[%c0_69, %c21] : memref<8x222xbf16, #tpu.memory_space<vmem>>, vector<8x200xbf16>
    %cst_70 = arith.constant dense<0.000000e+00> : vector<8x200xf32>
    %63 = tpu.matmul %61, %62, %cst_70 {dimension_numbers = #tpu.dot_dimension_numbers<[1], [0], [0], [1], [0, 0, 1, 1], [], []>} : vector<8x8xbf16>, vector<8x200xbf16>, vector<8x200xf32> -> vector<8x200xf32>
    %64 = arith.addf %59, %63 : vector<8x200xf32>
    %c8 = arith.constant 8 : index
    %c0_71 = arith.constant 0 : index
    %c0_72 = arith.constant 0 : index
    %65 = vector.load %arg6[%c8, %c0_71, %c0_72] : memref<81x8x8xbf16, #tpu.memory_space<vmem>>, vector<1x8x8xbf16>
    %66 = vector.shape_cast %65 : vector<1x8x8xbf16> to vector<8x8xbf16>
    %c0_73 = arith.constant 0 : index
    %c22 = arith.constant 22 : index
    %67 = vector.load %arg10[%c0_73, %c22] : memref<8x222xbf16, #tpu.memory_space<vmem>>, vector<8x200xbf16>
    %cst_74 = arith.constant dense<0.000000e+00> : vector<8x200xf32>
    %68 = tpu.matmul %66, %67, %cst_74 {dimension_numbers = #tpu.dot_dimension_numbers<[1], [0], [0], [1], [0, 0, 1, 1], [], []>} : vector<8x8xbf16>, vector<8x200xbf16>, vector<8x200xf32> -> vector<8x200xf32>
    %69 = arith.addf %64, %68 : vector<8x200xf32>
    %c0_75 = arith.constant 0 : index
    %c0_76 = arith.constant 0 : index
    %c0_77 = arith.constant 0 : index
    %70 = vector.load %arg8[%c0_75, %c0_76, %c0_77] : memref<8x8x1xf32, #tpu.memory_space<vmem>>, vector<1x8x1xf32>
    %71 = vector.shape_cast %70 : vector<1x8x1xf32> to vector<8x1xf32>
    %72 = vector.broadcast %71 : vector<8x1xf32> to vector<8x200xf32>
    %73 = arith.addf %69, %72 : vector<8x200xf32>
    %cst_78 = arith.constant 0.000000e+00 : f32
    %74 = vector.broadcast %cst_78 : f32 to vector<8x200xf32>
    %75 = arith.maximumf %73, %74 : vector<8x200xf32>
    %76 = vector.broadcast %20 : vector<1x200xf32> to vector<8x200xf32>
    %77 = arith.mulf %75, %76 : vector<8x200xf32>
    %78 = arith.truncf %77 : vector<8x200xf32> to vector<8x200xbf16>
    %c0_79 = arith.constant 0 : index
    %c11_80 = arith.constant 11 : index
    %79 = vector.load %arg11[%c0_79, %c11_80] : memref<8x222xbf16, #tpu.memory_space<vmem>>, vector<8x200xbf16>
    tpu.vector_store %arg11[%c0_79, %c11_80], %78 {strides = array<i32>} : memref<8x222xbf16, #tpu.memory_space<vmem>>, vector<8x200xbf16>,
    %c9 = arith.constant 9 : index
    %c0_81 = arith.constant 0 : index
    %c0_82 = arith.constant 0 : index
    %80 = vector.load %arg6[%c9, %c0_81, %c0_82] : memref<81x8x8xbf16, #tpu.memory_space<vmem>>, vector<1x8x8xbf16>
    %81 = vector.shape_cast %80 : vector<1x8x8xbf16> to vector<8x8xbf16>
    %c0_83 = arith.constant 0 : index
    %c0_84 = arith.constant 0 : index
    %82 = vector.load %arg11[%c0_83, %c0_84] : memref<8x222xbf16, #tpu.memory_space<vmem>>, vector<8x200xbf16>
    %cst_85 = arith.constant dense<0.000000e+00> : vector<8x200xf32>
    %83 = tpu.matmul %81, %82, %cst_85 {dimension_numbers = #tpu.dot_dimension_numbers<[1], [0], [0], [1], [0, 0, 1, 1], [], []>} : vector<8x8xbf16>, vector<8x200xbf16>, vector<8x200xf32> -> vector<8x200xf32>
    %c10_86 = arith.constant 10 : index
    %c0_87 = arith.constant 0 : index
    %c0_88 = arith.constant 0 : index
    %84 = vector.load %arg6[%c10_86, %c0_87, %c0_88] : memref<81x8x8xbf16, #tpu.memory_space<vmem>>, vector<1x8x8xbf16>
    %85 = vector.shape_cast %84 : vector<1x8x8xbf16> to vector<8x8xbf16>
    %c0_89 = arith.constant 0 : index
    %c1_90 = arith.constant 1 : index
    %86 = vector.load %arg11[%c0_89, %c1_90] : memref<8x222xbf16, #tpu.memory_space<vmem>>, vector<8x200xbf16>
    %cst_91 = arith.constant dense<0.000000e+00> : vector<8x200xf32>
    %87 = tpu.matmul %85, %86, %cst_91 {dimension_numbers = #tpu.dot_dimension_numbers<[1], [0], [0], [1], [0, 0, 1, 1], [], []>} : vector<8x8xbf16>, vector<8x200xbf16>, vector<8x200xf32> -> vector<8x200xf32>
    %88 = arith.addf %83, %87 : vector<8x200xf32>
    %c11_92 = arith.constant 11 : index
    %c0_93 = arith.constant 0 : index
    %c0_94 = arith.constant 0 : index
    %89 = vector.load %arg6[%c11_92, %c0_93, %c0_94] : memref<81x8x8xbf16, #tpu.memory_space<vmem>>, vector<1x8x8xbf16>
    %90 = vector.shape_cast %89 : vector<1x8x8xbf16> to vector<8x8xbf16>
    %c0_95 = arith.constant 0 : index
    %c2_96 = arith.constant 2 : index
    %91 = vector.load %arg11[%c0_95, %c2_96] : memref<8x222xbf16, #tpu.memory_space<vmem>>, vector<8x200xbf16>
    %cst_97 = arith.constant dense<0.000000e+00> : vector<8x200xf32>
    %92 = tpu.matmul %90, %91, %cst_97 {dimension_numbers = #tpu.dot_dimension_numbers<[1], [0], [0], [1], [0, 0, 1, 1], [], []>} : vector<8x8xbf16>, vector<8x200xbf16>, vector<8x200xf32> -> vector<8x200xf32>
    %93 = arith.addf %88, %92 : vector<8x200xf32>
    %c12_98 = arith.constant 12 : index
    %c0_99 = arith.constant 0 : index
    %c0_100 = arith.constant 0 : index
    %94 = vector.load %arg6[%c12_98, %c0_99, %c0_100] : memref<81x8x8xbf16, #tpu.memory_space<vmem>>, vector<1x8x8xbf16>
    %95 = vector.shape_cast %94 : vector<1x8x8xbf16> to vector<8x8xbf16>
    %c0_101 = arith.constant 0 : index
    %c10_102 = arith.constant 10 : index
    %96 = vector.load %arg11[%c0_101, %c10_102] : memref<8x222xbf16, #tpu.memory_space<vmem>>, vector<8x200xbf16>
    %cst_103 = arith.constant dense<0.000000e+00> : vector<8x200xf32>
    %97 = tpu.matmul %95, %96, %cst_103 {dimension_numbers = #tpu.dot_dimension_numbers<[1], [0], [0], [1], [0, 0, 1, 1], [], []>} : vector<8x8xbf16>, vector<8x200xbf16>, vector<8x200xf32> -> vector<8x200xf32>
    %98 = arith.addf %93, %97 : vector<8x200xf32>
    %c13 = arith.constant 13 : index
    %c0_104 = arith.constant 0 : index
    %c0_105 = arith.constant 0 : index
    %99 = vector.load %arg6[%c13, %c0_104, %c0_105] : memref<81x8x8xbf16, #tpu.memory_space<vmem>>, vector<1x8x8xbf16>
    %100 = vector.shape_cast %99 : vector<1x8x8xbf16> to vector<8x8xbf16>
    %c0_106 = arith.constant 0 : index
    %c11_107 = arith.constant 11 : index
    %101 = vector.load %arg11[%c0_106, %c11_107] : memref<8x222xbf16, #tpu.memory_space<vmem>>, vector<8x200xbf16>
    %cst_108 = arith.constant dense<0.000000e+00> : vector<8x200xf32>
    %102 = tpu.matmul %100, %101, %cst_108 {dimension_numbers = #tpu.dot_dimension_numbers<[1], [0], [0], [1], [0, 0, 1, 1], [], []>} : vector<8x8xbf16>, vector<8x200xbf16>, vector<8x200xf32> -> vector<8x200xf32>
    %103 = arith.addf %98, %102 : vector<8x200xf32>
    %c14 = arith.constant 14 : index
    %c0_109 = arith.constant 0 : index
    %c0_110 = arith.constant 0 : index
    %104 = vector.load %arg6[%c14, %c0_109, %c0_110] : memref<81x8x8xbf16, #tpu.memory_space<vmem>>, vector<1x8x8xbf16>
    %105 = vector.shape_cast %104 : vector<1x8x8xbf16> to vector<8x8xbf16>
    %c0_111 = arith.constant 0 : index
    %c12_112 = arith.constant 12 : index
    %106 = vector.load %arg11[%c0_111, %c12_112] : memref<8x222xbf16, #tpu.memory_space<vmem>>, vector<8x200xbf16>
    %cst_113 = arith.constant dense<0.000000e+00> : vector<8x200xf32>
    %107 = tpu.matmul %105, %106, %cst_113 {dimension_numbers = #tpu.dot_dimension_numbers<[1], [0], [0], [1], [0, 0, 1, 1], [], []>} : vector<8x8xbf16>, vector<8x200xbf16>, vector<8x200xf32> -> vector<8x200xf32>
    %108 = arith.addf %103, %107 : vector<8x200xf32>
    %c15 = arith.constant 15 : index
    %c0_114 = arith.constant 0 : index
    %c0_115 = arith.constant 0 : index
    %109 = vector.load %arg6[%c15, %c0_114, %c0_115] : memref<81x8x8xbf16, #tpu.memory_space<vmem>>, vector<1x8x8xbf16>
    %110 = vector.shape_cast %109 : vector<1x8x8xbf16> to vector<8x8xbf16>
    %c0_116 = arith.constant 0 : index
    %c20_117 = arith.constant 20 : index
    %111 = vector.load %arg11[%c0_116, %c20_117] : memref<8x222xbf16, #tpu.memory_space<vmem>>, vector<8x200xbf16>
    %cst_118 = arith.constant dense<0.000000e+00> : vector<8x200xf32>
    %112 = tpu.matmul %110, %111, %cst_118 {dimension_numbers = #tpu.dot_dimension_numbers<[1], [0], [0], [1], [0, 0, 1, 1], [], []>} : vector<8x8xbf16>, vector<8x200xbf16>, vector<8x200xf32> -> vector<8x200xf32>
    %113 = arith.addf %108, %112 : vector<8x200xf32>
    %c16 = arith.constant 16 : index
    %c0_119 = arith.constant 0 : index
    %c0_120 = arith.constant 0 : index
    %114 = vector.load %arg6[%c16, %c0_119, %c0_120] : memref<81x8x8xbf16, #tpu.memory_space<vmem>>, vector<1x8x8xbf16>
    %115 = vector.shape_cast %114 : vector<1x8x8xbf16> to vector<8x8xbf16>
    %c0_121 = arith.constant 0 : index
    %c21_122 = arith.constant 21 : index
    %116 = vector.load %arg11[%c0_121, %c21_122] : memref<8x222xbf16, #tpu.memory_space<vmem>>, vector<8x200xbf16>
    %cst_123 = arith.constant dense<0.000000e+00> : vector<8x200xf32>
    %117 = tpu.matmul %115, %116, %cst_123 {dimension_numbers = #tpu.dot_dimension_numbers<[1], [0], [0], [1], [0, 0, 1, 1], [], []>} : vector<8x8xbf16>, vector<8x200xbf16>, vector<8x200xf32> -> vector<8x200xf32>
    %118 = arith.addf %113, %117 : vector<8x200xf32>
    %c17 = arith.constant 17 : index
    %c0_124 = arith.constant 0 : index
    %c0_125 = arith.constant 0 : index
    %119 = vector.load %arg6[%c17, %c0_124, %c0_125] : memref<81x8x8xbf16, #tpu.memory_space<vmem>>, vector<1x8x8xbf16>
    %120 = vector.shape_cast %119 : vector<1x8x8xbf16> to vector<8x8xbf16>
    %c0_126 = arith.constant 0 : index
    %c22_127 = arith.constant 22 : index
    %121 = vector.load %arg11[%c0_126, %c22_127] : memref<8x222xbf16, #tpu.memory_space<vmem>>, vector<8x200xbf16>
    %cst_128 = arith.constant dense<0.000000e+00> : vector<8x200xf32>
    %122 = tpu.matmul %120, %121, %cst_128 {dimension_numbers = #tpu.dot_dimension_numbers<[1], [0], [0], [1], [0, 0, 1, 1], [], []>} : vector<8x8xbf16>, vector<8x200xbf16>, vector<8x200xf32> -> vector<8x200xf32>
    %123 = arith.addf %118, %122 : vector<8x200xf32>
    %c1_129 = arith.constant 1 : index
    %c0_130 = arith.constant 0 : index
    %c0_131 = arith.constant 0 : index
    %124 = vector.load %arg8[%c1_129, %c0_130, %c0_131] : memref<8x8x1xf32, #tpu.memory_space<vmem>>, vector<1x8x1xf32>
    %125 = vector.shape_cast %124 : vector<1x8x1xf32> to vector<8x1xf32>
    %126 = vector.broadcast %125 : vector<8x1xf32> to vector<8x200xf32>
    %127 = arith.addf %123, %126 : vector<8x200xf32>
    %128 = arith.addf %127, %23 : vector<8x200xf32>
    %cst_132 = arith.constant 0.000000e+00 : f32
    %129 = vector.broadcast %cst_132 : f32 to vector<8x200xf32>
    %130 = arith.maximumf %128, %129 : vector<8x200xf32>
    %131 = vector.broadcast %20 : vector<1x200xf32> to vector<8x200xf32>
    %132 = arith.mulf %130, %131 : vector<8x200xf32>
    %133 = arith.truncf %132 : vector<8x200xf32> to vector<8x200xbf16>
    %c0_133 = arith.constant 0 : index
    %c11_134 = arith.constant 11 : index
    %134 = vector.load %arg10[%c0_133, %c11_134] : memref<8x222xbf16, #tpu.memory_space<vmem>>, vector<8x200xbf16>
    tpu.vector_store %arg10[%c0_133, %c11_134], %133 {strides = array<i32>} : memref<8x222xbf16, #tpu.memory_space<vmem>>, vector<8x200xbf16>,
    %c18 = arith.constant 18 : index
    %c0_135 = arith.constant 0 : index
    %c0_136 = arith.constant 0 : index
    %135 = vector.load %arg6[%c18, %c0_135, %c0_136] : memref<81x8x8xbf16, #tpu.memory_space<vmem>>, vector<1x8x8xbf16>
    %136 = vector.shape_cast %135 : vector<1x8x8xbf16> to vector<8x8xbf16>
    %c0_137 = arith.constant 0 : index
    %c0_138 = arith.constant 0 : index
    %137 = vector.load %arg10[%c0_137, %c0_138] : memref<8x222xbf16, #tpu.memory_space<vmem>>, vector<8x200xbf16>
    %cst_139 = arith.constant dense<0.000000e+00> : vector<8x200xf32>
    %138 = tpu.matmul %136, %137, %cst_139 {dimension_numbers = #tpu.dot_dimension_numbers<[1], [0], [0], [1], [0, 0, 1, 1], [], []>} : vector<8x8xbf16>, vector<8x200xbf16>, vector<8x200xf32> -> vector<8x200xf32>
    %c19 = arith.constant 19 : index
    %c0_140 = arith.constant 0 : index
    %c0_141 = arith.constant 0 : index
    %139 = vector.load %arg6[%c19, %c0_140, %c0_141] : memref<81x8x8xbf16, #tpu.memory_space<vmem>>, vector<1x8x8xbf16>
    %140 = vector.shape_cast %139 : vector<1x8x8xbf16> to vector<8x8xbf16>
    %c0_142 = arith.constant 0 : index
    %c1_143 = arith.constant 1 : index
    %141 = vector.load %arg10[%c0_142, %c1_143] : memref<8x222xbf16, #tpu.memory_space<vmem>>, vector<8x200xbf16>
    %cst_144 = arith.constant dense<0.000000e+00> : vector<8x200xf32>
    %142 = tpu.matmul %140, %141, %cst_144 {dimension_numbers = #tpu.dot_dimension_numbers<[1], [0], [0], [1], [0, 0, 1, 1], [], []>} : vector<8x8xbf16>, vector<8x200xbf16>, vector<8x200xf32> -> vector<8x200xf32>
    %143 = arith.addf %138, %142 : vector<8x200xf32>
    %c20_145 = arith.constant 20 : index
    %c0_146 = arith.constant 0 : index
    %c0_147 = arith.constant 0 : index
    %144 = vector.load %arg6[%c20_145, %c0_146, %c0_147] : memref<81x8x8xbf16, #tpu.memory_space<vmem>>, vector<1x8x8xbf16>
    %145 = vector.shape_cast %144 : vector<1x8x8xbf16> to vector<8x8xbf16>
    %c0_148 = arith.constant 0 : index
    %c2_149 = arith.constant 2 : index
    %146 = vector.load %arg10[%c0_148, %c2_149] : memref<8x222xbf16, #tpu.memory_space<vmem>>, vector<8x200xbf16>
    %cst_150 = arith.constant dense<0.000000e+00> : vector<8x200xf32>
    %147 = tpu.matmul %145, %146, %cst_150 {dimension_numbers = #tpu.dot_dimension_numbers<[1], [0], [0], [1], [0, 0, 1, 1], [], []>} : vector<8x8xbf16>, vector<8x200xbf16>, vector<8x200xf32> -> vector<8x200xf32>
    %148 = arith.addf %143, %147 : vector<8x200xf32>
    %c21_151 = arith.constant 21 : index
    %c0_152 = arith.constant 0 : index
    %c0_153 = arith.constant 0 : index
    %149 = vector.load %arg6[%c21_151, %c0_152, %c0_153] : memref<81x8x8xbf16, #tpu.memory_space<vmem>>, vector<1x8x8xbf16>
    %150 = vector.shape_cast %149 : vector<1x8x8xbf16> to vector<8x8xbf16>
    %c0_154 = arith.constant 0 : index
    %c10_155 = arith.constant 10 : index
    %151 = vector.load %arg10[%c0_154, %c10_155] : memref<8x222xbf16, #tpu.memory_space<vmem>>, vector<8x200xbf16>
    %cst_156 = arith.constant dense<0.000000e+00> : vector<8x200xf32>
    %152 = tpu.matmul %150, %151, %cst_156 {dimension_numbers = #tpu.dot_dimension_numbers<[1], [0], [0], [1], [0, 0, 1, 1], [], []>} : vector<8x8xbf16>, vector<8x200xbf16>, vector<8x200xf32> -> vector<8x200xf32>
    %153 = arith.addf %148, %152 : vector<8x200xf32>
    %c22_157 = arith.constant 22 : index
    %c0_158 = arith.constant 0 : index
    %c0_159 = arith.constant 0 : index
    %154 = vector.load %arg6[%c22_157, %c0_158, %c0_159] : memref<81x8x8xbf16, #tpu.memory_space<vmem>>, vector<1x8x8xbf16>
    %155 = vector.shape_cast %154 : vector<1x8x8xbf16> to vector<8x8xbf16>
    %c0_160 = arith.constant 0 : index
    %c11_161 = arith.constant 11 : index
    %156 = vector.load %arg10[%c0_160, %c11_161] : memref<8x222xbf16, #tpu.memory_space<vmem>>, vector<8x200xbf16>
    %cst_162 = arith.constant dense<0.000000e+00> : vector<8x200xf32>
    %157 = tpu.matmul %155, %156, %cst_162 {dimension_numbers = #tpu.dot_dimension_numbers<[1], [0], [0], [1], [0, 0, 1, 1], [], []>} : vector<8x8xbf16>, vector<8x200xbf16>, vector<8x200xf32> -> vector<8x200xf32>
    %158 = arith.addf %153, %157 : vector<8x200xf32>
    %c23 = arith.constant 23 : index
    %c0_163 = arith.constant 0 : index
    %c0_164 = arith.constant 0 : index
    %159 = vector.load %arg6[%c23, %c0_163, %c0_164] : memref<81x8x8xbf16, #tpu.memory_space<vmem>>, vector<1x8x8xbf16>
    %160 = vector.shape_cast %159 : vector<1x8x8xbf16> to vector<8x8xbf16>
    %c0_165 = arith.constant 0 : index
    %c12_166 = arith.constant 12 : index
    %161 = vector.load %arg10[%c0_165, %c12_166] : memref<8x222xbf16, #tpu.memory_space<vmem>>, vector<8x200xbf16>
    %cst_167 = arith.constant dense<0.000000e+00> : vector<8x200xf32>
    %162 = tpu.matmul %160, %161, %cst_167 {dimension_numbers = #tpu.dot_dimension_numbers<[1], [0], [0], [1], [0, 0, 1, 1], [], []>} : vector<8x8xbf16>, vector<8x200xbf16>, vector<8x200xf32> -> vector<8x200xf32>
    %163 = arith.addf %158, %162 : vector<8x200xf32>
    %c24 = arith.constant 24 : index
    %c0_168 = arith.constant 0 : index
    %c0_169 = arith.constant 0 : index
    %164 = vector.load %arg6[%c24, %c0_168, %c0_169] : memref<81x8x8xbf16, #tpu.memory_space<vmem>>, vector<1x8x8xbf16>
    %165 = vector.shape_cast %164 : vector<1x8x8xbf16> to vector<8x8xbf16>
    %c0_170 = arith.constant 0 : index
    %c20_171 = arith.constant 20 : index
    %166 = vector.load %arg10[%c0_170, %c20_171] : memref<8x222xbf16, #tpu.memory_space<vmem>>, vector<8x200xbf16>
    %cst_172 = arith.constant dense<0.000000e+00> : vector<8x200xf32>
    %167 = tpu.matmul %165, %166, %cst_172 {dimension_numbers = #tpu.dot_dimension_numbers<[1], [0], [0], [1], [0, 0, 1, 1], [], []>} : vector<8x8xbf16>, vector<8x200xbf16>, vector<8x200xf32> -> vector<8x200xf32>
    %168 = arith.addf %163, %167 : vector<8x200xf32>
    %c25 = arith.constant 25 : index
    %c0_173 = arith.constant 0 : index
    %c0_174 = arith.constant 0 : index
    %169 = vector.load %arg6[%c25, %c0_173, %c0_174] : memref<81x8x8xbf16, #tpu.memory_space<vmem>>, vector<1x8x8xbf16>
    %170 = vector.shape_cast %169 : vector<1x8x8xbf16> to vector<8x8xbf16>
    %c0_175 = arith.constant 0 : index
    %c21_176 = arith.constant 21 : index
    %171 = vector.load %arg10[%c0_175, %c21_176] : memref<8x222xbf16, #tpu.memory_space<vmem>>, vector<8x200xbf16>
    %cst_177 = arith.constant dense<0.000000e+00> : vector<8x200xf32>
    %172 = tpu.matmul %170, %171, %cst_177 {dimension_numbers = #tpu.dot_dimension_numbers<[1], [0], [0], [1], [0, 0, 1, 1], [], []>} : vector<8x8xbf16>, vector<8x200xbf16>, vector<8x200xf32> -> vector<8x200xf32>
    %173 = arith.addf %168, %172 : vector<8x200xf32>
    %c26 = arith.constant 26 : index
    %c0_178 = arith.constant 0 : index
    %c0_179 = arith.constant 0 : index
    %174 = vector.load %arg6[%c26, %c0_178, %c0_179] : memref<81x8x8xbf16, #tpu.memory_space<vmem>>, vector<1x8x8xbf16>
    %175 = vector.shape_cast %174 : vector<1x8x8xbf16> to vector<8x8xbf16>
    %c0_180 = arith.constant 0 : index
    %c22_181 = arith.constant 22 : index
    %176 = vector.load %arg10[%c0_180, %c22_181] : memref<8x222xbf16, #tpu.memory_space<vmem>>, vector<8x200xbf16>
    %cst_182 = arith.constant dense<0.000000e+00> : vector<8x200xf32>
    %177 = tpu.matmul %175, %176, %cst_182 {dimension_numbers = #tpu.dot_dimension_numbers<[1], [0], [0], [1], [0, 0, 1, 1], [], []>} : vector<8x8xbf16>, vector<8x200xbf16>, vector<8x200xf32> -> vector<8x200xf32>
    %178 = arith.addf %173, %177 : vector<8x200xf32>
    %c2_183 = arith.constant 2 : index
    %c0_184 = arith.constant 0 : index
    %c0_185 = arith.constant 0 : index
    %179 = vector.load %arg8[%c2_183, %c0_184, %c0_185] : memref<8x8x1xf32, #tpu.memory_space<vmem>>, vector<1x8x1xf32>
    %180 = vector.shape_cast %179 : vector<1x8x1xf32> to vector<8x1xf32>
    %181 = vector.broadcast %180 : vector<8x1xf32> to vector<8x200xf32>
    %182 = arith.addf %178, %181 : vector<8x200xf32>
    %cst_186 = arith.constant 0.000000e+00 : f32
    %183 = vector.broadcast %cst_186 : f32 to vector<8x200xf32>
    %184 = arith.maximumf %182, %183 : vector<8x200xf32>
    %185 = arith.truncf %184 : vector<8x200xf32> to vector<8x200xbf16>
    %186 = arith.truncf %132 : vector<8x200xf32> to vector<8x200xbf16>
    %c0_187 = arith.constant 0 : index
    %c0_188 = arith.constant 0 : index
    %c0_189 = arith.constant 0 : index
    %187 = vector.load %arg7[%c0_187, %c0_188, %c0_189] : memref<8x8x8xbf16, #tpu.memory_space<vmem>>, vector<1x8x8xbf16>
    %188 = vector.shape_cast %187 : vector<1x8x8xbf16> to vector<8x8xbf16>
    %cst_190 = arith.constant dense<0.000000e+00> : vector<8x200xf32>
    %189 = tpu.matmul %188, %185, %cst_190 {dimension_numbers = #tpu.dot_dimension_numbers<[1], [0], [0], [1], [0, 0, 1, 1], [], []>} : vector<8x8xbf16>, vector<8x200xbf16>, vector<8x200xf32> -> vector<8x200xf32>
    %c4_191 = arith.constant 4 : index
    %c0_192 = arith.constant 0 : index
    %c0_193 = arith.constant 0 : index
    %190 = vector.load %arg7[%c4_191, %c0_192, %c0_193] : memref<8x8x8xbf16, #tpu.memory_space<vmem>>, vector<1x8x8xbf16>
    %191 = vector.shape_cast %190 : vector<1x8x8xbf16> to vector<8x8xbf16>
    %cst_194 = arith.constant dense<0.000000e+00> : vector<8x200xf32>
    %192 = tpu.matmul %191, %186, %cst_194 {dimension_numbers = #tpu.dot_dimension_numbers<[1], [0], [0], [1], [0, 0, 1, 1], [], []>} : vector<8x8xbf16>, vector<8x200xbf16>, vector<8x200xf32> -> vector<8x200xf32>
    %193 = arith.addf %189, %192 : vector<8x200xf32>
    %c3_195 = arith.constant 3 : index
    %c0_196 = arith.constant 0 : index
    %c0_197 = arith.constant 0 : index
    %194 = vector.load %arg8[%c3_195, %c0_196, %c0_197] : memref<8x8x1xf32, #tpu.memory_space<vmem>>, vector<1x8x1xf32>
    %195 = vector.shape_cast %194 : vector<1x8x1xf32> to vector<8x1xf32>
    %196 = vector.broadcast %195 : vector<8x1xf32> to vector<8x200xf32>
    %197 = arith.addf %193, %196 : vector<8x200xf32>
    %cst_198 = arith.constant 0.000000e+00 : f32
    %198 = vector.broadcast %cst_198 : f32 to vector<8x200xf32>
    %199 = arith.maximumf %197, %198 : vector<8x200xf32>
    %200 = arith.truncf %199 : vector<8x200xf32> to vector<8x200xbf16>
    %c1_199 = arith.constant 1 : index
    %c0_200 = arith.constant 0 : index
    %c0_201 = arith.constant 0 : index
    %201 = vector.load %arg7[%c1_199, %c0_200, %c0_201] : memref<8x8x8xbf16, #tpu.memory_space<vmem>>, vector<1x8x8xbf16>
    %202 = vector.shape_cast %201 : vector<1x8x8xbf16> to vector<8x8xbf16>
    %cst_202 = arith.constant dense<0.000000e+00> : vector<8x200xf32>
    %203 = tpu.matmul %202, %185, %cst_202 {dimension_numbers = #tpu.dot_dimension_numbers<[1], [0], [0], [1], [0, 0, 1, 1], [], []>} : vector<8x8xbf16>, vector<8x200xbf16>, vector<8x200xf32> -> vector<8x200xf32>
    %c5_203 = arith.constant 5 : index
    %c0_204 = arith.constant 0 : index
    %c0_205 = arith.constant 0 : index
    %204 = vector.load %arg7[%c5_203, %c0_204, %c0_205] : memref<8x8x8xbf16, #tpu.memory_space<vmem>>, vector<1x8x8xbf16>
    %205 = vector.shape_cast %204 : vector<1x8x8xbf16> to vector<8x8xbf16>
    %cst_206 = arith.constant dense<0.000000e+00> : vector<8x200xf32>
    %206 = tpu.matmul %205, %186, %cst_206 {dimension_numbers = #tpu.dot_dimension_numbers<[1], [0], [0], [1], [0, 0, 1, 1], [], []>} : vector<8x8xbf16>, vector<8x200xbf16>, vector<8x200xf32> -> vector<8x200xf32>
    %207 = arith.addf %203, %206 : vector<8x200xf32>
    %c3_207 = arith.constant 3 : index
    %c0_208 = arith.constant 0 : index
    %c0_209 = arith.constant 0 : index
    %208 = vector.load %arg8[%c3_207, %c0_208, %c0_209] : memref<8x8x1xf32, #tpu.memory_space<vmem>>, vector<1x8x1xf32>
    %209 = vector.shape_cast %208 : vector<1x8x1xf32> to vector<8x1xf32>
    %210 = vector.broadcast %209 : vector<8x1xf32> to vector<8x200xf32>
    %211 = arith.addf %207, %210 : vector<8x200xf32>
    %cst_210 = arith.constant 0.000000e+00 : f32
    %212 = vector.broadcast %cst_210 : f32 to vector<8x200xf32>
    %213 = arith.maximumf %211, %212 : vector<8x200xf32>
    %214 = arith.truncf %213 : vector<8x200xf32> to vector<8x200xbf16>
    %c2_211 = arith.constant 2 : index
    %c0_212 = arith.constant 0 : index
    %c0_213 = arith.constant 0 : index
    %215 = vector.load %arg7[%c2_211, %c0_212, %c0_213] : memref<8x8x8xbf16, #tpu.memory_space<vmem>>, vector<1x8x8xbf16>
    %216 = vector.shape_cast %215 : vector<1x8x8xbf16> to vector<8x8xbf16>
    %cst_214 = arith.constant dense<0.000000e+00> : vector<8x200xf32>
    %217 = tpu.matmul %216, %185, %cst_214 {dimension_numbers = #tpu.dot_dimension_numbers<[1], [0], [0], [1], [0, 0, 1, 1], [], []>} : vector<8x8xbf16>, vector<8x200xbf16>, vector<8x200xf32> -> vector<8x200xf32>
    %c6_215 = arith.constant 6 : index
    %c0_216 = arith.constant 0 : index
    %c0_217 = arith.constant 0 : index
    %218 = vector.load %arg7[%c6_215, %c0_216, %c0_217] : memref<8x8x8xbf16, #tpu.memory_space<vmem>>, vector<1x8x8xbf16>
    %219 = vector.shape_cast %218 : vector<1x8x8xbf16> to vector<8x8xbf16>
    %cst_218 = arith.constant dense<0.000000e+00> : vector<8x200xf32>
    %220 = tpu.matmul %219, %186, %cst_218 {dimension_numbers = #tpu.dot_dimension_numbers<[1], [0], [0], [1], [0, 0, 1, 1], [], []>} : vector<8x8xbf16>, vector<8x200xbf16>, vector<8x200xf32> -> vector<8x200xf32>
    %221 = arith.addf %217, %220 : vector<8x200xf32>
    %c3_219 = arith.constant 3 : index
    %c0_220 = arith.constant 0 : index
    %c0_221 = arith.constant 0 : index
    %222 = vector.load %arg8[%c3_219, %c0_220, %c0_221] : memref<8x8x1xf32, #tpu.memory_space<vmem>>, vector<1x8x1xf32>
    %223 = vector.shape_cast %222 : vector<1x8x1xf32> to vector<8x1xf32>
    %224 = vector.broadcast %223 : vector<8x1xf32> to vector<8x200xf32>
    %225 = arith.addf %221, %224 : vector<8x200xf32>
    %cst_222 = arith.constant 0.000000e+00 : f32
    %226 = vector.broadcast %cst_222 : f32 to vector<8x200xf32>
    %227 = arith.maximumf %225, %226 : vector<8x200xf32>
    %228 = arith.truncf %227 : vector<8x200xf32> to vector<8x200xbf16>
    %c3_223 = arith.constant 3 : index
    %c0_224 = arith.constant 0 : index
    %c0_225 = arith.constant 0 : index
    %229 = vector.load %arg7[%c3_223, %c0_224, %c0_225] : memref<8x8x8xbf16, #tpu.memory_space<vmem>>, vector<1x8x8xbf16>
    %230 = vector.shape_cast %229 : vector<1x8x8xbf16> to vector<8x8xbf16>
    %cst_226 = arith.constant dense<0.000000e+00> : vector<8x200xf32>
    %231 = tpu.matmul %230, %185, %cst_226 {dimension_numbers = #tpu.dot_dimension_numbers<[1], [0], [0], [1], [0, 0, 1, 1], [], []>} : vector<8x8xbf16>, vector<8x200xbf16>, vector<8x200xf32> -> vector<8x200xf32>
    %c7_227 = arith.constant 7 : index
    %c0_228 = arith.constant 0 : index
    %c0_229 = arith.constant 0 : index
    %232 = vector.load %arg7[%c7_227, %c0_228, %c0_229] : memref<8x8x8xbf16, #tpu.memory_space<vmem>>, vector<1x8x8xbf16>
    %233 = vector.shape_cast %232 : vector<1x8x8xbf16> to vector<8x8xbf16>
    %cst_230 = arith.constant dense<0.000000e+00> : vector<8x200xf32>
    %234 = tpu.matmul %233, %186, %cst_230 {dimension_numbers = #tpu.dot_dimension_numbers<[1], [0], [0], [1], [0, 0, 1, 1], [], []>} : vector<8x8xbf16>, vector<8x200xbf16>, vector<8x200xf32> -> vector<8x200xf32>
    %235 = arith.addf %231, %234 : vector<8x200xf32>
    %c3_231 = arith.constant 3 : index
    %c0_232 = arith.constant 0 : index
    %c0_233 = arith.constant 0 : index
    %236 = vector.load %arg8[%c3_231, %c0_232, %c0_233] : memref<8x8x1xf32, #tpu.memory_space<vmem>>, vector<1x8x1xf32>
    %237 = vector.shape_cast %236 : vector<1x8x1xf32> to vector<8x1xf32>
    %238 = vector.broadcast %237 : vector<8x1xf32> to vector<8x200xf32>
    %239 = arith.addf %235, %238 : vector<8x200xf32>
    %cst_234 = arith.constant 0.000000e+00 : f32
    %240 = vector.broadcast %cst_234 : f32 to vector<8x200xf32>
    %241 = arith.maximumf %239, %240 : vector<8x200xf32>
    %242 = arith.truncf %241 : vector<8x200xf32> to vector<8x200xbf16>
    %243 = vector.extract_strided_slice %200 {offsets = [0, 0], sizes = [8, 100], strides = [1, 1]} : vector<8x200xbf16> to vector<8x100xbf16>
    %c0_235 = arith.constant 0 : index
    %c0_236 = arith.constant 0 : index
    %c0_237 = arith.constant 0 : index
    %244 = vector.load %arg5[%c0_235, %c0_236, %c0_237] : memref<4x100x324xbf16, #tpu.memory_space<vmem>>, vector<1x100x324xbf16>
    %245 = vector.shape_cast %244 : vector<1x100x324xbf16> to vector<100x324xbf16>
    %cst_238 = arith.constant dense<0.000000e+00> : vector<8x324xf32>
    %246 = tpu.matmul %243, %245, %cst_238 {dimension_numbers = #tpu.dot_dimension_numbers<[1], [0], [0], [1], [0, 0, 1, 1], [], []>} : vector<8x100xbf16>, vector<100x324xbf16>, vector<8x324xf32> -> vector<8x324xf32>
    %247 = vector.extract_strided_slice %214 {offsets = [0, 0], sizes = [8, 100], strides = [1, 1]} : vector<8x200xbf16> to vector<8x100xbf16>
    %c1_239 = arith.constant 1 : index
    %c0_240 = arith.constant 0 : index
    %c0_241 = arith.constant 0 : index
    %248 = vector.load %arg5[%c1_239, %c0_240, %c0_241] : memref<4x100x324xbf16, #tpu.memory_space<vmem>>, vector<1x100x324xbf16>
    %249 = vector.shape_cast %248 : vector<1x100x324xbf16> to vector<100x324xbf16>
    %cst_242 = arith.constant dense<0.000000e+00> : vector<8x324xf32>
    %250 = tpu.matmul %247, %249, %cst_242 {dimension_numbers = #tpu.dot_dimension_numbers<[1], [0], [0], [1], [0, 0, 1, 1], [], []>} : vector<8x100xbf16>, vector<100x324xbf16>, vector<8x324xf32> -> vector<8x324xf32>
    %251 = arith.addf %246, %250 : vector<8x324xf32>
    %252 = vector.extract_strided_slice %228 {offsets = [0, 0], sizes = [8, 100], strides = [1, 1]} : vector<8x200xbf16> to vector<8x100xbf16>
    %c2_243 = arith.constant 2 : index
    %c0_244 = arith.constant 0 : index
    %c0_245 = arith.constant 0 : index
    %253 = vector.load %arg5[%c2_243, %c0_244, %c0_245] : memref<4x100x324xbf16, #tpu.memory_space<vmem>>, vector<1x100x324xbf16>
    %254 = vector.shape_cast %253 : vector<1x100x324xbf16> to vector<100x324xbf16>
    %cst_246 = arith.constant dense<0.000000e+00> : vector<8x324xf32>
    %255 = tpu.matmul %252, %254, %cst_246 {dimension_numbers = #tpu.dot_dimension_numbers<[1], [0], [0], [1], [0, 0, 1, 1], [], []>} : vector<8x100xbf16>, vector<100x324xbf16>, vector<8x324xf32> -> vector<8x324xf32>
    %256 = arith.addf %251, %255 : vector<8x324xf32>
    %257 = vector.extract_strided_slice %242 {offsets = [0, 0], sizes = [8, 100], strides = [1, 1]} : vector<8x200xbf16> to vector<8x100xbf16>
    %c3_247 = arith.constant 3 : index
    %c0_248 = arith.constant 0 : index
    %c0_249 = arith.constant 0 : index
    %258 = vector.load %arg5[%c3_247, %c0_248, %c0_249] : memref<4x100x324xbf16, #tpu.memory_space<vmem>>, vector<1x100x324xbf16>
    %259 = vector.shape_cast %258 : vector<1x100x324xbf16> to vector<100x324xbf16>
    %cst_250 = arith.constant dense<0.000000e+00> : vector<8x324xf32>
    %260 = tpu.matmul %257, %259, %cst_250 {dimension_numbers = #tpu.dot_dimension_numbers<[1], [0], [0], [1], [0, 0, 1, 1], [], []>} : vector<8x100xbf16>, vector<100x324xbf16>, vector<8x324xf32> -> vector<8x324xf32>
    %261 = arith.addf %256, %260 : vector<8x324xf32>
    %262 = arith.truncf %261 : vector<8x324xf32> to vector<8x324xbf16>
    %c0_251 = arith.constant 0 : index
    %c19_252 = arith.constant 19 : index
    %263 = vector.load %arg14[%c0_251, %c19_252] : memref<8x686xbf16, #tpu.memory_space<vmem>>, vector<8x324xbf16>
    tpu.vector_store %arg14[%c0_251, %c19_252], %262 {strides = array<i32>} : memref<8x686xbf16, #tpu.memory_space<vmem>>, vector<8x324xbf16>,
    %264 = vector.extract_strided_slice %200 {offsets = [0, 100], sizes = [8, 100], strides = [1, 1]} : vector<8x200xbf16> to vector<8x100xbf16>
    %c0_253 = arith.constant 0 : index
    %c0_254 = arith.constant 0 : index
    %c0_255 = arith.constant 0 : index
    %265 = vector.load %arg5[%c0_253, %c0_254, %c0_255] : memref<4x100x324xbf16, #tpu.memory_space<vmem>>, vector<1x100x324xbf16>
    %266 = vector.shape_cast %265 : vector<1x100x324xbf16> to vector<100x324xbf16>
    %cst_256 = arith.constant dense<0.000000e+00> : vector<8x324xf32>
    %267 = tpu.matmul %264, %266, %cst_256 {dimension_numbers = #tpu.dot_dimension_numbers<[1], [0], [0], [1], [0, 0, 1, 1], [], []>} : vector<8x100xbf16>, vector<100x324xbf16>, vector<8x324xf32> -> vector<8x324xf32>
    %268 = vector.extract_strided_slice %214 {offsets = [0, 100], sizes = [8, 100], strides = [1, 1]} : vector<8x200xbf16> to vector<8x100xbf16>
    %c1_257 = arith.constant 1 : index
    %c0_258 = arith.constant 0 : index
    %c0_259 = arith.constant 0 : index
    %269 = vector.load %arg5[%c1_257, %c0_258, %c0_259] : memref<4x100x324xbf16, #tpu.memory_space<vmem>>, vector<1x100x324xbf16>
    %270 = vector.shape_cast %269 : vector<1x100x324xbf16> to vector<100x324xbf16>
    %cst_260 = arith.constant dense<0.000000e+00> : vector<8x324xf32>
    %271 = tpu.matmul %268, %270, %cst_260 {dimension_numbers = #tpu.dot_dimension_numbers<[1], [0], [0], [1], [0, 0, 1, 1], [], []>} : vector<8x100xbf16>, vector<100x324xbf16>, vector<8x324xf32> -> vector<8x324xf32>
    %272 = arith.addf %267, %271 : vector<8x324xf32>
    %273 = vector.extract_strided_slice %228 {offsets = [0, 100], sizes = [8, 100], strides = [1, 1]} : vector<8x200xbf16> to vector<8x100xbf16>
    %c2_261 = arith.constant 2 : index
    %c0_262 = arith.constant 0 : index
    %c0_263 = arith.constant 0 : index
    %274 = vector.load %arg5[%c2_261, %c0_262, %c0_263] : memref<4x100x324xbf16, #tpu.memory_space<vmem>>, vector<1x100x324xbf16>
    %275 = vector.shape_cast %274 : vector<1x100x324xbf16> to vector<100x324xbf16>
    %cst_264 = arith.constant dense<0.000000e+00> : vector<8x324xf32>
    %276 = tpu.matmul %273, %275, %cst_264 {dimension_numbers = #tpu.dot_dimension_numbers<[1], [0], [0], [1], [0, 0, 1, 1], [], []>} : vector<8x100xbf16>, vector<100x324xbf16>, vector<8x324xf32> -> vector<8x324xf32>
    %277 = arith.addf %272, %276 : vector<8x324xf32>
    %278 = vector.extract_strided_slice %242 {offsets = [0, 100], sizes = [8, 100], strides = [1, 1]} : vector<8x200xbf16> to vector<8x100xbf16>
    %c3_265 = arith.constant 3 : index
    %c0_266 = arith.constant 0 : index
    %c0_267 = arith.constant 0 : index
    %279 = vector.load %arg5[%c3_265, %c0_266, %c0_267] : memref<4x100x324xbf16, #tpu.memory_space<vmem>>, vector<1x100x324xbf16>
    %280 = vector.shape_cast %279 : vector<1x100x324xbf16> to vector<100x324xbf16>
    %cst_268 = arith.constant dense<0.000000e+00> : vector<8x324xf32>
    %281 = tpu.matmul %278, %280, %cst_268 {dimension_numbers = #tpu.dot_dimension_numbers<[1], [0], [0], [1], [0, 0, 1, 1], [], []>} : vector<8x100xbf16>, vector<100x324xbf16>, vector<8x324xf32> -> vector<8x324xf32>
    %282 = arith.addf %277, %281 : vector<8x324xf32>
    %283 = arith.truncf %282 : vector<8x324xf32> to vector<8x324xbf16>
    %c0_269 = arith.constant 0 : index
    %c343 = arith.constant 343 : index
    %284 = vector.load %arg14[%c0_269, %c343] : memref<8x686xbf16, #tpu.memory_space<vmem>>, vector<8x324xbf16>
    tpu.vector_store %arg14[%c0_269, %c343], %283 {strides = array<i32>} : memref<8x686xbf16, #tpu.memory_space<vmem>>, vector<8x324xbf16>,
    %c0_270 = arith.constant 0 : index
    %c0_271 = arith.constant 0 : index
    %c0_272 = arith.constant 0 : index
    %285 = vector.load %arg2[%c0_270, %c0_271, %c0_272] : memref<1x8x648xf32, #tpu.memory_space<vmem>>, vector<1x8x648xf32>
    %286 = vector.shape_cast %285 : vector<1x8x648xf32> to vector<8x648xf32>
    %287 = arith.truncf %286 : vector<8x648xf32> to vector<8x648xbf16>
    %c0_273 = arith.constant 0 : index
    %c19_274 = arith.constant 19 : index
    %288 = vector.load %arg12[%c0_273, %c19_274] : memref<8x686xbf16, #tpu.memory_space<vmem>>, vector<8x648xbf16>
    tpu.vector_store %arg12[%c0_273, %c19_274], %287 {strides = array<i32>} : memref<8x686xbf16, #tpu.memory_space<vmem>>, vector<8x648xbf16>,
    %c27 = arith.constant 27 : index
    %c0_275 = arith.constant 0 : index
    %c0_276 = arith.constant 0 : index
    %289 = vector.load %arg6[%c27, %c0_275, %c0_276] : memref<81x8x8xbf16, #tpu.memory_space<vmem>>, vector<1x8x8xbf16>
    %290 = vector.shape_cast %289 : vector<1x8x8xbf16> to vector<8x8xbf16>
    %c0_277 = arith.constant 0 : index
    %c0_278 = arith.constant 0 : index
    %291 = vector.load %arg12[%c0_277, %c0_278] : memref<8x686xbf16, #tpu.memory_space<vmem>>, vector<8x648xbf16>
    %cst_279 = arith.constant dense<0.000000e+00> : vector<8x648xf32>
    %292 = tpu.matmul %290, %291, %cst_279 {dimension_numbers = #tpu.dot_dimension_numbers<[1], [0], [0], [1], [0, 0, 1, 1], [], []>} : vector<8x8xbf16>, vector<8x648xbf16>, vector<8x648xf32> -> vector<8x648xf32>
    %c28 = arith.constant 28 : index
    %c0_280 = arith.constant 0 : index
    %c0_281 = arith.constant 0 : index
    %293 = vector.load %arg6[%c28, %c0_280, %c0_281] : memref<81x8x8xbf16, #tpu.memory_space<vmem>>, vector<1x8x8xbf16>
    %294 = vector.shape_cast %293 : vector<1x8x8xbf16> to vector<8x8xbf16>
    %c0_282 = arith.constant 0 : index
    %c1_283 = arith.constant 1 : index
    %295 = vector.load %arg12[%c0_282, %c1_283] : memref<8x686xbf16, #tpu.memory_space<vmem>>, vector<8x648xbf16>
    %cst_284 = arith.constant dense<0.000000e+00> : vector<8x648xf32>
    %296 = tpu.matmul %294, %295, %cst_284 {dimension_numbers = #tpu.dot_dimension_numbers<[1], [0], [0], [1], [0, 0, 1, 1], [], []>} : vector<8x8xbf16>, vector<8x648xbf16>, vector<8x648xf32> -> vector<8x648xf32>
    %297 = arith.addf %292, %296 : vector<8x648xf32>
    %c29 = arith.constant 29 : index
    %c0_285 = arith.constant 0 : index
    %c0_286 = arith.constant 0 : index
    %298 = vector.load %arg6[%c29, %c0_285, %c0_286] : memref<81x8x8xbf16, #tpu.memory_space<vmem>>, vector<1x8x8xbf16>
    %299 = vector.shape_cast %298 : vector<1x8x8xbf16> to vector<8x8xbf16>
    %c0_287 = arith.constant 0 : index
    %c2_288 = arith.constant 2 : index
    %300 = vector.load %arg12[%c0_287, %c2_288] : memref<8x686xbf16, #tpu.memory_space<vmem>>, vector<8x648xbf16>
    %cst_289 = arith.constant dense<0.000000e+00> : vector<8x648xf32>
    %301 = tpu.matmul %299, %300, %cst_289 {dimension_numbers = #tpu.dot_dimension_numbers<[1], [0], [0], [1], [0, 0, 1, 1], [], []>} : vector<8x8xbf16>, vector<8x648xbf16>, vector<8x648xf32> -> vector<8x648xf32>
    %302 = arith.addf %297, %301 : vector<8x648xf32>
    %c30 = arith.constant 30 : index
    %c0_290 = arith.constant 0 : index
    %c0_291 = arith.constant 0 : index
    %303 = vector.load %arg6[%c30, %c0_290, %c0_291] : memref<81x8x8xbf16, #tpu.memory_space<vmem>>, vector<1x8x8xbf16>
    %304 = vector.shape_cast %303 : vector<1x8x8xbf16> to vector<8x8xbf16>
    %c0_292 = arith.constant 0 : index
    %c18_293 = arith.constant 18 : index
    %305 = vector.load %arg12[%c0_292, %c18_293] : memref<8x686xbf16, #tpu.memory_space<vmem>>, vector<8x648xbf16>
    %cst_294 = arith.constant dense<0.000000e+00> : vector<8x648xf32>
    %306 = tpu.matmul %304, %305, %cst_294 {dimension_numbers = #tpu.dot_dimension_numbers<[1], [0], [0], [1], [0, 0, 1, 1], [], []>} : vector<8x8xbf16>, vector<8x648xbf16>, vector<8x648xf32> -> vector<8x648xf32>
    %307 = arith.addf %302, %306 : vector<8x648xf32>
    %c31 = arith.constant 31 : index
    %c0_295 = arith.constant 0 : index
    %c0_296 = arith.constant 0 : index
    %308 = vector.load %arg6[%c31, %c0_295, %c0_296] : memref<81x8x8xbf16, #tpu.memory_space<vmem>>, vector<1x8x8xbf16>
    %309 = vector.shape_cast %308 : vector<1x8x8xbf16> to vector<8x8xbf16>
    %c0_297 = arith.constant 0 : index
    %c19_298 = arith.constant 19 : index
    %310 = vector.load %arg12[%c0_297, %c19_298] : memref<8x686xbf16, #tpu.memory_space<vmem>>, vector<8x648xbf16>
    %cst_299 = arith.constant dense<0.000000e+00> : vector<8x648xf32>
    %311 = tpu.matmul %309, %310, %cst_299 {dimension_numbers = #tpu.dot_dimension_numbers<[1], [0], [0], [1], [0, 0, 1, 1], [], []>} : vector<8x8xbf16>, vector<8x648xbf16>, vector<8x648xf32> -> vector<8x648xf32>
    %312 = arith.addf %307, %311 : vector<8x648xf32>
    %c32 = arith.constant 32 : index
    %c0_300 = arith.constant 0 : index
    %c0_301 = arith.constant 0 : index
    %313 = vector.load %arg6[%c32, %c0_300, %c0_301] : memref<81x8x8xbf16, #tpu.memory_space<vmem>>, vector<1x8x8xbf16>
    %314 = vector.shape_cast %313 : vector<1x8x8xbf16> to vector<8x8xbf16>
    %c0_302 = arith.constant 0 : index
    %c20_303 = arith.constant 20 : index
    %315 = vector.load %arg12[%c0_302, %c20_303] : memref<8x686xbf16, #tpu.memory_space<vmem>>, vector<8x648xbf16>
    %cst_304 = arith.constant dense<0.000000e+00> : vector<8x648xf32>
    %316 = tpu.matmul %314, %315, %cst_304 {dimension_numbers = #tpu.dot_dimension_numbers<[1], [0], [0], [1], [0, 0, 1, 1], [], []>} : vector<8x8xbf16>, vector<8x648xbf16>, vector<8x648xf32> -> vector<8x648xf32>
    %317 = arith.addf %312, %316 : vector<8x648xf32>
    %c33 = arith.constant 33 : index
    %c0_305 = arith.constant 0 : index
    %c0_306 = arith.constant 0 : index
    %318 = vector.load %arg6[%c33, %c0_305, %c0_306] : memref<81x8x8xbf16, #tpu.memory_space<vmem>>, vector<1x8x8xbf16>
    %319 = vector.shape_cast %318 : vector<1x8x8xbf16> to vector<8x8xbf16>
    %c0_307 = arith.constant 0 : index
    %c36 = arith.constant 36 : index
    %320 = vector.load %arg12[%c0_307, %c36] : memref<8x686xbf16, #tpu.memory_space<vmem>>, vector<8x648xbf16>
    %cst_308 = arith.constant dense<0.000000e+00> : vector<8x648xf32>
    %321 = tpu.matmul %319, %320, %cst_308 {dimension_numbers = #tpu.dot_dimension_numbers<[1], [0], [0], [1], [0, 0, 1, 1], [], []>} : vector<8x8xbf16>, vector<8x648xbf16>, vector<8x648xf32> -> vector<8x648xf32>
    %322 = arith.addf %317, %321 : vector<8x648xf32>
    %c34 = arith.constant 34 : index
    %c0_309 = arith.constant 0 : index
    %c0_310 = arith.constant 0 : index
    %323 = vector.load %arg6[%c34, %c0_309, %c0_310] : memref<81x8x8xbf16, #tpu.memory_space<vmem>>, vector<1x8x8xbf16>
    %324 = vector.shape_cast %323 : vector<1x8x8xbf16> to vector<8x8xbf16>
    %c0_311 = arith.constant 0 : index
    %c37 = arith.constant 37 : index
    %325 = vector.load %arg12[%c0_311, %c37] : memref<8x686xbf16, #tpu.memory_space<vmem>>, vector<8x648xbf16>
    %cst_312 = arith.constant dense<0.000000e+00> : vector<8x648xf32>
    %326 = tpu.matmul %324, %325, %cst_312 {dimension_numbers = #tpu.dot_dimension_numbers<[1], [0], [0], [1], [0, 0, 1, 1], [], []>} : vector<8x8xbf16>, vector<8x648xbf16>, vector<8x648xf32> -> vector<8x648xf32>
    %327 = arith.addf %322, %326 : vector<8x648xf32>
    %c35 = arith.constant 35 : index
    %c0_313 = arith.constant 0 : index
    %c0_314 = arith.constant 0 : index
    %328 = vector.load %arg6[%c35, %c0_313, %c0_314] : memref<81x8x8xbf16, #tpu.memory_space<vmem>>, vector<1x8x8xbf16>
    %329 = vector.shape_cast %328 : vector<1x8x8xbf16> to vector<8x8xbf16>
    %c0_315 = arith.constant 0 : index
    %c38 = arith.constant 38 : index
    %330 = vector.load %arg12[%c0_315, %c38] : memref<8x686xbf16, #tpu.memory_space<vmem>>, vector<8x648xbf16>
    %cst_316 = arith.constant dense<0.000000e+00> : vector<8x648xf32>
    %331 = tpu.matmul %329, %330, %cst_316 {dimension_numbers = #tpu.dot_dimension_numbers<[1], [0], [0], [1], [0, 0, 1, 1], [], []>} : vector<8x8xbf16>, vector<8x648xbf16>, vector<8x648xf32> -> vector<8x648xf32>
    %332 = arith.addf %327, %331 : vector<8x648xf32>
    %c4_317 = arith.constant 4 : index
    %c0_318 = arith.constant 0 : index
    %c0_319 = arith.constant 0 : index
    %333 = vector.load %arg8[%c4_317, %c0_318, %c0_319] : memref<8x8x1xf32, #tpu.memory_space<vmem>>, vector<1x8x1xf32>
    %334 = vector.shape_cast %333 : vector<1x8x1xf32> to vector<8x1xf32>
    %335 = vector.broadcast %334 : vector<8x1xf32> to vector<8x648xf32>
    %336 = arith.addf %332, %335 : vector<8x648xf32>
    %cst_320 = arith.constant 0.000000e+00 : f32
    %337 = vector.broadcast %cst_320 : f32 to vector<8x648xf32>
    %338 = arith.maximumf %336, %337 : vector<8x648xf32>
    %339 = vector.broadcast %21 : vector<1x648xf32> to vector<8x648xf32>
    %340 = arith.mulf %338, %339 : vector<8x648xf32>
    %341 = arith.truncf %340 : vector<8x648xf32> to vector<8x648xbf16>
    %c0_321 = arith.constant 0 : index
    %c19_322 = arith.constant 19 : index
    %342 = vector.load %arg13[%c0_321, %c19_322] : memref<8x686xbf16, #tpu.memory_space<vmem>>, vector<8x648xbf16>
    tpu.vector_store %arg13[%c0_321, %c19_322], %341 {strides = array<i32>} : memref<8x686xbf16, #tpu.memory_space<vmem>>, vector<8x648xbf16>,
    %c36_323 = arith.constant 36 : index
    %c0_324 = arith.constant 0 : index
    %c0_325 = arith.constant 0 : index
    %343 = vector.load %arg6[%c36_323, %c0_324, %c0_325] : memref<81x8x8xbf16, #tpu.memory_space<vmem>>, vector<1x8x8xbf16>
    %344 = vector.shape_cast %343 : vector<1x8x8xbf16> to vector<8x8xbf16>
    %c0_326 = arith.constant 0 : index
    %c0_327 = arith.constant 0 : index
    %345 = vector.load %arg13[%c0_326, %c0_327] : memref<8x686xbf16, #tpu.memory_space<vmem>>, vector<8x648xbf16>
    %cst_328 = arith.constant dense<0.000000e+00> : vector<8x648xf32>
    %346 = tpu.matmul %344, %345, %cst_328 {dimension_numbers = #tpu.dot_dimension_numbers<[1], [0], [0], [1], [0, 0, 1, 1], [], []>} : vector<8x8xbf16>, vector<8x648xbf16>, vector<8x648xf32> -> vector<8x648xf32>
    %c37_329 = arith.constant 37 : index
    %c0_330 = arith.constant 0 : index
    %c0_331 = arith.constant 0 : index
    %347 = vector.load %arg6[%c37_329, %c0_330, %c0_331] : memref<81x8x8xbf16, #tpu.memory_space<vmem>>, vector<1x8x8xbf16>
    %348 = vector.shape_cast %347 : vector<1x8x8xbf16> to vector<8x8xbf16>
    %c0_332 = arith.constant 0 : index
    %c1_333 = arith.constant 1 : index
    %349 = vector.load %arg13[%c0_332, %c1_333] : memref<8x686xbf16, #tpu.memory_space<vmem>>, vector<8x648xbf16>
    %cst_334 = arith.constant dense<0.000000e+00> : vector<8x648xf32>
    %350 = tpu.matmul %348, %349, %cst_334 {dimension_numbers = #tpu.dot_dimension_numbers<[1], [0], [0], [1], [0, 0, 1, 1], [], []>} : vector<8x8xbf16>, vector<8x648xbf16>, vector<8x648xf32> -> vector<8x648xf32>
    %351 = arith.addf %346, %350 : vector<8x648xf32>
    %c38_335 = arith.constant 38 : index
    %c0_336 = arith.constant 0 : index
    %c0_337 = arith.constant 0 : index
    %352 = vector.load %arg6[%c38_335, %c0_336, %c0_337] : memref<81x8x8xbf16, #tpu.memory_space<vmem>>, vector<1x8x8xbf16>
    %353 = vector.shape_cast %352 : vector<1x8x8xbf16> to vector<8x8xbf16>
    %c0_338 = arith.constant 0 : index
    %c2_339 = arith.constant 2 : index
    %354 = vector.load %arg13[%c0_338, %c2_339] : memref<8x686xbf16, #tpu.memory_space<vmem>>, vector<8x648xbf16>
    %cst_340 = arith.constant dense<0.000000e+00> : vector<8x648xf32>
    %355 = tpu.matmul %353, %354, %cst_340 {dimension_numbers = #tpu.dot_dimension_numbers<[1], [0], [0], [1], [0, 0, 1, 1], [], []>} : vector<8x8xbf16>, vector<8x648xbf16>, vector<8x648xf32> -> vector<8x648xf32>
    %356 = arith.addf %351, %355 : vector<8x648xf32>
    %c39 = arith.constant 39 : index
    %c0_341 = arith.constant 0 : index
    %c0_342 = arith.constant 0 : index
    %357 = vector.load %arg6[%c39, %c0_341, %c0_342] : memref<81x8x8xbf16, #tpu.memory_space<vmem>>, vector<1x8x8xbf16>
    %358 = vector.shape_cast %357 : vector<1x8x8xbf16> to vector<8x8xbf16>
    %c0_343 = arith.constant 0 : index
    %c18_344 = arith.constant 18 : index
    %359 = vector.load %arg13[%c0_343, %c18_344] : memref<8x686xbf16, #tpu.memory_space<vmem>>, vector<8x648xbf16>
    %cst_345 = arith.constant dense<0.000000e+00> : vector<8x648xf32>
    %360 = tpu.matmul %358, %359, %cst_345 {dimension_numbers = #tpu.dot_dimension_numbers<[1], [0], [0], [1], [0, 0, 1, 1], [], []>} : vector<8x8xbf16>, vector<8x648xbf16>, vector<8x648xf32> -> vector<8x648xf32>
    %361 = arith.addf %356, %360 : vector<8x648xf32>
    %c40 = arith.constant 40 : index
    %c0_346 = arith.constant 0 : index
    %c0_347 = arith.constant 0 : index
    %362 = vector.load %arg6[%c40, %c0_346, %c0_347] : memref<81x8x8xbf16, #tpu.memory_space<vmem>>, vector<1x8x8xbf16>
    %363 = vector.shape_cast %362 : vector<1x8x8xbf16> to vector<8x8xbf16>
    %c0_348 = arith.constant 0 : index
    %c19_349 = arith.constant 19 : index
    %364 = vector.load %arg13[%c0_348, %c19_349] : memref<8x686xbf16, #tpu.memory_space<vmem>>, vector<8x648xbf16>
    %cst_350 = arith.constant dense<0.000000e+00> : vector<8x648xf32>
    %365 = tpu.matmul %363, %364, %cst_350 {dimension_numbers = #tpu.dot_dimension_numbers<[1], [0], [0], [1], [0, 0, 1, 1], [], []>} : vector<8x8xbf16>, vector<8x648xbf16>, vector<8x648xf32> -> vector<8x648xf32>
    %366 = arith.addf %361, %365 : vector<8x648xf32>
    %c41 = arith.constant 41 : index
    %c0_351 = arith.constant 0 : index
    %c0_352 = arith.constant 0 : index
    %367 = vector.load %arg6[%c41, %c0_351, %c0_352] : memref<81x8x8xbf16, #tpu.memory_space<vmem>>, vector<1x8x8xbf16>
    %368 = vector.shape_cast %367 : vector<1x8x8xbf16> to vector<8x8xbf16>
    %c0_353 = arith.constant 0 : index
    %c20_354 = arith.constant 20 : index
    %369 = vector.load %arg13[%c0_353, %c20_354] : memref<8x686xbf16, #tpu.memory_space<vmem>>, vector<8x648xbf16>
    %cst_355 = arith.constant dense<0.000000e+00> : vector<8x648xf32>
    %370 = tpu.matmul %368, %369, %cst_355 {dimension_numbers = #tpu.dot_dimension_numbers<[1], [0], [0], [1], [0, 0, 1, 1], [], []>} : vector<8x8xbf16>, vector<8x648xbf16>, vector<8x648xf32> -> vector<8x648xf32>
    %371 = arith.addf %366, %370 : vector<8x648xf32>
    %c42 = arith.constant 42 : index
    %c0_356 = arith.constant 0 : index
    %c0_357 = arith.constant 0 : index
    %372 = vector.load %arg6[%c42, %c0_356, %c0_357] : memref<81x8x8xbf16, #tpu.memory_space<vmem>>, vector<1x8x8xbf16>
    %373 = vector.shape_cast %372 : vector<1x8x8xbf16> to vector<8x8xbf16>
    %c0_358 = arith.constant 0 : index
    %c36_359 = arith.constant 36 : index
    %374 = vector.load %arg13[%c0_358, %c36_359] : memref<8x686xbf16, #tpu.memory_space<vmem>>, vector<8x648xbf16>
    %cst_360 = arith.constant dense<0.000000e+00> : vector<8x648xf32>
    %375 = tpu.matmul %373, %374, %cst_360 {dimension_numbers = #tpu.dot_dimension_numbers<[1], [0], [0], [1], [0, 0, 1, 1], [], []>} : vector<8x8xbf16>, vector<8x648xbf16>, vector<8x648xf32> -> vector<8x648xf32>
    %376 = arith.addf %371, %375 : vector<8x648xf32>
    %c43 = arith.constant 43 : index
    %c0_361 = arith.constant 0 : index
    %c0_362 = arith.constant 0 : index
    %377 = vector.load %arg6[%c43, %c0_361, %c0_362] : memref<81x8x8xbf16, #tpu.memory_space<vmem>>, vector<1x8x8xbf16>
    %378 = vector.shape_cast %377 : vector<1x8x8xbf16> to vector<8x8xbf16>
    %c0_363 = arith.constant 0 : index
    %c37_364 = arith.constant 37 : index
    %379 = vector.load %arg13[%c0_363, %c37_364] : memref<8x686xbf16, #tpu.memory_space<vmem>>, vector<8x648xbf16>
    %cst_365 = arith.constant dense<0.000000e+00> : vector<8x648xf32>
    %380 = tpu.matmul %378, %379, %cst_365 {dimension_numbers = #tpu.dot_dimension_numbers<[1], [0], [0], [1], [0, 0, 1, 1], [], []>} : vector<8x8xbf16>, vector<8x648xbf16>, vector<8x648xf32> -> vector<8x648xf32>
    %381 = arith.addf %376, %380 : vector<8x648xf32>
    %c44 = arith.constant 44 : index
    %c0_366 = arith.constant 0 : index
    %c0_367 = arith.constant 0 : index
    %382 = vector.load %arg6[%c44, %c0_366, %c0_367] : memref<81x8x8xbf16, #tpu.memory_space<vmem>>, vector<1x8x8xbf16>
    %383 = vector.shape_cast %382 : vector<1x8x8xbf16> to vector<8x8xbf16>
    %c0_368 = arith.constant 0 : index
    %c38_369 = arith.constant 38 : index
    %384 = vector.load %arg13[%c0_368, %c38_369] : memref<8x686xbf16, #tpu.memory_space<vmem>>, vector<8x648xbf16>
    %cst_370 = arith.constant dense<0.000000e+00> : vector<8x648xf32>
    %385 = tpu.matmul %383, %384, %cst_370 {dimension_numbers = #tpu.dot_dimension_numbers<[1], [0], [0], [1], [0, 0, 1, 1], [], []>} : vector<8x8xbf16>, vector<8x648xbf16>, vector<8x648xf32> -> vector<8x648xf32>
    %386 = arith.addf %381, %385 : vector<8x648xf32>
    %c5_371 = arith.constant 5 : index
    %c0_372 = arith.constant 0 : index
    %c0_373 = arith.constant 0 : index
    %387 = vector.load %arg8[%c5_371, %c0_372, %c0_373] : memref<8x8x1xf32, #tpu.memory_space<vmem>>, vector<1x8x1xf32>
    %388 = vector.shape_cast %387 : vector<1x8x1xf32> to vector<8x1xf32>
    %389 = vector.broadcast %388 : vector<8x1xf32> to vector<8x648xf32>
    %390 = arith.addf %386, %389 : vector<8x648xf32>
    %391 = arith.addf %390, %286 : vector<8x648xf32>
    %cst_374 = arith.constant 0.000000e+00 : f32
    %392 = vector.broadcast %cst_374 : f32 to vector<8x648xf32>
    %393 = arith.maximumf %391, %392 : vector<8x648xf32>
    %394 = vector.broadcast %21 : vector<1x648xf32> to vector<8x648xf32>
    %395 = arith.mulf %393, %394 : vector<8x648xf32>
    %396 = arith.truncf %395 : vector<8x648xf32> to vector<8x648xbf16>
    %c0_375 = arith.constant 0 : index
    %c19_376 = arith.constant 19 : index
    %397 = vector.load %arg12[%c0_375, %c19_376] : memref<8x686xbf16, #tpu.memory_space<vmem>>, vector<8x648xbf16>
    tpu.vector_store %arg12[%c0_375, %c19_376], %396 {strides = array<i32>} : memref<8x686xbf16, #tpu.memory_space<vmem>>, vector<8x648xbf16>,
    %c45 = arith.constant 45 : index
    %c0_377 = arith.constant 0 : index
    %c0_378 = arith.constant 0 : index
    %398 = vector.load %arg6[%c45, %c0_377, %c0_378] : memref<81x8x8xbf16, #tpu.memory_space<vmem>>, vector<1x8x8xbf16>
    %399 = vector.shape_cast %398 : vector<1x8x8xbf16> to vector<8x8xbf16>
    %c0_379 = arith.constant 0 : index
    %c0_380 = arith.constant 0 : index
    %400 = vector.load %arg12[%c0_379, %c0_380] : memref<8x686xbf16, #tpu.memory_space<vmem>>, vector<8x648xbf16>
    %cst_381 = arith.constant dense<0.000000e+00> : vector<8x648xf32>
    %401 = tpu.matmul %399, %400, %cst_381 {dimension_numbers = #tpu.dot_dimension_numbers<[1], [0], [0], [1], [0, 0, 1, 1], [], []>} : vector<8x8xbf16>, vector<8x648xbf16>, vector<8x648xf32> -> vector<8x648xf32>
    %c46 = arith.constant 46 : index
    %c0_382 = arith.constant 0 : index
    %c0_383 = arith.constant 0 : index
    %402 = vector.load %arg6[%c46, %c0_382, %c0_383] : memref<81x8x8xbf16, #tpu.memory_space<vmem>>, vector<1x8x8xbf16>
    %403 = vector.shape_cast %402 : vector<1x8x8xbf16> to vector<8x8xbf16>
    %c0_384 = arith.constant 0 : index
    %c1_385 = arith.constant 1 : index
    %404 = vector.load %arg12[%c0_384, %c1_385] : memref<8x686xbf16, #tpu.memory_space<vmem>>, vector<8x648xbf16>
    %cst_386 = arith.constant dense<0.000000e+00> : vector<8x648xf32>
    %405 = tpu.matmul %403, %404, %cst_386 {dimension_numbers = #tpu.dot_dimension_numbers<[1], [0], [0], [1], [0, 0, 1, 1], [], []>} : vector<8x8xbf16>, vector<8x648xbf16>, vector<8x648xf32> -> vector<8x648xf32>
    %406 = arith.addf %401, %405 : vector<8x648xf32>
    %c47 = arith.constant 47 : index
    %c0_387 = arith.constant 0 : index
    %c0_388 = arith.constant 0 : index
    %407 = vector.load %arg6[%c47, %c0_387, %c0_388] : memref<81x8x8xbf16, #tpu.memory_space<vmem>>, vector<1x8x8xbf16>
    %408 = vector.shape_cast %407 : vector<1x8x8xbf16> to vector<8x8xbf16>
    %c0_389 = arith.constant 0 : index
    %c2_390 = arith.constant 2 : index
    %409 = vector.load %arg12[%c0_389, %c2_390] : memref<8x686xbf16, #tpu.memory_space<vmem>>, vector<8x648xbf16>
    %cst_391 = arith.constant dense<0.000000e+00> : vector<8x648xf32>
    %410 = tpu.matmul %408, %409, %cst_391 {dimension_numbers = #tpu.dot_dimension_numbers<[1], [0], [0], [1], [0, 0, 1, 1], [], []>} : vector<8x8xbf16>, vector<8x648xbf16>, vector<8x648xf32> -> vector<8x648xf32>
    %411 = arith.addf %406, %410 : vector<8x648xf32>
    %c48 = arith.constant 48 : index
    %c0_392 = arith.constant 0 : index
    %c0_393 = arith.constant 0 : index
    %412 = vector.load %arg6[%c48, %c0_392, %c0_393] : memref<81x8x8xbf16, #tpu.memory_space<vmem>>, vector<1x8x8xbf16>
    %413 = vector.shape_cast %412 : vector<1x8x8xbf16> to vector<8x8xbf16>
    %c0_394 = arith.constant 0 : index
    %c18_395 = arith.constant 18 : index
    %414 = vector.load %arg12[%c0_394, %c18_395] : memref<8x686xbf16, #tpu.memory_space<vmem>>, vector<8x648xbf16>
    %cst_396 = arith.constant dense<0.000000e+00> : vector<8x648xf32>
    %415 = tpu.matmul %413, %414, %cst_396 {dimension_numbers = #tpu.dot_dimension_numbers<[1], [0], [0], [1], [0, 0, 1, 1], [], []>} : vector<8x8xbf16>, vector<8x648xbf16>, vector<8x648xf32> -> vector<8x648xf32>
    %416 = arith.addf %411, %415 : vector<8x648xf32>
    %c49 = arith.constant 49 : index
    %c0_397 = arith.constant 0 : index
    %c0_398 = arith.constant 0 : index
    %417 = vector.load %arg6[%c49, %c0_397, %c0_398] : memref<81x8x8xbf16, #tpu.memory_space<vmem>>, vector<1x8x8xbf16>
    %418 = vector.shape_cast %417 : vector<1x8x8xbf16> to vector<8x8xbf16>
    %c0_399 = arith.constant 0 : index
    %c19_400 = arith.constant 19 : index
    %419 = vector.load %arg12[%c0_399, %c19_400] : memref<8x686xbf16, #tpu.memory_space<vmem>>, vector<8x648xbf16>
    %cst_401 = arith.constant dense<0.000000e+00> : vector<8x648xf32>
    %420 = tpu.matmul %418, %419, %cst_401 {dimension_numbers = #tpu.dot_dimension_numbers<[1], [0], [0], [1], [0, 0, 1, 1], [], []>} : vector<8x8xbf16>, vector<8x648xbf16>, vector<8x648xf32> -> vector<8x648xf32>
    %421 = arith.addf %416, %420 : vector<8x648xf32>
    %c50 = arith.constant 50 : index
    %c0_402 = arith.constant 0 : index
    %c0_403 = arith.constant 0 : index
    %422 = vector.load %arg6[%c50, %c0_402, %c0_403] : memref<81x8x8xbf16, #tpu.memory_space<vmem>>, vector<1x8x8xbf16>
    %423 = vector.shape_cast %422 : vector<1x8x8xbf16> to vector<8x8xbf16>
    %c0_404 = arith.constant 0 : index
    %c20_405 = arith.constant 20 : index
    %424 = vector.load %arg12[%c0_404, %c20_405] : memref<8x686xbf16, #tpu.memory_space<vmem>>, vector<8x648xbf16>
    %cst_406 = arith.constant dense<0.000000e+00> : vector<8x648xf32>
    %425 = tpu.matmul %423, %424, %cst_406 {dimension_numbers = #tpu.dot_dimension_numbers<[1], [0], [0], [1], [0, 0, 1, 1], [], []>} : vector<8x8xbf16>, vector<8x648xbf16>, vector<8x648xf32> -> vector<8x648xf32>
    %426 = arith.addf %421, %425 : vector<8x648xf32>
    %c51 = arith.constant 51 : index
    %c0_407 = arith.constant 0 : index
    %c0_408 = arith.constant 0 : index
    %427 = vector.load %arg6[%c51, %c0_407, %c0_408] : memref<81x8x8xbf16, #tpu.memory_space<vmem>>, vector<1x8x8xbf16>
    %428 = vector.shape_cast %427 : vector<1x8x8xbf16> to vector<8x8xbf16>
    %c0_409 = arith.constant 0 : index
    %c36_410 = arith.constant 36 : index
    %429 = vector.load %arg12[%c0_409, %c36_410] : memref<8x686xbf16, #tpu.memory_space<vmem>>, vector<8x648xbf16>
    %cst_411 = arith.constant dense<0.000000e+00> : vector<8x648xf32>
    %430 = tpu.matmul %428, %429, %cst_411 {dimension_numbers = #tpu.dot_dimension_numbers<[1], [0], [0], [1], [0, 0, 1, 1], [], []>} : vector<8x8xbf16>, vector<8x648xbf16>, vector<8x648xf32> -> vector<8x648xf32>
    %431 = arith.addf %426, %430 : vector<8x648xf32>
    %c52 = arith.constant 52 : index
    %c0_412 = arith.constant 0 : index
    %c0_413 = arith.constant 0 : index
    %432 = vector.load %arg6[%c52, %c0_412, %c0_413] : memref<81x8x8xbf16, #tpu.memory_space<vmem>>, vector<1x8x8xbf16>
    %433 = vector.shape_cast %432 : vector<1x8x8xbf16> to vector<8x8xbf16>
    %c0_414 = arith.constant 0 : index
    %c37_415 = arith.constant 37 : index
    %434 = vector.load %arg12[%c0_414, %c37_415] : memref<8x686xbf16, #tpu.memory_space<vmem>>, vector<8x648xbf16>
    %cst_416 = arith.constant dense<0.000000e+00> : vector<8x648xf32>
    %435 = tpu.matmul %433, %434, %cst_416 {dimension_numbers = #tpu.dot_dimension_numbers<[1], [0], [0], [1], [0, 0, 1, 1], [], []>} : vector<8x8xbf16>, vector<8x648xbf16>, vector<8x648xf32> -> vector<8x648xf32>
    %436 = arith.addf %431, %435 : vector<8x648xf32>
    %c53 = arith.constant 53 : index
    %c0_417 = arith.constant 0 : index
    %c0_418 = arith.constant 0 : index
    %437 = vector.load %arg6[%c53, %c0_417, %c0_418] : memref<81x8x8xbf16, #tpu.memory_space<vmem>>, vector<1x8x8xbf16>
    %438 = vector.shape_cast %437 : vector<1x8x8xbf16> to vector<8x8xbf16>
    %c0_419 = arith.constant 0 : index
    %c38_420 = arith.constant 38 : index
    %439 = vector.load %arg12[%c0_419, %c38_420] : memref<8x686xbf16, #tpu.memory_space<vmem>>, vector<8x648xbf16>
    %cst_421 = arith.constant dense<0.000000e+00> : vector<8x648xf32>
    %440 = tpu.matmul %438, %439, %cst_421 {dimension_numbers = #tpu.dot_dimension_numbers<[1], [0], [0], [1], [0, 0, 1, 1], [], []>} : vector<8x8xbf16>, vector<8x648xbf16>, vector<8x648xf32> -> vector<8x648xf32>
    %441 = arith.addf %436, %440 : vector<8x648xf32>
    %c6_422 = arith.constant 6 : index
    %c0_423 = arith.constant 0 : index
    %c0_424 = arith.constant 0 : index
    %442 = vector.load %arg8[%c6_422, %c0_423, %c0_424] : memref<8x8x1xf32, #tpu.memory_space<vmem>>, vector<1x8x1xf32>
    %443 = vector.shape_cast %442 : vector<1x8x1xf32> to vector<8x1xf32>
    %444 = vector.broadcast %443 : vector<8x1xf32> to vector<8x648xf32>
    %445 = arith.addf %441, %444 : vector<8x648xf32>
    %cst_425 = arith.constant 0.000000e+00 : f32
    %446 = vector.broadcast %cst_425 : f32 to vector<8x648xf32>
    %447 = arith.maximumf %445, %446 : vector<8x648xf32>
    %448 = vector.broadcast %21 : vector<1x648xf32> to vector<8x648xf32>
    %449 = arith.mulf %447, %448 : vector<8x648xf32>
    %450 = arith.truncf %449 : vector<8x648xf32> to vector<8x648xbf16>
    %c0_426 = arith.constant 0 : index
    %c19_427 = arith.constant 19 : index
    %451 = vector.load %arg13[%c0_426, %c19_427] : memref<8x686xbf16, #tpu.memory_space<vmem>>, vector<8x648xbf16>
    tpu.vector_store %arg13[%c0_426, %c19_427], %450 {strides = array<i32>} : memref<8x686xbf16, #tpu.memory_space<vmem>>, vector<8x648xbf16>,
    %c54 = arith.constant 54 : index
    %c0_428 = arith.constant 0 : index
    %c0_429 = arith.constant 0 : index
    %452 = vector.load %arg6[%c54, %c0_428, %c0_429] : memref<81x8x8xbf16, #tpu.memory_space<vmem>>, vector<1x8x8xbf16>
    %453 = vector.shape_cast %452 : vector<1x8x8xbf16> to vector<8x8xbf16>
    %c0_430 = arith.constant 0 : index
    %c0_431 = arith.constant 0 : index
    %454 = vector.load %arg13[%c0_430, %c0_431] : memref<8x686xbf16, #tpu.memory_space<vmem>>, vector<8x648xbf16>
    %cst_432 = arith.constant dense<0.000000e+00> : vector<8x648xf32>
    %455 = tpu.matmul %453, %454, %cst_432 {dimension_numbers = #tpu.dot_dimension_numbers<[1], [0], [0], [1], [0, 0, 1, 1], [], []>} : vector<8x8xbf16>, vector<8x648xbf16>, vector<8x648xf32> -> vector<8x648xf32>
    %c55 = arith.constant 55 : index
    %c0_433 = arith.constant 0 : index
    %c0_434 = arith.constant 0 : index
    %456 = vector.load %arg6[%c55, %c0_433, %c0_434] : memref<81x8x8xbf16, #tpu.memory_space<vmem>>, vector<1x8x8xbf16>
    %457 = vector.shape_cast %456 : vector<1x8x8xbf16> to vector<8x8xbf16>
    %c0_435 = arith.constant 0 : index
    %c1_436 = arith.constant 1 : index
    %458 = vector.load %arg13[%c0_435, %c1_436] : memref<8x686xbf16, #tpu.memory_space<vmem>>, vector<8x648xbf16>
    %cst_437 = arith.constant dense<0.000000e+00> : vector<8x648xf32>
    %459 = tpu.matmul %457, %458, %cst_437 {dimension_numbers = #tpu.dot_dimension_numbers<[1], [0], [0], [1], [0, 0, 1, 1], [], []>} : vector<8x8xbf16>, vector<8x648xbf16>, vector<8x648xf32> -> vector<8x648xf32>
    %460 = arith.addf %455, %459 : vector<8x648xf32>
    %c56 = arith.constant 56 : index
    %c0_438 = arith.constant 0 : index
    %c0_439 = arith.constant 0 : index
    %461 = vector.load %arg6[%c56, %c0_438, %c0_439] : memref<81x8x8xbf16, #tpu.memory_space<vmem>>, vector<1x8x8xbf16>
    %462 = vector.shape_cast %461 : vector<1x8x8xbf16> to vector<8x8xbf16>
    %c0_440 = arith.constant 0 : index
    %c2_441 = arith.constant 2 : index
    %463 = vector.load %arg13[%c0_440, %c2_441] : memref<8x686xbf16, #tpu.memory_space<vmem>>, vector<8x648xbf16>
    %cst_442 = arith.constant dense<0.000000e+00> : vector<8x648xf32>
    %464 = tpu.matmul %462, %463, %cst_442 {dimension_numbers = #tpu.dot_dimension_numbers<[1], [0], [0], [1], [0, 0, 1, 1], [], []>} : vector<8x8xbf16>, vector<8x648xbf16>, vector<8x648xf32> -> vector<8x648xf32>
    %465 = arith.addf %460, %464 : vector<8x648xf32>
    %c57 = arith.constant 57 : index
    %c0_443 = arith.constant 0 : index
    %c0_444 = arith.constant 0 : index
    %466 = vector.load %arg6[%c57, %c0_443, %c0_444] : memref<81x8x8xbf16, #tpu.memory_space<vmem>>, vector<1x8x8xbf16>
    %467 = vector.shape_cast %466 : vector<1x8x8xbf16> to vector<8x8xbf16>
    %c0_445 = arith.constant 0 : index
    %c18_446 = arith.constant 18 : index
    %468 = vector.load %arg13[%c0_445, %c18_446] : memref<8x686xbf16, #tpu.memory_space<vmem>>, vector<8x648xbf16>
    %cst_447 = arith.constant dense<0.000000e+00> : vector<8x648xf32>
    %469 = tpu.matmul %467, %468, %cst_447 {dimension_numbers = #tpu.dot_dimension_numbers<[1], [0], [0], [1], [0, 0, 1, 1], [], []>} : vector<8x8xbf16>, vector<8x648xbf16>, vector<8x648xf32> -> vector<8x648xf32>
    %470 = arith.addf %465, %469 : vector<8x648xf32>
    %c58 = arith.constant 58 : index
    %c0_448 = arith.constant 0 : index
    %c0_449 = arith.constant 0 : index
    %471 = vector.load %arg6[%c58, %c0_448, %c0_449] : memref<81x8x8xbf16, #tpu.memory_space<vmem>>, vector<1x8x8xbf16>
    %472 = vector.shape_cast %471 : vector<1x8x8xbf16> to vector<8x8xbf16>
    %c0_450 = arith.constant 0 : index
    %c19_451 = arith.constant 19 : index
    %473 = vector.load %arg13[%c0_450, %c19_451] : memref<8x686xbf16, #tpu.memory_space<vmem>>, vector<8x648xbf16>
    %cst_452 = arith.constant dense<0.000000e+00> : vector<8x648xf32>
    %474 = tpu.matmul %472, %473, %cst_452 {dimension_numbers = #tpu.dot_dimension_numbers<[1], [0], [0], [1], [0, 0, 1, 1], [], []>} : vector<8x8xbf16>, vector<8x648xbf16>, vector<8x648xf32> -> vector<8x648xf32>
    %475 = arith.addf %470, %474 : vector<8x648xf32>
    %c59 = arith.constant 59 : index
    %c0_453 = arith.constant 0 : index
    %c0_454 = arith.constant 0 : index
    %476 = vector.load %arg6[%c59, %c0_453, %c0_454] : memref<81x8x8xbf16, #tpu.memory_space<vmem>>, vector<1x8x8xbf16>
    %477 = vector.shape_cast %476 : vector<1x8x8xbf16> to vector<8x8xbf16>
    %c0_455 = arith.constant 0 : index
    %c20_456 = arith.constant 20 : index
    %478 = vector.load %arg13[%c0_455, %c20_456] : memref<8x686xbf16, #tpu.memory_space<vmem>>, vector<8x648xbf16>
    %cst_457 = arith.constant dense<0.000000e+00> : vector<8x648xf32>
    %479 = tpu.matmul %477, %478, %cst_457 {dimension_numbers = #tpu.dot_dimension_numbers<[1], [0], [0], [1], [0, 0, 1, 1], [], []>} : vector<8x8xbf16>, vector<8x648xbf16>, vector<8x648xf32> -> vector<8x648xf32>
    %480 = arith.addf %475, %479 : vector<8x648xf32>
    %c60 = arith.constant 60 : index
    %c0_458 = arith.constant 0 : index
    %c0_459 = arith.constant 0 : index
    %481 = vector.load %arg6[%c60, %c0_458, %c0_459] : memref<81x8x8xbf16, #tpu.memory_space<vmem>>, vector<1x8x8xbf16>
    %482 = vector.shape_cast %481 : vector<1x8x8xbf16> to vector<8x8xbf16>
    %c0_460 = arith.constant 0 : index
    %c36_461 = arith.constant 36 : index
    %483 = vector.load %arg13[%c0_460, %c36_461] : memref<8x686xbf16, #tpu.memory_space<vmem>>, vector<8x648xbf16>
    %cst_462 = arith.constant dense<0.000000e+00> : vector<8x648xf32>
    %484 = tpu.matmul %482, %483, %cst_462 {dimension_numbers = #tpu.dot_dimension_numbers<[1], [0], [0], [1], [0, 0, 1, 1], [], []>} : vector<8x8xbf16>, vector<8x648xbf16>, vector<8x648xf32> -> vector<8x648xf32>
    %485 = arith.addf %480, %484 : vector<8x648xf32>
    %c61 = arith.constant 61 : index
    %c0_463 = arith.constant 0 : index
    %c0_464 = arith.constant 0 : index
    %486 = vector.load %arg6[%c61, %c0_463, %c0_464] : memref<81x8x8xbf16, #tpu.memory_space<vmem>>, vector<1x8x8xbf16>
    %487 = vector.shape_cast %486 : vector<1x8x8xbf16> to vector<8x8xbf16>
    %c0_465 = arith.constant 0 : index
    %c37_466 = arith.constant 37 : index
    %488 = vector.load %arg13[%c0_465, %c37_466] : memref<8x686xbf16, #tpu.memory_space<vmem>>, vector<8x648xbf16>
    %cst_467 = arith.constant dense<0.000000e+00> : vector<8x648xf32>
    %489 = tpu.matmul %487, %488, %cst_467 {dimension_numbers = #tpu.dot_dimension_numbers<[1], [0], [0], [1], [0, 0, 1, 1], [], []>} : vector<8x8xbf16>, vector<8x648xbf16>, vector<8x648xf32> -> vector<8x648xf32>
    %490 = arith.addf %485, %489 : vector<8x648xf32>
    %c62 = arith.constant 62 : index
    %c0_468 = arith.constant 0 : index
    %c0_469 = arith.constant 0 : index
    %491 = vector.load %arg6[%c62, %c0_468, %c0_469] : memref<81x8x8xbf16, #tpu.memory_space<vmem>>, vector<1x8x8xbf16>
    %492 = vector.shape_cast %491 : vector<1x8x8xbf16> to vector<8x8xbf16>
    %c0_470 = arith.constant 0 : index
    %c38_471 = arith.constant 38 : index
    %493 = vector.load %arg13[%c0_470, %c38_471] : memref<8x686xbf16, #tpu.memory_space<vmem>>, vector<8x648xbf16>
    %cst_472 = arith.constant dense<0.000000e+00> : vector<8x648xf32>
    %494 = tpu.matmul %492, %493, %cst_472 {dimension_numbers = #tpu.dot_dimension_numbers<[1], [0], [0], [1], [0, 0, 1, 1], [], []>} : vector<8x8xbf16>, vector<8x648xbf16>, vector<8x648xf32> -> vector<8x648xf32>
    %495 = arith.addf %490, %494 : vector<8x648xf32>
    %c7_473 = arith.constant 7 : index
    %c0_474 = arith.constant 0 : index
    %c0_475 = arith.constant 0 : index
    %496 = vector.load %arg8[%c7_473, %c0_474, %c0_475] : memref<8x8x1xf32, #tpu.memory_space<vmem>>, vector<1x8x1xf32>
    %497 = vector.shape_cast %496 : vector<1x8x1xf32> to vector<8x1xf32>
    %498 = vector.broadcast %497 : vector<8x1xf32> to vector<8x648xf32>
    %499 = arith.addf %495, %498 : vector<8x648xf32>
    %500 = arith.addf %499, %395 : vector<8x648xf32>
    %cst_476 = arith.constant 0.000000e+00 : f32
    %501 = vector.broadcast %cst_476 : f32 to vector<8x648xf32>
    %502 = arith.maximumf %500, %501 : vector<8x648xf32>
    %503 = vector.broadcast %21 : vector<1x648xf32> to vector<8x648xf32>
    %504 = arith.mulf %502, %503 : vector<8x648xf32>
    %505 = arith.truncf %504 : vector<8x648xf32> to vector<8x648xbf16>
    %c0_477 = arith.constant 0 : index
    %c19_478 = arith.constant 19 : index
    %506 = vector.load %arg12[%c0_477, %c19_478] : memref<8x686xbf16, #tpu.memory_space<vmem>>, vector<8x648xbf16>
    tpu.vector_store %arg12[%c0_477, %c19_478], %505 {strides = array<i32>} : memref<8x686xbf16, #tpu.memory_space<vmem>>, vector<8x648xbf16>,
    %c63 = arith.constant 63 : index
    %c0_479 = arith.constant 0 : index
    %c0_480 = arith.constant 0 : index
    %507 = vector.load %arg6[%c63, %c0_479, %c0_480] : memref<81x8x8xbf16, #tpu.memory_space<vmem>>, vector<1x8x8xbf16>
    %508 = vector.shape_cast %507 : vector<1x8x8xbf16> to vector<8x8xbf16>
    %c0_481 = arith.constant 0 : index
    %c0_482 = arith.constant 0 : index
    %509 = vector.load %arg14[%c0_481, %c0_482] : memref<8x686xbf16, #tpu.memory_space<vmem>>, vector<8x648xbf16>
    %cst_483 = arith.constant dense<0.000000e+00> : vector<8x648xf32>
    %510 = tpu.matmul %508, %509, %cst_483 {dimension_numbers = #tpu.dot_dimension_numbers<[1], [0], [0], [1], [0, 0, 1, 1], [], []>} : vector<8x8xbf16>, vector<8x648xbf16>, vector<8x648xf32> -> vector<8x648xf32>
    %c64 = arith.constant 64 : index
    %c0_484 = arith.constant 0 : index
    %c0_485 = arith.constant 0 : index
    %511 = vector.load %arg6[%c64, %c0_484, %c0_485] : memref<81x8x8xbf16, #tpu.memory_space<vmem>>, vector<1x8x8xbf16>
    %512 = vector.shape_cast %511 : vector<1x8x8xbf16> to vector<8x8xbf16>
    %c0_486 = arith.constant 0 : index
    %c1_487 = arith.constant 1 : index
    %513 = vector.load %arg14[%c0_486, %c1_487] : memref<8x686xbf16, #tpu.memory_space<vmem>>, vector<8x648xbf16>
    %cst_488 = arith.constant dense<0.000000e+00> : vector<8x648xf32>
    %514 = tpu.matmul %512, %513, %cst_488 {dimension_numbers = #tpu.dot_dimension_numbers<[1], [0], [0], [1], [0, 0, 1, 1], [], []>} : vector<8x8xbf16>, vector<8x648xbf16>, vector<8x648xf32> -> vector<8x648xf32>
    %515 = arith.addf %510, %514 : vector<8x648xf32>
    %c65 = arith.constant 65 : index
    %c0_489 = arith.constant 0 : index
    %c0_490 = arith.constant 0 : index
    %516 = vector.load %arg6[%c65, %c0_489, %c0_490] : memref<81x8x8xbf16, #tpu.memory_space<vmem>>, vector<1x8x8xbf16>
    %517 = vector.shape_cast %516 : vector<1x8x8xbf16> to vector<8x8xbf16>
    %c0_491 = arith.constant 0 : index
    %c2_492 = arith.constant 2 : index
    %518 = vector.load %arg14[%c0_491, %c2_492] : memref<8x686xbf16, #tpu.memory_space<vmem>>, vector<8x648xbf16>
    %cst_493 = arith.constant dense<0.000000e+00> : vector<8x648xf32>
    %519 = tpu.matmul %517, %518, %cst_493 {dimension_numbers = #tpu.dot_dimension_numbers<[1], [0], [0], [1], [0, 0, 1, 1], [], []>} : vector<8x8xbf16>, vector<8x648xbf16>, vector<8x648xf32> -> vector<8x648xf32>
    %520 = arith.addf %515, %519 : vector<8x648xf32>
    %c66 = arith.constant 66 : index
    %c0_494 = arith.constant 0 : index
    %c0_495 = arith.constant 0 : index
    %521 = vector.load %arg6[%c66, %c0_494, %c0_495] : memref<81x8x8xbf16, #tpu.memory_space<vmem>>, vector<1x8x8xbf16>
    %522 = vector.shape_cast %521 : vector<1x8x8xbf16> to vector<8x8xbf16>
    %c0_496 = arith.constant 0 : index
    %c18_497 = arith.constant 18 : index
    %523 = vector.load %arg14[%c0_496, %c18_497] : memref<8x686xbf16, #tpu.memory_space<vmem>>, vector<8x648xbf16>
    %cst_498 = arith.constant dense<0.000000e+00> : vector<8x648xf32>
    %524 = tpu.matmul %522, %523, %cst_498 {dimension_numbers = #tpu.dot_dimension_numbers<[1], [0], [0], [1], [0, 0, 1, 1], [], []>} : vector<8x8xbf16>, vector<8x648xbf16>, vector<8x648xf32> -> vector<8x648xf32>
    %525 = arith.addf %520, %524 : vector<8x648xf32>
    %c67 = arith.constant 67 : index
    %c0_499 = arith.constant 0 : index
    %c0_500 = arith.constant 0 : index
    %526 = vector.load %arg6[%c67, %c0_499, %c0_500] : memref<81x8x8xbf16, #tpu.memory_space<vmem>>, vector<1x8x8xbf16>
    %527 = vector.shape_cast %526 : vector<1x8x8xbf16> to vector<8x8xbf16>
    %c0_501 = arith.constant 0 : index
    %c19_502 = arith.constant 19 : index
    %528 = vector.load %arg14[%c0_501, %c19_502] : memref<8x686xbf16, #tpu.memory_space<vmem>>, vector<8x648xbf16>
    %cst_503 = arith.constant dense<0.000000e+00> : vector<8x648xf32>
    %529 = tpu.matmul %527, %528, %cst_503 {dimension_numbers = #tpu.dot_dimension_numbers<[1], [0], [0], [1], [0, 0, 1, 1], [], []>} : vector<8x8xbf16>, vector<8x648xbf16>, vector<8x648xf32> -> vector<8x648xf32>
    %530 = arith.addf %525, %529 : vector<8x648xf32>
    %c68 = arith.constant 68 : index
    %c0_504 = arith.constant 0 : index
    %c0_505 = arith.constant 0 : index
    %531 = vector.load %arg6[%c68, %c0_504, %c0_505] : memref<81x8x8xbf16, #tpu.memory_space<vmem>>, vector<1x8x8xbf16>
    %532 = vector.shape_cast %531 : vector<1x8x8xbf16> to vector<8x8xbf16>
    %c0_506 = arith.constant 0 : index
    %c20_507 = arith.constant 20 : index
    %533 = vector.load %arg14[%c0_506, %c20_507] : memref<8x686xbf16, #tpu.memory_space<vmem>>, vector<8x648xbf16>
    %cst_508 = arith.constant dense<0.000000e+00> : vector<8x648xf32>
    %534 = tpu.matmul %532, %533, %cst_508 {dimension_numbers = #tpu.dot_dimension_numbers<[1], [0], [0], [1], [0, 0, 1, 1], [], []>} : vector<8x8xbf16>, vector<8x648xbf16>, vector<8x648xf32> -> vector<8x648xf32>
    %535 = arith.addf %530, %534 : vector<8x648xf32>
    %c69 = arith.constant 69 : index
    %c0_509 = arith.constant 0 : index
    %c0_510 = arith.constant 0 : index
    %536 = vector.load %arg6[%c69, %c0_509, %c0_510] : memref<81x8x8xbf16, #tpu.memory_space<vmem>>, vector<1x8x8xbf16>
    %537 = vector.shape_cast %536 : vector<1x8x8xbf16> to vector<8x8xbf16>
    %c0_511 = arith.constant 0 : index
    %c36_512 = arith.constant 36 : index
    %538 = vector.load %arg14[%c0_511, %c36_512] : memref<8x686xbf16, #tpu.memory_space<vmem>>, vector<8x648xbf16>
    %cst_513 = arith.constant dense<0.000000e+00> : vector<8x648xf32>
    %539 = tpu.matmul %537, %538, %cst_513 {dimension_numbers = #tpu.dot_dimension_numbers<[1], [0], [0], [1], [0, 0, 1, 1], [], []>} : vector<8x8xbf16>, vector<8x648xbf16>, vector<8x648xf32> -> vector<8x648xf32>
    %540 = arith.addf %535, %539 : vector<8x648xf32>
    %c70 = arith.constant 70 : index
    %c0_514 = arith.constant 0 : index
    %c0_515 = arith.constant 0 : index
    %541 = vector.load %arg6[%c70, %c0_514, %c0_515] : memref<81x8x8xbf16, #tpu.memory_space<vmem>>, vector<1x8x8xbf16>
    %542 = vector.shape_cast %541 : vector<1x8x8xbf16> to vector<8x8xbf16>
    %c0_516 = arith.constant 0 : index
    %c37_517 = arith.constant 37 : index
    %543 = vector.load %arg14[%c0_516, %c37_517] : memref<8x686xbf16, #tpu.memory_space<vmem>>, vector<8x648xbf16>
    %cst_518 = arith.constant dense<0.000000e+00> : vector<8x648xf32>
    %544 = tpu.matmul %542, %543, %cst_518 {dimension_numbers = #tpu.dot_dimension_numbers<[1], [0], [0], [1], [0, 0, 1, 1], [], []>} : vector<8x8xbf16>, vector<8x648xbf16>, vector<8x648xf32> -> vector<8x648xf32>
    %545 = arith.addf %540, %544 : vector<8x648xf32>
    %c71 = arith.constant 71 : index
    %c0_519 = arith.constant 0 : index
    %c0_520 = arith.constant 0 : index
    %546 = vector.load %arg6[%c71, %c0_519, %c0_520] : memref<81x8x8xbf16, #tpu.memory_space<vmem>>, vector<1x8x8xbf16>
    %547 = vector.shape_cast %546 : vector<1x8x8xbf16> to vector<8x8xbf16>
    %c0_521 = arith.constant 0 : index
    %c38_522 = arith.constant 38 : index
    %548 = vector.load %arg14[%c0_521, %c38_522] : memref<8x686xbf16, #tpu.memory_space<vmem>>, vector<8x648xbf16>
    %cst_523 = arith.constant dense<0.000000e+00> : vector<8x648xf32>
    %549 = tpu.matmul %547, %548, %cst_523 {dimension_numbers = #tpu.dot_dimension_numbers<[1], [0], [0], [1], [0, 0, 1, 1], [], []>} : vector<8x8xbf16>, vector<8x648xbf16>, vector<8x648xf32> -> vector<8x648xf32>
    %550 = arith.addf %545, %549 : vector<8x648xf32>
    %c72 = arith.constant 72 : index
    %c0_524 = arith.constant 0 : index
    %c0_525 = arith.constant 0 : index
    %551 = vector.load %arg6[%c72, %c0_524, %c0_525] : memref<81x8x8xbf16, #tpu.memory_space<vmem>>, vector<1x8x8xbf16>
    %552 = vector.shape_cast %551 : vector<1x8x8xbf16> to vector<8x8xbf16>
    %c0_526 = arith.constant 0 : index
    %c0_527 = arith.constant 0 : index
    %553 = vector.load %arg12[%c0_526, %c0_527] : memref<8x686xbf16, #tpu.memory_space<vmem>>, vector<8x648xbf16>
    %cst_528 = arith.constant dense<0.000000e+00> : vector<8x648xf32>
    %554 = tpu.matmul %552, %553, %cst_528 {dimension_numbers = #tpu.dot_dimension_numbers<[1], [0], [0], [1], [0, 0, 1, 1], [], []>} : vector<8x8xbf16>, vector<8x648xbf16>, vector<8x648xf32> -> vector<8x648xf32>
    %c73 = arith.constant 73 : index
    %c0_529 = arith.constant 0 : index
    %c0_530 = arith.constant 0 : index
    %555 = vector.load %arg6[%c73, %c0_529, %c0_530] : memref<81x8x8xbf16, #tpu.memory_space<vmem>>, vector<1x8x8xbf16>
    %556 = vector.shape_cast %555 : vector<1x8x8xbf16> to vector<8x8xbf16>
    %c0_531 = arith.constant 0 : index
    %c1_532 = arith.constant 1 : index
    %557 = vector.load %arg12[%c0_531, %c1_532] : memref<8x686xbf16, #tpu.memory_space<vmem>>, vector<8x648xbf16>
    %cst_533 = arith.constant dense<0.000000e+00> : vector<8x648xf32>
    %558 = tpu.matmul %556, %557, %cst_533 {dimension_numbers = #tpu.dot_dimension_numbers<[1], [0], [0], [1], [0, 0, 1, 1], [], []>} : vector<8x8xbf16>, vector<8x648xbf16>, vector<8x648xf32> -> vector<8x648xf32>
    %559 = arith.addf %554, %558 : vector<8x648xf32>
    %c74 = arith.constant 74 : index
    %c0_534 = arith.constant 0 : index
    %c0_535 = arith.constant 0 : index
    %560 = vector.load %arg6[%c74, %c0_534, %c0_535] : memref<81x8x8xbf16, #tpu.memory_space<vmem>>, vector<1x8x8xbf16>
    %561 = vector.shape_cast %560 : vector<1x8x8xbf16> to vector<8x8xbf16>
    %c0_536 = arith.constant 0 : index
    %c2_537 = arith.constant 2 : index
    %562 = vector.load %arg12[%c0_536, %c2_537] : memref<8x686xbf16, #tpu.memory_space<vmem>>, vector<8x648xbf16>
    %cst_538 = arith.constant dense<0.000000e+00> : vector<8x648xf32>
    %563 = tpu.matmul %561, %562, %cst_538 {dimension_numbers = #tpu.dot_dimension_numbers<[1], [0], [0], [1], [0, 0, 1, 1], [], []>} : vector<8x8xbf16>, vector<8x648xbf16>, vector<8x648xf32> -> vector<8x648xf32>
    %564 = arith.addf %559, %563 : vector<8x648xf32>
    %c75 = arith.constant 75 : index
    %c0_539 = arith.constant 0 : index
    %c0_540 = arith.constant 0 : index
    %565 = vector.load %arg6[%c75, %c0_539, %c0_540] : memref<81x8x8xbf16, #tpu.memory_space<vmem>>, vector<1x8x8xbf16>
    %566 = vector.shape_cast %565 : vector<1x8x8xbf16> to vector<8x8xbf16>
    %c0_541 = arith.constant 0 : index
    %c18_542 = arith.constant 18 : index
    %567 = vector.load %arg12[%c0_541, %c18_542] : memref<8x686xbf16, #tpu.memory_space<vmem>>, vector<8x648xbf16>
    %cst_543 = arith.constant dense<0.000000e+00> : vector<8x648xf32>
    %568 = tpu.matmul %566, %567, %cst_543 {dimension_numbers = #tpu.dot_dimension_numbers<[1], [0], [0], [1], [0, 0, 1, 1], [], []>} : vector<8x8xbf16>, vector<8x648xbf16>, vector<8x648xf32> -> vector<8x648xf32>
    %569 = arith.addf %564, %568 : vector<8x648xf32>
    %c76 = arith.constant 76 : index
    %c0_544 = arith.constant 0 : index
    %c0_545 = arith.constant 0 : index
    %570 = vector.load %arg6[%c76, %c0_544, %c0_545] : memref<81x8x8xbf16, #tpu.memory_space<vmem>>, vector<1x8x8xbf16>
    %571 = vector.shape_cast %570 : vector<1x8x8xbf16> to vector<8x8xbf16>
    %c0_546 = arith.constant 0 : index
    %c19_547 = arith.constant 19 : index
    %572 = vector.load %arg12[%c0_546, %c19_547] : memref<8x686xbf16, #tpu.memory_space<vmem>>, vector<8x648xbf16>
    %cst_548 = arith.constant dense<0.000000e+00> : vector<8x648xf32>
    %573 = tpu.matmul %571, %572, %cst_548 {dimension_numbers = #tpu.dot_dimension_numbers<[1], [0], [0], [1], [0, 0, 1, 1], [], []>} : vector<8x8xbf16>, vector<8x648xbf16>, vector<8x648xf32> -> vector<8x648xf32>
    %574 = arith.addf %569, %573 : vector<8x648xf32>
    %c77 = arith.constant 77 : index
    %c0_549 = arith.constant 0 : index
    %c0_550 = arith.constant 0 : index
    %575 = vector.load %arg6[%c77, %c0_549, %c0_550] : memref<81x8x8xbf16, #tpu.memory_space<vmem>>, vector<1x8x8xbf16>
    %576 = vector.shape_cast %575 : vector<1x8x8xbf16> to vector<8x8xbf16>
    %c0_551 = arith.constant 0 : index
    %c20_552 = arith.constant 20 : index
    %577 = vector.load %arg12[%c0_551, %c20_552] : memref<8x686xbf16, #tpu.memory_space<vmem>>, vector<8x648xbf16>
    %cst_553 = arith.constant dense<0.000000e+00> : vector<8x648xf32>
    %578 = tpu.matmul %576, %577, %cst_553 {dimension_numbers = #tpu.dot_dimension_numbers<[1], [0], [0], [1], [0, 0, 1, 1], [], []>} : vector<8x8xbf16>, vector<8x648xbf16>, vector<8x648xf32> -> vector<8x648xf32>
    %579 = arith.addf %574, %578 : vector<8x648xf32>
    %c78 = arith.constant 78 : index
    %c0_554 = arith.constant 0 : index
    %c0_555 = arith.constant 0 : index
    %580 = vector.load %arg6[%c78, %c0_554, %c0_555] : memref<81x8x8xbf16, #tpu.memory_space<vmem>>, vector<1x8x8xbf16>
    %581 = vector.shape_cast %580 : vector<1x8x8xbf16> to vector<8x8xbf16>
    %c0_556 = arith.constant 0 : index
    %c36_557 = arith.constant 36 : index
    %582 = vector.load %arg12[%c0_556, %c36_557] : memref<8x686xbf16, #tpu.memory_space<vmem>>, vector<8x648xbf16>
    %cst_558 = arith.constant dense<0.000000e+00> : vector<8x648xf32>
    %583 = tpu.matmul %581, %582, %cst_558 {dimension_numbers = #tpu.dot_dimension_numbers<[1], [0], [0], [1], [0, 0, 1, 1], [], []>} : vector<8x8xbf16>, vector<8x648xbf16>, vector<8x648xf32> -> vector<8x648xf32>
    %584 = arith.addf %579, %583 : vector<8x648xf32>
    %c79 = arith.constant 79 : index
    %c0_559 = arith.constant 0 : index
    %c0_560 = arith.constant 0 : index
    %585 = vector.load %arg6[%c79, %c0_559, %c0_560] : memref<81x8x8xbf16, #tpu.memory_space<vmem>>, vector<1x8x8xbf16>
    %586 = vector.shape_cast %585 : vector<1x8x8xbf16> to vector<8x8xbf16>
    %c0_561 = arith.constant 0 : index
    %c37_562 = arith.constant 37 : index
    %587 = vector.load %arg12[%c0_561, %c37_562] : memref<8x686xbf16, #tpu.memory_space<vmem>>, vector<8x648xbf16>
    %cst_563 = arith.constant dense<0.000000e+00> : vector<8x648xf32>
    %588 = tpu.matmul %586, %587, %cst_563 {dimension_numbers = #tpu.dot_dimension_numbers<[1], [0], [0], [1], [0, 0, 1, 1], [], []>} : vector<8x8xbf16>, vector<8x648xbf16>, vector<8x648xf32> -> vector<8x648xf32>
    %589 = arith.addf %584, %588 : vector<8x648xf32>
    %c80 = arith.constant 80 : index
    %c0_564 = arith.constant 0 : index
    %c0_565 = arith.constant 0 : index
    %590 = vector.load %arg6[%c80, %c0_564, %c0_565] : memref<81x8x8xbf16, #tpu.memory_space<vmem>>, vector<1x8x8xbf16>
    %591 = vector.shape_cast %590 : vector<1x8x8xbf16> to vector<8x8xbf16>
    %c0_566 = arith.constant 0 : index
    %c38_567 = arith.constant 38 : index
    %592 = vector.load %arg12[%c0_566, %c38_567] : memref<8x686xbf16, #tpu.memory_space<vmem>>, vector<8x648xbf16>
    %cst_568 = arith.constant dense<0.000000e+00> : vector<8x648xf32>
    %593 = tpu.matmul %591, %592, %cst_568 {dimension_numbers = #tpu.dot_dimension_numbers<[1], [0], [0], [1], [0, 0, 1, 1], [], []>} : vector<8x8xbf16>, vector<8x648xbf16>, vector<8x648xf32> -> vector<8x648xf32>
    %594 = arith.addf %589, %593 : vector<8x648xf32>
    %595 = arith.addf %550, %594 : vector<8x648xf32>
    %cst_569 = arith.constant 0.000000e+00 : f32
    %596 = vector.broadcast %cst_569 : f32 to vector<8x648xf32>
    %597 = arith.maximumf %595, %596 : vector<8x648xf32>
    %c0_570 = arith.constant 0 : index
    %c0_571 = arith.constant 0 : index
    %c0_572 = arith.constant 0 : index
    %598 = vector.load %arg9[%c0_570, %c0_571, %c0_572] : memref<1x8x648xf32, #tpu.memory_space<vmem>>, vector<1x8x648xf32>
    %599 = vector.shape_cast %598 : vector<1x8x648xf32> to vector<8x648xf32>
    %600 = vector.shape_cast %597 : vector<8x648xf32> to vector<1x8x648xf32>
    tpu.vector_store %arg9[%c0_570, %c0_571, %c0_572], %600 {strides = array<i32>} : memref<1x8x648xf32, #tpu.memory_space<vmem>>, vector<1x8x648xf32>,
    return
  }
  func.func @transform_0(%arg0: i32) -> (i32, i32, i32) {
    %c0_i32 = arith.constant 0 : i32
    %c0_i32_0 = arith.constant 0 : i32
    %c0_i32_1 = arith.constant 0 : i32
    return %arg0, %c0_i32, %c0_i32_0 : i32, i32, i32
  }
  func.func @transform_1(%arg0: i32) -> (i32, i32, i32) {
    %c0_i32 = arith.constant 0 : i32
    %c0_i32_0 = arith.constant 0 : i32
    %c0_i32_1 = arith.constant 0 : i32
    return %arg0, %c0_i32, %c0_i32_0 : i32, i32, i32
  }
  func.func @transform_2(%arg0: i32) -> (i32, i32) {
    %c0_i32 = arith.constant 0 : i32
    %c0_i32_0 = arith.constant 0 : i32
    %c0_i32_1 = arith.constant 0 : i32
    return %c0_i32, %c0_i32_0 : i32, i32
  }
  func.func @transform_3(%arg0: i32) -> (i32, i32) {
    %c0_i32 = arith.constant 0 : i32
    %c0_i32_0 = arith.constant 0 : i32
    %c0_i32_1 = arith.constant 0 : i32
    return %c0_i32, %c0_i32_0 : i32, i32
  }
  func.func @transform_4(%arg0: i32) -> (i32, i32, i32) {
    %c0_i32 = arith.constant 0 : i32
    %c0_i32_0 = arith.constant 0 : i32
    %c0_i32_1 = arith.constant 0 : i32
    %c0_i32_2 = arith.constant 0 : i32
    return %c0_i32, %c0_i32_0, %c0_i32_1 : i32, i32, i32
  }
  func.func @transform_5(%arg0: i32) -> (i32, i32, i32) {
    %c0_i32 = arith.constant 0 : i32
    %c0_i32_0 = arith.constant 0 : i32
    %c0_i32_1 = arith.constant 0 : i32
    %c0_i32_2 = arith.constant 0 : i32
    return %c0_i32, %c0_i32_0, %c0_i32_1 : i32, i32, i32
  }
  func.func @transform_6(%arg0: i32) -> (i32, i32, i32) {
    %c0_i32 = arith.constant 0 : i32
    %c0_i32_0 = arith.constant 0 : i32
    %c0_i32_1 = arith.constant 0 : i32
    %c0_i32_2 = arith.constant 0 : i32
    return %c0_i32, %c0_i32_0, %c0_i32_1 : i32, i32, i32
  }
  func.func @transform_7(%arg0: i32) -> (i32, i32, i32) {
    %c0_i32 = arith.constant 0 : i32
    %c0_i32_0 = arith.constant 0 : i32
    %c0_i32_1 = arith.constant 0 : i32
    %c0_i32_2 = arith.constant 0 : i32
    return %c0_i32, %c0_i32_0, %c0_i32_1 : i32, i32, i32
  }
  func.func @transform_8(%arg0: i32) -> (i32, i32, i32) {
    %c0_i32 = arith.constant 0 : i32
    %c0_i32_0 = arith.constant 0 : i32
    %c0_i32_1 = arith.constant 0 : i32
    return %arg0, %c0_i32, %c0_i32_0 : i32, i32, i32
  }
}

</mosaic_0001>

<bundles_post_ra>
// kernel: tpu_custom_call.1
= control target key start
LH: loop header
LB: loop body
LE: loop exit
PB: predicated region body
PF: predicated region fallthrough
CT: control target
= control target key end

     0   :  { %s15783_s0 = inlined_call_operand.vmem [shape: f32[2,8,200], index: 0, kind: input, shape index: {}]   ;;  %s15784_s1 = inlined_call_operand.vmem [shape: f32[2,8,648], index: 1, kind: input, shape index: {}]   ;;  %s15785_s2 = inlined_call_operand.vmem [shape: f32[1,200], index: 2, kind: input, shape index: {}]   ;;  %s15786_s3 = inlined_call_operand.vmem [shape: f32[1,648], index: 3, kind: input, shape index: {}]   ;;  %s15787_s4 = inlined_call_operand.vmem [shape: bf16[4,100,324], index: 4, kind: input, shape index: {}]   ;;  %s15788_s5 = inlined_call_operand.vmem [shape: bf16[81,8,8], index: 5, kind: input, shape index: {}]   ;;  %s15789_s6 = inlined_call_operand.vmem [shape: bf16[8,8,8], index: 6, kind: input, shape index: {}]   ;;  %s15790_s7 = inlined_call_operand.vmem [shape: f32[8,8,1], index: 7, kind: input, shape index: {}]   ;;  %s15791_s8 = inlined_call_operand.hbm [shape: f32[2,8,648], index: 8, kind: output, shape index: {}]  }
   0x1   :  { %15820 = sst [smem:[#allocation10_spill]] %s15783_s0 }
   0x2   :  { %15821 = sst [smem:[#allocation11_spill]] %s15784_s1 }
   0x3   :  { %15822 = sst [smem:[#allocation12_spill]] %s15785_s2 }
   0x4   :  { %15823 = sst [smem:[#allocation13_spill]] %s15789_s6 }
   0x5   :  { %13 = vsyncpa [#allocation8], 0 }
   0x6   :  { %15 = vsyncpa [#allocation8 + $0x1], 0  ;;  %s12040_s27 = smov 0   ;;  %s12042_s28 = smov 0  }
   0x7   :  { %s12044_s29 = smov 0   ;;  %s12046_s30 = smov 0  }
   0x8 LB: > { %s12061_s9 = sadd.s32 4294967295, %s11975_s30   ;;  %s10445_s10 = sadd.s32 4294967294, %s11975_s30   ;;  %s11975_s30 = sphi %s12046_s30, %s15872_s30   ;;  %s11971_s29 = sphi %s12044_s29, %s15871_s29   ;;  %s11967_s28 = sphi %s12042_s28, %s15870_s28   ;;  %s11963_s27 = sphi %s12040_s27, %s15869_s27  }
   0x9   : > { %s12065_s11 = sadd.s32 1, %s11975_s30   ;;  %s206_s12 = sadd.s32 1, %s11971_s29 }
   0xa   : > { %s203_s13 = ssub.s32 %s11975_s30, %s12065_s11  ;;  %p216_p0 = scmp.ne.s32.totalorder %s11971_s29, %s11967_s28 }
   0xb   : > { %p204_p1 = scmp.eq.s32.totalorder %s203_s13, 0  ;;  %p217_p2 = scmp.eq.s32.totalorder %s12061_s9, 1 }
   0xc   : > { %p222_p3 = scmp.ne.s32.totalorder %s11967_s28, %s11963_s27  ;;  %p223_p4 = scmp.eq.s32.totalorder %s10445_s10, 1 }
   0xd   : > { %s12076_s14 = scalar_select %p204_p1, %s11971_s29, %s206_s12  }
   0xe   : > { %p12078_p5 = por %p217_p2, %p216_p0  ;;  %p12082_p6 = por %p223_p4, %p222_p3 }
   0xf   : > { %p10448_p7 = scmp.ge.s32.totalorder %s11975_s30, 1  ;;  %p275_p8 = scmp.lt.s32.totalorder %s11975_s30, 3 }
  0x11   : > { %p276_p9 = pnand %p10448_p7, %p275_p8 }
  0x12   : > { %p314_p10 = scmp.lt.s32.totalorder (!%p276_p9), %s12061_s9, 1  ;;  %s15826_s0 = sld [smem:[#allocation10_spill]] (!%p276_p9) }
  0x13   : > { %279 = sbr.rel (%p276_p9) target bundleno = 4401 (0x1131), region = 52  ;;  %s11978_s22 = smov (!%p276_p9), 11  }
  0x14   : > { %s15806_s23 = smov (!%p276_p9), 126   ;;  %s15808_s24 = smov (!%p276_p9), 127  }
  0x15   : > { %s15802_s25 = smov (!%p276_p9), 118   ;;  %s15798_s26 = smov (!%p276_p9), 117  }
  0x16   : > { %s15796_s10 = smov (!%p276_p9), 116   ;;  %s15800_s12 = smov (!%p276_p9), 108  }
  0x17   : > { %s15792_s13 = smov (!%p276_p9), 107   ;;  %s15829_s2 = sld [smem:[#allocation12_spill]] (!%p276_p9) }
  0x18   : > { %vm325_vm0 = vcmask 84992   ;;  %vm327_vm1 = vcmask 765592   ;;  %v11977_v0 = vmov 0   ;;  %s12093_s17 = scalar_select %p314_p10, %s12061_s9, 1  ;;  %vm351_vm2 = vcmask 1043544   ;;  %v757_v56 = vld [vmem:[%s15790_s7] sm:$0xff] }
  0x19   : > { %326 = vst.msk [vmem:[#allocation2] sm:$0xf] %vm325_vm0, %v11977_v0  ;;  %11904 = vset.pattern.permute.xlu2 %v11977_v0  ;;  %11905 = vset.pattern.permute.xlu0 %v11977_v0  ;;  %vm352_vm3 = vcmask 678916   ;;  %vm348_vm4 = vcmask 89088   ;;  %vm374_vm6 = vcmask 1043456   ;;  %vm370_vm7 = vcmask 64512  }
  0x1a   : > { %328 = vst.msk [vmem:[#allocation2 + $0x4] sm:$0xf] %vm327_vm1, %v11977_v0  ;;  %11906 = vset.pattern.permute.xlu1 %v11977_v0  ;;  %s11699_s18 = sshll.u32 %s12093_s17, 4  ;;  %vm12110_vm5 = vmor %vm352_vm3, %vm351_vm2  ;;  %v355_v15 = vld [vmem:[%s15788_s5] sm:$0xf]  ;;  %vm368_vm8 = vcmask 1039360  }
  0x1b   : > { %329 = vst.msk [vmem:[#allocation3] sm:$0xf] %vm325_vm0, %v11977_v0  ;;  %s318_s21 = scalar_lea.vmem %s15826_s0, %s11699_s18  ;;  %s15794_s18 = smov 106   ;;  %v10452_v24 = vld [vmem:[%s15788_s5 + $0x4] sm:$0xf]  ;;  %vm448_vm9 = vcmask 1031168  }
  0x1c   : > { %330 = vst.msk [vmem:[#allocation3 + $0x4] sm:$0xf] %vm327_vm1, %v11977_v0  ;;  %v12103_v1 = vld [vmem:[%s318_s21] sm:$0xff]  ;;  %v12105_v2 = vld [vmem:[%s318_s21 + $0x8] sm:$0xff]  ;;  %vm493_vm10 = vcmask 965632   ;;  %vm538_vm11 = vcmask 957440  }
  0x1d   : > { %v343_v3 = vpack.c.bf16 %v12105_v2, %v12103_v1  ;;  %v10460_v34 = vld [vmem:[%s15788_s5 + $0xc] sm:$0xf]  ;;  %v10457_v40 = vld [vmem:[%s15788_s5 + $0x8] sm:$0xf]  ;;  %vm583_vm12 = vcmask 949248   ;;  %vm15818_vm13 = vcmask 883712  }
  0x1e   : > { %v10466_v51 = vld [vmem:[%s15788_s5 + $0x14] sm:$0xf]  ;;  %vm673_vm14 = vcmask 875520   ;;  %v10463_v55 = vld [vmem:[%s15788_s5 + $0x10] sm:$0xf]  ;;  %vm718_vm15 = vcmask 867328  }
  0x1f   : > { %345 = vrot.lane.b32.xlu0 %v343_v3, %s11978_s22  ;;  %v10472_v62 = vld [vmem:[%s15788_s5 + $0x1c] sm:$0xf]  ;;  %v10469_v63 = vld [vmem:[%s15788_s5 + $0x18] sm:$0xf]  ;;  %v10475_v3 = vld [vmem:[%s15788_s5 + $0x20] sm:$0xf] }
  0x20   : > { %s15830_s21 = smov 116   ;;  %s15831_s19 = smov 106   ;;  %v10533_v5 = vld [vmem:[%s15790_s7 + $0x10] sm:$0xff]  ;;  %vm2055_vm0 = vcmask 1041408   ;;  %vm2051_vm1 = vcmask 818176   ;;  %vm331_vm2 = vcmask 150528  }
  0x21   : > { %s15836_s6 = sld [smem:[#allocation13_spill]]  ;;  %s11845_s20 = smul.u32 48, %s12093_s17  ;;  %vm2638_vm3 = vcmask 154624   ;;  %332 = vst.msk [vmem:[#allocation4] sm:$0xf] %vm331_vm2, %v11977_v0 }
  0x22   : > { %s15837_s1 = sld [smem:[#allocation11_spill]]  ;;  %s15804_s17 = smov 19   ;;  %335 = vst.msk [vmem:[#allocation5] sm:$0xf] %vm331_vm2, %v11977_v0 }
  0x23   : > { %337 = vst.msk [vmem:[#allocation6] sm:$0xf] %vm331_vm2, %v11977_v0  ;;  %s15810_s0 = smov 110   ;;  %vm4224_vm2 = vcmask 752640  }
  0x91   : > { %v346_v4 = vpop.permute.xlu0 %345 }
  0x92   : > { %v347_v6 = vrot.slane %v346_v4, 4 }
  0x94   : > { %v349_v7 = vsel %vm348_vm4, %v347_v6, %v346_v4 }
  0x95   : > { %354 = vst.msk [vmem:[#allocation2] sm:$0xff] %vm12110_vm5, %v349_v7 }
  0x9c   : > { %v356_v8 = vld [vmem:[#allocation2] sm:$0xff] }
  0x9d   : > { %v361_v9 = vunpack.c.h.b16 %v356_v8  ;;  %v360_v10 = vunpack.c.l.b16 %v356_v8 }
  0x9f   : > { %v363_v11 = vpack.c.b16 %v361_v9, %v361_v9  ;;  %v362_v12 = vpack.c.b16 %v360_v10, %v360_v10 }
  0xa1   : > { %446 = vrot.lane.b32.xlu2 %v363_v11, %s15806_s23  ;;  %366 = vrot.lane.b32.xlu1 %v363_v11, %s15808_s24  ;;  %v411_v13 = vsel %vm374_vm6, %v362_v12, 0  ;;  %v414_v14 = vsel %vm374_vm6, %v363_v11, 0 }
  0xa2   : > { %364 = vrot.lane.b32.xlu0 %v362_v12, %s15808_s24  ;;  %423 = vmatpush.bf16.msra.mxu2 %v411_v13 }
  0xa3   : > { %436 = vmatpush.bf16.msra.mxu3 %v414_v14 }
  0xa5   : > { %10455 = vmatmul.msk.bf16.vlgmr.msra.gmra.mxu2 %vm370_vm7, %v355_v15 }
  0xa6   : > { %10456 = vmatmul.msk.bf16.vlgmr.msra.gmra.mxu3 %vm370_vm7, %v355_v15 }
  0xa9   : > { %489 = vrot.lane.b32.xlu2 %v362_v12, %s15802_s25  ;;  %444 = vrot.lane.b32.xlu1 %v362_v12, %s15806_s23 }
  0xaa   : > { %491 = vrot.lane.b32.xlu0 %v363_v11, %s15802_s25 }
  0xb1   : > { %536 = vrot.lane.b32.xlu2 %v363_v11, %s15798_s26  ;;  %534 = vrot.lane.b32.xlu1 %v362_v12, %s15798_s26 }
  0xb2   : > { %579 = vrot.lane.b32.xlu0 %v362_v12, %s15796_s10 }
  0xb9   : > { %624 = vrot.lane.b32.xlu2 %v362_v12, %s15800_s12  ;;  %581 = vrot.lane.b32.xlu1 %v363_v11, %s15796_s10  ;;  %s15848_s10 = smov 19  }
  0xba   : > { %626 = vrot.lane.b32.xlu0 %v363_v11, %s15800_s12 }
  0xc1   : > { %671 = vrot.lane.b32.xlu2 %v363_v11, %s15792_s13  ;;  %669 = vrot.lane.b32.xlu1 %v362_v12, %s15792_s13  ;;  %s15832_s13 = smov 107  }
  0xc2   : > { %714 = vrot.lane.b32.xlu0 %v362_v12, %s15794_s18 }
  0xc9   : > { %716 = vrot.lane.b32.xlu1 %v363_v11, %s15794_s18  ;;  %760 = vperm.xlu2 %11904, %v757_v56   ;;  %s15812_s18 = smov 109  }
  0xfb   : > { %v447_v16 = vpop.permute.xlu2 %446 }
  0xfc   : > { %v457_v23 = vsel %vm374_vm6, %v447_v16, 0 }
 0x103   : > { %v490_v17 = vpop.permute.xlu2 %489 }
 0x10b   : > { %v537_v21 = vpop.permute.xlu2 %536 }
 0x10c   : > { %v547_v26 = vsel %vm374_vm6, %v537_v21, 0 }
 0x113   : > { %v367_v18 = vpop.permute.xlu1 %366  ;;  %v625_v35 = vpop.permute.xlu2 %624 }
 0x114   : > { %v365_v19 = vpop.permute.xlu0 %364  ;;  %v379_v20 = vsel %vm374_vm6, %v367_v18, 0 }
 0x115   : > { %401 = vmatpush.bf16.msra.mxu1 %v379_v20  ;;  %v369_v22 = vsel %vm368_vm8, %v365_v19, %v367_v18 }
 0x116   : > { %v376_v25 = vsel %vm374_vm6, %v369_v22, 0 }
 0x117   : > { %388 = vmatpush.bf16.msra.mxu0 %v376_v25 }
 0x118   : > { %10454 = vmatmul.msk.bf16.vlgmr.msra.gmra.mxu1 %vm370_vm7, %v10452_v24 }
 0x119   : > { %479 = vmatpush.bf16.msrb.mxu1 %v457_v23 }
 0x11a   : > { %10453 = vmatmul.msk.bf16.vlgmr.msra.gmra.mxu0 %vm370_vm7, %v10452_v24 }
 0x11b   : > { %v445_v27 = vpop.permute.xlu1 %444  ;;  %v672_v41 = vpop.permute.xlu2 %671 }
 0x11c   : > { %v492_v28 = vpop.permute.xlu0 %491  ;;  %v449_v29 = vsel %vm448_vm9, %v445_v27, %v447_v16  ;;  %v682_v50 = vsel %vm374_vm6, %v672_v41, 0 }
 0x11d   : > { %569 = vmatpush.bf16.msra.mxu1 %v547_v26  ;;  %v502_v30 = vsel %vm374_vm6, %v492_v28, 0  ;;  %v454_v31 = vsel %vm374_vm6, %v449_v29, 0  ;;  %v494_v32 = vsel %vm493_vm10, %v490_v17, %v492_v28 }
 0x11e   : > { %524 = vmatpush.bf16.msrb.mxu3 %v502_v30  ;;  %466 = vmatpush.bf16.msrb.mxu0 %v454_v31  ;;  %v499_v33 = vsel %vm374_vm6, %v494_v32, 0 }
 0x11f   : > { %511 = vmatpush.bf16.msrb.mxu2 %v499_v33 }
 0x121   : > { %10462 = vmatmul.msk.bf16.vlgmr.msrb.gmra.mxu3 %vm370_vm7, %v10460_v34 }
 0x122   : > { %10461 = vmatmul.msk.bf16.vlgmr.msrb.gmra.mxu2 %vm370_vm7, %v10460_v34 }
 0x123   : > { %v535_v36 = vpop.permute.xlu1 %534 }
 0x124   : > { %v539_v37 = vsel %vm538_vm11, %v535_v36, %v537_v21  ;;  %v580_v38 = vpop.permute.xlu0 %579 }
 0x125   : > { %v544_v39 = vsel %vm374_vm6, %v539_v37, 0 }
 0x126   : > { %556 = vmatpush.bf16.msra.mxu0 %v544_v39 }
 0x128   : > { %10459 = vmatmul.msk.bf16.vlgmr.msrb.gmra.mxu1 %vm370_vm7, %v10457_v40  ;;  %v425_v4 = vpop.f32.mrf.mxu2 }
 0x129   : > { %v438_v6 = vpop.f32.mrf.mxu3 }
 0x12a   : > { %10458 = vmatmul.msk.bf16.vlgmr.msrb.gmra.mxu0 %vm370_vm7, %v10457_v40 }
 0x12b   : > { %v582_v42 = vpop.permute.xlu1 %581 }
 0x12c   : > { %v584_v43 = vsel %vm583_vm12, %v580_v38, %v582_v42  ;;  %v627_v44 = vpop.permute.xlu0 %626  ;;  %v592_v45 = vsel %vm374_vm6, %v582_v42, 0 }
 0x12d   : > { %v629_v46 = vsel %vm15818_vm13, %v625_v35, %v627_v44  ;;  %614 = vmatpush.bf16.msra.mxu3 %v592_v45  ;;  %v637_v47 = vsel %vm374_vm6, %v627_v44, 0  ;;  %v589_v48 = vsel %vm374_vm6, %v584_v43, 0 }
 0x12e   : > { %659 = vmatpush.bf16.msrb.mxu1 %v637_v47  ;;  %601 = vmatpush.bf16.msra.mxu2 %v589_v48  ;;  %v634_v49 = vsel %vm374_vm6, %v629_v46, 0 }
 0x12f   : > { %646 = vmatpush.bf16.msrb.mxu0 %v634_v49 }
 0x130   : > { %v427_v8 = vpop.f32.mrf.mxu2 }
 0x131   : > { %704 = vmatpush.bf16.msrb.mxu3 %v682_v50  ;;  %v440_v7 = vpop.f32.mrf.mxu3 }
 0x132   : > { %10468 = vmatmul.msk.bf16.vlgmr.msra.gmra.mxu3 %vm370_vm7, %v10466_v51  ;;  %10467 = vmatmul.msk.bf16.vlgmr.msra.gmra.mxu2 %vm370_vm7, %v10466_v51  ;;  %v761_v51 = vpop.permute.xlu2 %760 }
 0x133   : > { %v670_v52 = vpop.permute.xlu1 %669 }
 0x134   : > { %v674_v53 = vsel %vm673_vm14, %v670_v52, %v672_v41  ;;  %v715_v57 = vpop.permute.xlu0 %714  ;;  %v12210_v52 = vld [vmem:[%s15829_s2] sm:$0x3] }
 0x135   : > { %v679_v54 = vsel %vm374_vm6, %v674_v53, 0 }
 0x136   : > { %691 = vmatpush.bf16.msrb.mxu2 %v679_v54 }
 0x138   : > { %10465 = vmatmul.msk.bf16.vlgmr.msra.gmra.mxu1 %vm370_vm7, %v10463_v55 }
 0x13a   : > { %10464 = vmatmul.msk.bf16.vlgmr.msra.gmra.mxu0 %vm370_vm7, %v10463_v55 }
 0x13b   : > { %v717_v58 = vpop.permute.xlu1 %716 }
 0x13c   : > { %v719_v59 = vsel %vm718_vm15, %v715_v57, %v717_v58  ;;  %v727_v60 = vsel %vm374_vm6, %v717_v58, 0  ;;  %v769_v58 = vperm.slane %v12210_v52, 1 }
 0x13d   : > { %749 = vmatpush.bf16.msra.mxu1 %v727_v60  ;;  %v724_v61 = vsel %vm374_vm6, %v719_v59, 0 }
 0x13e   : > { %736 = vmatpush.bf16.msra.mxu0 %v724_v61  ;;  %v768_v61 = vperm.slane %v12210_v52, 0 }
 0x142   : > { %10474 = vmatmul.msk.bf16.vlgmr.msrb.gmra.mxu3 %vm370_vm7, %v10472_v62  ;;  %10473 = vmatmul.msk.bf16.vlgmr.msrb.gmra.mxu2 %vm370_vm7, %v10472_v62 }
 0x148   : > { %10471 = vmatmul.msk.bf16.vlgmr.msrb.gmra.mxu1 %vm370_vm7, %v10469_v63 }
 0x14a   : > { %10470 = vmatmul.msk.bf16.vlgmr.msrb.gmra.mxu0 %vm370_vm7, %v10469_v63 }
 0x158   : > { %10477 = vmatmul.msk.bf16.vlgmr.msra.gmra.mxu1 %vm370_vm7, %v10475_v3 }
 0x15a   : > { %10476 = vmatmul.msk.bf16.vlgmr.msra.gmra.mxu0 %vm370_vm7, %v10475_v3 }
 0x195   : > { %v403_v9 = vpop.f32.mrf.mxu1 }
 0x196   : > { %v439_v29 = vadd.f32 %v438_v6, %v403_v9 }
 0x197   : > { %v390_v10 = vpop.f32.mrf.mxu0 }
 0x198   : > { %v426_v30 = vadd.f32 %v425_v4, %v390_v10 }
 0x19d   : > { %v405_v11 = vpop.f32.mrf.mxu1 }
 0x19f   : > { %v392_v12 = vpop.f32.mrf.mxu0 }
 0x1a4   : > { %v526_v13 = vpop.f32.mrf.mxu3 }
 0x1a5   : > { %v481_v14 = vpop.f32.mrf.mxu1  ;;  %v513_v15 = vpop.f32.mrf.mxu2 }
 0x1a6   : > { %v486_v31 = vadd.f32 %v481_v14, %v439_v29 }
 0x1a7   : > { %v468_v16 = vpop.f32.mrf.mxu0 }
 0x1a8   : > { %v485_v35 = vadd.f32 %v468_v16, %v426_v30  ;;  %v531_v37 = vadd.f32 %v526_v13, %v486_v31 }
 0x1aa   : > { %v530_v38 = vadd.f32 %v513_v15, %v485_v35 }
 0x1ac   : > { %v528_v17 = vpop.f32.mrf.mxu3 }
 0x1ad   : > { %v483_v18 = vpop.f32.mrf.mxu1  ;;  %v515_v19 = vpop.f32.mrf.mxu2 }
 0x1ae   : > { %v10505_v18 = vld [vmem:[%s15790_s7 + $0x8] sm:$0xff]  ;;  %v10478_v19 = vld [vmem:[%s15788_s5 + $0x24] sm:$0xf] }
 0x1af   : > { %v470_v20 = vpop.f32.mrf.mxu0 }
 0x1b5   : > { %v616_v21 = vpop.f32.mrf.mxu3  ;;  %v571_v22 = vpop.f32.mrf.mxu1 }
 0x1b6   : > { %v603_v23 = vpop.f32.mrf.mxu2  ;;  %v576_v39 = vadd.f32 %v571_v22, %v531_v37  ;;  %v10479_v22 = vld [vmem:[%s15788_s5 + $0x28] sm:$0xf] }
 0x1b7   : > { %v558_v24 = vpop.f32.mrf.mxu0 }
 0x1b8   : > { %v575_v40 = vadd.f32 %v558_v24, %v530_v38  ;;  %v621_v44 = vadd.f32 %v616_v21, %v576_v39  ;;  %v10484_v39 = vld [vmem:[%s15788_s5 + $0x2c] sm:$0xf] }
 0x1ba   : > { %v620_v46 = vadd.f32 %v603_v23, %v575_v40 }
 0x1bd   : > { %v618_v25 = vpop.f32.mrf.mxu3  ;;  %v573_v26 = vpop.f32.mrf.mxu1 }
 0x1be   : > { %v605_v27 = vpop.f32.mrf.mxu2  ;;  %v10487_v26 = vld [vmem:[%s15788_s5 + $0x30] sm:$0xf] }
 0x1bf   : > { %v560_v28 = vpop.f32.mrf.mxu0 }
 0x1c5   : > { %v706_v32 = vpop.f32.mrf.mxu3  ;;  %v661_v33 = vpop.f32.mrf.mxu1 }
 0x1c6   : > { %v693_v34 = vpop.f32.mrf.mxu2  ;;  %v666_v47 = vadd.f32 %v661_v33, %v621_v44 }
 0x1c7   : > { %v648_v36 = vpop.f32.mrf.mxu0 }
 0x1c8   : > { %v665_v48 = vadd.f32 %v648_v36, %v620_v46  ;;  %v711_v49 = vadd.f32 %v706_v32, %v666_v47 }
 0x1ca   : > { %v710_v53 = vadd.f32 %v693_v34, %v665_v48 }
 0x1cd   : > { %v708_v41 = vpop.f32.mrf.mxu3  ;;  %v663_v42 = vpop.f32.mrf.mxu1 }
 0x1ce   : > { %v695_v43 = vpop.f32.mrf.mxu2 }
 0x1cf   : > { %v650_v45 = vpop.f32.mrf.mxu0 }
 0x1d5   : > { %v751_v50 = vpop.f32.mrf.mxu1 }
 0x1d6   : > { %v756_v54 = vadd.f32 %v751_v50, %v711_v49 }
 0x1d7   : > { %v738_v55 = vpop.f32.mrf.mxu0 }
 0x1d8   : > { %v755_v56 = vadd.f32 %v738_v55, %v710_v53  ;;  %v764_v57 = vadd.f32 %v761_v51, %v756_v54  ;;  %v10493_v53 = vld [vmem:[%s15788_s5 + $0x38] sm:$0xf] }
 0x1da   : > { %v763_v59 = vadd.f32 %v761_v51, %v755_v56  ;;  %v766_v60 = vmax.f32 %v764_v57, 0.0  ;;  %v10490_v56 = vld [vmem:[%s15788_s5 + $0x34] sm:$0xf] }
 0x1dc   : > { %v765_v62 = vmax.f32 %v763_v59, 0.0  ;;  %v773_v63 = vmul.f32 %v769_v58, %v766_v60 }
 0x1dd   : > { %v753_v3 = vpop.f32.mrf.mxu1 }
 0x1de   : > { %v772_v4 = vmul.f32 %v768_v61, %v765_v62 }
 0x1df   : > { %v740_v6 = vpop.f32.mrf.mxu0 }
 0x1e0   : > { %v774_v7 = vpack.c.bf16 %v773_v63, %v772_v4 }
 0x1e2   : > { %776 = vrot.lane.b32.xlu0 %v774_v7, %s11978_s22 }
 0x254   : > { %v777_v8 = vpop.permute.xlu0 %776 }
 0x255   : > { %v778_v9 = vrot.slane %v777_v8, 4 }
 0x257   : > { %v779_v10 = vsel %vm348_vm4, %v778_v9, %v777_v8  ;;  %v10496_v8 = vld [vmem:[%s15788_s5 + $0x3c] sm:$0xf]  ;;  %v10499_v9 = vld [vmem:[%s15788_s5 + $0x40] sm:$0xf] }
 0x258   : > { %781 = vst.msk [vmem:[#allocation3] sm:$0xff] %vm12110_vm5, %v779_v10  ;;  %v10502_v10 = vld [vmem:[%s15788_s5 + $0x44] sm:$0xf] }
 0x25f   : > { %v784_v11 = vld [vmem:[#allocation3] sm:$0xff] }
 0x260   : > { %v789_v12 = vunpack.c.h.b16 %v784_v11  ;;  %v788_v13 = vunpack.c.l.b16 %v784_v11 }
 0x262   : > { %v791_v14 = vpack.c.b16 %v789_v12, %v789_v12  ;;  %v790_v15 = vpack.c.b16 %v788_v13, %v788_v13 }
 0x264   : > { %794 = vrot.lane.b32.xlu2 %v791_v14, %s15808_s24  ;;  %869 = vrot.lane.b32.xlu0 %v790_v15, %s15806_s23  ;;  %v836_v16 = vsel %vm374_vm6, %v790_v15, 0  ;;  %v839_v17 = vsel %vm374_vm6, %v791_v14, 0 }
 0x265   : > { %792 = vrot.lane.b32.xlu1 %v790_v15, %s15808_s24  ;;  %848 = vmatpush.bf16.msrb.mxu0 %v836_v16 }
 0x266   : > { %861 = vmatpush.bf16.msrb.mxu1 %v839_v17 }
 0x268   : > { %10482 = vmatmul.msk.bf16.vlgmr.msrb.gmra.mxu0 %vm370_vm7, %v10478_v19 }
 0x269   : > { %10483 = vmatmul.msk.bf16.vlgmr.msrb.gmra.mxu1 %vm370_vm7, %v10478_v19 }
 0x26c   : > { %957 = vrot.lane.b32.xlu2 %v790_v15, %s15798_s26  ;;  %959 = vrot.lane.b32.xlu0 %v791_v14, %s15798_s26  ;;  %s15846_s26 = smov 92  }
 0x26d   : > { %871 = vrot.lane.b32.xlu1 %v791_v14, %s15806_s23 }
 0x274   : > { %915 = vrot.lane.b32.xlu2 %v791_v14, %s15802_s25  ;;  %1045 = vrot.lane.b32.xlu0 %v790_v15, %s15800_s12 }
 0x275   : > { %913 = vrot.lane.b32.xlu1 %v790_v15, %s15802_s25  ;;  %s15834_s25 = smov 117  }
 0x27c   : > { %1001 = vrot.lane.b32.xlu2 %v790_v15, %s15830_s21  ;;  %1003 = vrot.lane.b32.xlu0 %v791_v14, %s15830_s21 }
 0x27d   : > { %1047 = vrot.lane.b32.xlu1 %v791_v14, %s15800_s12  ;;  %s15835_s12 = smov 108  }
 0x284   : > { %1135 = vrot.lane.b32.xlu2 %v791_v14, %s15831_s19  ;;  %1089 = vrot.lane.b32.xlu0 %v790_v15, %s15832_s13 }
 0x285   : > { %1133 = vrot.lane.b32.xlu1 %v790_v15, %s15831_s19 }
 0x28c   : > { %1179 = vperm.xlu2 %11904, %v10505_v18  }
 0x28d   : > { %1091 = vrot.lane.b32.xlu1 %v791_v14, %s15832_s13 }
 0x2be   : > { %v795_v20 = vpop.permute.xlu2 %794 }
 0x2bf   : > { %v804_v21 = vsel %vm374_vm6, %v795_v20, 0 }
 0x2c0   : > { %826 = vmatpush.bf16.msra.mxu3 %v804_v21 }
 0x2c3   : > { %10481 = vmatmul.msk.bf16.vlgmr.msra.gmra.mxu3 %vm370_vm7, %v10479_v22 }
 0x2c6   : > { %v958_v23 = vpop.permute.xlu2 %957 }
 0x2ce   : > { %v916_v24 = vpop.permute.xlu2 %915 }
 0x2cf   : > { %v925_v25 = vsel %vm374_vm6, %v916_v24, 0 }
 0x2d0   : > { %947 = vmatpush.bf16.msra.mxu1 %v925_v25 }
 0x2d3   : > { %10489 = vmatmul.msk.bf16.vlgmr.msra.gmra.mxu1 %vm370_vm7, %v10487_v26 }
 0x2d6   : > { %v870_v27 = vpop.permute.xlu0 %869  ;;  %v1002_v41 = vpop.permute.xlu2 %1001 }
 0x2d7   : > { %v793_v28 = vpop.permute.xlu1 %792 }
 0x2d8   : > { %v796_v29 = vsel %vm368_vm8, %v793_v28, %v795_v20 }
 0x2d9   : > { %v801_v30 = vsel %vm374_vm6, %v796_v29, 0 }
 0x2da   : > { %813 = vmatpush.bf16.msra.mxu2 %v801_v30 }
 0x2dd   : > { %10480 = vmatmul.msk.bf16.vlgmr.msra.gmra.mxu2 %vm370_vm7, %v10479_v22 }
 0x2de   : > { %v960_v31 = vpop.permute.xlu0 %959  ;;  %v1136_v54 = vpop.permute.xlu2 %1135 }
 0x2df   : > { %v961_v32 = vsel %vm538_vm11, %v958_v23, %v960_v31  ;;  %v872_v33 = vpop.permute.xlu1 %871  ;;  %v969_v34 = vsel %vm374_vm6, %v960_v31, 0  ;;  %v1145_v57 = vsel %vm374_vm6, %v1136_v54, 0 }
 0x2e0   : > { %v873_v35 = vsel %vm448_vm9, %v870_v27, %v872_v33  ;;  %v881_v36 = vsel %vm374_vm6, %v872_v33, 0  ;;  %v966_v37 = vsel %vm374_vm6, %v961_v32, 0 }
 0x2e1   : > { %903 = vmatpush.bf16.msrb.mxu3 %v881_v36  ;;  %v878_v38 = vsel %vm374_vm6, %v873_v35, 0 }
 0x2e2   : > { %890 = vmatpush.bf16.msrb.mxu2 %v878_v38 }
 0x2e4   : > { %10486 = vmatmul.msk.bf16.vlgmr.msrb.gmra.mxu3 %vm370_vm7, %v10484_v39 }
 0x2e5   : > { %991 = vmatpush.bf16.msra.mxu3 %v969_v34  ;;  %v850_v12 = vpop.f32.mrf.mxu0 }
 0x2e6   : > { %978 = vmatpush.bf16.msra.mxu2 %v966_v37  ;;  %v1046_v40 = vpop.permute.xlu0 %1045  ;;  %v863_v11 = vpop.f32.mrf.mxu1 }
 0x2e7   : > { %v914_v42 = vpop.permute.xlu1 %913 }
 0x2e8   : > { %v917_v43 = vsel %vm493_vm10, %v914_v42, %v916_v24 }
 0x2e9   : > { %v922_v44 = vsel %vm374_vm6, %v917_v43, 0 }
 0x2ea   : > { %934 = vmatpush.bf16.msra.mxu0 %v922_v44 }
 0x2ed   : > { %10485 = vmatmul.msk.bf16.vlgmr.msrb.gmra.mxu2 %vm370_vm7, %v10484_v39  ;;  %10488 = vmatmul.msk.bf16.vlgmr.msra.gmra.mxu0 %vm370_vm7, %v10487_v26  ;;  %v852_v16 = vpop.f32.mrf.mxu0 }
 0x2ee   : > { %v1004_v45 = vpop.permute.xlu0 %1003  ;;  %v865_v13 = vpop.f32.mrf.mxu1 }
 0x2ef   : > { %v1005_v46 = vsel %vm583_vm12, %v1002_v41, %v1004_v45  ;;  %v1048_v47 = vpop.permute.xlu1 %1047  ;;  %v1013_v48 = vsel %vm374_vm6, %v1004_v45, 0 }
 0x2f0   : > { %v1049_v49 = vsel %vm15818_vm13, %v1046_v40, %v1048_v47  ;;  %1035 = vmatpush.bf16.msrb.mxu1 %v1013_v48  ;;  %v1057_v50 = vsel %vm374_vm6, %v1048_v47, 0  ;;  %v1010_v51 = vsel %vm374_vm6, %v1005_v46, 0 }
 0x2f1   : > { %1079 = vmatpush.bf16.msrb.mxu3 %v1057_v50  ;;  %1022 = vmatpush.bf16.msrb.mxu0 %v1010_v51  ;;  %v1054_v55 = vsel %vm374_vm6, %v1049_v49, 0 }
 0x2f2   : > { %1066 = vmatpush.bf16.msrb.mxu2 %v1054_v55 }
 0x2f3   : > { %10495 = vmatmul.msk.bf16.vlgmr.msrb.gmra.mxu1 %vm370_vm7, %v10493_v53 }
 0x2f4   : > { %10492 = vmatmul.msk.bf16.vlgmr.msra.gmra.mxu3 %vm370_vm7, %v10490_v56 }
 0x2f5   : > { %1167 = vmatpush.bf16.msra.mxu3 %v1145_v57 }
 0x2f6   : > { %v1090_v63 = vpop.permute.xlu0 %1089 }
 0x2f7   : > { %v1134_v59 = vpop.permute.xlu1 %1133 }
 0x2f8   : > { %v1137_v60 = vsel %vm718_vm15, %v1134_v59, %v1136_v54 }
 0x2f9   : > { %v1142_v62 = vsel %vm374_vm6, %v1137_v60, 0  ;;  %v1180_v60 = vpop.permute.xlu2 %1179 }
 0x2fd   : > { %10491 = vmatmul.msk.bf16.vlgmr.msra.gmra.mxu2 %vm370_vm7, %v10490_v56  ;;  %10494 = vmatmul.msk.bf16.vlgmr.msrb.gmra.mxu0 %vm370_vm7, %v10493_v53 }
 0x2fe   : > { %1154 = vmatpush.bf16.msra.mxu2 %v1142_v62 }
 0x2ff   : > { %v1092_v3 = vpop.permute.xlu1 %1091 }
 0x300   : > { %v1093_v4 = vsel %vm673_vm14, %v1090_v63, %v1092_v3  ;;  %v1101_v6 = vsel %vm374_vm6, %v1092_v3, 0 }
 0x301   : > { %1123 = vmatpush.bf16.msra.mxu1 %v1101_v6  ;;  %v1098_v7 = vsel %vm374_vm6, %v1093_v4, 0 }
 0x302   : > { %1110 = vmatpush.bf16.msra.mxu0 %v1098_v7 }
 0x304   : > { %10498 = vmatmul.msk.bf16.vlgmr.msrb.gmra.mxu3 %vm370_vm7, %v10496_v8  ;;  %10501 = vmatmul.msk.bf16.vlgmr.msra.gmra.mxu1 %vm370_vm7, %v10499_v9 }
 0x30d   : > { %10497 = vmatmul.msk.bf16.vlgmr.msrb.gmra.mxu2 %vm370_vm7, %v10496_v8  ;;  %10500 = vmatmul.msk.bf16.vlgmr.msra.gmra.mxu0 %vm370_vm7, %v10499_v9 }
 0x314   : > { %10504 = vmatmul.msk.bf16.vlgmr.msra.gmra.mxu3 %vm370_vm7, %v10502_v10 }
 0x31d   : > { %10503 = vmatmul.msk.bf16.vlgmr.msra.gmra.mxu2 %vm370_vm7, %v10502_v10 }
 0x346   : > { %v828_v14 = vpop.f32.mrf.mxu3 }
 0x347   : > { %v864_v15 = vadd.f32 %v863_v11, %v828_v14 }
 0x34e   : > { %v830_v17 = vpop.f32.mrf.mxu3 }
 0x350   : > { %v949_v18 = vpop.f32.mrf.mxu1 }
 0x358   : > { %v951_v19 = vpop.f32.mrf.mxu1 }
 0x360   : > { %v815_v20 = vpop.f32.mrf.mxu2 }
 0x361   : > { %v851_v42 = vadd.f32 %v850_v12, %v815_v20 }
 0x367   : > { %v905_v21 = vpop.f32.mrf.mxu3 }
 0x368   : > { %v910_v22 = vadd.f32 %v905_v21, %v864_v15  ;;  %v817_v23 = vpop.f32.mrf.mxu2  ;;  %v10506_v21 = vld [vmem:[%s15788_s5 + $0x48] sm:$0xf] }
 0x36a   : > { %v954_v24 = vadd.f32 %v949_v18, %v910_v22  ;;  %v936_v25 = vpop.f32.mrf.mxu0 }
 0x36f   : > { %v907_v26 = vpop.f32.mrf.mxu3 }
 0x370   : > { %v892_v27 = vpop.f32.mrf.mxu2  ;;  %v1037_v28 = vpop.f32.mrf.mxu1 }
 0x371   : > { %v909_v44 = vadd.f32 %v892_v27, %v851_v42 }
 0x372   : > { %v938_v29 = vpop.f32.mrf.mxu0 }
 0x373   : > { %v953_v49 = vadd.f32 %v936_v25, %v909_v44 }
 0x377   : > { %v993_v30 = vpop.f32.mrf.mxu3 }
 0x378   : > { %v894_v31 = vpop.f32.mrf.mxu2  ;;  %v1039_v32 = vpop.f32.mrf.mxu1  ;;  %v998_v43 = vadd.f32 %v993_v30, %v954_v24  ;;  %v10507_v24 = vld [vmem:[%s15788_s5 + $0x4c] sm:$0xf] }
 0x37a   : > { %v1024_v33 = vpop.f32.mrf.mxu0  ;;  %v1042_v47 = vadd.f32 %v1037_v28, %v998_v43 }
 0x37f   : > { %v995_v34 = vpop.f32.mrf.mxu3 }
 0x380   : > { %v980_v35 = vpop.f32.mrf.mxu2 }
 0x381   : > { %v1125_v36 = vpop.f32.mrf.mxu1  ;;  %v997_v51 = vadd.f32 %v980_v35, %v953_v49 }
 0x382   : > { %v1026_v37 = vpop.f32.mrf.mxu0 }
 0x383   : > { %v1041_v56 = vadd.f32 %v1024_v33, %v997_v51 }
 0x387   : > { %v1081_v38 = vpop.f32.mrf.mxu3 }
 0x388   : > { %v982_v39 = vpop.f32.mrf.mxu2  ;;  %v1086_v50 = vadd.f32 %v1081_v38, %v1042_v47  ;;  %v10515_v38 = vld [vmem:[%s15788_s5 + $0x54] sm:$0xf] }
 0x389   : > { %v1127_v40 = vpop.f32.mrf.mxu1 }
 0x38a   : > { %v1112_v41 = vpop.f32.mrf.mxu0  ;;  %v1130_v53 = vadd.f32 %v1125_v36, %v1086_v50 }
 0x38f   : > { %v1083_v45 = vpop.f32.mrf.mxu3 }
 0x390   : > { %v1068_v46 = vpop.f32.mrf.mxu2 }
 0x391   : > { %v1085_v59 = vadd.f32 %v1068_v46, %v1041_v56 }
 0x392   : > { %v1114_v48 = vpop.f32.mrf.mxu0 }
 0x393   : > { %v1129_v63 = vadd.f32 %v1112_v41, %v1085_v59  ;;  %v10512_v41 = vld [vmem:[%s15788_s5 + $0x50] sm:$0xf] }
 0x397   : > { %v1169_v54 = vpop.f32.mrf.mxu3 }
 0x398   : > { %v1070_v55 = vpop.f32.mrf.mxu2  ;;  %v1174_v57 = vadd.f32 %v1169_v54, %v1130_v53 }
 0x39a   : > { %v1183_v62 = vadd.f32 %v1180_v60, %v1174_v57 }
 0x39c   : > { %v1185_v6 = vadd.f32 %v1183_v62, %v12105_v2  ;;  %v10518_v62 = vld [vmem:[%s15788_s5 + $0x58] sm:$0xf] }
 0x39e   : > { %v1187_v9 = vmax.f32 %v1185_v6, 0.0 }
 0x39f   : > { %v1171_v3 = vpop.f32.mrf.mxu3 }
 0x3a0   : > { %v1156_v4 = vpop.f32.mrf.mxu2  ;;  %v1189_v14 = vmul.f32 %v1187_v9, %v769_v58 }
 0x3a1   : > { %v1173_v7 = vadd.f32 %v1156_v4, %v1129_v63  ;;  %v10521_v63 = vld [vmem:[%s15788_s5 + $0x5c] sm:$0xf] }
 0x3a3   : > { %v1182_v8 = vadd.f32 %v1180_v60, %v1173_v7 }
 0x3a5   : > { %v1184_v10 = vadd.f32 %v1182_v8, %v12103_v1 }
 0x3a7   : > { %v1186_v11 = vmax.f32 %v1184_v10, 0.0 }
 0x3a8   : > { %v1158_v12 = vpop.f32.mrf.mxu2 }
 0x3a9   : > { %v1188_v13 = vmul.f32 %v1186_v11, %v768_v61 }
 0x3ab   : > { %v12318_v15 = vpack.c.bf16 %v1189_v14, %v1188_v13 }
 0x3ad   : > { %1192 = vrot.lane.b32.xlu0 %v12318_v15, %s11978_s22  ;;  %s15833_s22 = smov 118   ;;  %v1608_v47 = vunpack.c.h.b16 %v12318_v15  ;;  %v1607_v3 = vunpack.c.l.b16 %v12318_v15 }
 0x3af   : > { %v1610_v57 = vpack.c.b16 %v1608_v47, %v1608_v47  ;;  %v1609_v6 = vpack.c.b16 %v1607_v3, %v1607_v3 }
 0x3b1   : > { %v1618_v4 = vsel %vm374_vm6, %v1610_v57, 0  ;;  %v1615_v10 = vsel %vm374_vm6, %v1609_v6, 0 }
 0x41f   : > { %v1193_v16 = vpop.permute.xlu0 %1192 }
 0x420   : > { %v1194_v2 = vrot.slane %v1193_v16, 4 }
 0x422   : > { %v1195_v17 = vsel %vm348_vm4, %v1194_v2, %v1193_v16  ;;  %v10524_v16 = vld [vmem:[%s15788_s5 + $0x60] sm:$0xf]  ;;  %v10527_v2 = vld [vmem:[%s15788_s5 + $0x64] sm:$0xf]  ;;  %vm2643_vm4 = vcmask 1043608  }
 0x423   : > { %1197 = vst.msk [vmem:[#allocation2] sm:$0xff] %vm12110_vm5, %v1195_v17  ;;  %v10530_v17 = vld [vmem:[%s15788_s5 + $0x68] sm:$0xf]  ;;  %vm2644_vm5 = vcmask 1047556  }
 0x42a   : > { %v1200_v1 = vld [vmem:[#allocation2] sm:$0xff] }
 0x42b   : > { %v1205_v18 = vunpack.c.h.b16 %v1200_v1  ;;  %v1204_v19 = vunpack.c.l.b16 %v1200_v1  ;;  %v10534_v1 = vld [vmem:[%s15836_s6 + $0x10] sm:$0xf] }
 0x42d   : > { %v1207_v20 = vpack.c.b16 %v1205_v18, %v1205_v18  ;;  %v1206_v61 = vpack.c.b16 %v1204_v19, %v1204_v19  ;;  %v10541_v18 = vld [vmem:[%s15836_s6 + $0x14] sm:$0xf] }
 0x42f   : > { %1210 = vrot.lane.b32.xlu2 %v1207_v20, %s15808_s24  ;;  %1285 = vrot.lane.b32.xlu0 %v1206_v61, %s15806_s23  ;;  %v1252_v52 = vsel %vm374_vm6, %v1206_v61, 0  ;;  %v1255_v58 = vsel %vm374_vm6, %v1207_v20, 0 }
 0x430   : > { %1208 = vrot.lane.b32.xlu1 %v1206_v61, %s15808_s24  ;;  %1264 = vmatpush.bf16.msrb.mxu2 %v1252_v52  ;;  %s15847_s24 = smov 91  }
 0x431   : > { %1277 = vmatpush.bf16.msrb.mxu3 %v1255_v58 }
 0x433   : > { %10510 = vmatmul.msk.bf16.vlgmr.msrb.gmra.mxu2 %vm370_vm7, %v10506_v21 }
 0x434   : > { %10511 = vmatmul.msk.bf16.vlgmr.msrb.gmra.mxu3 %vm370_vm7, %v10506_v21 }
 0x437   : > { %1329 = vrot.lane.b32.xlu2 %v1206_v61, %s15833_s22  ;;  %1331 = vrot.lane.b32.xlu0 %v1207_v20, %s15833_s22  ;;  %s11993_s22 = smov 90  }
 0x438   : > { %1287 = vrot.lane.b32.xlu1 %v1207_v20, %s15806_s23  ;;  %s15845_s23 = smov 109  }
 0x43f   : > { %1375 = vrot.lane.b32.xlu2 %v1207_v20, %s15834_s25  ;;  %1417 = vrot.lane.b32.xlu0 %v1206_v61, %s15830_s21 }
 0x440   : > { %1373 = vrot.lane.b32.xlu1 %v1206_v61, %s15834_s25  ;;  %s12453_s25 = scalar_lea.vmem %s15837_s1, %s11845_s20  ;;  %s15814_s1 = smov 92  }
 0x447   : > { %1461 = vrot.lane.b32.xlu2 %v1206_v61, %s15835_s12  ;;  %1463 = vrot.lane.b32.xlu0 %v1207_v20, %s15835_s12 }
 0x448   : > { %1419 = vrot.lane.b32.xlu1 %v1207_v20, %s15830_s21  ;;  %s11988_s21 = smov 28  }
 0x44f   : > { %1507 = vrot.lane.b32.xlu2 %v1207_v20, %s15832_s13  ;;  %1549 = vrot.lane.b32.xlu0 %v1206_v61, %s15831_s19 }
 0x450   : > { %1505 = vrot.lane.b32.xlu1 %v1206_v61, %s15832_s13 }
 0x457   : > { %1595 = vperm.xlu2 %11904, %v10533_v5  }
 0x458   : > { %1551 = vrot.lane.b32.xlu1 %v1207_v20, %s15831_s19  ;;  %s15844_s19 = smov 110  }
 0x489   : > { %v1211_v22 = vpop.permute.xlu2 %1210 }
 0x48a   : > { %v1220_v23 = vsel %vm374_vm6, %v1211_v22, 0 }
 0x48b   : > { %1242 = vmatpush.bf16.msrb.mxu1 %v1220_v23 }
 0x48e   : > { %10509 = vmatmul.msk.bf16.vlgmr.msrb.gmra.mxu1 %vm370_vm7, %v10507_v24 }
 0x491   : > { %v1330_v25 = vpop.permute.xlu2 %1329 }
 0x499   : > { %v1376_v30 = vpop.permute.xlu2 %1375 }
 0x49a   : > { %v1385_v40 = vsel %vm374_vm6, %v1376_v30, 0 }
 0x4a1   : > { %v1286_v26 = vpop.permute.xlu0 %1285  ;;  %v1462_v42 = vpop.permute.xlu2 %1461 }
 0x4a2   : > { %v1209_v27 = vpop.permute.xlu1 %1208 }
 0x4a3   : > { %v1212_v28 = vsel %vm368_vm8, %v1209_v27, %v1211_v22 }
 0x4a4   : > { %v1217_v29 = vsel %vm374_vm6, %v1212_v28, 0 }
 0x4a5   : > { %1229 = vmatpush.bf16.msrb.mxu0 %v1217_v29 }
 0x4a8   : > { %10508 = vmatmul.msk.bf16.vlgmr.msrb.gmra.mxu0 %vm370_vm7, %v10507_v24 }
 0x4a9   : > { %v1332_v31 = vpop.permute.xlu0 %1331  ;;  %v1508_v48 = vpop.permute.xlu2 %1507 }
 0x4aa   : > { %v1333_v32 = vsel %vm493_vm10, %v1330_v25, %v1332_v31  ;;  %v1288_v33 = vpop.permute.xlu1 %1287  ;;  %v1341_v34 = vsel %vm374_vm6, %v1332_v31, 0  ;;  %v1517_v60 = vsel %vm374_vm6, %v1508_v48, 0  ;;  %vm12834_vm10 = vmor %vm2644_vm5, %vm2643_vm4  ;;  %vm4349_vm4 = vcmask 744448  }
 0x4ab   : > { %v1289_v35 = vsel %vm448_vm9, %v1286_v26, %v1288_v33  ;;  %v1297_v36 = vsel %vm374_vm6, %v1288_v33, 0  ;;  %1363 = vmatpush.bf16.msra.mxu3 %v1341_v34  ;;  %v1338_v37 = vsel %vm374_vm6, %v1333_v32, 0 }
 0x4ac   : > { %1319 = vmatpush.bf16.msra.mxu1 %v1297_v36  ;;  %v1294_v39 = vsel %vm374_vm6, %v1289_v35, 0  ;;  %1350 = vmatpush.bf16.msra.mxu2 %v1338_v37 }
 0x4ad   : > { %1306 = vmatpush.bf16.msra.mxu0 %v1294_v39 }
 0x4ae   : > { %10517 = vmatmul.msk.bf16.vlgmr.msra.gmra.mxu3 %vm370_vm7, %v10515_v38 }
 0x4af   : > { %10514 = vmatmul.msk.bf16.vlgmr.msra.gmra.mxu1 %vm370_vm7, %v10512_v41  ;;  %10516 = vmatmul.msk.bf16.vlgmr.msra.gmra.mxu2 %vm370_vm7, %v10515_v38 }
 0x4b0   : > { %1407 = vmatpush.bf16.msrb.mxu1 %v1385_v40 }
 0x4b1   : > { %v1418_v43 = vpop.permute.xlu0 %1417  ;;  %v1596_v3 = vpop.permute.xlu2 %1595 }
 0x4b2   : > { %v1374_v44 = vpop.permute.xlu1 %1373 }
 0x4b3   : > { %v1377_v45 = vsel %vm538_vm11, %v1374_v44, %v1376_v30  ;;  %vm333_vm11 = vcmask 371928  }
 0x4b4   : > { %v1382_v46 = vsel %vm374_vm6, %v1377_v45, 0  ;;  %334 = vst.msk [vmem:[#allocation4 + $0x14] sm:$0xf] %vm333_vm11, %v11977_v0 }
 0x4b5   : > { %1394 = vmatpush.bf16.msrb.mxu0 %v1382_v46  ;;  %336 = vst.msk [vmem:[#allocation5 + $0x14] sm:$0xf] %vm333_vm11, %v11977_v0 }
 0x4b6   : > { %v1266_v20 = vpop.f32.mrf.mxu2  ;;  %338 = vst.msk [vmem:[#allocation6 + $0x14] sm:$0xf] %vm333_vm11, %v11977_v0  ;;  %vm4474_vm11 = vcmask 736256  }
 0x4b7   : > { %v1279_v19 = vpop.f32.mrf.mxu3 }
 0x4b8   : > { %10513 = vmatmul.msk.bf16.vlgmr.msra.gmra.mxu0 %vm370_vm7, %v10512_v41 }
 0x4b9   : > { %v1464_v49 = vpop.permute.xlu0 %1463 }
 0x4ba   : > { %v1465_v50 = vsel %vm15818_vm13, %v1462_v42, %v1464_v49  ;;  %v1420_v51 = vpop.permute.xlu1 %1419  ;;  %v1473_v53 = vsel %vm374_vm6, %v1464_v49, 0 }
 0x4bb   : > { %v1421_v54 = vsel %vm583_vm12, %v1418_v43, %v1420_v51  ;;  %v1429_v55 = vsel %vm374_vm6, %v1420_v51, 0  ;;  %1495 = vmatpush.bf16.msra.mxu1 %v1473_v53  ;;  %v1470_v56 = vsel %vm374_vm6, %v1465_v50, 0  ;;  %vm3440_vm12 = vcmask 220164  }
 0x4bc   : > { %1451 = vmatpush.bf16.msrb.mxu3 %v1429_v55  ;;  %v1426_v59 = vsel %vm374_vm6, %v1421_v54, 0  ;;  %1482 = vmatpush.bf16.msra.mxu0 %v1470_v56  ;;  %v10539_v56 = vld [vmem:[%s15790_s7 + $0x18] sm:$0xff] }
 0x4bd   : > { %1438 = vmatpush.bf16.msrb.mxu2 %v1426_v59  ;;  %1685 = vperm.xlu0 %11905, %v10539_v56   ;;  %v10636_v56 = vld [vmem:[%s15787_s4 + $0x108] sm:$0xf0] }
 0x4be   : > { %v1268_v5 = vpop.f32.mrf.mxu2 }
 0x4bf   : > { %10520 = vmatmul.msk.bf16.vlgmr.msrb.gmra.mxu1 %vm370_vm7, %v10518_v62  ;;  %10523 = vmatmul.msk.bf16.vlgmr.msrb.gmra.mxu3 %vm370_vm7, %v10521_v63  ;;  %v1281_v61 = vpop.f32.mrf.mxu3 }
 0x4c0   : > { %1539 = vmatpush.bf16.msra.mxu3 %v1517_v60  ;;  %10522 = vmatmul.msk.bf16.vlgmr.msrb.gmra.mxu2 %vm370_vm7, %v10521_v63  ;;  %v10540_v61 = vld [vmem:[%s15836_s6 + $0x4] sm:$0xf] }
 0x4c1   : > { %v1550_v11 = vpop.permute.xlu0 %1549 }
 0x4c2   : > { %v1506_v7 = vpop.permute.xlu1 %1505 }
 0x4c3   : > { %v1509_v8 = vsel %vm673_vm14, %v1506_v7, %v1508_v48  ;;  %vm12869_vm14 = vmor %vm3440_vm12, %vm374_vm6  ;;  %vm3437_vm12 = vcmask 1044152  }
 0x4c4   : > { %1640 = vmatpush.bf16.msrb.mxu3 %v1618_v4  ;;  %v1514_v9 = vsel %vm374_vm6, %v1509_v8, 0 }
 0x4c5   : > { %1526 = vmatpush.bf16.msra.mxu2 %v1514_v9 }
 0x4c8   : > { %10519 = vmatmul.msk.bf16.vlgmr.msrb.gmra.mxu0 %vm370_vm7, %v10518_v62 }
 0x4c9   : > { %1627 = vmatpush.bf16.msrb.mxu2 %v1615_v10 }
 0x4ca   : > { %v1552_v12 = vpop.permute.xlu1 %1551 }
 0x4cb   : > { %v1553_v13 = vsel %vm718_vm15, %v1550_v11, %v1552_v12  ;;  %v1561_v14 = vsel %vm374_vm6, %v1552_v12, 0  ;;  %vm2710_vm15 = vcmask 228352  }
 0x4cc   : > { %1583 = vmatpush.bf16.msrb.mxu1 %v1561_v14  ;;  %v1558_v15 = vsel %vm374_vm6, %v1553_v13, 0 }
 0x4cd   : > { %1570 = vmatpush.bf16.msrb.mxu0 %v1558_v15 }
 0x4cf   : > { %10526 = vmatmul.msk.bf16.vlgmr.msra.gmra.mxu1 %vm370_vm7, %v10524_v16  ;;  %10529 = vmatmul.msk.bf16.vlgmr.msra.gmra.mxu3 %vm370_vm7, %v10527_v2 }
 0x4d0   : > { %1720 = vmatpush.bf16.msra.mxu3 %v1618_v4  ;;  %10528 = vmatmul.msk.bf16.vlgmr.msra.gmra.mxu2 %vm370_vm7, %v10527_v2 }
 0x4d1   : > { %1707 = vmatpush.bf16.msra.mxu2 %v1615_v10 }
 0x4d8   : > { %10525 = vmatmul.msk.bf16.vlgmr.msra.gmra.mxu0 %vm370_vm7, %v10524_v16  ;;  %v1604_v16 = vld [vmem:[%s15836_s6] sm:$0xf] }
 0x4df   : > { %10532 = vmatmul.msk.bf16.vlgmr.msrb.gmra.mxu1 %vm370_vm7, %v10530_v17  ;;  %10536 = vmatmul.msk.bf16.vlgmr.msrb.gmra.mxu3 %vm370_vm7, %v10534_v1 }
 0x4e0   : > { %1787 = vmatpush.bf16.msrb.mxu3 %v1618_v4  ;;  %10535 = vmatmul.msk.bf16.vlgmr.msrb.gmra.mxu2 %vm370_vm7, %v10534_v1 }
 0x4e1   : > { %1774 = vmatpush.bf16.msrb.mxu2 %v1615_v10 }
 0x4e8   : > { %10531 = vmatmul.msk.bf16.vlgmr.msrb.gmra.mxu0 %vm370_vm7, %v10530_v17 }
 0x4ef   : > { %10543 = vmatmul.msk.bf16.vlgmr.msra.gmra.mxu3 %vm370_vm7, %v10541_v18 }
 0x4f0   : > { %1854 = vmatpush.bf16.msra.mxu3 %v1618_v4  ;;  %10542 = vmatmul.msk.bf16.vlgmr.msra.gmra.mxu2 %vm370_vm7, %v10541_v18 }
 0x4f1   : > { %1841 = vmatpush.bf16.msra.mxu2 %v1615_v10  ;;  %v10547_v10 = vld [vmem:[%s15836_s6 + $0x18] sm:$0xf] }
 0x4ff   : > { %10549 = vmatmul.msk.bf16.vlgmr.msrb.gmra.mxu3 %vm370_vm7, %v10547_v10 }
 0x500   : > { %10548 = vmatmul.msk.bf16.vlgmr.msrb.gmra.mxu2 %vm370_vm7, %v10547_v10  ;;  %v11732_v10 = vld [vmem:[%s15787_s4 + $0x10c] sm:$0xf0] }
 0x50b   : > { %v1244_v52 = vpop.f32.mrf.mxu1 }
 0x50c   : > { %v1280_v58 = vadd.f32 %v1279_v19, %v1244_v52  ;;  %v3443_v52 = vld [vmem:[%s12453_s25] sm:$0xff] }
 0x513   : > { %v1246_v21 = vpop.f32.mrf.mxu1 }
 0x514   : > { %v3447_v21 = vld [vmem:[%s12453_s25 + $0x20] sm:$0xff] }
 0x525   : > { %v1231_v22 = vpop.f32.mrf.mxu0 }
 0x526   : > { %v1267_v42 = vadd.f32 %v1266_v20, %v1231_v22  ;;  %v10553_v20 = vld [vmem:[%s15836_s6 + $0x1c] sm:$0xf]  ;;  %v3448_v22 = vld [vmem:[%s12453_s25 + $0x28] sm:$0xff] }
 0x527   : > { %10555 = vmatmul.msk.bf16.vlgmr.msra.gmra.mxu3 %vm370_vm7, %v10553_v20  ;;  %10554 = vmatmul.msk.bf16.vlgmr.msra.gmra.mxu2 %vm370_vm7, %v10553_v20 }
 0x52c   : > { %v1321_v23 = vpop.f32.mrf.mxu1 }
 0x52d   : > { %v1233_v24 = vpop.f32.mrf.mxu0  ;;  %v1326_v41 = vadd.f32 %v1321_v23, %v1280_v58  ;;  %v3444_v58 = vld [vmem:[%s12453_s25 + $0x8] sm:$0xff]  ;;  %v3445_v23 = vld [vmem:[%s12453_s25 + $0x10] sm:$0xff] }
 0x52e   : > { %v3449_v5 = vpack.c.bf16 %v3444_v58, %v3443_v52  ;;  %v11710_v52 = vld [vmem:[%s15787_s4 + $0x50] sm:$0xf0]  ;;  %v10610_v58 = vld [vmem:[%s15787_s4 + $0xcc] sm:$0xf] }
 0x530   : > { %3455 = vrot.lane.b32.xlu1 %v3449_v5, %s15804_s17 }
 0x531   : > { %v1365_v25 = vpop.f32.mrf.mxu3 }
 0x532   : > { %v1352_v26 = vpop.f32.mrf.mxu2  ;;  %v1370_v44 = vadd.f32 %v1365_v25, %v1326_v41  ;;  %v3451_v25 = vpack.c.bf16 %v3448_v22, %v3447_v21  ;;  %v10648_v41 = vld [vmem:[%s15787_s4 + $0x120] sm:$0xf0]  ;;  %v11725_v21 = vld [vmem:[%s15787_s4 + $0xd4] sm:$0xf0]  ;;  %v11724_v22 = vld [vmem:[%s15787_s4 + $0xd0] sm:$0xf] }
 0x534   : > { %v1323_v27 = vpop.f32.mrf.mxu1  ;;  %3459 = vrot.lane.b32.xlu0 %v3451_v25, %s15804_s17  ;;  %v10611_v25 = vor.u32 %v11725_v21, %v10610_v58  ;;  %v11752_v58 = vld [vmem:[%s15787_s4 + $0x1b8] sm:$0xf0] }
 0x535   : > { %v1308_v28 = vpop.f32.mrf.mxu0  ;;  %v10582_v27 = vld [vmem:[%s15787_s4 + $0x12c] sm:$0x33] }
 0x536   : > { %v1325_v46 = vadd.f32 %v1308_v28, %v1267_v42  ;;  %v10721_v42 = vld [vmem:[%s15787_s4 + $0x78] sm:$0xf] }
 0x538   : > { %v1369_v51 = vadd.f32 %v1352_v26, %v1325_v46  ;;  %v3446_v26 = vld [vmem:[%s12453_s25 + $0x18] sm:$0xff] }
 0x539   : > { %v1367_v29 = vpop.f32.mrf.mxu3  ;;  %v3450_v28 = vpack.c.bf16 %v3446_v26, %v3445_v23  ;;  %v10612_v23 = vld [vmem:[%s15787_s4 + $0xd8] sm:$0xf0] }
 0x53a   : > { %v1354_v30 = vpop.f32.mrf.mxu2  ;;  %v2009_v29 = vunpack.c.l.b16 %v10582_v27  ;;  %v10615_v26 = vor.u32 %v11724_v22, %v10612_v23  ;;  %v10824_v23 = vld [vmem:[%s15787_s4 + $0x1bc] sm:$0xf0] }
 0x53b   : > { %v2010_v30 = vunpack.c.h.b16 %v10582_v27  ;;  %3457 = vrot.lane.b32.xlu2 %v3450_v28, %s15804_s17  ;;  %v10618_v27 = vld [vmem:[%s15787_s4 + $0xd4] sm:$0xf]  ;;  %v11726_v28 = vld [vmem:[%s15787_s4 + $0xdc] sm:$0xf0]  ;;  %s15842_s17 = smov 127  }
 0x53c   : > { %v1409_v31 = vpop.f32.mrf.mxu1 }
 0x53d   : > { %v1310_v32 = vpop.f32.mrf.mxu0  ;;  %v1414_v48 = vadd.f32 %v1409_v31, %v1370_v44  ;;  %v12475_v31 = vld [vmem:[%s15787_s4 + $0x90] sm:$0x33] }
 0x53e   : > { %v10546_v32 = vld [vmem:[%s15836_s6 + $0x8] sm:$0xf] }
 0x542   : > { %v1453_v33 = vpop.f32.mrf.mxu3 }
 0x543   : > { %v1440_v34 = vpop.f32.mrf.mxu2  ;;  %v1458_v50 = vadd.f32 %v1453_v33, %v1414_v48  ;;  %v10583_v33 = vld [vmem:[%s15787_s4 + $0x134] sm:$0x3] }
 0x544   : > { %v1411_v35 = vpop.f32.mrf.mxu1  ;;  %v2011_v46 = vunpack.c.l.b16 %v10583_v33 }
 0x545   : > { %v1396_v36 = vpop.f32.mrf.mxu0  ;;  %v2030_v35 = vpack.c.b16 %v2009_v29, %v2009_v29  ;;  %v10685_v29 = vld [vmem:[%s15787_s4 + $0x30] sm:$0xf] }
 0x546   : > { %v1413_v54 = vadd.f32 %v1396_v36, %v1369_v51  ;;  %v2031_v36 = vpack.c.b16 %v2010_v30, %v2010_v30  ;;  %v10634_v51 = vld [vmem:[%s15787_s4 + $0xfc] sm:$0xf]  ;;  %v10619_v30 = vor.u32 %v11726_v28, %v10618_v27  ;;  %v10711_v27 = vld [vmem:[%s15787_s4 + $0x6c] sm:$0xf0]  ;;  %v10717_v28 = vld [vmem:[%s15787_s4 + $0x68] sm:$0xf] }
 0x547   : > { %v2057_v44 = vsel %vm2055_vm0, %v2030_v35, 0  ;;  %v11722_v35 = vld [vmem:[%s15787_s4 + $0xbc] sm:$0xf0] }
 0x548   : > { %v1457_v4 = vadd.f32 %v1440_v34, %v1413_v54  ;;  %v2166_v34 = vunpack.c.l.b16 %v12475_v31  ;;  %2066 = vmatpush.bf16.msrb.mxu2 %v2057_v44  ;;  %v10673_v44 = vld [vmem:[%s15787_s4 + $0x18] sm:$0xf] }
 0x54a   : > { %v1455_v37 = vpop.f32.mrf.mxu3 }
 0x54b   : > { %v1442_v38 = vpop.f32.mrf.mxu2  ;;  %v10646_v37 = vld [vmem:[%s15787_s4 + $0x114] sm:$0xf] }
 0x54c   : > { %v1497_v39 = vpop.f32.mrf.mxu1  ;;  %v11734_v38 = vld [vmem:[%s15787_s4 + $0x11c] sm:$0xf0] }
 0x54d   : > { %v1398_v40 = vpop.f32.mrf.mxu0  ;;  %v1502_v53 = vadd.f32 %v1497_v39, %v1458_v50  ;;  %v11733_v39 = vld [vmem:[%s15787_s4 + $0x118] sm:$0xf]  ;;  %v10647_v48 = vor.u32 %v11734_v38, %v10646_v37  ;;  %v10600_v38 = vld [vmem:[%s15787_s4 + $0xc0] sm:$0xf0] }
 0x54e   : > { %v2187_v40 = vpack.c.b16 %v2166_v34, %v2166_v34  ;;  %v10598_v34 = vld [vmem:[%s15787_s4 + $0xb4] sm:$0xf] }
 0x54f   : > { %2067 = vmatpush.bf16.msrb.mxu2 %v10647_v48  ;;  %v10599_v37 = vor.u32 %v11722_v35, %v10598_v34  ;;  %v10586_v48 = vld [vmem:[%s15787_s4 + $0x9c] sm:$0xf] }
 0x552   : > { %v1541_v43 = vpop.f32.mrf.mxu3 }
 0x553   : > { %v1528_v45 = vpop.f32.mrf.mxu2  ;;  %v1546_v57 = vadd.f32 %v1541_v43, %v1502_v53  ;;  %v11716_v43 = vld [vmem:[%s15787_s4 + $0x80] sm:$0xf0]  ;;  %v11731_v53 = vld [vmem:[%s15787_s4 + $0x104] sm:$0xf0] }
 0x554   : > { %v1499_v47 = vpop.f32.mrf.mxu1  ;;  %v10722_v50 = vor.u32 %v11716_v43, %v10721_v42 }
 0x555   : > { %v1484_v49 = vpop.f32.mrf.mxu0  ;;  %v2212_v47 = vsel %vm2055_vm0, %v2187_v40, 0  ;;  %v11723_v40 = vld [vmem:[%s15787_s4 + $0xc4] sm:$0xf0] }
 0x556   : > { %v1501_v7 = vadd.f32 %v1484_v49, %v1457_v4  ;;  %v10651_v49 = vor.u32 %v11733_v39, %v10648_v41  ;;  %v10606_v39 = vld [vmem:[%s15787_s4 + $0xbc] sm:$0xf] }
 0x557   : > { %v10607_v43 = vor.u32 %v11723_v40, %v10606_v39  ;;  %v11709_v39 = vld [vmem:[%s15787_s4 + $0x4c] sm:$0xf]  ;;  %v10699_v40 = vld [vmem:[%s15787_s4 + $0x54] sm:$0xf0] }
 0x558   : > { %v1545_v11 = vadd.f32 %v1528_v45, %v1501_v7  ;;  %v2060_v45 = vsel %vm2055_vm0, %v2031_v36, 0  ;;  %v11735_v7 = vld [vmem:[%s15787_s4 + $0x124] sm:$0xf0]  ;;  %v11721_v36 = vld [vmem:[%s15787_s4 + $0xb8] sm:$0xf] }
 0x559   : > { %2079 = vmatpush.bf16.msrb.mxu3 %v2060_v45  ;;  %v10603_v42 = vor.u32 %v11721_v36, %v10600_v38  ;;  %v11704_v45 = vld [vmem:[%s15787_s4 + $0x20] sm:$0xf0]  ;;  %v11748_v36 = vld [vmem:[%s15787_s4 + $0x19c] sm:$0xf] }
 0x55a   : > { %v1543_v55 = vpop.f32.mrf.mxu3 }
 0x55b   : > { %v1530_v59 = vpop.f32.mrf.mxu2  ;;  %v11730_v55 = vld [vmem:[%s15787_s4 + $0x100] sm:$0xf] }
 0x55c   : > { %v1585_v60 = vpop.f32.mrf.mxu1  ;;  %v10709_v59 = vld [vmem:[%s15787_s4 + $0x60] sm:$0xf] }
 0x55d   : > { %v1590_v62 = vadd.f32 %v1585_v60, %v1546_v57  ;;  %v1486_v63 = vpop.f32.mrf.mxu0  ;;  %v2032_v57 = vpack.c.b16 %v2011_v46, %v2011_v46  ;;  %v11713_v60 = vld [vmem:[%s15787_s4 + $0x68] sm:$0xf0]  ;;  %2080 = vmatpush.bf16.msrb.mxu3 %v10651_v49  ;;  %v1919_v46 = vld [vmem:[%s15787_s4 + $0x98] sm:$0x3]  ;;  %v11719_v49 = vld [vmem:[%s15787_s4 + $0xa4] sm:$0xf0] }
 0x55e   : > { %v10639_v63 = vor.u32 %v11730_v55, %v10636_v56  ;;  %v10587_v55 = vor.u32 %v11719_v49, %v10586_v48  ;;  %v10588_v56 = vld [vmem:[%s15787_s4 + $0xa8] sm:$0xf0]  ;;  %v11745_v49 = vld [vmem:[%s15787_s4 + $0x184] sm:$0xf] }
 0x55f   : > { %v1599_v6 = vadd.f32 %v1596_v3, %v1590_v62  ;;  %v10635_v62 = vor.u32 %v11731_v53, %v10634_v51  ;;  %v2063_v4 = vsel %vm2055_vm0, %v2032_v57, 0  ;;  %v2167_v51 = vunpack.c.h.b16 %v12475_v31  ;;  %v10594_v57 = vld [vmem:[%s15787_s4 + $0xa4] sm:$0xf] }
 0x560   : > { %v2168_v53 = vunpack.c.l.b16 %v1919_v46 }
 0x561   : > { %v1601_v8 = vmax.f32 %v1599_v6, 0.0  ;;  %v10654_v6 = vld [vmem:[%s15787_s4 + $0x11c] sm:$0xf]  ;;  %2068 = vmatpush.bf16.msrb.mxu2 %v10635_v62  ;;  %2081 = vmatpush.bf16.msrb.mxu3 %v10639_v63  ;;  %v10661_v62 = vld [vmem:[%s15787_s4] sm:$0xf] }
 0x562   : > { %v12466_v24 = vpop.f32.mrf.mxu3  ;;  %v11701_v63 = vld [vmem:[%s15787_s4 + $0x8] sm:$0xf0] }
 0x563   : > { %v1603_v9 = vpack.c.bf16 %v1601_v8, %v1601_v8  ;;  %v10655_v8 = vor.u32 %v11735_v7, %v10654_v6  ;;  %v10758_v6 = vld [vmem:[%s15787_s4 + $0x1c8] sm:$0x33]  ;;  %v10662_v7 = vor.u32 %v11701_v63, %v10661_v62 }
 0x564   : > { %v1587_v12 = vpop.f32.mrf.mxu1 }
 0x565   : > { %v1572_v13 = vpop.f32.mrf.mxu0  ;;  %v1653_v14 = vsel %vm374_vm6, %v1603_v9, 0  ;;  %v10642_v9 = vld [vmem:[%s15787_s4 + $0x104] sm:$0xf] }
 0x566   : > { %v1589_v15 = vadd.f32 %v1572_v13, %v1545_v11  ;;  %1675 = vmatpush.bf16.msra.mxu1 %v1653_v14  ;;  %v10552_v11 = vld [vmem:[%s15836_s6 + $0xc] sm:$0xf]  ;;  %v10643_v12 = vor.u32 %v11732_v10, %v10642_v9  ;;  %v10622_v13 = vld [vmem:[%s15787_s4 + $0xe4] sm:$0xf]  ;;  %v2349_v9 = vunpack.c.h.b16 %v10758_v6 }
 0x568   : > { %v1598_v2 = vadd.f32 %v1596_v3, %v1589_v15  ;;  %v10710_v3 = vor.u32 %v11713_v60, %v10709_v59  ;;  %v11727_v15 = vld [vmem:[%s15787_s4 + $0xe8] sm:$0xf]  ;;  %v11720_v59 = vld [vmem:[%s15787_s4 + $0xac] sm:$0xf0] }
 0x569   : > { %10538 = vmatmul.msk.bf16.vlgmr.msra.gmra.mxu1 %vm370_vm7, %v1604_v16  ;;  %v10595_v60 = vor.u32 %v11720_v59, %v10594_v57  ;;  %v11708_v59 = vld [vmem:[%s15787_s4 + $0x40] sm:$0xf0] }
 0x56a   : > { %1749 = vmatpush.bf16.msrb.mxu1 %v1653_v14  ;;  %v1600_v17 = vmax.f32 %v1598_v2, 0.0  ;;  %v1644_v54 = vpop.f32.mrf.mxu3  ;;  %v10624_v2 = vld [vmem:[%s15787_s4 + $0xf0] sm:$0xf0] }
 0x56c   : > { %v1602_v1 = vpack.c.bf16 %v1600_v17, %v1600_v17  ;;  %v10630_v17 = vld [vmem:[%s15787_s4 + $0xec] sm:$0xf] }
 0x56d   : > { %v1574_v18 = vpop.f32.mrf.mxu0 }
 0x56e   : > { %1816 = vmatpush.bf16.msra.mxu1 %v1653_v14  ;;  %v1650_v19 = vsel %vm374_vm6, %v1602_v1, 0  ;;  %v11729_v1 = vld [vmem:[%s15787_s4 + $0xf4] sm:$0xf0]  ;;  %v12563_v18 = vpop.f32.mrf.mxu2 }
 0x56f   : > { %1662 = vmatpush.bf16.msra.mxu0 %v1650_v19  ;;  %v10631_v20 = vor.u32 %v11729_v1, %v10630_v17 }
 0x572   : > { %10537 = vmatmul.msk.bf16.vlgmr.msra.gmra.mxu0 %vm370_vm7, %v1604_v16  ;;  %v12632_v54 = vpop.f32.mrf.mxu3 }
 0x573   : > { %1736 = vmatpush.bf16.msrb.mxu0 %v1650_v19 }
 0x576   : > { %v1631_v41 = vpop.f32.mrf.mxu2 }
 0x577   : > { %1803 = vmatpush.bf16.msra.mxu0 %v1650_v19  ;;  %v10705_v41 = vld [vmem:[%s15787_s4 + $0x50] sm:$0xf] }
 0x579   : > { %10545 = vmatmul.msk.bf16.vlgmr.msrb.gmra.mxu1 %vm370_vm7, %v10540_v61 }
 0x57a   : > { %1883 = vmatpush.bf16.msrb.mxu1 %v1653_v14  ;;  %v11728_v14 = vld [vmem:[%s15787_s4 + $0xec] sm:$0xf0]  ;;  %v1724_v21 = vpop.f32.mrf.mxu3 }
 0x57b   : > { %v10623_v16 = vor.u32 %v11728_v14, %v10622_v13  ;;  %v2370_v13 = vpack.c.b16 %v2349_v9, %v2349_v9  ;;  %v11715_v14 = vld [vmem:[%s15787_s4 + $0x7c] sm:$0xf]  ;;  %v10675_v9 = vld [vmem:[%s15787_s4 + $0x24] sm:$0xf0]  ;;  %v10663_v21 = vld [vmem:[%s15787_s4 + $0xc] sm:$0xf0] }
 0x57d   : > { %2069 = vmatpush.bf16.msrb.mxu2 %v10623_v16  ;;  %v10729_v16 = vld [vmem:[%s15787_s4 + $0x80] sm:$0xf]  ;;  %v2397_v17 = vsel %vm2055_vm0, %v2370_v13, 0  ;;  %v11705_v13 = vld [vmem:[%s15787_s4 + $0x28] sm:$0xf0] }
 0x581   : > { %2070 = vmatpush.bf16.msrb.mxu2 %v10611_v25 }
 0x582   : > { %10544 = vmatmul.msk.bf16.vlgmr.msrb.gmra.mxu0 %vm370_vm7, %v10540_v61  ;;  %v10697_v61 = vld [vmem:[%s15787_s4 + $0x48] sm:$0xf] }
 0x583   : > { %1870 = vmatpush.bf16.msrb.mxu0 %v1650_v19  ;;  %v10627_v19 = vor.u32 %v11727_v15, %v10624_v2  ;;  %v10698_v5 = vor.u32 %v11710_v52, %v10697_v61  ;;  %v10723_v15 = vld [vmem:[%s15787_s4 + $0x84] sm:$0xf0]  ;;  %v12671_v61 = vpop.f32.mrf.mxu2 }
 0x584   : > { %v10726_v1 = vor.u32 %v11715_v14, %v10723_v15  ;;  %v10774_v14 = vld [vmem:[%s15787_s4 + $0x150] sm:$0xf]  ;;  %v11740_v15 = vld [vmem:[%s15787_s4 + $0x158] sm:$0xf0] }
 0x585   : > { %2082 = vmatpush.bf16.msrb.mxu3 %v10627_v19  ;;  %2071 = vmatpush.bf16.msrb.mxu2 %v10599_v37  ;;  %v11717_v19 = vld [vmem:[%s15787_s4 + $0x88] sm:$0xf0]  ;;  %v10812_v37 = vld [vmem:[%s15787_s4 + $0x1a4] sm:$0xf0] }
 0x586   : > { %v10730_v52 = vor.u32 %v11717_v19, %v10729_v16  ;;  %v10815_v38 = vor.u32 %v11748_v36, %v10812_v37 }
 0x589   : > { %10551 = vmatmul.msk.bf16.vlgmr.msra.gmra.mxu1 %vm370_vm7, %v10546_v32  ;;  %2083 = vmatpush.bf16.msrb.mxu3 %v10615_v26  ;;  %v11712_v26 = vld [vmem:[%s15787_s4 + $0x64] sm:$0xf] }
 0x58a   : > { %2221 = vmatpush.bf16.msra.mxu1 %v2212_v47  ;;  %v10674_v47 = vor.u32 %v11704_v45, %v10673_v44  ;;  %2072 = vmatpush.bf16.msrb.mxu2 %v10587_v55  ;;  %v10798_v44 = vld [vmem:[%s15787_s4 + $0x180] sm:$0xf]  ;;  %v11746_v45 = vld [vmem:[%s15787_s4 + $0x188] sm:$0xf0] }
 0x58b   : > { %v1711_v46 = vpop.f32.mrf.mxu2  ;;  %v10799_v48 = vor.u32 %v11746_v45, %v10798_v44  ;;  %v10687_v55 = vld [vmem:[%s15787_s4 + $0x3c] sm:$0xf0] }
 0x58c   : > { %v10931_v46 = vld [vmem:[%s15787_s4 + $0x254] sm:$0xf] }
 0x58d   : > { %2084 = vmatpush.bf16.msrb.mxu3 %v10603_v42  ;;  %v10702_v42 = vor.u32 %v11709_v39, %v10699_v40 }
 0x58e   : > { %2222 = vmatpush.bf16.msra.mxu1 %v10722_v50  ;;  %v11718_v50 = vld [vmem:[%s15787_s4 + $0xa0] sm:$0xf] }
 0x58f   : > { %v10591_v31 = vor.u32 %v11718_v50, %v10588_v56  ;;  %v10800_v50 = vld [vmem:[%s15787_s4 + $0x18c] sm:$0xf0]  ;;  %v10693_v56 = vld [vmem:[%s15787_s4 + $0x38] sm:$0xf] }
 0x590   : > { %v10694_v62 = vor.u32 %v11708_v59, %v10693_v56 }
 0x591   : > { %2085 = vmatpush.bf16.msrb.mxu3 %v10591_v31  ;;  %v10786_v31 = vld [vmem:[%s15787_s4 + $0x168] sm:$0xf] }
 0x592   : > { %10550 = vmatmul.msk.bf16.vlgmr.msra.gmra.mxu0 %vm370_vm7, %v10546_v32  ;;  %2223 = vmatpush.bf16.msra.mxu1 %v10710_v3  ;;  %v11707_v32 = vld [vmem:[%s15787_s4 + $0x38] sm:$0xf0]  ;;  %v2188_v3 = vpack.c.b16 %v2167_v51, %v2167_v51  ;;  %v10803_v51 = vor.u32 %v11745_v49, %v10800_v50 }
 0x593   : > { %2092 = vmatpush.bf16.msra.mxu0 %v2063_v4  ;;  %v10686_v33 = vor.u32 %v11707_v32, %v10685_v29  ;;  %v2189_v4 = vpack.c.b16 %v2168_v53, %v2168_v53  ;;  %v10714_v29 = vor.u32 %v11712_v26, %v10711_v27  ;;  %v10810_v32 = vld [vmem:[%s15787_s4 + $0x198] sm:$0xf]  ;;  %v11706_v53 = vld [vmem:[%s15787_s4 + $0x34] sm:$0xf]  ;;  %v12780_v19 = vpop.f32.mrf.mxu2 }
 0x594   : > { %v2215_v10 = vsel %vm2055_vm0, %v2188_v3, 0  ;;  %v10690_v57 = vor.u32 %v11706_v53, %v10687_v55  ;;  %v11742_v3 = vld [vmem:[%s15787_s4 + $0x16c] sm:$0xf]  ;;  %v10762_v26 = vld [vmem:[%s15787_s4 + $0x138] sm:$0xf] }
 0x595   : > { %2234 = vmatpush.bf16.msra.mxu2 %v2215_v10  ;;  %v10681_v10 = vld [vmem:[%s15787_s4 + $0x20] sm:$0xf] }
 0x596   : > { %2224 = vmatpush.bf16.msra.mxu1 %v10698_v5  ;;  %v11751_v5 = vld [vmem:[%s15787_s4 + $0x1b4] sm:$0xf]  ;;  %v10682_v16 = vor.u32 %v11705_v13, %v10681_v10 }
 0x597   : > { %2093 = vmatpush.bf16.msra.mxu0 %v10655_v8  ;;  %v2348_v8 = vunpack.c.l.b16 %v10758_v6  ;;  %v10827_v25 = vor.u32 %v11751_v5, %v10824_v23  ;;  %v11700_v5 = vld [vmem:[%s15787_s4 + $0x4] sm:$0xf]  ;;  %v12795_v23 = vpop.permute.xlu0 %1685 }
 0x599   : > { %10557 = vmatmul.msk.bf16.vlgmr.msrb.gmra.mxu1 %vm370_vm7, %v10552_v11  ;;  %2235 = vmatpush.bf16.msra.mxu2 %v10726_v1  ;;  %v10776_v1 = vld [vmem:[%s15787_s4 + $0x15c] sm:$0xf0] }
 0x59a   : > { %2225 = vmatpush.bf16.msra.mxu1 %v10686_v33  ;;  %v11749_v33 = vld [vmem:[%s15787_s4 + $0x1a0] sm:$0xf0] }
 0x59b   : > { %2094 = vmatpush.bf16.msra.mxu0 %v10643_v12  ;;  %v2369_v12 = vpack.c.b16 %v2348_v8, %v2348_v8  ;;  %v10811_v35 = vor.u32 %v11749_v33, %v10810_v32  ;;  %v11703_v8 = vld [vmem:[%s15787_s4 + $0x1c] sm:$0xf]  ;;  %v1778_v40 = vpop.f32.mrf.mxu2 }
 0x59c   : > { %v11769_v40 = vld [vmem:[%s15787_s4 + $0x250] sm:$0xf] }
 0x59d   : > { %v2394_v2 = vsel %vm2055_vm0, %v2369_v12, 0  ;;  %2236 = vmatpush.bf16.msra.mxu2 %v10714_v29  ;;  %v10678_v12 = vor.u32 %v11703_v8, %v10675_v9  ;;  %v11736_v29 = vld [vmem:[%s15787_s4 + $0x13c] sm:$0xf] }
 0x59e   : > { %2226 = vmatpush.bf16.msra.mxu1 %v10674_v47 }
 0x59f   : > { %2095 = vmatpush.bf16.msra.mxu0 %v10631_v20  ;;  %v10822_v20 = vld [vmem:[%s15787_s4 + $0x1b0] sm:$0xf] }
 0x5a0   : > { %v10823_v22 = vor.u32 %v11752_v58, %v10822_v20 }
 0x5a1   : > { %2237 = vmatpush.bf16.msra.mxu2 %v10702_v42 }
 0x5a2   : > { %10556 = vmatmul.msk.bf16.vlgmr.msrb.gmra.mxu0 %vm370_vm7, %v10552_v11  ;;  %v2218_v11 = vsel %vm2055_vm0, %v2189_v4, 0  ;;  %2227 = vmatpush.bf16.msra.mxu1 %v10662_v7  ;;  %v10788_v4 = vld [vmem:[%s15787_s4 + $0x174] sm:$0xf0] }
 0x5a3   : > { %2096 = vmatpush.bf16.msra.mxu0 %v10619_v30  ;;  %2247 = vmatpush.bf16.msra.mxu3 %v2218_v11  ;;  %v11714_v30 = vld [vmem:[%s15787_s4 + $0x70] sm:$0xf0]  ;;  %v10791_v6 = vor.u32 %v11742_v3, %v10788_v4  ;;  %v12763_v11 = vpop.f32.mrf.mxu3  ;;  %v12860_v3 = vpop.permute.xlu2 %3457 }
 0x5a4   : > { %v10718_v34 = vor.u32 %v11714_v30, %v10717_v28  ;;  %v11737_v28 = vld [vmem:[%s15787_s4 + $0x140] sm:$0xf0]  ;;  %v10764_v30 = vld [vmem:[%s15787_s4 + $0x144] sm:$0xf0] }
 0x5a5   : > { %2238 = vmatpush.bf16.msra.mxu2 %v10690_v57  ;;  %v10763_v32 = vor.u32 %v11737_v28, %v10762_v26  ;;  %v10767_v33 = vor.u32 %v11736_v29, %v10764_v30  ;;  %v10759_v57 = vld [vmem:[%s15787_s4 + $0x1d0] sm:$0x3]  ;;  %v10895_v28 = vld [vmem:[%s15787_s4 + $0x20c] sm:$0xf]  ;;  %v10830_v30 = vld [vmem:[%s15787_s4 + $0x1b8] sm:$0xf] }
 0x5a6   : > { %2416 = vmatpush.bf16.msrb.mxu1 %v2397_v17  ;;  %v11739_v17 = vld [vmem:[%s15787_s4 + $0x154] sm:$0xf]  ;;  %v3460_v4 = vpop.permute.xlu0 %3459  ;;  %v2350_v8 = vunpack.c.l.b16 %v10759_v57 }
 0x5a7   : > { %2097 = vmatpush.bf16.msra.mxu0 %v10607_v43  ;;  %2248 = vmatpush.bf16.msra.mxu3 %v10730_v52  ;;  %v11711_v43 = vld [vmem:[%s15787_s4 + $0x58] sm:$0xf0]  ;;  %v10779_v20 = vor.u32 %v11739_v17, %v10776_v1  ;;  %v10860_v52 = vld [vmem:[%s15787_s4 + $0x26c] sm:$0x3] }
 0x5a8   : > { %v10706_v47 = vor.u32 %v11711_v43, %v10705_v41 }
 0x5a9   : > { %2239 = vmatpush.bf16.msra.mxu2 %v10678_v12 }
 0x5aa   : > { %2417 = vmatpush.bf16.msrb.mxu1 %v10827_v25  ;;  %v10666_v25 = vor.u32 %v11700_v5, %v10663_v21  ;;  %v12840_v56 = vpop.f32.mrf.mxu2  ;;  %v2371_v21 = vpack.c.b16 %v2350_v8, %v2350_v8 }
 0x5ab   : > { %2098 = vmatpush.bf16.msra.mxu0 %v10595_v60  ;;  %2249 = vmatpush.bf16.msra.mxu3 %v10718_v34  ;;  %v11743_v60 = vld [vmem:[%s15787_s4 + $0x170] sm:$0xf0]  ;;  %v2535_v34 = vunpack.c.l.b16 %v10860_v52 }
 0x5ac   : > { %v10787_v63 = vor.u32 %v11743_v60, %v10786_v31  ;;  %v2400_v29 = vsel %vm2055_vm0, %v2371_v21, 0  ;;  %v10901_v21 = vld [vmem:[%s15787_s4 + $0x228] sm:$0xf0] }
 0x5ad   : > { %2240 = vmatpush.bf16.msra.mxu2 %v10666_v25  ;;  %v2556_v41 = vpack.c.b16 %v2535_v34, %v2535_v34  ;;  %v11753_v34 = vld [vmem:[%s15787_s4 + $0x1c0] sm:$0xf0] }
 0x5ae   : > { %2418 = vmatpush.bf16.msrb.mxu1 %v10815_v38  ;;  %v1791_v38 = vpop.f32.mrf.mxu3 }
 0x5af   : > { %2403 = vmatpush.bf16.msrb.mxu0 %v2394_v2  ;;  %2250 = vmatpush.bf16.msra.mxu3 %v10706_v47  ;;  %v10775_v2 = vor.u32 %v11740_v15, %v10774_v14  ;;  %v2585_v45 = vsel %vm2055_vm0, %v2556_v41, 0  ;;  %v12819_v47 = vpop.permute.xlu1 %3455  ;;  %v10907_v14 = vld [vmem:[%s15787_s4 + $0x224] sm:$0xf]  ;;  %v11765_v15 = vld [vmem:[%s15787_s4 + $0x22c] sm:$0xf0] }
 0x5b0   : > { %v10925_v41 = vld [vmem:[%s15787_s4 + $0x258] sm:$0xf0] }
 0x5b2   : > { %2419 = vmatpush.bf16.msrb.mxu1 %v10803_v51  ;;  %v3461_v51 = vrot.slane %v12819_v47, 4  ;;  %v1845_v5 = vpop.f32.mrf.mxu2 }
 0x5b3   : > { %2404 = vmatpush.bf16.msrb.mxu0 %v10823_v22  ;;  %2251 = vmatpush.bf16.msra.mxu3 %v10694_v62  ;;  %v10669_v22 = vld [vmem:[%s15787_s4 + $0x8] sm:$0xf]  ;;  %v10919_v62 = vld [vmem:[%s15787_s4 + $0x23c] sm:$0xf]  ;;  %v11763_v5 = vld [vmem:[%s15787_s4 + $0x220] sm:$0xf] }
 0x5b4   : > { %v3464_v31 = vsel %vm2638_vm3, %v3461_v51, %v12819_v47 }
 0x5b5   : > { %3472 = vst.msk [vmem:[#allocation4] sm:$0xff] %vm12834_vm10, %v3464_v31  ;;  %v10818_v31 = vld [vmem:[%s15787_s4 + $0x1a0] sm:$0xf] }
 0x5b6   : > { %2420 = vmatpush.bf16.msrb.mxu1 %v10791_v6  ;;  %v12829_v53 = vpop.f32.mrf.mxu3  ;;  %v3462_v6 = vrot.slane %v12860_v3, 4 }
 0x5b7   : > { %2405 = vmatpush.bf16.msrb.mxu0 %v10811_v35  ;;  %2252 = vmatpush.bf16.msra.mxu3 %v10682_v16 }
 0x5ba   : > { %2421 = vmatpush.bf16.msrb.mxu1 %v10779_v20 }
 0x5bb   : > { %2406 = vmatpush.bf16.msrb.mxu0 %v10799_v48 }
 0x5be   : > { %2422 = vmatpush.bf16.msrb.mxu1 %v10767_v33  ;;  %v1858_v52 = vpop.f32.mrf.mxu3 }
 0x5bf   : > { %2407 = vmatpush.bf16.msrb.mxu0 %v10787_v63  ;;  %v11768_v63 = vld [vmem:[%s15787_s4 + $0x244] sm:$0xf0] }
 0x5c0   : > { %v10920_v9 = vor.u32 %v11768_v63, %v10919_v62  ;;  %v10911_v62 = vld [vmem:[%s15787_s4 + $0x234] sm:$0xf]  ;;  %v11767_v63 = vld [vmem:[%s15787_s4 + $0x23c] sm:$0xf0] }
 0x5c3   : > { %2408 = vmatpush.bf16.msrb.mxu0 %v10775_v2 }
 0x5c7   : > { %2409 = vmatpush.bf16.msrb.mxu0 %v10763_v32 }
 0x5e6   : > { %v1677_v7 = vpop.f32.mrf.mxu1 }
 0x5e7   : > { %v1678_v58 = vadd.f32 %v1677_v7, %v12466_v24  ;;  %v11702_v24 = vld [vmem:[%s15787_s4 + $0x10] sm:$0xf0]  ;;  %v3463_v7 = vrot.slane %v3460_v4, 4 }
 0x5e8   : > { %v10670_v27 = vor.u32 %v11702_v24, %v10669_v22  ;;  %v10908_v22 = vor.u32 %v11765_v15, %v10907_v14 }
 0x5e9   : > { %v1689_v36 = vadd.f32 %v12795_v23, %v1678_v58  ;;  %v3467_v16 = vsel %vm374_vm6, %v3462_v6, %v3463_v7 }
 0x5ea   : > { %2253 = vmatpush.bf16.msra.mxu3 %v10670_v27  ;;  %v3468_v20 = vsel %vm2638_vm3, %v3467_v16, %v3460_v4  ;;  %v11766_v4 = vld [vmem:[%s15787_s4 + $0x238] sm:$0xf]  ;;  %v10912_v16 = vor.u32 %v11767_v63, %v10911_v62 }
 0x5eb   : > { %v1691_v43 = vmax.f32 %v1689_v36, 0.0  ;;  %3474 = vst.msk [vmem:[#allocation4 + $0x10] sm:$0xff] %vm12869_vm14, %v3468_v20  ;;  %v11770_v36 = vld [vmem:[%s15787_s4 + $0x254] sm:$0xf0]  ;;  %v10899_v20 = vld [vmem:[%s15787_s4 + $0x21c] sm:$0xf] }
 0x5ee   : > { %v1679_v35 = vpop.f32.mrf.mxu1 }
 0x5ef   : > { %v1664_v37 = vpop.f32.mrf.mxu0  ;;  %v10923_v35 = vld [vmem:[%s15787_s4 + $0x24c] sm:$0xf] }
 0x5f0   : > { %v1665_v39 = vadd.f32 %v1664_v37, %v12563_v18  ;;  %v11771_v18 = vld [vmem:[%s15787_s4 + $0x25c] sm:$0xf0] }
 0x5f1   : > { %v10932_v59 = vor.u32 %v11771_v18, %v10931_v46  ;;  %v11759_v46 = vld [vmem:[%s15787_s4 + $0x1fc] sm:$0xf0]  ;;  %v10924_v18 = vor.u32 %v11770_v36, %v10923_v35  ;;  %v11760_v36 = vld [vmem:[%s15787_s4 + $0x208] sm:$0xf] }
 0x5f2   : > { %v1688_v42 = vadd.f32 %v12795_v23, %v1665_v39 }
 0x5f4   : > { %v1690_v44 = vmax.f32 %v1688_v42, 0.0 }
 0x5f6   : > { %v1751_v48 = vpop.f32.mrf.mxu1  ;;  %v12821_v49 = vpack.c.bf16 %v1691_v43, %v1690_v44 }
 0x5f7   : > { %v1666_v50 = vpop.f32.mrf.mxu0  ;;  %v1752_v60 = vadd.f32 %v1751_v48, %v12632_v54  ;;  %v10859_v54 = vld [vmem:[%s15787_s4 + $0x264] sm:$0x33]  ;;  %v10831_v48 = vor.u32 %v11753_v34, %v10830_v30  ;;  %v10794_v30 = vld [vmem:[%s15787_s4 + $0x170] sm:$0xf] }
 0x5f8   : > { %10731 = vmatmul.msk.bf16.vlgmr.msra.gmra.mxu1 %vm2051_vm1, %v12821_v49  ;;  %v2533_v17 = vunpack.c.l.b16 %v10859_v54  ;;  %v2534_v1 = vunpack.c.h.b16 %v10859_v54  ;;  %v10913_v54 = vld [vmem:[%s15787_s4 + $0x240] sm:$0xf0]  ;;  %v2868_v14 = vunpack.c.l.b16 %v12821_v49 }
 0x5f9   : > { %2614 = vmatpush.bf16.msra.mxu1 %v2585_v45  ;;  %v1756_v12 = vadd.f32 %v1752_v60, %v12795_v23  ;;  %v10883_v45 = vld [vmem:[%s15787_s4 + $0x1f4] sm:$0xf]  ;;  %v11750_v60 = vld [vmem:[%s15787_s4 + $0x1a8] sm:$0xf0] }
 0x5fa   : > { %v2554_v26 = vpack.c.b16 %v2533_v17, %v2533_v17  ;;  %v2555_v0 = vpack.c.b16 %v2534_v1, %v2534_v1  ;;  %v10884_v7 = vor.u32 %v11759_v46, %v10883_v45  ;;  %v10819_v15 = vor.u32 %v11750_v60, %v10818_v31  ;;  %v10806_v17 = vld [vmem:[%s15787_s4 + $0x188] sm:$0xf]  ;;  %v11747_v1 = vld [vmem:[%s15787_s4 + $0x190] sm:$0xf0]  ;;  %v10875_v46 = vld [vmem:[%s15787_s4 + $0x1ec] sm:$0xf] }
 0x5fb   : > { %v1758_v25 = vmax.f32 %v1756_v12, 0.0  ;;  %v11756_v12 = vld [vmem:[%s15787_s4 + $0x1e4] sm:$0xf0]  ;;  %v13024_v31 = vld [vmem:[#allocation4] sm:$0xff] }
 0x5fc   : > { %v2579_v38 = vsel %vm2055_vm0, %v2554_v26, 0  ;;  %v2582_v39 = vsel %vm2055_vm0, %v2555_v0, 0  ;;  %v2870_v0 = vpack.c.b16 %v2868_v14, %v2868_v14  ;;  %v11754_v14 = vld [vmem:[%s15787_s4 + $0x1d8] sm:$0xf] }
 0x5fd   : > { %2615 = vmatpush.bf16.msra.mxu1 %v10932_v59  ;;  %v10928_v59 = vor.u32 %v11769_v40, %v10925_v41 }
 0x5fe   : > { %v1753_v13 = vpop.f32.mrf.mxu1 }
 0x5ff   : > { %v1738_v2 = vpop.f32.mrf.mxu0  ;;  %v2869_v13 = vunpack.c.h.b16 %v12821_v49 }
 0x600   : > { %v1739_v58 = vadd.f32 %v1738_v2, %v12671_v61  ;;  %v11762_v61 = vld [vmem:[%s15787_s4 + $0x214] sm:$0xf0]  ;;  %v10916_v2 = vor.u32 %v11766_v4, %v10913_v54  ;;  %v10770_v4 = vld [vmem:[%s15787_s4 + $0x140] sm:$0xf] }
 0x601   : > { %2616 = vmatpush.bf16.msra.mxu1 %v10920_v9  ;;  %v10896_v42 = vor.u32 %v11762_v61, %v10895_v28  ;;  %v10871_v9 = vld [vmem:[%s15787_s4 + $0x1dc] sm:$0xf]  ;;  %v2871_v26 = vpack.c.b16 %v2869_v13, %v2869_v13 }
 0x602   : > { %v1755_v24 = vadd.f32 %v1739_v58, %v12795_v23  ;;  %v11764_v58 = vld [vmem:[%s15787_s4 + $0x224] sm:$0xf0] }
 0x603   : > { %v10900_v61 = vor.u32 %v11764_v58, %v10899_v20  ;;  %v13056_v58 = vld [vmem:[#allocation4 + $0x10] sm:$0xff] }
 0x604   : > { %v1757_v27 = vmax.f32 %v1755_v24, 0.0 }
 0x605   : > { %2617 = vmatpush.bf16.msra.mxu1 %v10908_v22  ;;  %v10872_v22 = vor.u32 %v11756_v12, %v10871_v9  ;;  %v11755_v9 = vld [vmem:[%s15787_s4 + $0x1dc] sm:$0xf0]  ;;  %v3485_v12 = vunpack.c.l.b16 %v13024_v31 }
 0x606   : > { %v1759_v32 = vpack.c.bf16 %v1758_v25, %v1757_v27  ;;  %v1818_v33 = vpop.f32.mrf.mxu1  ;;  %v10807_v27 = vor.u32 %v11747_v1, %v10806_v17 }
 0x607   : > { %v1740_v37 = vpop.f32.mrf.mxu0  ;;  %v1819_v8 = vadd.f32 %v1818_v33, %v12763_v11  ;;  %v11761_v33 = vld [vmem:[%s15787_s4 + $0x20c] sm:$0xf0] }
 0x608   : > { %10656 = vmatmul.msk.bf16.vlgmr.msrb.gmra.mxu2 %vm2051_vm1, %v1759_v32  ;;  %10657 = vmatmul.msk.bf16.vlgmr.msrb.gmra.mxu3 %vm2051_vm1, %v1759_v32  ;;  %v2703_v43 = vunpack.c.h.b16 %v1759_v32  ;;  %v2702_v44 = vunpack.c.l.b16 %v1759_v32  ;;  %v10889_v37 = vld [vmem:[%s15787_s4 + $0x210] sm:$0xf0] }
 0x609   : > { %10658 = vmatmul.msk.bf16.vlgmr.msra.gmra.mxu0 %vm2051_vm1, %v1759_v32  ;;  %2429 = vmatpush.bf16.msrb.mxu2 %v2400_v29  ;;  %v1823_v25 = vadd.f32 %v1819_v8, %v12795_v23  ;;  %v10904_v29 = vor.u32 %v11763_v5, %v10901_v21  ;;  %v11744_v32 = vld [vmem:[%s15787_s4 + $0x178] sm:$0xf0]  ;;  %v10892_v45 = vor.u32 %v11760_v36, %v10889_v37  ;;  %v10863_v8 = vld [vmem:[%s15787_s4 + $0x1d4] sm:$0xf] }
 0x60a   : > { %v2705_v50 = vpack.c.b16 %v2703_v43, %v2703_v43  ;;  %v2704_v57 = vpack.c.b16 %v2702_v44, %v2702_v44  ;;  %2588 = vmatpush.bf16.msrb.mxu3 %v2579_v38  ;;  %2601 = vmatpush.bf16.msra.mxu0 %v2582_v39  ;;  %v10795_v40 = vor.u32 %v11744_v32, %v10794_v30  ;;  %v11741_v43 = vld [vmem:[%s15787_s4 + $0x160] sm:$0xf0]  ;;  %v3486_v30 = vunpack.c.h.b16 %v13024_v31  ;;  %v11024_v32 = vld [vmem:[%s15787_s4 + $0x114] sm:$0xf] }
 0x60b   : > { %2618 = vmatpush.bf16.msra.mxu1 %v10896_v42  ;;  %v1825_v34 = vmax.f32 %v1823_v25, 0.0  ;;  %v10782_v42 = vld [vmem:[%s15787_s4 + $0x158] sm:$0xf] }
 0x60c   : > { %2708 = vrot.lane.b32.xlu2 %v2705_v50, %s11988_s21  ;;  %2706 = vrot.lane.b32.xlu1 %v2704_v57, %s11988_s21  ;;  %v11757_v57 = vld [vmem:[%s15787_s4 + $0x1f0] sm:$0xf] }
 0x60d   : > { %2430 = vmatpush.bf16.msrb.mxu2 %v10831_v48  ;;  %v11758_v48 = vld [vmem:[%s15787_s4 + $0x1f4] sm:$0xf0] }
 0x60e   : > { %v1820_v11 = vpop.f32.mrf.mxu1  ;;  %2589 = vmatpush.bf16.msrb.mxu3 %v10924_v18  ;;  %2602 = vmatpush.bf16.msra.mxu0 %v10928_v59  ;;  %v10877_v59 = vld [vmem:[%s15787_s4 + $0x1f8] sm:$0xf0]  ;;  %v10876_v63 = vor.u32 %v11758_v48, %v10875_v46  ;;  %v3490_v46 = vunpack.c.h.b16 %v13056_v58 }
 0x60f   : > { %v1805_v52 = vpop.f32.mrf.mxu0  ;;  %2619 = vmatpush.bf16.msra.mxu1 %v10884_v7  ;;  %v10880_v54 = vor.u32 %v11757_v57, %v10877_v59  ;;  %v11738_v7 = vld [vmem:[%s15787_s4 + $0x148] sm:$0xf0]  ;;  %v11032_v57 = vld [vmem:[%s15787_s4 + $0x11c] sm:$0xf] }
 0x610   : > { %v1806_v24 = vadd.f32 %v1805_v52, %v12780_v19  ;;  %v10887_v19 = vld [vmem:[%s15787_s4 + $0x204] sm:$0xf]  ;;  %v13054_v52 = vpack.c.b16 %v3485_v12, %v3485_v12  ;;  %v2673_v12 = vld [vmem:[%s15787_s4 + $0x90] sm:$0x33] }
 0x611   : > { %2431 = vmatpush.bf16.msrb.mxu2 %v10819_v15  ;;  %v10888_v41 = vor.u32 %v11761_v33, %v10887_v19  ;;  %v10865_v15 = vld [vmem:[%s15787_s4 + $0x1e0] sm:$0xf0]  ;;  %v11806_v19 = vld [vmem:[%s15787_s4 + $0x11c] sm:$0xf0] }
 0x612   : > { %v1822_v28 = vadd.f32 %v1806_v24, %v12795_v23  ;;  %2590 = vmatpush.bf16.msrb.mxu3 %v10912_v16  ;;  %2603 = vmatpush.bf16.msra.mxu0 %v10916_v2  ;;  %v10771_v16 = vor.u32 %v11738_v7, %v10770_v4  ;;  %v10864_v2 = vor.u32 %v11755_v9, %v10863_v8  ;;  %v11014_v7 = vld [vmem:[%s15787_s4 + $0x108] sm:$0xf0]  ;;  %v11020_v8 = vld [vmem:[%s15787_s4 + $0x104] sm:$0xf]  ;;  %v11804_v9 = vld [vmem:[%s15787_s4 + $0x10c] sm:$0xf0] }
 0x613   : > { %2620 = vmatpush.bf16.msra.mxu1 %v10872_v22  ;;  %v3489_v22 = vunpack.c.l.b16 %v13056_v58  ;;  %v11025_v37 = vor.u32 %v11806_v19, %v11024_v32  ;;  %v11799_v58 = vld [vmem:[%s15787_s4 + $0xe8] sm:$0xf]  ;;  %v11087_v32 = vld [vmem:[%s15787_s4 + $0x60] sm:$0xf]  ;;  %v11785_v19 = vld [vmem:[%s15787_s4 + $0x68] sm:$0xf0] }
 0x614   : > { %v1824_v35 = vmax.f32 %v1822_v28, 0.0  ;;  %2874 = vrot.lane.b32.xlu2 %v2871_v26, %s11988_s21  ;;  %2872 = vrot.lane.b32.xlu1 %v2870_v0, %s11988_s21  ;;  %v10960_v28 = vld [vmem:[%s15787_s4 + $0x12c] sm:$0x33] }
 0x615   : > { %2432 = vmatpush.bf16.msrb.mxu2 %v10807_v27  ;;  %v2775_v33 = vunpack.c.h.b16 %v10960_v28 }
 0x616   : > { %v12998_v38 = vpack.c.bf16 %v1825_v34, %v1824_v35  ;;  %v1885_v39 = vpop.f32.mrf.mxu1  ;;  %2591 = vmatpush.bf16.msrb.mxu3 %v10900_v61  ;;  %2604 = vmatpush.bf16.msra.mxu0 %v10904_v29 }
 0x617   : > { %v1807_v44 = vpop.f32.mrf.mxu0  ;;  %v1886_v13 = vadd.f32 %v1885_v39, %v12829_v53  ;;  %v10868_v53 = vor.u32 %v11754_v14, %v10865_v15  ;;  %v2939_v15 = vunpack.c.l.b16 %v2673_v12 }
 0x618   : > { %10732 = vmatmul.msk.bf16.vlgmr.msra.gmra.mxu2 %vm2051_vm1, %v12821_v49  ;;  %10733 = vmatmul.msk.bf16.vlgmr.msra.gmra.mxu3 %vm2051_vm1, %v12821_v49  ;;  %v3060_v18 = vunpack.c.h.b16 %v12998_v38  ;;  %v3059_v50 = vunpack.c.l.b16 %v12998_v38  ;;  %v10783_v49 = vor.u32 %v11741_v43, %v10782_v42  ;;  %v11012_v44 = vld [vmem:[%s15787_s4 + $0xfc] sm:$0xf] }
 0x619   : > { %10832 = vmatmul.msk.bf16.vlgmr.msrb.gmra.mxu0 %vm2051_vm1, %v12998_v38  ;;  %10833 = vmatmul.msk.bf16.vlgmr.msrb.gmra.mxu1 %vm2051_vm1, %v12998_v38  ;;  %v1890_v1 = vadd.f32 %v1886_v13, %v12795_v23  ;;  %v13146_v13 = vpack.c.b16 %v3490_v46, %v3490_v46  ;;  %v11075_v46 = vld [vmem:[%s15787_s4 + $0x48] sm:$0xf] }
 0x61a   : > { %v3062_v60 = vpack.c.b16 %v3060_v18, %v3060_v18  ;;  %v3061_v62 = vpack.c.b16 %v3059_v50, %v3059_v50  ;;  %2433 = vmatpush.bf16.msrb.mxu2 %v10795_v40  ;;  %2592 = vmatpush.bf16.msrb.mxu3 %v10888_v41  ;;  %v13094_v40 = vpack.c.b16 %v3486_v30, %v3486_v30  ;;  %v11805_v18 = vld [vmem:[%s15787_s4 + $0x118] sm:$0xf]  ;;  %v11026_v50 = vld [vmem:[%s15787_s4 + $0x120] sm:$0xf0]  ;;  %v11798_v30 = vld [vmem:[%s15787_s4 + $0xdc] sm:$0xf0] }
 0x61b   : > { %2605 = vmatpush.bf16.msra.mxu0 %v10892_v45  ;;  %v1892_v21 = vmax.f32 %v1890_v1, 0.0  ;;  %v11803_v45 = vld [vmem:[%s15787_s4 + $0x104] sm:$0xf0]  ;;  %v11029_v31 = vor.u32 %v11805_v18, %v11026_v50 }
 0x61c   : > { %3065 = vrot.lane.b32.xlu1 %v3062_v60, %s11988_s21  ;;  %3063 = vrot.lane.b32.xlu0 %v3061_v62, %s11988_s21  ;;  %v11013_v48 = vor.u32 %v11803_v45, %v11012_v44  ;;  %v11000_v60 = vld [vmem:[%s15787_s4 + $0xe4] sm:$0xf]  ;;  %v11800_v62 = vld [vmem:[%s15787_s4 + $0xec] sm:$0xf0] }
 0x61d   : > { %v11001_v4 = vor.u32 %v11800_v62, %v11000_v60  ;;  %v11795_v45 = vld [vmem:[%s15787_s4 + $0xc4] sm:$0xf0]  ;;  %v11792_v60 = vld [vmem:[%s15787_s4 + $0xac] sm:$0xf0] }
 0x61e   : > { %v1887_v11 = vpop.f32.mrf.mxu1  ;;  %2434 = vmatpush.bf16.msrb.mxu2 %v10783_v49  ;;  %2593 = vmatpush.bf16.msrb.mxu3 %v10876_v63  ;;  %v11807_v49 = vld [vmem:[%s15787_s4 + $0x124] sm:$0xf0]  ;;  %v11063_v62 = vld [vmem:[%s15787_s4 + $0x30] sm:$0xf] }
 0x61f   : > { %v1872_v17 = vpop.f32.mrf.mxu0  ;;  %2606 = vmatpush.bf16.msra.mxu0 %v10880_v54  ;;  %v11033_v63 = vor.u32 %v11807_v49, %v11032_v57  ;;  %v11802_v54 = vld [vmem:[%s15787_s4 + $0x100] sm:$0xf]  ;;  %v10972_v49 = vld [vmem:[%s15787_s4 + $0xa4] sm:$0xf] }
 0x620   : > { %v1873_v20 = vadd.f32 %v1872_v17, %v12840_v56  ;;  %v3465_v56 = vsel %vm374_vm6, %v3461_v51, %v3462_v6  ;;  %v2774_v51 = vunpack.c.l.b16 %v10960_v28  ;;  %v11017_v14 = vor.u32 %v11802_v54, %v11014_v7  ;;  %v10988_v17 = vld [vmem:[%s15787_s4 + $0xcc] sm:$0xf]  ;;  %v11787_v54 = vld [vmem:[%s15787_s4 + $0x7c] sm:$0xf]  ;;  %v11101_v7 = vld [vmem:[%s15787_s4 + $0x84] sm:$0xf0] }
 0x621   : > { %v3466_v6 = vsel %vm2638_vm3, %v3465_v56, %v12860_v3  ;;  %v10961_v3 = vld [vmem:[%s15787_s4 + $0x134] sm:$0x3]  ;;  %v11788_v56 = vld [vmem:[%s15787_s4 + $0x80] sm:$0xf0] }
 0x622   : > { %v1889_v5 = vadd.f32 %v1873_v20, %v12795_v23  ;;  %2435 = vmatpush.bf16.msrb.mxu2 %v10771_v16  ;;  %2594 = vmatpush.bf16.msrb.mxu3 %v10864_v2  ;;  %v13070_v23 = vpack.c.b16 %v3489_v22, %v3489_v22  ;;  %v2795_v29 = vpack.c.b16 %v2774_v51, %v2774_v51  ;;  %v3487_v34 = vunpack.c.l.b16 %v3466_v6  ;;  %v11008_v22 = vld [vmem:[%s15787_s4 + $0xec] sm:$0xf]  ;;  %v10990_v51 = vld [vmem:[%s15787_s4 + $0xd8] sm:$0xf0] }
 0x623   : > { %2607 = vmatpush.bf16.msra.mxu0 %v10868_v53  ;;  %v2776_v36 = vunpack.c.l.b16 %v10961_v3  ;;  %v3488_v59 = vunpack.c.h.b16 %v3466_v6  ;;  %v11021_v16 = vor.u32 %v11804_v9, %v11020_v8  ;;  %v2960_v2 = vpack.c.b16 %v2939_v15, %v2939_v15  ;;  %v11797_v53 = vld [vmem:[%s15787_s4 + $0xd4] sm:$0xf0]  ;;  %v10996_v6 = vld [vmem:[%s15787_s4 + $0xd4] sm:$0xf] }
 0x624   : > { %v1891_v25 = vmax.f32 %v1889_v5, 0.0  ;;  %3497 = vrot.lane.b32.xlu1 %v13054_v52, %s15842_s17  ;;  %v2820_v35 = vsel %vm2055_vm0, %v2795_v29, 0  ;;  %v13097_v42 = vpack.c.b16 %v3487_v34, %v3487_v34  ;;  %v10989_v20 = vor.u32 %v11797_v53, %v10988_v17  ;;  %v11002_v5 = vld [vmem:[%s15787_s4 + $0xf0] sm:$0xf0] }
 0x625   : > { %v2797_v39 = vpack.c.b16 %v2776_v36, %v2776_v36  ;;  %v13148_v11 = vpack.c.b16 %v3488_v59, %v3488_v59  ;;  %v2985_v1 = vsel %vm2055_vm0, %v2960_v2, 0  ;;  %v11088_v3 = vor.u32 %v11785_v19, %v11087_v32  ;;  %v11791_v36 = vld [vmem:[%s15787_s4 + $0xa4] sm:$0xf0]  ;;  %v11790_v59 = vld [vmem:[%s15787_s4 + $0xa0] sm:$0xf] }
 0x626   : > { %v1893_v24 = vpack.c.bf16 %v1892_v21, %v1891_v25  ;;  %2829 = vmatpush.bf16.msra.mxu2 %v2820_v35  ;;  %2994 = vmatpush.bf16.msrb.mxu1 %v2985_v1  ;;  %v11005_v21 = vor.u32 %v11799_v58, %v11002_v5  ;;  %v11801_v25 = vld [vmem:[%s15787_s4 + $0xf4] sm:$0xf0]  ;;  %v2940_v34 = vunpack.c.h.b16 %v2673_v12  ;;  %v10964_v35 = vld [vmem:[%s15787_s4 + $0x9c] sm:$0xf]  ;;  %v10973_v8 = vor.u32 %v11792_v60, %v10972_v49  ;;  %v11784_v58 = vld [vmem:[%s15787_s4 + $0x64] sm:$0xf] }
 0x627   : > { %v1874_v26 = vpop.f32.mrf.mxu0  ;;  %v2826_v43 = vsel %vm2055_vm0, %v2797_v39, 0  ;;  %v10978_v39 = vld [vmem:[%s15787_s4 + $0xc0] sm:$0xf0]  ;;  %v2674_v12 = vld [vmem:[%s15787_s4 + $0x98] sm:$0x3]  ;;  %v11104_v15 = vor.u32 %v11787_v54, %v11101_v7 }
 0x628   : > { %10834 = vmatmul.msk.bf16.vlgmr.msrb.gmra.mxu2 %vm2051_vm1, %v12998_v38  ;;  %10933 = vmatmul.msk.bf16.vlgmr.msrb.gmra.mxu3 %vm2051_vm1, %v1893_v24  ;;  %v3254_v0 = vunpack.c.h.b16 %v1893_v24  ;;  %v3253_v27 = vunpack.c.l.b16 %v1893_v24  ;;  %v2796_v38 = vpack.c.b16 %v2775_v33, %v2775_v33  ;;  %v11009_v26 = vor.u32 %v11801_v25, %v11008_v22  ;;  %v11051_v1 = vld [vmem:[%s15787_s4 + $0x18] sm:$0xf]  ;;  %v11107_v22 = vld [vmem:[%s15787_s4 + $0x80] sm:$0xf]  ;;  %v11789_v25 = vld [vmem:[%s15787_s4 + $0x88] sm:$0xf0] }
 0x629   : > { %10934 = vmatmul.msk.bf16.vlgmr.msra.gmra.mxu0 %vm2051_vm1, %v1893_v24  ;;  %10935 = vmatmul.msk.bf16.vlgmr.msra.gmra.mxu1 %vm2051_vm1, %v1893_v24  ;;  %v11099_v24 = vld [vmem:[%s15787_s4 + $0x78] sm:$0xf]  ;;  %v10997_v33 = vor.u32 %v11798_v30, %v10996_v6  ;;  %v11108_v6 = vor.u32 %v11789_v25, %v11107_v22  ;;  %v11095_v19 = vld [vmem:[%s15787_s4 + $0x68] sm:$0xf]  ;;  %v11178_v22 = vld [vmem:[%s15787_s4 + $0x18c] sm:$0xf0] }
 0x62a   : > { %v3256_v47 = vpack.c.b16 %v3254_v0, %v3254_v0  ;;  %v3255_v61 = vpack.c.b16 %v3253_v27, %v3253_v27  ;;  %v2823_v41 = vsel %vm2055_vm0, %v2796_v38, 0  ;;  %2830 = vmatpush.bf16.msra.mxu2 %v11025_v37  ;;  %2855 = vmatpush.bf16.msrb.mxu0 %v2826_v43  ;;  %v10976_v0 = vld [vmem:[%s15787_s4 + $0xb4] sm:$0xf]  ;;  %v11794_v27 = vld [vmem:[%s15787_s4 + $0xbc] sm:$0xf0]  ;;  %v11100_v28 = vor.u32 %v11788_v56, %v11099_v24 }
 0x62b   : > { %2842 = vmatpush.bf16.msra.mxu3 %v2823_v41  ;;  %v10965_v37 = vor.u32 %v11791_v36, %v10964_v35  ;;  %v11793_v38 = vld [vmem:[%s15787_s4 + $0xb8] sm:$0xf]  ;;  %v10984_v41 = vld [vmem:[%s15787_s4 + $0xbc] sm:$0xf]  ;;  %v2961_v43 = vpack.c.b16 %v2940_v34, %v2940_v34  ;;  %v11821_v36 = vld [vmem:[%s15787_s4 + $0x1a0] sm:$0xf0] }
 0x62c   : > { %3505 = vrot.lane.b32.xlu1 %v13070_v23, %s15842_s17  ;;  %3259 = vrot.lane.b32.xlu0 %v3256_v47, %s11988_s21  ;;  %v10977_v47 = vor.u32 %v11794_v27, %v10976_v0  ;;  %v10981_v44 = vor.u32 %v11793_v38, %v10978_v39  ;;  %v10985_v18 = vor.u32 %v11795_v45, %v10984_v41  ;;  %v11200_v0 = vld [vmem:[%s15787_s4 + $0x1b0] sm:$0xf]  ;;  %v11824_v27 = vld [vmem:[%s15787_s4 + $0x1b8] sm:$0xf0] }
 0x62d   : > { %3257 = vrot.lane.b32.xlu2 %v3255_v61, %s11988_s21  ;;  %s15843_s21 = smov 126   ;;  %v11796_v61 = vld [vmem:[%s15787_s4 + $0xd0] sm:$0xf]  ;;  %2995 = vmatpush.bf16.msrb.mxu1 %v11100_v28  ;;  %v2988_v57 = vsel %vm2055_vm0, %v2961_v43, 0  ;;  %v11039_v28 = vld [vmem:[%s15787_s4] sm:$0xf]  ;;  %v11201_v30 = vor.u32 %v11824_v27, %v11200_v0 }
 0x62e   : > { %2831 = vmatpush.bf16.msra.mxu2 %v11013_v48  ;;  %2856 = vmatpush.bf16.msrb.mxu0 %v11033_v63  ;;  %v10993_v29 = vor.u32 %v11796_v61, %v10990_v51  ;;  %v11782_v48 = vld [vmem:[%s15787_s4 + $0x50] sm:$0xf0]  ;;  %v11781_v61 = vld [vmem:[%s15787_s4 + $0x4c] sm:$0xf]  ;;  %v11188_v35 = vld [vmem:[%s15787_s4 + $0x198] sm:$0xf] }
 0x62f   : > { %2843 = vmatpush.bf16.msra.mxu3 %v11029_v31  ;;  %v11076_v50 = vor.u32 %v11782_v48, %v11075_v46  ;;  %v10966_v31 = vld [vmem:[%s15787_s4 + $0xa8] sm:$0xf0]  ;;  %v11778_v39 = vld [vmem:[%s15787_s4 + $0x34] sm:$0xf]  ;;  %v11065_v41 = vld [vmem:[%s15787_s4 + $0x3c] sm:$0xf0]  ;;  %v11189_v43 = vor.u32 %v11821_v36, %v11188_v35 }
 0x630   : > { %v10969_v63 = vor.u32 %v11790_v59, %v10966_v31  ;;  %v11783_v45 = vld [vmem:[%s15787_s4 + $0x58] sm:$0xf0]  ;;  %v11176_v46 = vld [vmem:[%s15787_s4 + $0x180] sm:$0xf]  ;;  %v11068_v48 = vor.u32 %v11778_v39, %v11065_v41  ;;  %v11053_v49 = vld [vmem:[%s15787_s4 + $0x24] sm:$0xf0] }
 0x631   : > { %2996 = vmatpush.bf16.msrb.mxu1 %v11088_v3  ;;  %v11775_v31 = vld [vmem:[%s15787_s4 + $0x1c] sm:$0xf]  ;;  %v11164_v54 = vld [vmem:[%s15787_s4 + $0x168] sm:$0xf]  ;;  %v11774_v0 = vld [vmem:[%s15787_s4 + $0x10] sm:$0xf0] }
 0x632   : > { %2832 = vmatpush.bf16.msra.mxu2 %v11001_v4  ;;  %2857 = vmatpush.bf16.msrb.mxu0 %v11021_v16  ;;  %v11779_v4 = vld [vmem:[%s15787_s4 + $0x38] sm:$0xf0]  ;;  %v2941_v16 = vunpack.c.l.b16 %v2674_v12  ;;  %v11056_v7 = vor.u32 %v11775_v31, %v11053_v49  ;;  %v11190_v12 = vld [vmem:[%s15787_s4 + $0x1a4] sm:$0xf0]  ;;  %v11140_v27 = vld [vmem:[%s15787_s4 + $0x138] sm:$0xf] }
 0x633   : > { %2844 = vmatpush.bf16.msra.mxu3 %v11017_v14  ;;  %v11064_v9 = vor.u32 %v11779_v4, %v11063_v62  ;;  %v11136_v14 = vld [vmem:[%s15787_s4 + $0x1c8] sm:$0x33]  ;;  %v11780_v4 = vld [vmem:[%s15787_s4 + $0x40] sm:$0xf0]  ;;  %v11137_v35 = vld [vmem:[%s15787_s4 + $0x1d0] sm:$0x3] }
 0x634   : > { %3714 = vrot.lane.b32.xlu1 %v13054_v52, %s15843_s21  ;;  %3501 = vrot.lane.b32.xlu0 %v13097_v42, %s15842_s17  ;;  %v3130_v2 = vunpack.c.l.b16 %v11136_v14  ;;  %v2962_v17 = vpack.c.b16 %v2941_v16, %v2941_v16  ;;  %v3131_v51 = vunpack.c.h.b16 %v11136_v14  ;;  %v11772_v16 = vld [vmem:[%s15787_s4 + $0x4] sm:$0xf] }
 0x635   : > { %3499 = vrot.lane.b32.xlu2 %v13094_v40, %s15842_s17  ;;  %2997 = vmatpush.bf16.msrb.mxu1 %v11076_v50  ;;  %v11823_v50 = vld [vmem:[%s15787_s4 + $0x1b4] sm:$0xf]  ;;  %v11237_v36 = vld [vmem:[%s15787_s4 + $0x264] sm:$0x33] }
 0x636   : > { %2833 = vmatpush.bf16.msra.mxu2 %v10989_v20  ;;  %2858 = vmatpush.bf16.msrb.mxu0 %v11009_v26  ;;  %v3151_v53 = vpack.c.b16 %v3130_v2, %v3130_v2  ;;  %v11776_v20 = vld [vmem:[%s15787_s4 + $0x20] sm:$0xf0]  ;;  %v2991_v24 = vsel %vm2055_vm0, %v2962_v17, 0  ;;  %v3152_v3 = vpack.c.b16 %v3131_v51, %v3131_v51  ;;  %v11041_v2 = vld [vmem:[%s15787_s4 + $0xc] sm:$0xf0]  ;;  %v3324_v41 = vunpack.c.l.b16 %v11237_v36 }
 0x637   : > { %2845 = vmatpush.bf16.msra.mxu3 %v11005_v21  ;;  %v11052_v5 = vor.u32 %v11776_v20, %v11051_v1  ;;  %v11089_v21 = vld [vmem:[%s15787_s4 + $0x6c] sm:$0xf0]  ;;  %v11777_v1 = vld [vmem:[%s15787_s4 + $0x28] sm:$0xf0]  ;;  %v11825_v31 = vld [vmem:[%s15787_s4 + $0x1c0] sm:$0xf0] }
 0x638   : > { %v3176_v26 = vsel %vm2055_vm0, %v3151_v53, 0  ;;  %v11092_v56 = vor.u32 %v11784_v58, %v11089_v21  ;;  %v11059_v53 = vld [vmem:[%s15787_s4 + $0x20] sm:$0xf]  ;;  %v11152_v20 = vld [vmem:[%s15787_s4 + $0x150] sm:$0xf]  ;;  %v11044_v58 = vor.u32 %v11772_v16, %v11041_v2 }
 0x639   : > { %2998 = vmatpush.bf16.msrb.mxu1 %v11064_v9  ;;  %v11820_v9 = vld [vmem:[%s15787_s4 + $0x19c] sm:$0xf]  ;;  %v11817_v21 = vld [vmem:[%s15787_s4 + $0x184] sm:$0xf] }
 0x63a   : > { %2834 = vmatpush.bf16.msra.mxu2 %v10977_v47  ;;  %2859 = vmatpush.bf16.msrb.mxu0 %v10997_v33  ;;  %v11773_v47 = vld [vmem:[%s15787_s4 + $0x8] sm:$0xf0]  ;;  %v11786_v33 = vld [vmem:[%s15787_s4 + $0x70] sm:$0xf0]  ;;  %v11193_v14 = vor.u32 %v11820_v9, %v11190_v12  ;;  %v11181_v25 = vor.u32 %v11817_v21, %v11178_v22  ;;  %v11184_v21 = vld [vmem:[%s15787_s4 + $0x188] sm:$0xf] }
 0x63b   : > { %2846 = vmatpush.bf16.msra.mxu3 %v10993_v29  ;;  %v11077_v29 = vld [vmem:[%s15787_s4 + $0x54] sm:$0xf0]  ;;  %v11040_v32 = vor.u32 %v11773_v47, %v11039_v28  ;;  %v11096_v38 = vor.u32 %v11786_v33, %v11095_v19  ;;  %v11809_v28 = vld [vmem:[%s15787_s4 + $0x140] sm:$0xf0]  ;;  %v11814_v47 = vld [vmem:[%s15787_s4 + $0x16c] sm:$0xf] }
 0x63c   : > { %3722 = vrot.lane.b32.xlu1 %v13070_v23, %s15843_s21  ;;  %3503 = vrot.lane.b32.xlu0 %v13148_v11, %s15842_s17  ;;  %v11080_v34 = vor.u32 %v11781_v61, %v11077_v29  ;;  %v11166_v61 = vld [vmem:[%s15787_s4 + $0x174] sm:$0xf0]  ;;  %v11141_v29 = vor.u32 %v11809_v28, %v11140_v27  ;;  %v11808_v33 = vld [vmem:[%s15787_s4 + $0x13c] sm:$0xf] }
 0x63d   : > { %3507 = vrot.lane.b32.xlu2 %v13146_v13, %s15842_s17  ;;  %2999 = vmatpush.bf16.msrb.mxu1 %v11052_v5  ;;  %v11812_v5 = vld [vmem:[%s15787_s4 + $0x158] sm:$0xf0] }
 0x63e   : > { %2835 = vmatpush.bf16.msra.mxu2 %v10965_v37  ;;  %2860 = vmatpush.bf16.msrb.mxu0 %v10985_v18  ;;  %v3179_v37 = vsel %vm2055_vm0, %v3152_v3, 0  ;;  %v11818_v18 = vld [vmem:[%s15787_s4 + $0x188] sm:$0xf0]  ;;  %v11142_v3 = vld [vmem:[%s15787_s4 + $0x144] sm:$0xf0] }
 0x63f   : > { %2847 = vmatpush.bf16.msra.mxu3 %v10981_v44  ;;  %v11083_v44 = vld [vmem:[%s15787_s4 + $0x50] sm:$0xf]  ;;  %v11177_v62 = vor.u32 %v11818_v18, %v11176_v46  ;;  %v11277_v27 = vld [vmem:[%s15787_s4 + $0x21c] sm:$0xf] }
 0x640   : > { %v11084_v60 = vor.u32 %v11783_v45, %v11083_v44  ;;  %v3345_v45 = vpack.c.b16 %v3324_v41, %v3324_v41  ;;  %v11833_v41 = vld [vmem:[%s15787_s4 + $0x20c] sm:$0xf0] }
 0x641   : > { %3000 = vmatpush.bf16.msrb.mxu1 %v11040_v32  ;;  %v11154_v32 = vld [vmem:[%s15787_s4 + $0x15c] sm:$0xf0] }
 0x642   : > { %3007 = vmatpush.bf16.msrb.mxu2 %v2988_v57  ;;  %2861 = vmatpush.bf16.msrb.mxu0 %v10973_v8  ;;  %v11202_v57 = vld [vmem:[%s15787_s4 + $0x1bc] sm:$0xf0]  ;;  %v11815_v8 = vld [vmem:[%s15787_s4 + $0x170] sm:$0xf0]  ;;  %v3370_v49 = vsel %vm2055_vm0, %v3345_v45, 0 }
 0x643   : > { %2848 = vmatpush.bf16.msra.mxu3 %v10969_v63  ;;  %v11205_v59 = vor.u32 %v11823_v50, %v11202_v57  ;;  %v11071_v63 = vld [vmem:[%s15787_s4 + $0x38] sm:$0xf]  ;;  %v11165_v17 = vor.u32 %v11815_v8, %v11164_v54  ;;  %v11303_v8 = vld [vmem:[%s15787_s4 + $0x258] sm:$0xf0] }
 0x644   : > { %3842 = vrot.lane.b32.xlu1 %v13097_v42, %s15810_s0  ;;  %3718 = vrot.lane.b32.xlu0 %v13097_v42, %s15843_s21  ;;  %v11208_v57 = vld [vmem:[%s15787_s4 + $0x1b8] sm:$0xf]  ;;  %s15816_s0 = smov 91  }
 0x645   : > { %3716 = vrot.lane.b32.xlu2 %v13094_v40, %s15843_s21  ;;  %3198 = vmatpush.bf16.msra.mxu1 %v3179_v37  ;;  %v11842_v54 = vld [vmem:[%s15787_s4 + $0x254] sm:$0xf0]  ;;  %v11209_v12 = vor.u32 %v11825_v31, %v11208_v57 }
 0x646   : > { %3008 = vmatpush.bf16.msrb.mxu2 %v11104_v15  ;;  %3185 = vmatpush.bf16.msra.mxu0 %v3176_v26  ;;  %v11072_v15 = vor.u32 %v11780_v4, %v11071_v63  ;;  %v11153_v26 = vor.u32 %v11812_v5, %v11152_v20  ;;  %v11838_v20 = vld [vmem:[%s15787_s4 + $0x238] sm:$0xf] }
 0x647   : > { %3020 = vmatpush.bf16.msrb.mxu3 %v2991_v24  ;;  %v11060_v24 = vor.u32 %v11777_v1, %v11059_v53  ;;  %v11839_v1 = vld [vmem:[%s15787_s4 + $0x23c] sm:$0xf0]  ;;  %v11160_v57 = vld [vmem:[%s15787_s4 + $0x158] sm:$0xf] }
 0x649   : > { %3199 = vmatpush.bf16.msra.mxu1 %v11205_v59 }
 0x64a   : > { %3009 = vmatpush.bf16.msrb.mxu2 %v11092_v56  ;;  %3186 = vmatpush.bf16.msra.mxu0 %v11201_v30  ;;  %v11047_v56 = vld [vmem:[%s15787_s4 + $0x8] sm:$0xf]  ;;  %v11811_v30 = vld [vmem:[%s15787_s4 + $0x154] sm:$0xf] }
 0x64b   : > { %3021 = vmatpush.bf16.msrb.mxu3 %v11108_v6  ;;  %v11048_v51 = vor.u32 %v11774_v0, %v11047_v56  ;;  %v11169_v6 = vor.u32 %v11814_v47, %v11166_v61  ;;  %v11157_v19 = vor.u32 %v11811_v30, %v11154_v32  ;;  %v11836_v47 = vld [vmem:[%s15787_s4 + $0x224] sm:$0xf0]  ;;  %v11835_v61 = vld [vmem:[%s15787_s4 + $0x220] sm:$0xf] }
 0x64c   : > { %3838 = vrot.lane.b32.xlu1 %v13054_v52, %s15844_s19  ;;  %3720 = vrot.lane.b32.xlu0 %v13148_v11, %s15843_s21  ;;  %v11843_v30 = vld [vmem:[%s15787_s4 + $0x25c] sm:$0xf0] }
 0x64d   : > { %3724 = vrot.lane.b32.xlu2 %v13146_v13, %s15843_s21  ;;  %3200 = vmatpush.bf16.msra.mxu1 %v11193_v14  ;;  %v11196_v14 = vld [vmem:[%s15787_s4 + $0x1a0] sm:$0xf] }
 0x64e   : > { %3010 = vmatpush.bf16.msrb.mxu2 %v11080_v34  ;;  %3187 = vmatpush.bf16.msra.mxu0 %v11189_v43  ;;  %v11145_v34 = vor.u32 %v11808_v33, %v11142_v3  ;;  %v3325_v43 = vunpack.c.h.b16 %v11237_v36  ;;  %v11816_v33 = vld [vmem:[%s15787_s4 + $0x178] sm:$0xf0]  ;;  %v11278_v3 = vor.u32 %v11836_v47, %v11277_v27 }
 0x64f   : > { %3022 = vmatpush.bf16.msrb.mxu3 %v11096_v38  ;;  %v3132_v38 = vunpack.c.l.b16 %v11137_v35  ;;  %v11265_v35 = vld [vmem:[%s15787_s4 + $0x204] sm:$0xf] }
 0x650   : > { %v3346_v46 = vpack.c.b16 %v3325_v43, %v3325_v43  ;;  %v11832_v43 = vld [vmem:[%s15787_s4 + $0x208] sm:$0xf]  ;;  %v11266_v31 = vor.u32 %v11833_v41, %v11265_v35 }
 0x651   : > { %3201 = vmatpush.bf16.msra.mxu1 %v11181_v25  ;;  %v3153_v44 = vpack.c.b16 %v3132_v38, %v3132_v38 }
 0x652   : > { %3011 = vmatpush.bf16.msrb.mxu2 %v11068_v48  ;;  %3188 = vmatpush.bf16.msra.mxu0 %v11177_v62  ;;  %v11238_v48 = vld [vmem:[%s15787_s4 + $0x26c] sm:$0x3] }
 0x653   : > { %3023 = vmatpush.bf16.msrb.mxu3 %v11084_v60  ;;  %v3182_v50 = vsel %vm2055_vm0, %v3153_v44, 0  ;;  %v3373_v60 = vsel %vm2055_vm0, %v3346_v46, 0  ;;  %v11301_v62 = vld [vmem:[%s15787_s4 + $0x24c] sm:$0xf]  ;;  %v3326_v63 = vunpack.c.l.b16 %v11238_v48  ;;  %v11267_v44 = vld [vmem:[%s15787_s4 + $0x210] sm:$0xf0] }
 0x654   : > { %3965 = vrot.lane.b32.xlu1 %v13094_v40, %s15812_s18  ;;  %3846 = vrot.lane.b32.xlu0 %v13070_v23, %s15844_s19  ;;  %v11302_v16 = vor.u32 %v11842_v54, %v11301_v62  ;;  %v11297_v46 = vld [vmem:[%s15787_s4 + $0x23c] sm:$0xf]  ;;  %v11840_v48 = vld [vmem:[%s15787_s4 + $0x244] sm:$0xf0]  ;;  %s11933_s18 = scalar_lea.hbm %s15791_s8, 96 }
 0x655   : > { %3844 = vrot.lane.b32.xlu2 %v13148_v11, %s15844_s19  ;;  %3202 = vmatpush.bf16.msra.mxu1 %v11169_v6  ;;  %v3347_v53 = vpack.c.b16 %v3326_v63, %v3326_v63  ;;  %v11298_v63 = vor.u32 %v11840_v48, %v11297_v46  ;;  %v11829_v54 = vld [vmem:[%s15787_s4 + $0x1f0] sm:$0xf] }
 0x656   : > { %3012 = vmatpush.bf16.msrb.mxu2 %v11056_v7  ;;  %3189 = vmatpush.bf16.msra.mxu0 %v11165_v17  ;;  %v11841_v7 = vld [vmem:[%s15787_s4 + $0x250] sm:$0xf]  ;;  %v11289_v17 = vld [vmem:[%s15787_s4 + $0x234] sm:$0xf] }
 0x657   : > { %3024 = vmatpush.bf16.msrb.mxu3 %v11072_v15  ;;  %v11822_v15 = vld [vmem:[%s15787_s4 + $0x1a8] sm:$0xf0]  ;;  %v11306_v2 = vor.u32 %v11841_v7, %v11303_v8  ;;  %v3376_v0 = vsel %vm2055_vm0, %v3347_v53, 0  ;;  %v11255_v7 = vld [vmem:[%s15787_s4 + $0x1f8] sm:$0xf0]  ;;  %vm3850_vm0 = vcmask 900096  }
 0x658   : > { %v11197_v5 = vor.u32 %v11822_v15, %v11196_v14  ;;  %v11258_v53 = vor.u32 %v11829_v54, %v11255_v7 }
 0x659   : > { %3203 = vmatpush.bf16.msra.mxu1 %v11157_v19  ;;  %v11172_v19 = vld [vmem:[%s15787_s4 + $0x170] sm:$0xf] }
 0x65a   : > { %3013 = vmatpush.bf16.msrb.mxu2 %v11044_v58  ;;  %3190 = vmatpush.bf16.msra.mxu0 %v11153_v26  ;;  %v11291_v58 = vld [vmem:[%s15787_s4 + $0x240] sm:$0xf0]  ;;  %v11290_v26 = vor.u32 %v11839_v1, %v11289_v17  ;;  %v11241_v1 = vld [vmem:[%s15787_s4 + $0x1d4] sm:$0xf] }
 0x65b   : > { %3025 = vmatpush.bf16.msrb.mxu3 %v11060_v24  ;;  %v11819_v24 = vld [vmem:[%s15787_s4 + $0x190] sm:$0xf0]  ;;  %v11294_v56 = vor.u32 %v11838_v20, %v11291_v58 }
 0x65c   : > { %3971 = vrot.lane.b32.xlu1 %v13070_v23, %s15845_s23  ;;  %3963 = vrot.lane.b32.xlu0 %v13054_v52, %s15845_s23  ;;  %v11185_v32 = vor.u32 %v11819_v24, %v11184_v21  ;;  %v11827_v21 = vld [vmem:[%s15787_s4 + $0x1dc] sm:$0xf0]  ;;  %v11243_v24 = vld [vmem:[%s15787_s4 + $0x1e0] sm:$0xf0] }
 0x65d   : > { %3840 = vrot.lane.b32.xlu2 %v13094_v40, %s15844_s19  ;;  %3204 = vmatpush.bf16.msra.mxu1 %v11145_v34  ;;  %v11242_v47 = vor.u32 %v11827_v21, %v11241_v1 }
 0x65e   : > { %3191 = vmatpush.bf16.msra.mxu0 %v11141_v29  ;;  %v11309_v29 = vld [vmem:[%s15787_s4 + $0x254] sm:$0xf] }
 0x65f   : > { %3026 = vmatpush.bf16.msrb.mxu3 %v11048_v51  ;;  %v11279_v51 = vld [vmem:[%s15787_s4 + $0x228] sm:$0xf0] }
 0x660   : > { %v11282_v34 = vor.u32 %v11835_v61, %v11279_v51 }
 0x664   : > { %4092 = vrot.lane.b32.xlu1 %v13097_v42, %s15835_s12  ;;  %3848 = vrot.lane.b32.xlu0 %v13146_v13, %s15844_s19 }
 0x665   : > { %3967 = vrot.lane.b32.xlu2 %v13097_v42, %s15845_s23 }
 0x666   : > { %v2709_v39 = vpop.permute.xlu2 %2708 }
 0x66c   : > { %4088 = vrot.lane.b32.xlu1 %v13054_v52, %s15835_s12  ;;  %3969 = vrot.lane.b32.xlu0 %v13148_v11, %s15845_s23 }
 0x66d   : > { %3973 = vrot.lane.b32.xlu2 %v13146_v13, %s15845_s23 }
 0x66e   : > { %v2875_v9 = vpop.permute.xlu2 %2874 }
 0x674   : > { %4214 = vrot.lane.b32.xlu1 %v13094_v40, %s15814_s1  ;;  %4096 = vrot.lane.b32.xlu0 %v13070_v23, %s15835_s12 }
 0x675   : > { %4094 = vrot.lane.b32.xlu2 %v13148_v11, %s15835_s12  ;;  %v13461_v37 = vpop.f32.mrf.mxu1 }
 0x67c   : > { %4220 = vrot.lane.b32.xlu1 %v13070_v23, %s15814_s1  ;;  %4212 = vrot.lane.b32.xlu0 %v13054_v52, %s15814_s1 }
 0x67d   : > { %4090 = vrot.lane.b32.xlu2 %v13094_v40, %s15835_s12  ;;  %v2231_v18 = vpop.f32.mrf.mxu1 }
 0x67e   : > { %v2707_v59 = vpop.permute.xlu1 %2706  ;;  %v11173_v18 = vor.u32 %v11816_v33, %v11172_v19  ;;  %v11261_v19 = vld [vmem:[%s15787_s4 + $0x1f4] sm:$0xf]  ;;  %v11831_v33 = vld [vmem:[%s15787_s4 + $0x1fc] sm:$0xf0] }
 0x67f   : > { %v2711_v4 = vsel %vm2710_vm15, %v2707_v59, %v2709_v39  ;;  %v11310_v39 = vor.u32 %v11843_v30, %v11309_v29  ;;  %v11813_v59 = vld [vmem:[%s15787_s4 + $0x160] sm:$0xf0] }
 0x680   : > { %11034 = vmatmul.msk.bf16.vlgmr.msra.gmra.mxu2 %vm2051_vm1, %v2711_v4  ;;  %11035 = vmatmul.msk.bf16.vlgmr.msra.gmra.mxu3 %vm2051_vm1, %v2711_v4  ;;  %v11161_v14 = vor.u32 %v11813_v59, %v11160_v57 }
 0x681   : > { %11036 = vmatmul.msk.bf16.vlgmr.msrb.gmra.mxu0 %vm2051_vm1, %v2711_v4  ;;  %3211 = vmatpush.bf16.msra.mxu2 %v3182_v50  ;;  %v11830_v4 = vld [vmem:[%s15787_s4 + $0x1f4] sm:$0xf0] }
 0x682   : > { %3379 = vmatpush.bf16.msra.mxu3 %v3370_v49  ;;  %3392 = vmatpush.bf16.msrb.mxu0 %v3373_v60  ;;  %v11270_v49 = vor.u32 %v11832_v43, %v11267_v44  ;;  %v11253_v60 = vld [vmem:[%s15787_s4 + $0x1ec] sm:$0xf]  ;;  %v11249_v43 = vld [vmem:[%s15787_s4 + $0x1dc] sm:$0xf]  ;;  %v11828_v44 = vld [vmem:[%s15787_s4 + $0x1e4] sm:$0xf0] }
 0x683   : > { %v11254_v17 = vor.u32 %v11830_v4, %v11253_v60 }
 0x684   : > { %4341 = vrot.lane.b32.xlu1 %v13097_v42, %s15816_s0  ;;  %4098 = vrot.lane.b32.xlu0 %v13146_v13, %s15835_s12  ;;  %s11994_s0 = smov 87  }
 0x685   : > { %3212 = vmatpush.bf16.msra.mxu2 %v11209_v12  ;;  %4216 = vrot.lane.b32.xlu2 %v13097_v42, %s15846_s26  ;;  %v11837_v12 = vld [vmem:[%s15787_s4 + $0x22c] sm:$0xf0] }
 0x686   : > { %v13524_v22 = vpop.f32.mrf.mxu0  ;;  %v2873_v25 = vpop.permute.xlu1 %2872  ;;  %3380 = vmatpush.bf16.msra.mxu3 %v11302_v16  ;;  %3393 = vmatpush.bf16.msrb.mxu0 %v11306_v2  ;;  %v11148_v16 = vld [vmem:[%s15787_s4 + $0x140] sm:$0xf]  ;;  %v11810_v2 = vld [vmem:[%s15787_s4 + $0x148] sm:$0xf0] }
 0x687   : > { %v2876_v28 = vsel %vm2710_vm15, %v2873_v25, %v2875_v9  ;;  %v13543_v6 = vpop.permute.xlu2 %3257  ;;  %v11285_v9 = vld [vmem:[%s15787_s4 + $0x224] sm:$0xf]  ;;  %v11826_v25 = vld [vmem:[%s15787_s4 + $0x1d8] sm:$0xf] }
 0x688   : > { %11109 = vmatmul.msk.bf16.vlgmr.msrb.gmra.mxu1 %vm2051_vm1, %v2876_v28  ;;  %v11246_v29 = vor.u32 %v11826_v25, %v11243_v24  ;;  %v3626_v25 = vsel %vm374_vm6, %v13148_v11, 0 }
 0x689   : > { %3213 = vmatpush.bf16.msra.mxu2 %v11197_v5  ;;  %3405 = vmatpush.bf16.msrb.mxu1 %v3376_v0  ;;  %v11286_v5 = vor.u32 %v11837_v12, %v11285_v9  ;;  %v11149_v0 = vor.u32 %v11810_v2, %v11148_v16 }
 0x68a   : > { %3381 = vmatpush.bf16.msra.mxu3 %v11290_v26  ;;  %3394 = vmatpush.bf16.msrb.mxu0 %v11294_v56  ;;  %v11273_v26 = vld [vmem:[%s15787_s4 + $0x20c] sm:$0xf]  ;;  %v11834_v56 = vld [vmem:[%s15787_s4 + $0x214] sm:$0xf0] }
 0x68b   : > { %v2074_v36 = vpop.f32.mrf.mxu2  ;;  %v13561_v38 = vpop.f32.mrf.mxu3  ;;  %v11274_v30 = vor.u32 %v11834_v56, %v11273_v26 }
 0x68c   : > { %v2230_v45 = vadd.f32 %v13461_v37, %v2074_v36  ;;  %4337 = vrot.lane.b32.xlu1 %v13054_v52, %s15847_s24  ;;  %4218 = vrot.lane.b32.xlu0 %v13148_v11, %s15846_s26  ;;  %v11262_v36 = vor.u32 %v11831_v33, %v11261_v19 }
 0x68d   : > { %3214 = vmatpush.bf16.msra.mxu2 %v11185_v32  ;;  %4222 = vrot.lane.b32.xlu2 %v13146_v13, %s15846_s26 }
 0x68e   : > { %v2102_v37 = vpop.f32.mrf.mxu0  ;;  %v3066_v50 = vpop.permute.xlu1 %3065  ;;  %3382 = vmatpush.bf16.msra.mxu3 %v11278_v3  ;;  %3395 = vmatpush.bf16.msrb.mxu0 %v11282_v34 }
 0x68f   : > { %v3064_v62 = vpop.permute.xlu0 %3063  ;;  %3406 = vmatpush.bf16.msrb.mxu1 %v11310_v39  ;;  %v13616_v15 = vpop.permute.xlu2 %3499  ;;  %v11250_v37 = vor.u32 %v11828_v44, %v11249_v43 }
 0x690   : > { %v13604_v8 = vsel %vm2710_vm15, %v3064_v62, %v3066_v50  ;;  %11110 = vmatmul.msk.bf16.vlgmr.msrb.gmra.mxu2 %vm2051_vm1, %v2876_v28  ;;  %11111 = vmatmul.msk.bf16.vlgmr.msrb.gmra.mxu3 %vm2051_vm1, %v2876_v28 }
 0x691   : > { %11210 = vmatmul.msk.bf16.vlgmr.msra.gmra.mxu0 %vm2051_vm1, %v13604_v8  ;;  %3215 = vmatpush.bf16.msra.mxu2 %v11173_v18 }
 0x692   : > { %3383 = vmatpush.bf16.msra.mxu3 %v11266_v31  ;;  %3396 = vmatpush.bf16.msrb.mxu0 %v11270_v49 }
 0x693   : > { %v2076_v20 = vpop.f32.mrf.mxu2  ;;  %v2089_v58 = vpop.f32.mrf.mxu3  ;;  %3407 = vmatpush.bf16.msrb.mxu1 %v11298_v63 }
 0x694   : > { %4464 = vrot.lane.b32.xlu1 %v13094_v40, %s11993_s22  ;;  %4345 = vrot.lane.b32.xlu0 %v13070_v23, %s15847_s24 }
 0x695   : > { %3216 = vmatpush.bf16.msra.mxu2 %v11161_v14  ;;  %4343 = vrot.lane.b32.xlu2 %v13148_v11, %s15847_s24 }
 0x696   : > { %v2411_v27 = vpop.f32.mrf.mxu0  ;;  %v2424_v28 = vpop.f32.mrf.mxu1  ;;  %3384 = vmatpush.bf16.msra.mxu3 %v11254_v17  ;;  %3397 = vmatpush.bf16.msrb.mxu0 %v11258_v53 }
 0x697   : > { %v2441_v61 = vadd.f32 %v2411_v27, %v2230_v45  ;;  %v3498_v51 = vpop.permute.xlu1 %3497  ;;  %3408 = vmatpush.bf16.msrb.mxu1 %v11286_v5  ;;  %v3508_v45 = vpop.permute.xlu2 %3507  ;;  %v3623_v5 = vsel %vm374_vm6, %v13097_v42, 0 }
 0x698   : > { %v3509_v32 = vsel %vm368_vm8, %v3498_v51, %v13616_v15  ;;  %11211 = vmatmul.msk.bf16.vlgmr.msra.gmra.mxu1 %vm2051_vm1, %v13604_v8  ;;  %v3533_v7 = vsel %vm374_vm6, %v3508_v45, 0 }
 0x699   : > { %v3518_v3 = vsel %vm374_vm6, %v3509_v32, 0  ;;  %3217 = vmatpush.bf16.msra.mxu2 %v11149_v0  ;;  %v3617_v0 = vsel %vm374_vm6, %v13054_v52, 0 }
 0x69a   : > { %3385 = vmatpush.bf16.msra.mxu3 %v11242_v47  ;;  %3398 = vmatpush.bf16.msrb.mxu0 %v11246_v29 }
 0x69b   : > { %v2242_v34 = vpop.f32.mrf.mxu2  ;;  %v2255_v35 = vpop.f32.mrf.mxu3  ;;  %3409 = vmatpush.bf16.msrb.mxu1 %v11274_v30 }
 0x69c   : > { %v2243_v39 = vadd.f32 %v2242_v34, %v13561_v38  ;;  %v2256_v41 = vadd.f32 %v2255_v35, %v13524_v22  ;;  %4470 = vrot.lane.b32.xlu1 %v13070_v23, %s11993_s22  ;;  %4462 = vrot.lane.b32.xlu0 %v13054_v52, %s11993_s22  ;;  %v3632_v52 = vsel %vm374_vm6, %v13146_v13, 0 }
 0x69d   : > { %3542 = vmatpush.bf16.msrb.mxu2 %v3518_v3  ;;  %4339 = vrot.lane.b32.xlu2 %v13094_v40, %s15847_s24 }
 0x69e   : > { %v2413_v38 = vpop.f32.mrf.mxu0  ;;  %v2426_v22 = vpop.f32.mrf.mxu1  ;;  %v2442_v46 = vadd.f32 %v2424_v28, %v2243_v39 }
 0x69f   : > { %v3506_v48 = vpop.permute.xlu1 %3505  ;;  %v3260_v18 = vpop.permute.xlu0 %3259  ;;  %3410 = vmatpush.bf16.msrb.mxu1 %v11262_v36 }
 0x6a0   : > { %v3513_v50 = vsel %vm368_vm8, %v3506_v48, %v3508_v45  ;;  %v3261_v57 = vsel %vm2710_vm15, %v13543_v6, %v3260_v18  ;;  %11212 = vmatmul.msk.bf16.vlgmr.msra.gmra.mxu2 %vm2051_vm1, %v13604_v8  ;;  %v3717_v56 = vpop.permute.xlu2 %3716  ;;  %vm3430_vm15 = vcmask 711680  }
 0x6a1   : > { %11311 = vmatmul.msk.bf16.vlgmr.msra.gmra.mxu3 %vm2051_vm1, %v3261_v57  ;;  %11312 = vmatmul.msk.bf16.vlgmr.msrb.gmra.mxu0 %vm2051_vm1, %v3261_v57  ;;  %v3530_v59 = vsel %vm374_vm6, %v3513_v50, 0 }
 0x6a2   : > { %3594 = vmatpush.bf16.msra.mxu2 %v3530_v59 }
 0x6a3   : > { %v2244_v31 = vpop.f32.mrf.mxu2  ;;  %v2257_v49 = vpop.f32.mrf.mxu3  ;;  %3411 = vmatpush.bf16.msrb.mxu1 %v11250_v37 }
 0x6a4   : > { %4347 = vrot.lane.b32.xlu0 %v13146_v13, %s15847_s24 }
 0x6a5   : > { %4466 = vrot.lane.b32.xlu2 %v13097_v42, %s11993_s22  ;;  %v3620_v42 = vsel %vm374_vm6, %v13094_v40, 0 }
 0x6a6   : > { %v2609_v6 = vpop.f32.mrf.mxu0  ;;  %v2622_v60 = vpop.f32.mrf.mxu1 }
 0x6a7   : > { %v13685_v62 = vadd.f32 %v2609_v6, %v2442_v46  ;;  %v3502_v63 = vpop.permute.xlu0 %3501  ;;  %v3715_v21 = vpop.permute.xlu1 %3714 }
 0x6a8   : > { %v3510_v4 = vsel %vm368_vm8, %v13616_v15, %v3502_v63  ;;  %11313 = vmatmul.msk.bf16.vlgmr.msrb.gmra.mxu1 %vm2051_vm1, %v3261_v57  ;;  %v11315_v15 = vld [vmem:[%s15788_s5 + $0x70] sm:$0xf]  ;;  %v3726_v51 = vsel %vm448_vm9, %v3715_v21, %v3717_v56  ;;  %v3725_v40 = vpop.permute.xlu2 %3724  ;;  %v11328_v57 = vld [vmem:[%s15788_s5 + $0x74] sm:$0xf]  ;;  %vm15819_vm1 = vcmask 891904  }
 0x6a9   : > { %v3521_v54 = vsel %vm374_vm6, %v3510_v4, 0  ;;  %v3735_v32 = vsel %vm374_vm6, %v3726_v51, 0  ;;  %v3750_v38 = vsel %vm374_vm6, %v3725_v40, 0 }
 0x6aa   : > { %3555 = vmatpush.bf16.msrb.mxu3 %v3521_v54 }
 0x6ab   : > { %v2437_v8 = vpop.f32.mrf.mxu2  ;;  %v2596_v9 = vpop.f32.mrf.mxu3 }
 0x6ac   : > { %v2443_v12 = vadd.f32 %v2437_v8, %v2256_v41  ;;  %v13692_v14 = vadd.f32 %v2596_v9, %v2441_v61  ;;  %4468 = vrot.lane.b32.xlu0 %v13148_v11, %s11993_s22  ;;  %v3629_v11 = vsel %vm374_vm6, %v13070_v23, 0 }
 0x6ad   : > { %4472 = vrot.lane.b32.xlu2 %v13146_v13, %s11993_s22  ;;  %v11314_v13 = vld [vmem:[%s15788_s5 + $0x6c] sm:$0xf] }
 0x6ae   : > { %3607 = vmatpush.bf16.msra.mxu3 %v3533_v7  ;;  %v13701_v16 = vadd.f32 %v2622_v60, %v2443_v12  ;;  %v2629_v2 = vpack.c.bf16 %v13685_v62, %v13692_v14  ;;  %v2611_v17 = vpop.f32.mrf.mxu0  ;;  %v2624_v53 = vpop.f32.mrf.mxu1  ;;  %v11507_v14 = vld [vmem:[%s15788_s5 + $0xdc] sm:$0xf] }
 0x6af   : > { %v3504_v1 = vpop.permute.xlu0 %3503  ;;  %v3723_v61 = vpop.permute.xlu1 %3722 }
 0x6b0   : > { %v3511_v20 = vsel %vm368_vm8, %v3502_v63, %v3504_v1  ;;  %v3512_v58 = vsel %vm368_vm8, %v3504_v1, %v3506_v48  ;;  %11316 = vmatmul.msk.bf16.vlgmr.msrb.gmra.mxu2 %vm370_vm7, %v11315_v15  ;;  %v3845_v35 = vpop.permute.xlu2 %3844  ;;  %v3730_v41 = vsel %vm448_vm9, %v3723_v61, %v3725_v40  ;;  %v2630_v62 = vpack.c.bf16 %v13701_v16, %v13701_v16 }
 0x6b1   : > { %11317 = vmatmul.msk.bf16.vlgmr.msrb.gmra.mxu3 %vm370_vm7, %v11315_v15  ;;  %3667 = vmatpush.bf16.msrb.mxu2 %v3623_v5  ;;  %v3524_v24 = vsel %vm374_vm6, %v3511_v20, 0  ;;  %v3527_v26 = vsel %vm374_vm6, %v3512_v58, 0  ;;  %v3747_v44 = vsel %vm374_vm6, %v3730_v41, 0  ;;  %v11335_v58 = vld [vmem:[%s15788_s5 + $0x78] sm:$0xf] }
 0x6b2   : > { %3680 = vmatpush.bf16.msrb.mxu3 %v3626_v25  ;;  %3568 = vmatpush.bf16.msra.mxu0 %v3524_v24 }
 0x6b3   : > { %3581 = vmatpush.bf16.msra.mxu1 %v3527_v26  ;;  %v2439_v27 = vpop.f32.mrf.mxu2  ;;  %v2598_v28 = vpop.f32.mrf.mxu3 }
 0x6b5   : > { %11318 = vmatmul.msk.bf16.vlgmr.msra.gmra.mxu0 %vm370_vm7, %v11315_v15 }
 0x6b6   : > { %3641 = vmatpush.bf16.msrb.mxu0 %v3617_v0 }
 0x6b7   : > { %3654 = vmatpush.bf16.msrb.mxu1 %v3620_v42  ;;  %v3719_v47 = vpop.permute.xlu0 %3718  ;;  %v3843_v33 = vpop.permute.xlu1 %3842 }
 0x6b8   : > { %11319 = vmatmul.msk.bf16.vlgmr.msra.gmra.mxu1 %vm370_vm7, %v11315_v15  ;;  %v3727_v29 = vsel %vm448_vm9, %v3717_v56, %v3719_v47  ;;  %v3841_v45 = vpop.permute.xlu2 %3840  ;;  %v3853_v50 = vsel %vm3850_vm0, %v3843_v33, %v3845_v35 }
 0x6b9   : > { %v3738_v23 = vsel %vm374_vm6, %v3727_v29, 0  ;;  %v3852_v46 = vsel %vm3850_vm0, %v3841_v45, %v3843_v33  ;;  %v3866_v49 = vsel %vm374_vm6, %v3853_v50, 0 }
 0x6ba   : > { %3693 = vmatpush.bf16.msra.mxu0 %v3629_v11  ;;  %v3863_v37 = vsel %vm374_vm6, %v3852_v46, 0 }
 0x6bb   : > { %3706 = vmatpush.bf16.msra.mxu1 %v3632_v52 }
 0x6bf   : > { %v3721_v30 = vpop.permute.xlu0 %3720  ;;  %v3839_v43 = vpop.permute.xlu1 %3838 }
 0x6c0   : > { %11320 = vmatmul.msk.bf16.vlgmr.msra.gmra.mxu2 %vm370_vm7, %v11315_v15  ;;  %v3728_v19 = vsel %vm448_vm9, %v3719_v47, %v3721_v30  ;;  %v3729_v3 = vsel %vm448_vm9, %v3721_v30, %v3723_v61  ;;  %v3851_v22 = vsel %vm3850_vm0, %v3839_v43, %v3841_v45  ;;  %v3968_v4 = vpop.permute.xlu2 %3967 }
 0x6c1   : > { %11321 = vmatmul.msk.bf16.vlgmr.msra.gmra.mxu3 %vm370_vm7, %v11315_v15  ;;  %3759 = vmatpush.bf16.msra.mxu2 %v3735_v32  ;;  %v3741_v34 = vsel %vm374_vm6, %v3728_v19, 0  ;;  %v3744_v36 = vsel %vm374_vm6, %v3729_v3, 0  ;;  %v3860_v48 = vsel %vm374_vm6, %v3851_v22, 0 }
 0x6c2   : > { %3772 = vmatpush.bf16.msra.mxu3 %v3738_v23 }
 0x6c5   : > { %11322 = vmatmul.msk.bf16.vlgmr.msrb.gmra.mxu0 %vm370_vm7, %v11314_v13 }
 0x6c6   : > { %3785 = vmatpush.bf16.msrb.mxu0 %v3741_v34 }
 0x6c7   : > { %v3847_v39 = vpop.permute.xlu0 %3846  ;;  %v3966_v6 = vpop.permute.xlu1 %3965 }
 0x6c8   : > { %11323 = vmatmul.msk.bf16.vlgmr.msrb.gmra.mxu1 %vm370_vm7, %v11314_v13  ;;  %v3854_v59 = vsel %vm3850_vm0, %v3845_v35, %v3847_v39  ;;  %v3974_v9 = vpop.permute.xlu2 %3973  ;;  %v3977_v15 = vsel %vm15819_vm1, %v3966_v6, %v3968_v4 }
 0x6c9   : > { %3798 = vmatpush.bf16.msrb.mxu1 %v3744_v36  ;;  %v3869_v60 = vsel %vm374_vm6, %v3854_v59, 0  ;;  %v3988_v1 = vsel %vm374_vm6, %v3977_v15, 0  ;;  %v4000_v47 = vsel %vm374_vm6, %v3974_v9, 0  ;;  %v11342_v36 = vld [vmem:[%s15788_s5 + $0x7c] sm:$0xf] }
 0x6cf   : > { %v3964_v18 = vpop.permute.xlu0 %3963  ;;  %v3972_v8 = vpop.permute.xlu1 %3971 }
 0x6d0   : > { %11324 = vmatmul.msk.bf16.vlgmr.msrb.gmra.mxu2 %vm370_vm7, %v11314_v13  ;;  %v3976_v12 = vsel %vm15819_vm1, %v3964_v18, %v3966_v6  ;;  %v4095_v24 = vpop.permute.xlu2 %4094  ;;  %v3980_v0 = vsel %vm15819_vm1, %v3972_v8, %v3974_v9 }
 0x6d1   : > { %11325 = vmatmul.msk.bf16.vlgmr.msrb.gmra.mxu3 %vm370_vm7, %v11314_v13  ;;  %3811 = vmatpush.bf16.msrb.mxu2 %v3747_v44  ;;  %v3985_v53 = vsel %vm374_vm6, %v3976_v12, 0  ;;  %v3997_v28 = vsel %vm374_vm6, %v3980_v0, 0 }
 0x6d2   : > { %3824 = vmatpush.bf16.msrb.mxu3 %v3750_v38 }
 0x6d5   : > { %11326 = vmatmul.msk.bf16.vlgmr.msra.gmra.mxu0 %vm370_vm7, %v11314_v13 }
 0x6d6   : > { %3884 = vmatpush.bf16.msra.mxu0 %v3860_v48 }
 0x6d7   : > { %v3849_v31 = vpop.permute.xlu0 %3848  ;;  %v4093_v5 = vpop.permute.xlu1 %4092 }
 0x6d8   : > { %11327 = vmatmul.msk.bf16.vlgmr.msra.gmra.mxu1 %vm370_vm7, %v11314_v13  ;;  %v3855_v63 = vsel %vm3850_vm0, %v3847_v39, %v3849_v31  ;;  %v3875_v7 = vsel %vm374_vm6, %v3849_v31, 0  ;;  %v4091_v11 = vpop.permute.xlu2 %4090  ;;  %v4102_v34 = vsel %vm15818_vm13, %v4093_v5, %v4095_v24 }
 0x6d9   : > { %3897 = vmatpush.bf16.msra.mxu1 %v3863_v37  ;;  %v3872_v54 = vsel %vm374_vm6, %v3855_v63, 0  ;;  %v4101_v40 = vsel %vm15818_vm13, %v4091_v11, %v4093_v5  ;;  %v4115_v38 = vsel %vm374_vm6, %v4102_v34, 0  ;;  %v11349_v5 = vld [vmem:[%s15788_s5 + $0x80] sm:$0xf] }
 0x6da   : > { %v4112_v13 = vsel %vm374_vm6, %v4101_v40, 0 }
 0x6df   : > { %v3970_v17 = vpop.permute.xlu0 %3969  ;;  %v4089_v27 = vpop.permute.xlu1 %4088 }
 0x6e0   : > { %11329 = vmatmul.msk.bf16.vlgmr.msra.gmra.mxu2 %vm370_vm7, %v11328_v57  ;;  %v3978_v20 = vsel %vm15819_vm1, %v3968_v4, %v3970_v17  ;;  %v3979_v21 = vsel %vm15819_vm1, %v3970_v17, %v3972_v8  ;;  %v4100_v52 = vsel %vm15818_vm13, %v4089_v27, %v4091_v11  ;;  %v4217_v46 = vpop.permute.xlu2 %4216 }
 0x6e1   : > { %11330 = vmatmul.msk.bf16.vlgmr.msra.gmra.mxu3 %vm370_vm7, %v11328_v57  ;;  %3910 = vmatpush.bf16.msra.mxu2 %v3866_v49  ;;  %v3991_v25 = vsel %vm374_vm6, %v3978_v20, 0  ;;  %v3994_v26 = vsel %vm374_vm6, %v3979_v21, 0  ;;  %v4109_v29 = vsel %vm374_vm6, %v4100_v52, 0 }
 0x6e2   : > { %3923 = vmatpush.bf16.msra.mxu3 %v3869_v60 }
 0x6e5   : > { %11331 = vmatmul.msk.bf16.vlgmr.msrb.gmra.mxu0 %vm370_vm7, %v11328_v57 }
 0x6e6   : > { %3936 = vmatpush.bf16.msrb.mxu0 %v3872_v54 }
 0x6e7   : > { %v4097_v56 = vpop.permute.xlu0 %4096  ;;  %v4215_v45 = vpop.permute.xlu1 %4214 }
 0x6e8   : > { %11332 = vmatmul.msk.bf16.vlgmr.msrb.gmra.mxu1 %vm370_vm7, %v11328_v57  ;;  %v4103_v39 = vsel %vm15818_vm13, %v4095_v24, %v4097_v56  ;;  %v4226_v12 = vsel %vm4224_vm2, %v4215_v45, %v4217_v46 }
 0x6e9   : > { %3949 = vmatpush.bf16.msrb.mxu1 %v3875_v7  ;;  %v4118_v22 = vsel %vm374_vm6, %v4103_v39, 0  ;;  %v4223_v7 = vpop.permute.xlu2 %4222  ;;  %v4237_v20 = vsel %vm374_vm6, %v4226_v12, 0 }
 0x6ef   : > { %v4213_v30 = vpop.permute.xlu0 %4212  ;;  %v4221_v63 = vpop.permute.xlu1 %4220 }
 0x6f0   : > { %11333 = vmatmul.msk.bf16.vlgmr.msrb.gmra.mxu2 %vm370_vm7, %v11328_v57  ;;  %v4225_v8 = vsel %vm4224_vm2, %v4213_v30, %v4215_v45  ;;  %v4229_v30 = vsel %vm4224_vm2, %v4221_v63, %v4223_v7 }
 0x6f1   : > { %11334 = vmatmul.msk.bf16.vlgmr.msrb.gmra.mxu3 %vm370_vm7, %v11328_v57  ;;  %4009 = vmatpush.bf16.msrb.mxu2 %v3985_v53 }
 0x6f2   : > { %4022 = vmatpush.bf16.msrb.mxu3 %v3988_v1  ;;  %v4234_v1 = vsel %vm374_vm6, %v4225_v8, 0 }
 0x6f5   : > { %11336 = vmatmul.msk.bf16.vlgmr.msra.gmra.mxu0 %vm370_vm7, %v11335_v58 }
 0x6f6   : > { %4035 = vmatpush.bf16.msra.mxu0 %v3991_v25 }
 0x6f7   : > { %v4099_v43 = vpop.permute.xlu0 %4098 }
 0x6f8   : > { %11337 = vmatmul.msk.bf16.vlgmr.msra.gmra.mxu1 %vm370_vm7, %v11335_v58  ;;  %v4104_v48 = vsel %vm15818_vm13, %v4097_v56, %v4099_v43  ;;  %v4124_v60 = vsel %vm374_vm6, %v4099_v43, 0 }
 0x6f9   : > { %4048 = vmatpush.bf16.msra.mxu1 %v3994_v26  ;;  %v4121_v59 = vsel %vm374_vm6, %v4104_v48, 0  ;;  %v4342_v26 = vpop.permute.xlu1 %4341 }
 0x6fe   : > { %v2863_v42 = vpop.f32.mrf.mxu0 }
 0x6ff   : > { %v4219_v17 = vpop.permute.xlu0 %4218 }
 0x700   : > { %11338 = vmatmul.msk.bf16.vlgmr.msra.gmra.mxu2 %vm370_vm7, %v11335_v58  ;;  %v4228_v56 = vsel %vm4224_vm2, %v4219_v17, %v4221_v63 }
 0x701   : > { %11339 = vmatmul.msk.bf16.vlgmr.msra.gmra.mxu3 %vm370_vm7, %v11335_v58  ;;  %4061 = vmatpush.bf16.msra.mxu2 %v3997_v28 }
 0x702   : > { %4074 = vmatpush.bf16.msra.mxu3 %v4000_v47  ;;  %v4344_v47 = vpop.permute.xlu2 %4343 }
 0x703   : > { %v2837_v61 = vpop.f32.mrf.mxu2  ;;  %v2850_v51 = vpop.f32.mrf.mxu3  ;;  %v4352_v48 = vsel %vm4349_vm4, %v4342_v26, %v4344_v47 }
 0x705   : > { %11340 = vmatmul.msk.bf16.vlgmr.msrb.gmra.mxu0 %vm370_vm7, %v11335_v58  ;;  %v3002_v32 = vpop.f32.mrf.mxu1 }
 0x706   : > { %4133 = vmatpush.bf16.msrb.mxu0 %v4109_v29  ;;  %v2865_v23 = vpop.f32.mrf.mxu0  ;;  %v3003_v19 = vadd.f32 %v3002_v32, %v2837_v61  ;;  %v4243_v61 = vsel %vm374_vm6, %v4228_v56, 0 }
 0x707   : > { %v4338_v23 = vpop.permute.xlu1 %4337 }
 0x708   : > { %11341 = vmatmul.msk.bf16.vlgmr.msrb.gmra.mxu1 %vm370_vm7, %v11335_v58  ;;  %v4227_v58 = vsel %vm4224_vm2, %v4217_v46, %v4219_v17 }
 0x709   : > { %4146 = vmatpush.bf16.msrb.mxu1 %v4112_v13 }
 0x70a   : > { %v4340_v13 = vpop.permute.xlu2 %4339 }
 0x70b   : > { %v2839_v33 = vpop.f32.mrf.mxu2  ;;  %v2852_v3 = vpop.f32.mrf.mxu3  ;;  %v4351_v39 = vsel %vm4349_vm4, %v4340_v13, %v4342_v26 }
 0x70c   : > { %v4249_v33 = vsel %vm374_vm6, %v4223_v7, 0  ;;  %v4350_v3 = vsel %vm4349_vm4, %v4338_v23, %v4340_v13  ;;  %v4362_v45 = vsel %vm374_vm6, %v4351_v39, 0 }
 0x70d   : > { %v3004_v35 = vpop.f32.mrf.mxu1 }
 0x70e   : > { %v3193_v41 = vpop.f32.mrf.mxu0 }
 0x70f   : > { %v3223_v44 = vadd.f32 %v3193_v41, %v3003_v19  ;;  %v4246_v19 = vsel %vm374_vm6, %v4229_v30, 0  ;;  %v4359_v41 = vsel %vm374_vm6, %v4350_v3, 0  ;;  %v4465_v12 = vpop.permute.xlu1 %4464 }
 0x710   : > { %11343 = vmatmul.msk.bf16.vlgmr.msrb.gmra.mxu2 %vm370_vm7, %v11342_v36 }
 0x711   : > { %11344 = vmatmul.msk.bf16.vlgmr.msrb.gmra.mxu3 %vm370_vm7, %v11342_v36  ;;  %4159 = vmatpush.bf16.msrb.mxu2 %v4115_v38 }
 0x712   : > { %4172 = vmatpush.bf16.msrb.mxu3 %v4118_v22 }
 0x713   : > { %v3015_v18 = vpop.f32.mrf.mxu2  ;;  %v3028_v37 = vpop.f32.mrf.mxu3 }
 0x714   : > { %v3016_v50 = vadd.f32 %v3015_v18, %v2850_v51  ;;  %v3029_v57 = vadd.f32 %v3028_v37, %v2863_v42  ;;  %v4240_v42 = vsel %vm374_vm6, %v4227_v58, 0  ;;  %v4346_v51 = vpop.permute.xlu0 %4345  ;;  %v11356_v37 = vld [vmem:[%s15788_s5 + $0x84] sm:$0xf] }
 0x715   : > { %11345 = vmatmul.msk.bf16.vlgmr.msra.gmra.mxu0 %vm370_vm7, %v11342_v36  ;;  %v3206_v31 = vpop.f32.mrf.mxu1 }
 0x716   : > { %4185 = vmatpush.bf16.msra.mxu0 %v4121_v59  ;;  %v3195_v49 = vpop.f32.mrf.mxu0  ;;  %v3224_v6 = vadd.f32 %v3206_v31, %v3016_v50  ;;  %v4353_v50 = vsel %vm4349_vm4, %v4344_v47, %v4346_v51  ;;  %v4365_v59 = vsel %vm374_vm6, %v4352_v48, 0 }
 0x717   : > { %v4368_v31 = vsel %vm374_vm6, %v4353_v50, 0 }
 0x718   : > { %11346 = vmatmul.msk.bf16.vlgmr.msra.gmra.mxu1 %vm370_vm7, %v11342_v36 }
 0x719   : > { %4198 = vmatpush.bf16.msra.mxu1 %v4124_v60 }
 0x71b   : > { %v3017_v4 = vpop.f32.mrf.mxu2  ;;  %v3030_v54 = vpop.f32.mrf.mxu3 }
 0x71c   : > { %v4463_v43 = vpop.permute.xlu0 %4462 }
 0x71d   : > { %v3208_v9 = vpop.f32.mrf.mxu1  ;;  %v4475_v58 = vsel %vm4474_vm11, %v4463_v43, %v4465_v12 }
 0x71e   : > { %v3400_v15 = vpop.f32.mrf.mxu0 }
 0x71f   : > { %v13807_v53 = vadd.f32 %v3400_v15, %v3224_v6 }
 0x720   : > { %11347 = vmatmul.msk.bf16.vlgmr.msra.gmra.mxu2 %vm370_vm7, %v11342_v36 }
 0x721   : > { %11348 = vmatmul.msk.bf16.vlgmr.msra.gmra.mxu3 %vm370_vm7, %v11342_v36  ;;  %4258 = vmatpush.bf16.msra.mxu2 %v4234_v1 }
 0x722   : > { %4271 = vmatpush.bf16.msra.mxu3 %v4237_v20  ;;  %v4467_v20 = vpop.permute.xlu2 %4466 }
 0x723   : > { %v3219_v21 = vpop.f32.mrf.mxu2 }
 0x724   : > { %v3225_v25 = vadd.f32 %v3219_v21, %v3029_v57  ;;  %v3387_v24 = vpop.f32.mrf.mxu3  ;;  %v4348_v57 = vpop.permute.xlu0 %4347  ;;  %v4476_v21 = vsel %vm4474_vm11, %v4465_v12, %v4467_v20 }
 0x725   : > { %v13818_v0 = vadd.f32 %v3387_v24, %v3223_v44  ;;  %11350 = vmatmul.msk.bf16.vlgmr.msrb.gmra.mxu0 %vm370_vm7, %v11349_v5  ;;  %v3413_v27 = vpop.f32.mrf.mxu1  ;;  %v4354_v49 = vsel %vm4349_vm4, %v4346_v51, %v4348_v57  ;;  %v4374_v9 = vsel %vm374_vm6, %v4348_v57, 0  ;;  %v4484_v24 = vsel %vm374_vm6, %v4475_v58, 0 }
 0x726   : > { %4284 = vmatpush.bf16.msrb.mxu0 %v4240_v42  ;;  %v3402_v28 = vpop.f32.mrf.mxu0  ;;  %v13822_v11 = vadd.f32 %v3413_v27, %v3225_v25  ;;  %v4371_v54 = vsel %vm374_vm6, %v4354_v49, 0  ;;  %v4487_v26 = vsel %vm374_vm6, %v4476_v21, 0  ;;  %v11363_v27 = vld [vmem:[%s15788_s5 + $0x88] sm:$0xf] }
 0x727   : > { %v3420_v52 = vpack.c.bf16 %v13807_v53, %v13818_v0 }
 0x728   : > { %11351 = vmatmul.msk.bf16.vlgmr.msrb.gmra.mxu1 %vm370_vm7, %v11349_v5 }
 0x729   : > { %4297 = vmatpush.bf16.msrb.mxu1 %v4243_v61  ;;  %v4471_v61 = vpop.permute.xlu1 %4470 }
 0x72b   : > { %v3221_v40 = vpop.f32.mrf.mxu2 }
 0x72c   : > { %v3389_v29 = vpop.f32.mrf.mxu3  ;;  %v4469_v25 = vpop.permute.xlu0 %4468 }
 0x72d   : > { %v3415_v32 = vpop.f32.mrf.mxu1  ;;  %v4477_v56 = vsel %vm4474_vm11, %v4467_v20, %v4469_v25  ;;  %v4478_v29 = vsel %vm4474_vm11, %v4469_v25, %v4471_v61 }
 0x72e   : > { %v4490_v32 = vsel %vm374_vm6, %v4477_v56, 0  ;;  %v4493_v13 = vsel %vm374_vm6, %v4478_v29, 0 }
 0x730   : > { %11352 = vmatmul.msk.bf16.vlgmr.msrb.gmra.mxu2 %vm370_vm7, %v11349_v5 }
 0x731   : > { %11353 = vmatmul.msk.bf16.vlgmr.msrb.gmra.mxu3 %vm370_vm7, %v11349_v5  ;;  %4310 = vmatpush.bf16.msrb.mxu2 %v4246_v19 }
 0x732   : > { %4323 = vmatpush.bf16.msrb.mxu3 %v4249_v33  ;;  %v3570_v34 = vpop.f32.mrf.mxu0 }
 0x733   : > { %v3544_v35 = vpop.f32.mrf.mxu2 }
 0x734   : > { %v3557_v36 = vpop.f32.mrf.mxu3 }
 0x735   : > { %11354 = vmatmul.msk.bf16.vlgmr.msra.gmra.mxu0 %vm370_vm7, %v11349_v5  ;;  %v3583_v44 = vpop.f32.mrf.mxu1 }
 0x736   : > { %4383 = vmatpush.bf16.msra.mxu0 %v4359_v41 }
 0x738   : > { %11355 = vmatmul.msk.bf16.vlgmr.msra.gmra.mxu1 %vm370_vm7, %v11349_v5 }
 0x739   : > { %4396 = vmatpush.bf16.msra.mxu1 %v4362_v45 }
 0x73a   : > { %v3572_v38 = vpop.f32.mrf.mxu0 }
 0x73b   : > { %v3546_v22 = vpop.f32.mrf.mxu2 }
 0x73c   : > { %v3559_v46 = vpop.f32.mrf.mxu3 }
 0x73d   : > { %v3585_v18 = vpop.f32.mrf.mxu1 }
 0x740   : > { %11357 = vmatmul.msk.bf16.vlgmr.msra.gmra.mxu2 %vm370_vm7, %v11356_v37 }
 0x741   : > { %11358 = vmatmul.msk.bf16.vlgmr.msra.gmra.mxu3 %vm370_vm7, %v11356_v37  ;;  %4409 = vmatpush.bf16.msra.mxu2 %v4365_v59 }
 0x742   : > { %4422 = vmatpush.bf16.msra.mxu3 %v4368_v31  ;;  %v3643_v6 = vpop.f32.mrf.mxu0 }
 0x743   : > { %v3644_v60 = vadd.f32 %v3643_v6, %v3544_v35  ;;  %v3596_v63 = vpop.f32.mrf.mxu2  ;;  %v4473_v35 = vpop.permute.xlu2 %4472  ;;  %v11370_v6 = vld [vmem:[%s15788_s5 + $0x8c] sm:$0xf] }
 0x744   : > { %v3609_v4 = vpop.f32.mrf.mxu3  ;;  %v4499_v43 = vsel %vm374_vm6, %v4473_v35, 0 }
 0x745   : > { %11359 = vmatmul.msk.bf16.vlgmr.msrb.gmra.mxu0 %vm370_vm7, %v11356_v37  ;;  %v3656_v7 = vpop.f32.mrf.mxu1 }
 0x746   : > { %4435 = vmatpush.bf16.msrb.mxu0 %v4371_v54  ;;  %v3657_v8 = vadd.f32 %v3656_v7, %v3557_v36  ;;  %v4479_v36 = vsel %vm4474_vm11, %v4471_v61, %v4473_v35 }
 0x747   : > { %v4496_v41 = vsel %vm374_vm6, %v4479_v36, 0 }
 0x748   : > { %11360 = vmatmul.msk.bf16.vlgmr.msrb.gmra.mxu1 %vm370_vm7, %v11356_v37 }
 0x749   : > { %4448 = vmatpush.bf16.msrb.mxu1 %v4374_v9 }
 0x74a   : > { %v3645_v15 = vpop.f32.mrf.mxu0 }
 0x74b   : > { %v3598_v17 = vpop.f32.mrf.mxu2 }
 0x74c   : > { %v3611_v1 = vpop.f32.mrf.mxu3 }
 0x74d   : > { %v3658_v5 = vpop.f32.mrf.mxu1 }
 0x750   : > { %11361 = vmatmul.msk.bf16.vlgmr.msrb.gmra.mxu2 %vm370_vm7, %v11356_v37 }
 0x751   : > { %11362 = vmatmul.msk.bf16.vlgmr.msrb.gmra.mxu3 %vm370_vm7, %v11356_v37  ;;  %4508 = vmatpush.bf16.msrb.mxu2 %v4484_v24 }
 0x752   : > { %4521 = vmatpush.bf16.msrb.mxu3 %v4487_v26  ;;  %v3695_v42 = vpop.f32.mrf.mxu0 }
 0x753   : > { %v3696_v28 = vadd.f32 %v3695_v42, %v3596_v63  ;;  %v3669_v47 = vpop.f32.mrf.mxu2 }
 0x754   : > { %v3670_v51 = vadd.f32 %v3669_v47, %v3570_v34  ;;  %v3682_v40 = vpop.f32.mrf.mxu3 }
 0x755   : > { %v3683_v30 = vadd.f32 %v3682_v40, %v3583_v44  ;;  %11364 = vmatmul.msk.bf16.vlgmr.msra.gmra.mxu0 %vm370_vm7, %v11363_v27  ;;  %v3708_v23 = vpop.f32.mrf.mxu1  ;;  %v11377_v44 = vld [vmem:[%s15790_s7 + $0x20] sm:$0xff] }
 0x756   : > { %4534 = vmatpush.bf16.msra.mxu0 %v4490_v32  ;;  %v3709_v19 = vadd.f32 %v3708_v23, %v3609_v4  ;;  %4589 = vperm.xlu1 %11906, %v11377_v44  }
 0x758   : > { %11365 = vmatmul.msk.bf16.vlgmr.msra.gmra.mxu1 %vm370_vm7, %v11363_v27 }
 0x759   : > { %4547 = vmatpush.bf16.msra.mxu1 %v4493_v13 }
 0x75a   : > { %v3697_v33 = vpop.f32.mrf.mxu0 }
 0x75b   : > { %v3671_v3 = vpop.f32.mrf.mxu2 }
 0x75c   : > { %v3684_v34 = vpop.f32.mrf.mxu3 }
 0x75d   : > { %v3710_v39 = vpop.f32.mrf.mxu1 }
 0x760   : > { %11366 = vmatmul.msk.bf16.vlgmr.msra.gmra.mxu2 %vm370_vm7, %v11363_v27 }
 0x761   : > { %11367 = vmatmul.msk.bf16.vlgmr.msra.gmra.mxu3 %vm370_vm7, %v11363_v27  ;;  %4560 = vmatpush.bf16.msra.mxu2 %v4496_v41 }
 0x762   : > { %4573 = vmatpush.bf16.msra.mxu3 %v4499_v43  ;;  %v3787_v45 = vpop.f32.mrf.mxu0 }
 0x763   : > { %v3832_v38 = vadd.f32 %v3787_v45, %v3670_v51  ;;  %v3761_v22 = vpop.f32.mrf.mxu2 }
 0x764   : > { %v3830_v46 = vadd.f32 %v3761_v22, %v3644_v60  ;;  %v3774_v48 = vpop.f32.mrf.mxu3 }
 0x765   : > { %v3831_v18 = vadd.f32 %v3774_v48, %v3657_v8  ;;  %11368 = vmatmul.msk.bf16.vlgmr.msrb.gmra.mxu0 %vm370_vm7, %v11363_v27  ;;  %v3800_v37 = vpop.f32.mrf.mxu1 }
 0x766   : > { %v3833_v50 = vadd.f32 %v3800_v37, %v3683_v30 }
 0x768   : > { %11369 = vmatmul.msk.bf16.vlgmr.msrb.gmra.mxu1 %vm370_vm7, %v11363_v27 }
 0x76a   : > { %v3789_v57 = vpop.f32.mrf.mxu0 }
 0x76b   : > { %v3763_v59 = vpop.f32.mrf.mxu2 }
 0x76c   : > { %v3776_v31 = vpop.f32.mrf.mxu3 }
 0x76d   : > { %v3802_v49 = vpop.f32.mrf.mxu1 }
 0x770   : > { %11371 = vmatmul.msk.bf16.vlgmr.msrb.gmra.mxu2 %vm370_vm7, %v11370_v6 }
 0x771   : > { %11372 = vmatmul.msk.bf16.vlgmr.msrb.gmra.mxu3 %vm370_vm7, %v11370_v6 }
 0x772   : > { %v3886_v60 = vpop.f32.mrf.mxu0 }
 0x773   : > { %v3955_v63 = vadd.f32 %v3886_v60, %v3830_v46  ;;  %v3813_v4 = vpop.f32.mrf.mxu2 }
 0x774   : > { %v3834_v54 = vadd.f32 %v3813_v4, %v3696_v28  ;;  %v3826_v7 = vpop.f32.mrf.mxu3 }
 0x775   : > { %v3835_v8 = vadd.f32 %v3826_v7, %v3709_v19  ;;  %11373 = vmatmul.msk.bf16.vlgmr.msra.gmra.mxu0 %vm370_vm7, %v11370_v6  ;;  %v3899_v9 = vpop.f32.mrf.mxu1 }
 0x776   : > { %v3956_v12 = vadd.f32 %v3899_v9, %v3831_v18 }
 0x778   : > { %11374 = vmatmul.msk.bf16.vlgmr.msra.gmra.mxu1 %vm370_vm7, %v11370_v6 }
 0x77a   : > { %v3888_v15 = vpop.f32.mrf.mxu0 }
 0x77b   : > { %v3815_v17 = vpop.f32.mrf.mxu2 }
 0x77c   : > { %v3828_v1 = vpop.f32.mrf.mxu3 }
 0x77d   : > { %v3901_v20 = vpop.f32.mrf.mxu1 }
 0x780   : > { %11375 = vmatmul.msk.bf16.vlgmr.msra.gmra.mxu2 %vm370_vm7, %v11370_v6 }
 0x781   : > { %11376 = vmatmul.msk.bf16.vlgmr.msra.gmra.mxu3 %vm370_vm7, %v11370_v6 }
 0x782   : > { %v3938_v58 = vpop.f32.mrf.mxu0 }
 0x783   : > { %v3959_v5 = vadd.f32 %v3938_v58, %v3834_v54  ;;  %v3912_v21 = vpop.f32.mrf.mxu2 }
 0x784   : > { %v3957_v25 = vadd.f32 %v3912_v21, %v3832_v38  ;;  %v3925_v24 = vpop.f32.mrf.mxu3 }
 0x785   : > { %v3958_v26 = vadd.f32 %v3925_v24, %v3833_v50  ;;  %v3951_v56 = vpop.f32.mrf.mxu1 }
 0x786   : > { %v3960_v42 = vadd.f32 %v3951_v56, %v3835_v8 }
 0x78a   : > { %v3940_v27 = vpop.f32.mrf.mxu0 }
 0x78b   : > { %v3914_v28 = vpop.f32.mrf.mxu2 }
 0x78c   : > { %v3927_v47 = vpop.f32.mrf.mxu3 }
 0x78d   : > { %v3953_v61 = vpop.f32.mrf.mxu1 }
 0x792   : > { %v4037_v51 = vpop.f32.mrf.mxu0 }
 0x793   : > { %v4082_v40 = vadd.f32 %v4037_v51, %v3957_v25  ;;  %v4011_v29 = vpop.f32.mrf.mxu2 }
 0x794   : > { %v4080_v30 = vadd.f32 %v4011_v29, %v3955_v63  ;;  %v4024_v32 = vpop.f32.mrf.mxu3 }
 0x795   : > { %v4081_v23 = vadd.f32 %v4024_v32, %v3956_v12  ;;  %v4050_v19 = vpop.f32.mrf.mxu1 }
 0x796   : > { %v4083_v13 = vadd.f32 %v4050_v19, %v3958_v26 }
 0x79a   : > { %v4039_v33 = vpop.f32.mrf.mxu0 }
 0x79b   : > { %v4013_v3 = vpop.f32.mrf.mxu2 }
 0x79c   : > { %v4026_v35 = vpop.f32.mrf.mxu3 }
 0x79d   : > { %v4052_v34 = vpop.f32.mrf.mxu1 }
 0x7a2   : > { %v4135_v36 = vpop.f32.mrf.mxu0 }
 0x7a3   : > { %v4204_v39 = vadd.f32 %v4135_v36, %v4080_v30  ;;  %v4063_v41 = vpop.f32.mrf.mxu2 }
 0x7a4   : > { %v4084_v43 = vadd.f32 %v4063_v41, %v3959_v5  ;;  %v4076_v44 = vpop.f32.mrf.mxu3 }
 0x7a5   : > { %v4085_v45 = vadd.f32 %v4076_v44, %v3960_v42  ;;  %v4148_v38 = vpop.f32.mrf.mxu1 }
 0x7a6   : > { %v4205_v22 = vadd.f32 %v4148_v38, %v4081_v23 }
 0x7aa   : > { %v4137_v46 = vpop.f32.mrf.mxu0 }
 0x7ab   : > { %v4065_v48 = vpop.f32.mrf.mxu2 }
 0x7ac   : > { %v4078_v18 = vpop.f32.mrf.mxu3 }
 0x7ad   : > { %v4150_v37 = vpop.f32.mrf.mxu1  ;;  %v340_v18 = vld [vmem:[%s15786_s3] sm:$0x3f] }
 0x7b2   : > { %v4187_v50 = vpop.f32.mrf.mxu0 }
 0x7b3   : > { %v13887_v57 = vadd.f32 %v4187_v50, %v4084_v43  ;;  %v4161_v59 = vpop.f32.mrf.mxu2 }
 0x7b4   : > { %v4174_v31 = vpop.f32.mrf.mxu3  ;;  %v4206_v32 = vadd.f32 %v4161_v59, %v4082_v40 }
 0x7b5   : > { %v4200_v49 = vpop.f32.mrf.mxu1  ;;  %v4207_v33 = vadd.f32 %v4174_v31, %v4083_v13 }
 0x7b6   : > { %v13889_v6 = vadd.f32 %v4200_v49, %v4085_v45 }
 0x7ba   : > { %v4189_v60 = vpop.f32.mrf.mxu0 }
 0x7bb   : > { %v4163_v63 = vpop.f32.mrf.mxu2  ;;  %v13896_v60 = vperm.slane %v340_v18, 1 }
 0x7bc   : > { %v4176_v4 = vpop.f32.mrf.mxu3  ;;  %v13898_v63 = vperm.slane %v340_v18, 2 }
 0x7bd   : > { %v4202_v54 = vpop.f32.mrf.mxu1 }
 0x7c2   : > { %v4286_v7 = vpop.f32.mrf.mxu0 }
 0x7c3   : > { %v4260_v8 = vpop.f32.mrf.mxu2  ;;  %v4331_v19 = vadd.f32 %v4286_v7, %v4206_v32  ;;  %v13900_v7 = vperm.slane %v340_v18, 3 }
 0x7c4   : > { %v4273_v9 = vpop.f32.mrf.mxu3  ;;  %v4329_v3 = vadd.f32 %v4260_v8, %v4204_v39 }
 0x7c5   : > { %v4299_v12 = vpop.f32.mrf.mxu1  ;;  %v4330_v35 = vadd.f32 %v4273_v9, %v4205_v22  ;;  %v13894_v22 = vperm.slane %v340_v18, 0 }
 0x7c6   : > { %v4332_v36 = vadd.f32 %v4299_v12, %v4207_v33 }
 0x7c8   : > { %v4590_v44 = vpop.permute.xlu1 %4589 }
 0x7ca   : > { %v4288_v15 = vpop.f32.mrf.mxu0 }
 0x7cb   : > { %v4262_v17 = vpop.f32.mrf.mxu2 }
 0x7cc   : > { %v4275_v1 = vpop.f32.mrf.mxu3 }
 0x7cd   : > { %v4301_v20 = vpop.f32.mrf.mxu1 }
 0x7d2   : > { %v4385_v58 = vpop.f32.mrf.mxu0 }
 0x7d3   : > { %v4312_v5 = vpop.f32.mrf.mxu2  ;;  %v4454_v41 = vadd.f32 %v4385_v58, %v4329_v3  ;;  %v13910_v3 = vperm.slane %v340_v18, 4 }
 0x7d4   : > { %v4325_v21 = vpop.f32.mrf.mxu3 }
 0x7d5   : > { %v4398_v25 = vpop.f32.mrf.mxu1 }
 0x7d6   : > { %v4455_v45 = vadd.f32 %v4398_v25, %v4330_v35 }
 0x7da   : > { %v4387_v24 = vpop.f32.mrf.mxu0 }
 0x7db   : > { %v4314_v26 = vpop.f32.mrf.mxu2 }
 0x7dc   : > { %v4327_v56 = vpop.f32.mrf.mxu3 }
 0x7dd   : > { %v4400_v42 = vpop.f32.mrf.mxu1 }
 0x7e2   : > { %v4437_v27 = vpop.f32.mrf.mxu0 }
 0x7e3   : > { %v4411_v28 = vpop.f32.mrf.mxu2 }
 0x7e4   : > { %v4424_v47 = vpop.f32.mrf.mxu3  ;;  %v4456_v34 = vadd.f32 %v4411_v28, %v4331_v19  ;;  %v4333_v28 = vadd.f32 %v4312_v5, %v13887_v57 }
 0x7e5   : > { %v4450_v61 = vpop.f32.mrf.mxu1  ;;  %v4457_v48 = vadd.f32 %v4424_v47, %v4332_v36  ;;  %v4334_v47 = vadd.f32 %v4325_v21, %v13889_v6 }
 0x7ea   : > { %v4439_v51 = vpop.f32.mrf.mxu0 }
 0x7eb   : > { %v4413_v29 = vpop.f32.mrf.mxu2  ;;  %v4458_v51 = vadd.f32 %v4437_v27, %v4333_v28 }
 0x7ec   : > { %v4426_v30 = vpop.f32.mrf.mxu3  ;;  %v4459_v29 = vadd.f32 %v4450_v61, %v4334_v47 }
 0x7ed   : > { %v4452_v23 = vpop.f32.mrf.mxu1 }
 0x7f2   : > { %v4536_v43 = vpop.f32.mrf.mxu0 }
 0x7f3   : > { %v4581_v38 = vadd.f32 %v4536_v43, %v4456_v34  ;;  %v4510_v46 = vpop.f32.mrf.mxu2  ;;  %v13912_v34 = vperm.slane %v340_v18, 5 }
 0x7f4   : > { %v4579_v37 = vadd.f32 %v4510_v46, %v4454_v41  ;;  %v4523_v40 = vpop.f32.mrf.mxu3 }
 0x7f5   : > { %v4580_v50 = vadd.f32 %v4523_v40, %v4455_v45  ;;  %v4549_v59 = vpop.f32.mrf.mxu1  ;;  %v4594_v13 = vadd.f32 %v4590_v44, %v4581_v38 }
 0x7f6   : > { %v4592_v39 = vadd.f32 %v4590_v44, %v4579_v37  ;;  %v4582_v31 = vadd.f32 %v4549_v59, %v4457_v48 }
 0x7f7   : > { %v4593_v49 = vadd.f32 %v4590_v44, %v4580_v50  ;;  %v4600_v8 = vmax.f32 %v4594_v13, 0.0 }
 0x7f8   : > { %v4598_v4 = vmax.f32 %v4592_v39, 0.0  ;;  %v4595_v54 = vadd.f32 %v4590_v44, %v4582_v31 }
 0x7f9   : > { %v4599_v9 = vmax.f32 %v4593_v49, 0.0  ;;  %v4619_v24 = vmul.f32 %v13898_v63, %v4600_v8 }
 0x7fa   : > { %v4617_v12 = vmul.f32 %v13894_v22, %v4598_v4  ;;  %v4601_v15 = vmax.f32 %v4595_v54, 0.0  ;;  %v4538_v17 = vpop.f32.mrf.mxu0 }
 0x7fb   : > { %v4618_v1 = vmul.f32 %v13896_v60, %v4599_v9  ;;  %v4512_v20 = vpop.f32.mrf.mxu2 }
 0x7fc   : > { %v4620_v58 = vmul.f32 %v13900_v7, %v4601_v15  ;;  %v4525_v25 = vpop.f32.mrf.mxu3 }
 0x7fd   : > { %v4551_v26 = vpop.f32.mrf.mxu1  ;;  %v4623_v56 = vpack.c.bf16 %v4618_v1, %v4617_v12 }
 0x7fe   : > { %v4624_v42 = vpack.c.bf16 %v4620_v58, %v4619_v24 }
 0x7ff   : > { %4629 = vrot.lane.b32.xlu2 %v4623_v56, %s15848_s10 }
 0x800   : > { %4631 = vrot.lane.b32.xlu0 %v4624_v42, %s15848_s10  ;;  %v11379_v42 = vld [vmem:[%s15788_s5 + $0x94] sm:$0xf] }
 0x803   : > { %v4562_v30 = vpop.f32.mrf.mxu2 }
 0x804   : > { %v4583_v32 = vadd.f32 %v4562_v30, %v4458_v51  ;;  %v4575_v23 = vpop.f32.mrf.mxu3 }
 0x805   : > { %v4584_v19 = vadd.f32 %v4575_v23, %v4459_v29 }
 0x806   : > { %v4596_v33 = vadd.f32 %v4590_v44, %v4583_v32 }
 0x807   : > { %v4597_v35 = vadd.f32 %v4590_v44, %v4584_v19  ;;  %v11441_v19 = vld [vmem:[%s15790_s7 + $0x28] sm:$0xff] }
 0x808   : > { %v4602_v36 = vmax.f32 %v4596_v33, 0.0 }
 0x809   : > { %v4603_v41 = vmax.f32 %v4597_v35, 0.0 }
 0x80a   : > { %v4621_v57 = vmul.f32 %v13910_v3, %v4602_v36 }
 0x80b   : > { %v4622_v5 = vmul.f32 %v13912_v34, %v4603_v41  ;;  %v4564_v43 = vpop.f32.mrf.mxu2  ;;  %v14042_v41 = vld [vmem:[%s15788_s5 + $0x90] sm:$0xf] }
 0x80c   : > { %v4577_v6 = vpop.f32.mrf.mxu3 }
 0x80d   : > { %v4625_v21 = vpack.c.bf16 %v4622_v5, %v4621_v57 }
 0x80f   : > { %4633 = vrot.lane.b32.xlu1 %v4625_v21, %s15848_s10 }
 0x859   : > { %v4630_v27 = vpop.permute.xlu2 %4629 }
 0x85a   : > { %v4635_v61 = vrot.slane %v4630_v27, 4 }
 0x85c   : > { %v4638_v45 = vsel %vm2638_vm3, %v4635_v61, %v4630_v27 }
 0x85d   : > { %4646 = vst.msk [vmem:[#allocation5] sm:$0xff] %vm12834_vm10, %v4638_v45 }
 0x864   : > { %v4651_v59 = vld [vmem:[#allocation5] sm:$0xff] }
 0x865   : > { %v4659_v13 = vunpack.c.l.b16 %v4651_v59  ;;  %v4660_v39 = vunpack.c.h.b16 %v4651_v59 }
 0x867   : > { %v13930_v49 = vpack.c.b16 %v4660_v39, %v4660_v39  ;;  %v4665_v4 = vpack.c.b16 %v4659_v13, %v4659_v13 }
 0x869   : > { %v4791_v56 = vsel %vm374_vm6, %v4665_v4, 0  ;;  %v4794_v21 = vsel %vm374_vm6, %v13930_v49, 0 }
 0x872   : > { %v4632_v44 = vpop.permute.xlu0 %4631 }
 0x873   : > { %v4636_v38 = vrot.slane %v4632_v44, 4 }
 0x875   : > { %v4639_v46 = vsel %vm374_vm6, %v4635_v61, %v4636_v38 }
 0x876   : > { %v4640_v48 = vsel %vm2638_vm3, %v4639_v46, %v4632_v44 }
 0x877   : > { %v4661_v18 = vunpack.c.l.b16 %v4640_v48  ;;  %v4662_v37 = vunpack.c.h.b16 %v4640_v48 }
 0x879   : > { %v13922_v40 = vpack.c.b16 %v4661_v18, %v4661_v18  ;;  %v13924_v50 = vpack.c.b16 %v4662_v37, %v4662_v37 }
 0x87b   : > { %4677 = vrot.lane.b32.xlu0 %v13924_v50, %s15842_s17  ;;  %4675 = vrot.lane.b32.xlu2 %v13922_v40, %s15842_s17  ;;  %v4800_v37 = vsel %vm374_vm6, %v13924_v50, 0  ;;  %v4797_v13 = vsel %vm374_vm6, %v13922_v40, 0 }
 0x881   : > { %v4634_v31 = vpop.permute.xlu1 %4633 }
 0x882   : > { %v4637_v54 = vrot.slane %v4634_v31, 4 }
 0x883   : > { %4673 = vrot.lane.b32.xlu0 %v13930_v49, %s15842_s17  ;;  %4671 = vrot.lane.b32.xlu2 %v4665_v4, %s15842_s17 }
 0x884   : > { %v4641_v8 = vsel %vm374_vm6, %v4636_v38, %v4637_v54 }
 0x885   : > { %v4642_v9 = vsel %vm2638_vm3, %v4641_v8, %v4634_v31 }
 0x886   : > { %4648 = vst.msk [vmem:[#allocation5 + $0x10] sm:$0xff] %vm12869_vm14, %v4642_v9 }
 0x88b   : > { %4894 = vrot.lane.b32.xlu0 %v13924_v50, %s15843_s21  ;;  %4892 = vrot.lane.b32.xlu2 %v13922_v40, %s15843_s21 }
 0x88d   : > { %v4653_v12 = vld [vmem:[#allocation5 + $0x10] sm:$0xff] }
 0x88e   : > { %v4663_v15 = vunpack.c.l.b16 %v4653_v12  ;;  %v4664_v1 = vunpack.c.h.b16 %v4653_v12 }
 0x890   : > { %v13943_v17 = vpack.c.b16 %v4663_v15, %v4663_v15  ;;  %v13950_v20 = vpack.c.b16 %v4664_v1, %v4664_v1 }
 0x892   : > { %4679 = vrot.lane.b32.xlu1 %v13943_v17, %s15842_s17  ;;  %v4803_v28 = vsel %vm374_vm6, %v13943_v17, 0  ;;  %v4806_v27 = vsel %vm374_vm6, %v13950_v20, 0 }
 0x893   : > { %4890 = vrot.lane.b32.xlu0 %v13930_v49, %s15843_s21  ;;  %4888 = vrot.lane.b32.xlu2 %v4665_v4, %s15843_s21 }
 0x89a   : > { %4681 = vrot.lane.b32.xlu1 %v13950_v20, %s15842_s17 }
 0x89b   : > { %5016 = vrot.lane.b32.xlu0 %v13922_v40, %s15844_s19  ;;  %5014 = vrot.lane.b32.xlu2 %v13930_v49, %s15844_s19 }
 0x8a2   : > { %4896 = vrot.lane.b32.xlu1 %v13943_v17, %s15843_s21 }
 0x8a3   : > { %5022 = vrot.lane.b32.xlu0 %v13950_v20, %s15844_s19  ;;  %5020 = vrot.lane.b32.xlu2 %v13943_v17, %s15844_s19 }
 0x8aa   : > { %5012 = vrot.lane.b32.xlu1 %v4665_v4, %s15844_s19 }
 0x8ab   : > { %5142 = vrot.lane.b32.xlu0 %v13924_v50, %s15845_s23  ;;  %5140 = vrot.lane.b32.xlu2 %v13922_v40, %s15845_s23 }
 0x8b2   : > { %4898 = vrot.lane.b32.xlu1 %v13950_v20, %s15843_s21 }
 0x8b3   : > { %5138 = vrot.lane.b32.xlu0 %v13930_v49, %s15845_s23  ;;  %5136 = vrot.lane.b32.xlu2 %v4665_v4, %s15845_s23 }
 0x8ba   : > { %5018 = vrot.lane.b32.xlu1 %v13924_v50, %s15844_s19 }
 0x8bb   : > { %5264 = vrot.lane.b32.xlu0 %v13922_v40, %s15835_s12  ;;  %5262 = vrot.lane.b32.xlu2 %v13930_v49, %s15835_s12 }
 0x8c2   : > { %5144 = vrot.lane.b32.xlu1 %v13943_v17, %s15845_s23 }
 0x8c3   : > { %5270 = vrot.lane.b32.xlu0 %v13950_v20, %s15835_s12  ;;  %5268 = vrot.lane.b32.xlu2 %v13943_v17, %s15835_s12 }
 0x8ca   : > { %5260 = vrot.lane.b32.xlu1 %v4665_v4, %s15835_s12 }
 0x8cb   : > { %5390 = vrot.lane.b32.xlu0 %v13924_v50, %s15846_s26  ;;  %5388 = vrot.lane.b32.xlu2 %v13922_v40, %s15846_s26 }
 0x8d2   : > { %5146 = vrot.lane.b32.xlu1 %v13950_v20, %s15845_s23 }
 0x8d3   : > { %5386 = vrot.lane.b32.xlu0 %v13930_v49, %s15846_s26  ;;  %5384 = vrot.lane.b32.xlu2 %v4665_v4, %s15846_s26 }
 0x8d5   : > { %v4676_v58 = vpop.permute.xlu2 %4675 }
 0x8da   : > { %5266 = vrot.lane.b32.xlu1 %v13924_v50, %s15835_s12 }
 0x8db   : > { %5512 = vrot.lane.b32.xlu0 %v13922_v40, %s15847_s24  ;;  %5510 = vrot.lane.b32.xlu2 %v13930_v49, %s15847_s24 }
 0x8dd   : > { %v4672_v47 = vpop.permute.xlu2 %4671 }
 0x8e2   : > { %5392 = vrot.lane.b32.xlu1 %v13943_v17, %s15846_s26 }
 0x8e3   : > { %5518 = vrot.lane.b32.xlu0 %v13950_v20, %s15847_s24  ;;  %5516 = vrot.lane.b32.xlu2 %v13943_v17, %s15847_s24 }
 0x8e5   : > { %v4893_v35 = vpop.permute.xlu2 %4892 }
 0x8ea   : > { %5508 = vrot.lane.b32.xlu1 %v4665_v4, %s15847_s24 }
 0x8eb   : > { %5638 = vrot.lane.b32.xlu0 %v13924_v50, %s11993_s22  ;;  %5636 = vrot.lane.b32.xlu2 %v13922_v40, %s11993_s22 }
 0x8ed   : > { %v4678_v25 = vpop.permute.xlu0 %4677  ;;  %v4889_v45 = vpop.permute.xlu2 %4888 }
 0x8ee   : > { %v4685_v24 = vsel %vm368_vm8, %v4676_v58, %v4678_v25 }
 0x8ef   : > { %v4698_v26 = vsel %vm374_vm6, %v4685_v24, 0 }
 0x8f0   : > { %4742 = vmatpush.bf16.msrb.mxu2 %v4698_v26 }
 0x8f2   : > { %5394 = vrot.lane.b32.xlu1 %v13950_v20, %s15846_s26 }
 0x8f3   : > { %5634 = vrot.lane.b32.xlu0 %v13930_v49, %s11993_s22  ;;  %5632 = vrot.lane.b32.xlu2 %v4665_v4, %s11993_s22 }
 0x8f4   : > { %4815 = vmatpush.bf16.msra.mxu2 %v4791_v56 }
 0x8f5   : > { %11382 = vmatmul.msk.bf16.vlgmr.msrb.gmra.mxu2 %vm370_vm7, %v11379_v42  ;;  %v4674_v51 = vpop.permute.xlu0 %4673  ;;  %v5015_v4 = vpop.permute.xlu2 %5014 }
 0x8f6   : > { %v4683_v29 = vsel %vm368_vm8, %v4672_v47, %v4674_v51  ;;  %v4684_v30 = vsel %vm368_vm8, %v4674_v51, %v4676_v58 }
 0x8f7   : > { %v4692_v32 = vsel %vm374_vm6, %v4683_v29, 0  ;;  %v4695_v23 = vsel %vm374_vm6, %v4684_v30, 0 }
 0x8f8   : > { %4867 = vmatpush.bf16.msrb.mxu2 %v4803_v28  ;;  %4716 = vmatpush.bf16.msrb.mxu0 %v4692_v32 }
 0x8f9   : > { %4729 = vmatpush.bf16.msrb.mxu1 %v4695_v23 }
 0x8fa   : > { %5514 = vrot.lane.b32.xlu1 %v13924_v50, %s15847_s24 }
 0x8fb   : > { %5758 = vperm.xlu2 %11904, %v11441_v19   ;;  %11380 = vmatmul.msk.bf16.vlgmr.msrb.gmra.mxu0 %vm370_vm7, %v11379_v42 }
 0x8fc   : > { %11381 = vmatmul.msk.bf16.vlgmr.msrb.gmra.mxu1 %vm370_vm7, %v11379_v42 }
 0x8fd   : > { %v4895_v33 = vpop.permute.xlu0 %4894 }
 0x8fe   : > { %v4902_v36 = vsel %vm448_vm9, %v4893_v35, %v4895_v33 }
 0x8ff   : > { %v4915_v5 = vsel %vm374_vm6, %v4902_v36, 0 }
 0x902   : > { %5640 = vrot.lane.b32.xlu1 %v13943_v17, %s11993_s22  ;;  %v5021_v17 = vpop.permute.xlu2 %5020 }
 0x904   : > { %v4680_v57 = vpop.permute.xlu1 %4679 }
 0x905   : > { %11386 = vmatmul.msk.bf16.vlgmr.msra.gmra.mxu2 %vm370_vm7, %v14042_v41  ;;  %v4686_v43 = vsel %vm368_vm8, %v4678_v25, %v4680_v57  ;;  %v4891_v61 = vpop.permute.xlu0 %4890 }
 0x906   : > { %4959 = vmatpush.bf16.msra.mxu2 %v4915_v5  ;;  %v4701_v6 = vsel %vm374_vm6, %v4686_v43, 0  ;;  %v4901_v48 = vsel %vm448_vm9, %v4891_v61, %v4893_v35  ;;  %v4900_v59 = vsel %vm448_vm9, %v4889_v45, %v4891_v61 }
 0x907   : > { %4755 = vmatpush.bf16.msrb.mxu3 %v4701_v6  ;;  %v4912_v39 = vsel %vm374_vm6, %v4901_v48, 0  ;;  %v4909_v31 = vsel %vm374_vm6, %v4900_v59, 0 }
 0x90a   : > { %5642 = vrot.lane.b32.xlu1 %v13950_v20, %s11993_s22  ;;  %11383 = vmatmul.msk.bf16.vlgmr.msrb.gmra.mxu3 %vm370_vm7, %v11379_v42  ;;  %v11392_v20 = vld [vmem:[%s15788_s5 + $0x98] sm:$0xf]  ;;  %v5141_v47 = vpop.permute.xlu2 %5140 }
 0x90b   : > { %4828 = vmatpush.bf16.msra.mxu3 %v4794_v21 }
 0x90c   : > { %v4682_v44 = vpop.permute.xlu1 %4681 }
 0x90d   : > { %v4687_v38 = vsel %vm368_vm8, %v4680_v57, %v4682_v44  ;;  %v4707_v46 = vsel %vm374_vm6, %v4682_v44, 0  ;;  %v5017_v50 = vpop.permute.xlu0 %5016 }
 0x90e   : > { %4781 = vmatpush.bf16.msra.mxu1 %v4707_v46  ;;  %v4704_v18 = vsel %vm374_vm6, %v4687_v38, 0 }
 0x90f   : > { %4880 = vmatpush.bf16.msrb.mxu3 %v4806_v27  ;;  %4768 = vmatpush.bf16.msra.mxu0 %v4704_v18 }
 0x911   : > { %11385 = vmatmul.msk.bf16.vlgmr.msra.gmra.mxu1 %vm370_vm7, %v11379_v42 }
 0x912   : > { %4854 = vmatpush.bf16.msrb.mxu1 %v4800_v37  ;;  %11384 = vmatmul.msk.bf16.vlgmr.msra.gmra.mxu0 %vm370_vm7, %v11379_v42  ;;  %v5025_v42 = vsel %vm3850_vm0, %v5015_v4, %v5017_v50  ;;  %v5137_v57 = vpop.permute.xlu2 %5136 }
 0x913   : > { %4841 = vmatpush.bf16.msrb.mxu0 %v4797_v13  ;;  %v5036_v28 = vsel %vm374_vm6, %v5025_v42, 0 }
 0x914   : > { %v4897_v49 = vpop.permute.xlu1 %4896 }
 0x915   : > { %11390 = vmatmul.msk.bf16.vlgmr.msrb.gmra.mxu2 %vm370_vm7, %v14042_v41  ;;  %v4903_v54 = vsel %vm448_vm9, %v4895_v33, %v4897_v49  ;;  %v5023_v15 = vpop.permute.xlu0 %5022  ;;  %v11399_v33 = vld [vmem:[%s15788_s5 + $0x9c] sm:$0xf] }
 0x916   : > { %4946 = vmatpush.bf16.msra.mxu1 %v4912_v39  ;;  %v4918_v40 = vsel %vm374_vm6, %v4903_v54, 0  ;;  %v5028_v1 = vsel %vm3850_vm0, %v5021_v17, %v5023_v15  ;;  %v5048_v43 = vsel %vm374_vm6, %v5023_v15, 0 }
 0x917   : > { %4933 = vmatpush.bf16.msra.mxu0 %v4909_v31  ;;  %v5045_v25 = vsel %vm374_vm6, %v5028_v1, 0 }
 0x91a   : > { %11387 = vmatmul.msk.bf16.vlgmr.msra.gmra.mxu3 %vm370_vm7, %v14042_v41  ;;  %v5263_v61 = vpop.permute.xlu2 %5262 }
 0x91b   : > { %4972 = vmatpush.bf16.msra.mxu3 %v4918_v40 }
 0x91c   : > { %v5013_v8 = vpop.permute.xlu1 %5012 }
 0x91d   : > { %v5024_v9 = vsel %vm3850_vm0, %v5013_v8, %v5015_v4  ;;  %v5143_v29 = vpop.permute.xlu0 %5142  ;;  %v11406_v4 = vld [vmem:[%s15788_s5 + $0xa0] sm:$0xf] }
 0x91e   : > { %v5033_v12 = vsel %vm374_vm6, %v5024_v9, 0  ;;  %v5150_v23 = vsel %vm15819_vm1, %v5141_v47, %v5143_v29 }
 0x91f   : > { %5057 = vmatpush.bf16.msrb.mxu2 %v5033_v12 }
 0x921   : > { %11389 = vmatmul.msk.bf16.vlgmr.msrb.gmra.mxu1 %vm370_vm7, %v14042_v41 }
 0x922   : > { %11388 = vmatmul.msk.bf16.vlgmr.msrb.gmra.mxu0 %vm370_vm7, %v14042_v41  ;;  %v5269_v31 = vpop.permute.xlu2 %5268 }
 0x924   : > { %v4899_v58 = vpop.permute.xlu1 %4898 }
 0x925   : > { %11395 = vmatmul.msk.bf16.vlgmr.msra.gmra.mxu2 %vm370_vm7, %v11392_v20  ;;  %v4904_v24 = vsel %vm448_vm9, %v4897_v49, %v4899_v58  ;;  %v4924_v26 = vsel %vm374_vm6, %v4899_v58, 0  ;;  %v5139_v5 = vpop.permute.xlu0 %5138 }
 0x926   : > { %5109 = vmatpush.bf16.msra.mxu2 %v5045_v25  ;;  %4998 = vmatpush.bf16.msrb.mxu1 %v4924_v26  ;;  %v4921_v56 = vsel %vm374_vm6, %v4904_v24, 0  ;;  %v5149_v6 = vsel %vm15819_vm1, %v5139_v5, %v5141_v47  ;;  %v5148_v27 = vsel %vm15819_vm1, %v5137_v57, %v5139_v5  ;;  %v11413_v24 = vld [vmem:[%s15788_s5 + $0xa4] sm:$0xf] }
 0x927   : > { %4985 = vmatpush.bf16.msrb.mxu0 %v4921_v56  ;;  %v5160_v44 = vsel %vm374_vm6, %v5149_v6, 0  ;;  %v5157_v38 = vsel %vm374_vm6, %v5148_v27, 0 }
 0x92a   : > { %11391 = vmatmul.msk.bf16.vlgmr.msrb.gmra.mxu3 %vm370_vm7, %v14042_v41  ;;  %v5163_v41 = vsel %vm374_vm6, %v5150_v23, 0  ;;  %v5389_v15 = vpop.permute.xlu2 %5388 }
 0x92b   : > { %5070 = vmatpush.bf16.msrb.mxu3 %v5036_v28 }
 0x92c   : > { %v5019_v51 = vpop.permute.xlu1 %5018 }
 0x92d   : > { %v5027_v30 = vsel %vm3850_vm0, %v5019_v51, %v5021_v17  ;;  %v5026_v32 = vsel %vm3850_vm0, %v5017_v50, %v5019_v51  ;;  %v5265_v46 = vpop.permute.xlu0 %5264 }
 0x92e   : > { %v5042_v19 = vsel %vm374_vm6, %v5027_v30, 0  ;;  %v5039_v35 = vsel %vm374_vm6, %v5026_v32, 0  ;;  %v5273_v8 = vsel %vm15818_vm13, %v5263_v61, %v5265_v46 }
 0x92f   : > { %v5284_v12 = vsel %vm374_vm6, %v5273_v8, 0 }
 0x931   : > { %11394 = vmatmul.msk.bf16.vlgmr.msra.gmra.mxu1 %vm370_vm7, %v11392_v20 }
 0x932   : > { %11393 = vmatmul.msk.bf16.vlgmr.msra.gmra.mxu0 %vm370_vm7, %v11392_v20  ;;  %5096 = vmatpush.bf16.msra.mxu1 %v5042_v19  ;;  %v5385_v28 = vpop.permute.xlu2 %5384 }
 0x933   : > { %5083 = vmatpush.bf16.msra.mxu0 %v5039_v35 }
 0x934   : > { %v5145_v36 = vpop.permute.xlu1 %5144 }
 0x935   : > { %11400 = vmatmul.msk.bf16.vlgmr.msrb.gmra.mxu2 %vm370_vm7, %v11399_v33  ;;  %v5151_v18 = vsel %vm15819_vm1, %v5143_v29, %v5145_v36  ;;  %v5271_v13 = vpop.permute.xlu0 %5270 }
 0x936   : > { %5207 = vmatpush.bf16.msrb.mxu2 %v5163_v41  ;;  %v5166_v37 = vsel %vm374_vm6, %v5151_v18, 0  ;;  %v5276_v49 = vsel %vm15818_vm13, %v5269_v31, %v5271_v13  ;;  %v5296_v51 = vsel %vm374_vm6, %v5271_v13, 0 }
 0x937   : > { %v5293_v40 = vsel %vm374_vm6, %v5276_v49, 0 }
 0x93a   : > { %11396 = vmatmul.msk.bf16.vlgmr.msra.gmra.mxu3 %vm370_vm7, %v11392_v20  ;;  %v5511_v23 = vpop.permute.xlu2 %5510 }
 0x93b   : > { %5122 = vmatpush.bf16.msra.mxu3 %v5048_v43 }
 0x93c   : > { %v5261_v21 = vpop.permute.xlu1 %5260 }
 0x93d   : > { %v5272_v45 = vsel %vm15818_vm13, %v5261_v21, %v5263_v61  ;;  %v5391_v17 = vpop.permute.xlu0 %5390 }
 0x93e   : > { %v5281_v48 = vsel %vm374_vm6, %v5272_v45, 0  ;;  %v5398_v58 = vsel %vm4224_vm2, %v5389_v15, %v5391_v17 }
 0x93f   : > { %v5411_v42 = vsel %vm374_vm6, %v5398_v58, 0 }
 0x941   : > { %11398 = vmatmul.msk.bf16.vlgmr.msrb.gmra.mxu1 %vm370_vm7, %v11392_v20 }
 0x942   : > { %11397 = vmatmul.msk.bf16.vlgmr.msrb.gmra.mxu0 %vm370_vm7, %v11392_v20  ;;  %5194 = vmatpush.bf16.msrb.mxu1 %v5160_v44 }
 0x943   : > { %5181 = vmatpush.bf16.msrb.mxu0 %v5157_v38  ;;  %v5517_v38 = vpop.permute.xlu2 %5516 }
 0x944   : > { %v5147_v59 = vpop.permute.xlu1 %5146 }
 0x945   : > { %11404 = vmatmul.msk.bf16.vlgmr.msra.gmra.mxu2 %vm370_vm7, %v11399_v33  ;;  %v5152_v39 = vsel %vm15819_vm1, %v5145_v36, %v5147_v59  ;;  %v5172_v50 = vsel %vm374_vm6, %v5147_v59, 0  ;;  %v5387_v47 = vpop.permute.xlu0 %5386  ;;  %v11420_v59 = vld [vmem:[%s15788_s5 + $0xa8] sm:$0xf] }
 0x946   : > { %5305 = vmatpush.bf16.msra.mxu2 %v5281_v48  ;;  %v5169_v54 = vsel %vm374_vm6, %v5152_v39, 0  ;;  %v5397_v29 = vsel %vm4224_vm2, %v5387_v47, %v5389_v15  ;;  %v5396_v32 = vsel %vm4224_vm2, %v5385_v28, %v5387_v47 }
 0x947   : > { %v5405_v35 = vsel %vm374_vm6, %v5396_v32, 0 }
 0x94a   : > { %11401 = vmatmul.msk.bf16.vlgmr.msrb.gmra.mxu3 %vm370_vm7, %v11399_v33 }
 0x94b   : > { %5220 = vmatpush.bf16.msrb.mxu3 %v5166_v37 }
 0x94c   : > { %v5267_v9 = vpop.permute.xlu1 %5266 }
 0x94d   : > { %v5275_v1 = vsel %vm15818_vm13, %v5267_v9, %v5269_v31  ;;  %v5274_v20 = vsel %vm15818_vm13, %v5265_v46, %v5267_v9  ;;  %v5513_v36 = vpop.permute.xlu0 %5512 }
 0x94e   : > { %v5290_v25 = vsel %vm374_vm6, %v5275_v1, 0  ;;  %v5287_v26 = vsel %vm374_vm6, %v5274_v20, 0  ;;  %v5521_v31 = vsel %vm4349_vm4, %v5511_v23, %v5513_v36  ;;  %v5637_v20 = vpop.permute.xlu2 %5636 }
 0x951   : > { %11403 = vmatmul.msk.bf16.vlgmr.msra.gmra.mxu1 %vm370_vm7, %v11399_v33 }
 0x952   : > { %11402 = vmatmul.msk.bf16.vlgmr.msra.gmra.mxu0 %vm370_vm7, %v11399_v33  ;;  %5246 = vmatpush.bf16.msra.mxu1 %v5172_v50 }
 0x953   : > { %5233 = vmatpush.bf16.msra.mxu0 %v5169_v54 }
 0x954   : > { %v5393_v56 = vpop.permute.xlu1 %5392 }
 0x955   : > { %11409 = vmatmul.msk.bf16.vlgmr.msrb.gmra.mxu2 %vm370_vm7, %v11406_v4  ;;  %v5399_v57 = vsel %vm4224_vm2, %v5391_v17, %v5393_v56  ;;  %v5519_v61 = vpop.permute.xlu0 %5518 }
 0x956   : > { %5357 = vmatpush.bf16.msrb.mxu2 %v5293_v40  ;;  %v5414_v21 = vsel %vm374_vm6, %v5399_v57, 0  ;;  %v5524_v48 = vsel %vm4349_vm4, %v5517_v38, %v5519_v61 }
 0x957   : > { %v5541_v39 = vsel %vm374_vm6, %v5524_v48, 0 }
 0x95a   : > { %11405 = vmatmul.msk.bf16.vlgmr.msra.gmra.mxu3 %vm370_vm7, %v11399_v33  ;;  %v5408_v33 = vsel %vm374_vm6, %v5397_v29, 0 }
 0x95b   : > { %5318 = vmatpush.bf16.msra.mxu3 %v5284_v12 }
 0x95c   : > { %v5509_v30 = vpop.permute.xlu1 %5508 }
 0x95d   : > { %v5520_v19 = vsel %vm4349_vm4, %v5509_v30, %v5511_v23  ;;  %v5639_v8 = vpop.permute.xlu0 %5638  ;;  %v5544_v30 = vsel %vm374_vm6, %v5519_v61, 0 }
 0x95e   : > { %v5529_v41 = vsel %vm374_vm6, %v5520_v19, 0  ;;  %v5646_v58 = vsel %vm4474_vm11, %v5637_v20, %v5639_v8  ;;  %v5633_v19 = vpop.permute.xlu2 %5632 }
 0x961   : > { %11408 = vmatmul.msk.bf16.vlgmr.msrb.gmra.mxu1 %vm370_vm7, %v11406_v4 }
 0x962   : > { %11407 = vmatmul.msk.bf16.vlgmr.msrb.gmra.mxu0 %vm370_vm7, %v11406_v4  ;;  %5344 = vmatpush.bf16.msrb.mxu1 %v5290_v25 }
 0x963   : > { %5331 = vmatpush.bf16.msrb.mxu0 %v5287_v26 }
 0x964   : > { %v5395_v27 = vpop.permute.xlu1 %5394 }
 0x965   : > { %11414 = vmatmul.msk.bf16.vlgmr.msra.gmra.mxu2 %vm370_vm7, %v11413_v24  ;;  %v5400_v45 = vsel %vm4224_vm2, %v5393_v56, %v5395_v27  ;;  %v5420_v18 = vsel %vm374_vm6, %v5395_v27, 0  ;;  %v5659_v56 = vsel %vm374_vm6, %v5646_v58, 0  ;;  %v5635_v32 = vpop.permute.xlu0 %5634 }
 0x966   : > { %5455 = vmatpush.bf16.msra.mxu2 %v5411_v42  ;;  %v5417_v13 = vsel %vm374_vm6, %v5400_v45, 0 }
 0x96a   : > { %11410 = vmatmul.msk.bf16.vlgmr.msrb.gmra.mxu3 %vm370_vm7, %v11406_v4 }
 0x96b   : > { %5370 = vmatpush.bf16.msrb.mxu3 %v5296_v51 }
 0x96c   : > { %v5515_v54 = vpop.permute.xlu1 %5514 }
 0x96d   : > { %v5523_v9 = vsel %vm4349_vm4, %v5515_v54, %v5517_v38  ;;  %v5522_v15 = vsel %vm4349_vm4, %v5513_v36, %v5515_v54 }
 0x96e   : > { %v5538_v25 = vsel %vm374_vm6, %v5523_v9, 0  ;;  %v5535_v26 = vsel %vm374_vm6, %v5522_v15, 0  ;;  %v11434_v15 = vld [vmem:[%s15788_s5 + $0xb0] sm:$0xf] }
 0x971   : > { %11412 = vmatmul.msk.bf16.vlgmr.msra.gmra.mxu1 %vm370_vm7, %v11406_v4 }
 0x972   : > { %11411 = vmatmul.msk.bf16.vlgmr.msra.gmra.mxu0 %vm370_vm7, %v11406_v4  ;;  %5442 = vmatpush.bf16.msra.mxu1 %v5408_v33  ;;  %v5532_v4 = vsel %vm374_vm6, %v5521_v31, 0  ;;  %v5645_v33 = vsel %vm4474_vm11, %v5635_v32, %v5637_v20 }
 0x973   : > { %5429 = vmatpush.bf16.msra.mxu0 %v5405_v35  ;;  %v5656_v45 = vsel %vm374_vm6, %v5645_v33, 0 }
 0x974   : > { %v5641_v61 = vpop.permute.xlu1 %5640 }
 0x975   : > { %11418 = vmatmul.msk.bf16.vlgmr.msrb.gmra.mxu2 %vm370_vm7, %v11413_v24 }
 0x976   : > { %5553 = vmatpush.bf16.msrb.mxu2 %v5529_v41  ;;  %v5644_v41 = vsel %vm4474_vm11, %v5633_v19, %v5635_v32 }
 0x978   : > { %v14160_v5 = vpop.f32.mrf.mxu2  ;;  %v4718_v43 = vpop.f32.mrf.mxu0 }
 0x979   : > { %v4731_v6 = vpop.f32.mrf.mxu1 }
 0x97a   : > { %11415 = vmatmul.msk.bf16.vlgmr.msra.gmra.mxu3 %vm370_vm7, %v11413_v24 }
 0x97b   : > { %5468 = vmatpush.bf16.msra.mxu3 %v5414_v21 }
 0x980   : > { %v4746_v44 = vpop.f32.mrf.mxu2  ;;  %v4720_v46 = vpop.f32.mrf.mxu0 }
 0x981   : > { %11417 = vmatmul.msk.bf16.vlgmr.msrb.gmra.mxu1 %vm370_vm7, %v11413_v24  ;;  %v4733_v37 = vpop.f32.mrf.mxu1  ;;  %v5653_v44 = vsel %vm374_vm6, %v5644_v41, 0  ;;  %v5647_v46 = vsel %vm4474_vm11, %v5639_v8, %v5641_v61 }
 0x982   : > { %11416 = vmatmul.msk.bf16.vlgmr.msrb.gmra.mxu0 %vm370_vm7, %v11413_v24  ;;  %5494 = vmatpush.bf16.msrb.mxu1 %v5420_v18  ;;  %v5662_v37 = vsel %vm374_vm6, %v5647_v46, 0 }
 0x983   : > { %5481 = vmatpush.bf16.msrb.mxu0 %v5417_v13 }
 0x985   : > { %11423 = vmatmul.msk.bf16.vlgmr.msra.gmra.mxu2 %vm370_vm7, %v11420_v59 }
 0x986   : > { %5605 = vmatpush.bf16.msra.mxu2 %v5541_v39 }
 0x988   : > { %v4817_v49 = vpop.f32.mrf.mxu2 }
 0x989   : > { %v14176_v50 = vadd.f32 %v4817_v49, %v4718_v43 }
 0x98a   : > { %11419 = vmatmul.msk.bf16.vlgmr.msrb.gmra.mxu3 %vm370_vm7, %v11413_v24  ;;  %v14188_v24 = vld [vmem:[%s15788_s5 + $0xac] sm:$0xf] }
 0x98b   : > { %5566 = vmatpush.bf16.msrb.mxu3 %v5532_v4 }
 0x98d   : > { %v4757_v40 = vpop.f32.mrf.mxu3 }
 0x98e   : > { %v4783_v12 = vpop.f32.mrf.mxu1 }
 0x98f   : > { %v4770_v17 = vpop.f32.mrf.mxu0 }
 0x990   : > { %v4819_v1 = vpop.f32.mrf.mxu2 }
 0x991   : > { %11422 = vmatmul.msk.bf16.vlgmr.msra.gmra.mxu1 %vm370_vm7, %v11420_v59 }
 0x992   : > { %11421 = vmatmul.msk.bf16.vlgmr.msra.gmra.mxu0 %vm370_vm7, %v11420_v59  ;;  %5592 = vmatpush.bf16.msra.mxu1 %v5538_v25 }
 0x993   : > { %5579 = vmatpush.bf16.msra.mxu0 %v5535_v26 }
 0x995   : > { %11428 = vmatmul.msk.bf16.vlgmr.msrb.gmra.mxu2 %vm370_vm7, %v14188_v24  ;;  %v4759_v42 = vpop.f32.mrf.mxu3 }
 0x996   : > { %5703 = vmatpush.bf16.msrb.mxu2 %v5659_v56  ;;  %v4785_v28 = vpop.f32.mrf.mxu1 }
 0x997   : > { %v4772_v47 = vpop.f32.mrf.mxu0 }
 0x998   : > { %v4869_v51 = vpop.f32.mrf.mxu2 }
 0x999   : > { %v4870_v29 = vadd.f32 %v4869_v51, %v4770_v17 }
 0x99a   : > { %11424 = vmatmul.msk.bf16.vlgmr.msra.gmra.mxu3 %vm370_vm7, %v11420_v59 }
 0x99b   : > { %5618 = vmatpush.bf16.msra.mxu3 %v5544_v30 }
 0x99d   : > { %v4830_v23 = vpop.f32.mrf.mxu3 }
 0x99e   : > { %v4831_v35 = vadd.f32 %v4830_v23, %v4731_v6  ;;  %v4856_v36 = vpop.f32.mrf.mxu1 }
 0x99f   : > { %v4843_v57 = vpop.f32.mrf.mxu0  ;;  %v4857_v43 = vadd.f32 %v4856_v36, %v4757_v40 }
 0x9a0   : > { %v4871_v21 = vpop.f32.mrf.mxu2  ;;  %v4844_v27 = vadd.f32 %v4843_v57, %v14160_v5 }
 0x9a1   : > { %11426 = vmatmul.msk.bf16.vlgmr.msrb.gmra.mxu1 %vm370_vm7, %v11420_v59 }
 0x9a2   : > { %11425 = vmatmul.msk.bf16.vlgmr.msrb.gmra.mxu0 %vm370_vm7, %v11420_v59  ;;  %5690 = vmatpush.bf16.msrb.mxu1 %v5656_v45  ;;  %v5643_v59 = vpop.permute.xlu1 %5642 }
 0x9a3   : > { %5677 = vmatpush.bf16.msrb.mxu0 %v5653_v44  ;;  %v5648_v49 = vsel %vm4474_vm11, %v5641_v61, %v5643_v59  ;;  %v5668_v9 = vsel %vm374_vm6, %v5643_v59, 0 }
 0x9a5   : > { %11432 = vmatmul.msk.bf16.vlgmr.msra.gmra.mxu2 %vm370_vm7, %v14188_v24  ;;  %v4832_v6 = vpop.f32.mrf.mxu3 }
 0x9a6   : > { %v4858_v38 = vpop.f32.mrf.mxu1 }
 0x9a7   : > { %v4845_v48 = vpop.f32.mrf.mxu0 }
 0x9a8   : > { %v4961_v5 = vpop.f32.mrf.mxu2 }
 0x9a9   : > { %v5006_v18 = vadd.f32 %v4961_v5, %v4844_v27 }
 0x9aa   : > { %11429 = vmatmul.msk.bf16.vlgmr.msrb.gmra.mxu3 %vm370_vm7, %v14188_v24 }
 0x9ab   : > { %5716 = vmatpush.bf16.msrb.mxu3 %v5662_v37 }
 0x9ad   : > { %v4882_v13 = vpop.f32.mrf.mxu3 }
 0x9ae   : > { %v4883_v39 = vadd.f32 %v4882_v13, %v4783_v12  ;;  %v4948_v31 = vpop.f32.mrf.mxu1  ;;  %v5665_v12 = vsel %vm374_vm6, %v5648_v49, 0 }
 0x9af   : > { %v4935_v4 = vpop.f32.mrf.mxu0  ;;  %v5005_v54 = vadd.f32 %v4948_v31, %v4831_v35 }
 0x9b0   : > { %v4963_v40 = vpop.f32.mrf.mxu2  ;;  %v5004_v8 = vadd.f32 %v4935_v4, %v14176_v50 }
 0x9b1   : > { %11431 = vmatmul.msk.bf16.vlgmr.msra.gmra.mxu1 %vm370_vm7, %v14188_v24 }
 0x9b2   : > { %11430 = vmatmul.msk.bf16.vlgmr.msra.gmra.mxu0 %vm370_vm7, %v14188_v24  ;;  %5742 = vmatpush.bf16.msra.mxu1 %v5668_v9 }
 0x9b3   : > { %5729 = vmatpush.bf16.msra.mxu0 %v5665_v12 }
 0x9b5   : > { %11437 = vmatmul.msk.bf16.vlgmr.msrb.gmra.mxu2 %vm370_vm7, %v11434_v15  ;;  %v4884_v17 = vpop.f32.mrf.mxu3 }
 0x9b6   : > { %v4950_v50 = vpop.f32.mrf.mxu1 }
 0x9b7   : > { %v4937_v1 = vpop.f32.mrf.mxu0 }
 0x9b8   : > { %v5059_v20 = vpop.f32.mrf.mxu2 }
 0x9b9   : > { %v5128_v58 = vadd.f32 %v5059_v20, %v5004_v8 }
 0x9ba   : > { %11433 = vmatmul.msk.bf16.vlgmr.msra.gmra.mxu3 %vm370_vm7, %v14188_v24 }
 0x9bd   : > { %v4974_v25 = vpop.f32.mrf.mxu3 }
 0x9be   : > { %v5007_v26 = vadd.f32 %v4974_v25, %v4857_v43  ;;  %v5000_v56 = vpop.f32.mrf.mxu1 }
 0x9bf   : > { %v4987_v42 = vpop.f32.mrf.mxu0  ;;  %v5009_v28 = vadd.f32 %v5000_v56, %v4883_v39 }
 0x9c0   : > { %v5061_v47 = vpop.f32.mrf.mxu2  ;;  %v5008_v51 = vadd.f32 %v4987_v42, %v4870_v29 }
 0x9c1   : > { %11436 = vmatmul.msk.bf16.vlgmr.msrb.gmra.mxu1 %vm370_vm7, %v11434_v15 }
 0x9c2   : > { %11435 = vmatmul.msk.bf16.vlgmr.msrb.gmra.mxu0 %vm370_vm7, %v11434_v15 }
 0x9c5   : > { %v4976_v30 = vpop.f32.mrf.mxu3 }
 0x9c6   : > { %v5002_v32 = vpop.f32.mrf.mxu1 }
 0x9c7   : > { %v4989_v23 = vpop.f32.mrf.mxu0 }
 0x9c8   : > { %v5111_v19 = vpop.f32.mrf.mxu2 }
 0x9c9   : > { %v5132_v33 = vadd.f32 %v5111_v19, %v5008_v51 }
 0x9ca   : > { %11438 = vmatmul.msk.bf16.vlgmr.msrb.gmra.mxu3 %vm370_vm7, %v11434_v15 }
 0x9cd   : > { %v5072_v35 = vpop.f32.mrf.mxu3 }
 0x9ce   : > { %v5129_v24 = vadd.f32 %v5072_v35, %v5005_v54  ;;  %v5098_v36 = vpop.f32.mrf.mxu1 }
 0x9cf   : > { %v5085_v41 = vpop.f32.mrf.mxu0  ;;  %v5131_v57 = vadd.f32 %v5098_v36, %v5007_v26 }
 0x9d0   : > { %v5113_v43 = vpop.f32.mrf.mxu2  ;;  %v5130_v21 = vadd.f32 %v5085_v41, %v5006_v18 }
 0x9d1   : > { %11440 = vmatmul.msk.bf16.vlgmr.msra.gmra.mxu1 %vm370_vm7, %v11434_v15 }
 0x9d2   : > { %11439 = vmatmul.msk.bf16.vlgmr.msra.gmra.mxu0 %vm370_vm7, %v11434_v15 }
 0x9d5   : > { %v5074_v29 = vpop.f32.mrf.mxu3 }
 0x9d6   : > { %v5100_v27 = vpop.f32.mrf.mxu1 }
 0x9d7   : > { %v5087_v45 = vpop.f32.mrf.mxu0 }
 0x9d8   : > { %v5209_v61 = vpop.f32.mrf.mxu2 }
 0x9d9   : > { %v5254_v44 = vadd.f32 %v5209_v61, %v5130_v21 }
 0x9dd   : > { %v5124_v6 = vpop.f32.mrf.mxu3 }
 0x9de   : > { %v5133_v38 = vadd.f32 %v5124_v6, %v5009_v28  ;;  %v5196_v46 = vpop.f32.mrf.mxu1 }
 0x9df   : > { %v5183_v48 = vpop.f32.mrf.mxu0  ;;  %v5253_v5 = vadd.f32 %v5196_v46, %v5129_v24 }
 0x9e0   : > { %v5211_v37 = vpop.f32.mrf.mxu2  ;;  %v5252_v59 = vadd.f32 %v5183_v48, %v5128_v58 }
 0x9e5   : > { %v5126_v13 = vpop.f32.mrf.mxu3 }
 0x9e6   : > { %v5198_v39 = vpop.f32.mrf.mxu1 }
 0x9e7   : > { %v5185_v31 = vpop.f32.mrf.mxu0 }
 0x9e8   : > { %v5307_v18 = vpop.f32.mrf.mxu2 }
 0x9e9   : > { %v5376_v49 = vadd.f32 %v5307_v18, %v5252_v59 }
 0x9ed   : > { %v5222_v4 = vpop.f32.mrf.mxu3 }
 0x9ee   : > { %v5255_v54 = vadd.f32 %v5222_v4, %v5131_v57  ;;  %v5248_v40 = vpop.f32.mrf.mxu1 }
 0x9ef   : > { %v5235_v8 = vpop.f32.mrf.mxu0  ;;  %v14229_v9 = vadd.f32 %v5248_v40, %v5133_v38 }
 0x9f0   : > { %v5309_v15 = vpop.f32.mrf.mxu2  ;;  %v5256_v12 = vadd.f32 %v5235_v8, %v5132_v33 }
 0x9f5   : > { %v5224_v17 = vpop.f32.mrf.mxu3 }
 0x9f6   : > { %v5250_v50 = vpop.f32.mrf.mxu1 }
 0x9f7   : > { %v5237_v1 = vpop.f32.mrf.mxu0 }
 0x9f8   : > { %v5359_v20 = vpop.f32.mrf.mxu2 }
 0x9f9   : > { %v14231_v25 = vadd.f32 %v5359_v20, %v5256_v12 }
 0x9fd   : > { %v5320_v58 = vpop.f32.mrf.mxu3 }
 0x9fe   : > { %v5346_v26 = vpop.f32.mrf.mxu1 }
 0x9ff   : > { %v5333_v56 = vpop.f32.mrf.mxu0  ;;  %v5379_v42 = vadd.f32 %v5346_v26, %v5255_v54  ;;  %v5377_v54 = vadd.f32 %v5320_v58, %v5253_v5 }
 0xa00   : > { %v5361_v28 = vpop.f32.mrf.mxu2  ;;  %v5378_v47 = vadd.f32 %v5333_v56, %v5254_v44  ;;  %v5759_v56 = vpop.permute.xlu2 %5758 }
 0xa05   : > { %v5322_v51 = vpop.f32.mrf.mxu3 }
 0xa06   : > { %v5348_v30 = vpop.f32.mrf.mxu1 }
 0xa07   : > { %v5335_v32 = vpop.f32.mrf.mxu0  ;;  %v11907_v30 = vld [vmem:[%s12453_s25 + $0x8] sm:$0xff] }
 0xa08   : > { %v5457_v23 = vpop.f32.mrf.mxu2 }
 0xa09   : > { %v5502_v19 = vadd.f32 %v5457_v23, %v5378_v47 }
 0xa0d   : > { %v5372_v35 = vpop.f32.mrf.mxu3 }
 0xa0e   : > { %v5444_v24 = vpop.f32.mrf.mxu1 }
 0xa0f   : > { %v5431_v33 = vpop.f32.mrf.mxu0  ;;  %v5501_v40 = vadd.f32 %v5444_v24, %v5377_v54 }
 0xa10   : > { %v5459_v36 = vpop.f32.mrf.mxu2  ;;  %v5500_v8 = vadd.f32 %v5431_v33, %v5376_v49 }
 0xa11   : > { %v11908_v36 = vld [vmem:[%s12453_s25] sm:$0xff] }
 0xa15   : > { %v5374_v41 = vpop.f32.mrf.mxu3 }
 0xa16   : > { %v5446_v57 = vpop.f32.mrf.mxu1 }
 0xa17   : > { %v5433_v43 = vpop.f32.mrf.mxu0 }
 0xa18   : > { %v5555_v21 = vpop.f32.mrf.mxu2 }
 0xa19   : > { %v5624_v17 = vadd.f32 %v5555_v21, %v5500_v8 }
 0xa1d   : > { %v5470_v29 = vpop.f32.mrf.mxu3 }
 0xa1e   : > { %v5496_v27 = vpop.f32.mrf.mxu1 }
 0xa1f   : > { %v5483_v45 = vpop.f32.mrf.mxu0 }
 0xa20   : > { %v5557_v61 = vpop.f32.mrf.mxu2 }
 0xa21   : > { %v5381_v61 = vadd.f32 %v5372_v35, %v14229_v9 }
 0xa25   : > { %v5472_v6 = vpop.f32.mrf.mxu3 }
 0xa26   : > { %v5498_v38 = vpop.f32.mrf.mxu1  ;;  %v5503_v6 = vadd.f32 %v5470_v29, %v5379_v42 }
 0xa27   : > { %v5485_v44 = vpop.f32.mrf.mxu0 }
 0xa28   : > { %v5607_v46 = vpop.f32.mrf.mxu2  ;;  %v5505_v44 = vadd.f32 %v5496_v27, %v5381_v61 }
 0xa2d   : > { %v5568_v48 = vpop.f32.mrf.mxu3 }
 0xa2e   : > { %v5594_v37 = vpop.f32.mrf.mxu1  ;;  %v5625_v15 = vadd.f32 %v5568_v48, %v5501_v40  ;;  %v5504_v48 = vadd.f32 %v5483_v45, %v14231_v25  ;;  %v11910_v25 = vld [vmem:[%s12453_s25 + $0x18] sm:$0xff] }
 0xa2f   : > { %v5581_v59 = vpop.f32.mrf.mxu0 }
 0xa30   : > { %v5609_v13 = vpop.f32.mrf.mxu2  ;;  %v5626_v23 = vadd.f32 %v5581_v59, %v5502_v19  ;;  %v5627_v59 = vadd.f32 %v5594_v37, %v5503_v6 }
 0xa35   : > { %v5570_v39 = vpop.f32.mrf.mxu3 }
 0xa36   : > { %v5596_v31 = vpop.f32.mrf.mxu1 }
 0xa37   : > { %v5583_v18 = vpop.f32.mrf.mxu0  ;;  %v5628_v31 = vadd.f32 %v5607_v46, %v5504_v48 }
 0xa38   : > { %v5705_v4 = vpop.f32.mrf.mxu2  ;;  %v11909_v18 = vld [vmem:[%s12453_s25 + $0x10] sm:$0xff] }
 0xa39   : > { %v5750_v24 = vadd.f32 %v5705_v4, %v5626_v23 }
 0xa3b   : > { %v5763_v38 = vadd.f32 %v5759_v56, %v5750_v24 }
 0xa3d   : > { %v5620_v12 = vpop.f32.mrf.mxu3  ;;  %v5769_v4 = vadd.f32 %v11909_v18, %v5763_v38 }
 0xa3e   : > { %v5692_v50 = vpop.f32.mrf.mxu1  ;;  %v5629_v13 = vadd.f32 %v5620_v12, %v5505_v44 }
 0xa3f   : > { %v5679_v1 = vpop.f32.mrf.mxu0  ;;  %v5749_v20 = vadd.f32 %v5692_v50, %v5625_v15  ;;  %v5775_v8 = vmax.f32 %v5769_v4, 0.0  ;;  %v11911_v15 = vld [vmem:[%s12453_s25 + $0x28] sm:$0xff]  ;;  %v11912_v50 = vld [vmem:[%s12453_s25 + $0x20] sm:$0xff] }
 0xa40   : > { %v5707_v26 = vpop.f32.mrf.mxu2  ;;  %v5748_v28 = vadd.f32 %v5679_v1, %v5624_v17 }
 0xa41   : > { %v5762_v47 = vadd.f32 %v5759_v56, %v5749_v20  ;;  %v14251_v26 = vmul.f32 %v5775_v8, %v13898_v63 }
 0xa42   : > { %v5761_v51 = vadd.f32 %v5759_v56, %v5748_v28 }
 0xa43   : > { %v5768_v32 = vadd.f32 %v11907_v30, %v5762_v47 }
 0xa44   : > { %v5767_v41 = vadd.f32 %v11908_v36, %v5761_v51 }
 0xa45   : > { %v5774_v5 = vmax.f32 %v5768_v32, 0.0  ;;  %v5622_v58 = vpop.f32.mrf.mxu3 }
 0xa46   : > { %v5773_v49 = vmax.f32 %v5767_v41, 0.0  ;;  %v5694_v33 = vpop.f32.mrf.mxu1 }
 0xa47   : > { %v14236_v57 = vmul.f32 %v5774_v5, %v13896_v60  ;;  %v5681_v43 = vpop.f32.mrf.mxu0 }
 0xa48   : > { %v14239_v21 = vmul.f32 %v5773_v49, %v13894_v22 }
 0xa4a   : > { %v5785_v19 = vpack.c.bf16 %v14236_v57, %v14239_v21 }
 0xa4c   : > { %5791 = vrot.lane.b32.xlu0 %v5785_v19, %s15848_s10 }
 0xa4d   : > { %v5718_v39 = vpop.f32.mrf.mxu3 }
 0xa4e   : > { %v5751_v9 = vadd.f32 %v5718_v39, %v5627_v59  ;;  %v5744_v42 = vpop.f32.mrf.mxu1 }
 0xa4f   : > { %v5731_v35 = vpop.f32.mrf.mxu0  ;;  %v5753_v29 = vadd.f32 %v5744_v42, %v5629_v13 }
 0xa50   : > { %v5764_v54 = vadd.f32 %v5759_v56, %v5751_v9  ;;  %v5752_v40 = vadd.f32 %v5731_v35, %v5628_v31 }
 0xa51   : > { %v5766_v27 = vadd.f32 %v5759_v56, %v5753_v29 }
 0xa52   : > { %v5770_v45 = vadd.f32 %v11910_v25, %v5764_v54  ;;  %v5765_v37 = vadd.f32 %v5759_v56, %v5752_v40 }
 0xa53   : > { %v5772_v17 = vadd.f32 %v11911_v15, %v5766_v27  ;;  %v11443_v15 = vld [vmem:[%s15788_s5 + $0xb8] sm:$0xf] }
 0xa54   : > { %v5776_v12 = vmax.f32 %v5770_v45, 0.0  ;;  %v5771_v1 = vadd.f32 %v11912_v50, %v5765_v37 }
 0xa55   : > { %v5778_v46 = vmax.f32 %v5772_v17, 0.0  ;;  %v5720_v20 = vpop.f32.mrf.mxu3 }
 0xa56   : > { %v14254_v28 = vmul.f32 %v5776_v12, %v13900_v7  ;;  %v5777_v47 = vmax.f32 %v5771_v1, 0.0  ;;  %v5746_v51 = vpop.f32.mrf.mxu1 }
 0xa57   : > { %v14257_v30 = vmul.f32 %v5778_v46, %v13912_v34  ;;  %v5733_v32 = vpop.f32.mrf.mxu0 }
 0xa58   : > { %v14260_v56 = vmul.f32 %v5777_v47, %v13910_v3  ;;  %v5786_v23 = vpack.c.bf16 %v14254_v28, %v14251_v26 }
 0xa5a   : > { %5793 = vrot.lane.b32.xlu1 %v5786_v23, %s15848_s10  ;;  %v5787_v36 = vpack.c.bf16 %v14257_v30, %v14260_v56 }
 0xa5c   : > { %5795 = vrot.lane.b32.xlu2 %v5787_v36, %s15848_s10  ;;  %v14399_v36 = vld [vmem:[%s15788_s5 + $0xb4] sm:$0xf] }
 0xab6   : > { %v5796_v49 = vpop.permute.xlu2 %5795 }
 0xab7   : > { %v5799_v19 = vrot.slane %v5796_v49, 4 }
 0xabe   : > { %v5792_v41 = vpop.permute.xlu0 %5791 }
 0xabf   : > { %v5797_v5 = vrot.slane %v5792_v41, 4 }
 0xac1   : > { %v5800_v58 = vsel %vm2638_vm3, %v5797_v5, %v5792_v41 }
 0xac2   : > { %5808 = vst.msk [vmem:[#allocation4] sm:$0xff] %vm12834_vm10, %v5800_v58 }
 0xac9   : > { %v5813_v24 = vld [vmem:[#allocation4] sm:$0xff] }
 0xaca   : > { %v5821_v33 = vunpack.c.l.b16 %v5813_v24  ;;  %v5822_v43 = vunpack.c.h.b16 %v5813_v24 }
 0xacc   : > { %v5794_v61 = vpop.permute.xlu1 %5793  ;;  %v14271_v6 = vpack.c.b16 %v5821_v33, %v5821_v33  ;;  %v14273_v38 = vpack.c.b16 %v5822_v43, %v5822_v43 }
 0xacd   : > { %v5798_v44 = vrot.slane %v5794_v61, 4 }
 0xace   : > { %5833 = vrot.lane.b32.xlu0 %v14271_v6, %s15842_s17  ;;  %5835 = vrot.lane.b32.xlu1 %v14273_v38, %s15842_s17  ;;  %v5953_v37 = vsel %vm374_vm6, %v14271_v6, 0 }
 0xacf   : > { %v5801_v48 = vsel %vm374_vm6, %v5797_v5, %v5798_v44  ;;  %v5803_v59 = vsel %vm374_vm6, %v5798_v44, %v5799_v19  ;;  %v5956_v19 = vsel %vm374_vm6, %v14273_v38, 0  ;;  %v11505_v44 = vld [vmem:[%s15790_s7 + $0x30] sm:$0xff] }
 0xad0   : > { %v5802_v13 = vsel %vm2638_vm3, %v5801_v48, %v5794_v61  ;;  %v5804_v39 = vsel %vm2638_vm3, %v5803_v59, %v5796_v49 }
 0xad1   : > { %5810 = vst.msk [vmem:[#allocation4 + $0x10] sm:$0xff] %vm12869_vm14, %v5804_v39  ;;  %v5823_v31 = vunpack.c.l.b16 %v5802_v13  ;;  %v5824_v4 = vunpack.c.h.b16 %v5802_v13 }
 0xad3   : > { %v14285_v18 = vpack.c.b16 %v5823_v31, %v5823_v31  ;;  %v14293_v40 = vpack.c.b16 %v5824_v4, %v5824_v4 }
 0xad5   : > { %5837 = vrot.lane.b32.xlu2 %v14285_v18, %s15842_s17  ;;  %v5959_v48 = vsel %vm374_vm6, %v14285_v18, 0 }
 0xad8   : > { %v5815_v9 = vld [vmem:[#allocation4 + $0x10] sm:$0xff] }
 0xad9   : > { %v5826_v42 = vunpack.c.h.b16 %v5815_v9  ;;  %v5825_v35 = vunpack.c.l.b16 %v5815_v9 }
 0xadb   : > { %v14289_v29 = vpack.c.b16 %v5826_v42, %v5826_v42  ;;  %v14291_v54 = vpack.c.b16 %v5825_v35, %v5825_v35 }
 0xadd   : > { %5843 = vrot.lane.b32.xlu1 %v14289_v29, %s15842_s17  ;;  %5841 = vrot.lane.b32.xlu0 %v14291_v54, %s15842_s17  ;;  %v5965_v17 = vsel %vm374_vm6, %v14291_v54, 0  ;;  %v5968_v59 = vsel %vm374_vm6, %v14289_v29, 0 }
 0xade   : > { %5839 = vrot.lane.b32.xlu2 %v14293_v40, %s15842_s17 }
 0xae5   : > { %6052 = vrot.lane.b32.xlu1 %v14273_v38, %s15843_s21  ;;  %6050 = vrot.lane.b32.xlu0 %v14271_v6, %s15843_s21 }
 0xae6   : > { %6054 = vrot.lane.b32.xlu2 %v14285_v18, %s15843_s21 }
 0xaed   : > { %6060 = vrot.lane.b32.xlu1 %v14289_v29, %s15843_s21  ;;  %6058 = vrot.lane.b32.xlu0 %v14291_v54, %s15843_s21 }
 0xaee   : > { %6056 = vrot.lane.b32.xlu2 %v14293_v40, %s15843_s21 }
 0xaf5   : > { %6180 = vrot.lane.b32.xlu1 %v14293_v40, %s15844_s19  ;;  %6178 = vrot.lane.b32.xlu0 %v14285_v18, %s15844_s19 }
 0xaf6   : > { %6182 = vrot.lane.b32.xlu2 %v14291_v54, %s15844_s19 }
 0xafd   : > { %6176 = vrot.lane.b32.xlu1 %v14273_v38, %s15844_s19  ;;  %6174 = vrot.lane.b32.xlu0 %v14271_v6, %s15844_s19 }
 0xafe   : > { %6298 = vrot.lane.b32.xlu2 %v14271_v6, %s15845_s23 }
 0xb05   : > { %6302 = vrot.lane.b32.xlu1 %v14285_v18, %s15845_s23  ;;  %6300 = vrot.lane.b32.xlu0 %v14273_v38, %s15845_s23 }
 0xb06   : > { %6184 = vrot.lane.b32.xlu2 %v14289_v29, %s15844_s19 }
 0xb0d   : > { %6308 = vrot.lane.b32.xlu1 %v14289_v29, %s15845_s23  ;;  %6306 = vrot.lane.b32.xlu0 %v14291_v54, %s15845_s23 }
 0xb0e   : > { %6304 = vrot.lane.b32.xlu2 %v14293_v40, %s15845_s23 }
 0xb15   : > { %6428 = vrot.lane.b32.xlu1 %v14293_v40, %s15835_s12  ;;  %6426 = vrot.lane.b32.xlu0 %v14285_v18, %s15835_s12 }
 0xb16   : > { %6430 = vrot.lane.b32.xlu2 %v14291_v54, %s15835_s12 }
 0xb1d   : > { %6424 = vrot.lane.b32.xlu1 %v14273_v38, %s15835_s12  ;;  %6422 = vrot.lane.b32.xlu0 %v14271_v6, %s15835_s12 }
 0xb1e   : > { %6546 = vrot.lane.b32.xlu2 %v14271_v6, %s15846_s26 }
 0xb25   : > { %6550 = vrot.lane.b32.xlu1 %v14285_v18, %s15846_s26  ;;  %6548 = vrot.lane.b32.xlu0 %v14273_v38, %s15846_s26 }
 0xb26   : > { %6432 = vrot.lane.b32.xlu2 %v14289_v29, %s15835_s12 }
 0xb2d   : > { %6556 = vrot.lane.b32.xlu1 %v14289_v29, %s15846_s26  ;;  %6554 = vrot.lane.b32.xlu0 %v14291_v54, %s15846_s26 }
 0xb2e   : > { %6552 = vrot.lane.b32.xlu2 %v14293_v40, %s15846_s26 }
 0xb2f   : > { %v5838_v27 = vpop.permute.xlu2 %5837 }
 0xb35   : > { %6676 = vrot.lane.b32.xlu1 %v14293_v40, %s15847_s24  ;;  %6674 = vrot.lane.b32.xlu0 %v14285_v18, %s15847_s24 }
 0xb36   : > { %6678 = vrot.lane.b32.xlu2 %v14291_v54, %s15847_s24 }
 0xb38   : > { %v5840_v8 = vpop.permute.xlu2 %5839 }
 0xb39   : > { %v5847_v25 = vsel %vm368_vm8, %v5838_v27, %v5840_v8 }
 0xb3a   : > { %v5860_v45 = vsel %vm374_vm6, %v5847_v25, 0 }
 0xb3b   : > { %5904 = vmatpush.bf16.msrb.mxu0 %v5860_v45 }
 0xb3d   : > { %6672 = vrot.lane.b32.xlu1 %v14273_v38, %s15847_s24  ;;  %6670 = vrot.lane.b32.xlu0 %v14271_v6, %s15847_s24 }
 0xb3e   : > { %6794 = vrot.lane.b32.xlu2 %v14271_v6, %s11993_s22  ;;  %11446 = vmatmul.msk.bf16.vlgmr.msrb.gmra.mxu0 %vm370_vm7, %v11443_v15  ;;  %v5962_v6 = vsel %vm374_vm6, %v14293_v40, 0 }
 0xb3f   : > { %5977 = vmatpush.bf16.msra.mxu0 %v5953_v37 }
 0xb40   : > { %v5834_v12 = vpop.permute.xlu0 %5833  ;;  %v5836_v50 = vpop.permute.xlu1 %5835 }
 0xb41   : > { %v5845_v1 = vsel %vm368_vm8, %v5834_v12, %v5836_v50  ;;  %v5846_v46 = vsel %vm368_vm8, %v5836_v50, %v5838_v27  ;;  %v6055_v20 = vpop.permute.xlu2 %6054 }
 0xb42   : > { %v5854_v47 = vsel %vm374_vm6, %v5845_v1, 0  ;;  %v5857_v51 = vsel %vm374_vm6, %v5846_v46, 0 }
 0xb43   : > { %6029 = vmatpush.bf16.msrb.mxu0 %v5965_v17  ;;  %5878 = vmatpush.bf16.msra.mxu2 %v5854_v47 }
 0xb44   : > { %5891 = vmatpush.bf16.msra.mxu3 %v5857_v51 }
 0xb45   : > { %6798 = vrot.lane.b32.xlu1 %v14285_v18, %s11993_s22  ;;  %6796 = vrot.lane.b32.xlu0 %v14273_v38, %s11993_s22 }
 0xb46   : > { %11444 = vmatmul.msk.bf16.vlgmr.msra.gmra.mxu2 %vm370_vm7, %v11443_v15  ;;  %6680 = vrot.lane.b32.xlu2 %v14289_v29, %s15847_s24 }
 0xb47   : > { %11445 = vmatmul.msk.bf16.vlgmr.msra.gmra.mxu3 %vm370_vm7, %v11443_v15 }
 0xb49   : > { %v6057_v32 = vpop.permute.xlu2 %6056 }
 0xb4a   : > { %v6064_v23 = vsel %vm448_vm9, %v6055_v20, %v6057_v32 }
 0xb4b   : > { %v6077_v41 = vsel %vm374_vm6, %v6064_v23, 0 }
 0xb4d   : > { %6804 = vrot.lane.b32.xlu1 %v14289_v29, %s11993_s22  ;;  %6802 = vrot.lane.b32.xlu0 %v14291_v54, %s11993_s22 }
 0xb4e   : > { %11450 = vmatmul.msk.bf16.vlgmr.msra.gmra.mxu0 %vm370_vm7, %v14399_v36  ;;  %6800 = vrot.lane.b32.xlu2 %v14293_v40, %s11993_s22 }
 0xb4f   : > { %v5842_v5 = vpop.permute.xlu0 %5841  ;;  %v5844_v58 = vpop.permute.xlu1 %5843  ;;  %6121 = vmatpush.bf16.msra.mxu0 %v6077_v41 }
 0xb50   : > { %v5848_v24 = vsel %vm368_vm8, %v5840_v8, %v5842_v5  ;;  %v5849_v49 = vsel %vm368_vm8, %v5842_v5, %v5844_v58  ;;  %v5869_v33 = vsel %vm374_vm6, %v5844_v58, 0 }
 0xb51   : > { %5943 = vmatpush.bf16.msrb.mxu3 %v5869_v33  ;;  %v5863_v43 = vsel %vm374_vm6, %v5848_v24, 0  ;;  %v5866_v61 = vsel %vm374_vm6, %v5849_v49, 0  ;;  %v6183_v39 = vpop.permute.xlu2 %6182 }
 0xb52   : > { %5917 = vmatpush.bf16.msrb.mxu1 %v5863_v43  ;;  %5930 = vmatpush.bf16.msrb.mxu2 %v5866_v61 }
 0xb55   : > { %6016 = vmatpush.bf16.msra.mxu3 %v5962_v6  ;;  %6920 = vperm.xlu0 %11905, %v11505_v44  }
 0xb56   : > { %5990 = vmatpush.bf16.msra.mxu1 %v5956_v19  ;;  %6003 = vmatpush.bf16.msra.mxu2 %v5959_v48 }
 0xb57   : > { %11447 = vmatmul.msk.bf16.vlgmr.msrb.gmra.mxu1 %vm370_vm7, %v11443_v15  ;;  %11448 = vmatmul.msk.bf16.vlgmr.msrb.gmra.mxu2 %vm370_vm7, %v11443_v15  ;;  %v6051_v38 = vpop.permute.xlu0 %6050  ;;  %v6053_v13 = vpop.permute.xlu1 %6052 }
 0xb58   : > { %11449 = vmatmul.msk.bf16.vlgmr.msrb.gmra.mxu3 %vm370_vm7, %v11443_v15  ;;  %v6062_v31 = vsel %vm448_vm9, %v6051_v38, %v6053_v13  ;;  %v6063_v4 = vsel %vm448_vm9, %v6053_v13, %v6055_v20  ;;  %v11456_v15 = vld [vmem:[%s15788_s5 + $0xbc] sm:$0xf] }
 0xb59   : > { %v6071_v18 = vsel %vm374_vm6, %v6062_v31, 0  ;;  %v6074_v9 = vsel %vm374_vm6, %v6063_v4, 0  ;;  %v6299_v54 = vpop.permute.xlu2 %6298 }
 0xb5a   : > { %6042 = vmatpush.bf16.msrb.mxu1 %v5968_v59  ;;  %6095 = vmatpush.bf16.msrb.mxu2 %v6071_v18 }
 0xb5b   : > { %6108 = vmatpush.bf16.msrb.mxu3 %v6074_v9 }
 0xb5e   : > { %11454 = vmatmul.msk.bf16.vlgmr.msrb.gmra.mxu0 %vm370_vm7, %v14399_v36 }
 0xb5f   : > { %v6059_v42 = vpop.permute.xlu0 %6058  ;;  %v6061_v35 = vpop.permute.xlu1 %6060 }
 0xb60   : > { %v6065_v29 = vsel %vm448_vm9, %v6057_v32, %v6059_v42  ;;  %v6066_v40 = vsel %vm448_vm9, %v6059_v42, %v6061_v35  ;;  %v6086_v37 = vsel %vm374_vm6, %v6061_v35, 0 }
 0xb61   : > { %v6080_v27 = vsel %vm374_vm6, %v6065_v29, 0  ;;  %v6083_v8 = vsel %vm374_vm6, %v6066_v40, 0  ;;  %v6185_v17 = vpop.permute.xlu2 %6184 }
 0xb62   : > { %v6190_v12 = vsel %vm3850_vm0, %v6183_v39, %v6185_v17  ;;  %v6210_v38 = vsel %vm374_vm6, %v6185_v17, 0 }
 0xb63   : > { %v6207_v51 = vsel %vm374_vm6, %v6190_v12, 0  ;;  %v11470_v12 = vld [vmem:[%s15788_s5 + $0xc4] sm:$0xf] }
 0xb67   : > { %11451 = vmatmul.msk.bf16.vlgmr.msra.gmra.mxu1 %vm370_vm7, %v14399_v36  ;;  %11452 = vmatmul.msk.bf16.vlgmr.msra.gmra.mxu2 %vm370_vm7, %v14399_v36  ;;  %v6179_v25 = vpop.permute.xlu0 %6178  ;;  %v6181_v45 = vpop.permute.xlu1 %6180 }
 0xb68   : > { %6134 = vmatpush.bf16.msra.mxu1 %v6080_v27  ;;  %11453 = vmatmul.msk.bf16.vlgmr.msra.gmra.mxu3 %vm370_vm7, %v14399_v36  ;;  %v6188_v32 = vsel %vm3850_vm0, %v6179_v25, %v6181_v45  ;;  %v6189_v23 = vsel %vm3850_vm0, %v6181_v45, %v6183_v39 }
 0xb69   : > { %6147 = vmatpush.bf16.msra.mxu2 %v6083_v8  ;;  %6160 = vmatpush.bf16.msra.mxu3 %v6086_v37  ;;  %v6201_v5 = vsel %vm374_vm6, %v6188_v32, 0  ;;  %v6204_v49 = vsel %vm374_vm6, %v6189_v23, 0  ;;  %v6305_v33 = vpop.permute.xlu2 %6304 }
 0xb6e   : > { %11459 = vmatmul.msk.bf16.vlgmr.msra.gmra.mxu0 %vm370_vm7, %v11456_v15 }
 0xb6f   : > { %v6175_v50 = vpop.permute.xlu0 %6174  ;;  %v6177_v1 = vpop.permute.xlu1 %6176 }
 0xb70   : > { %v6186_v46 = vsel %vm3850_vm0, %v6175_v50, %v6177_v1  ;;  %v6187_v47 = vsel %vm3850_vm0, %v6177_v1, %v6179_v25 }
 0xb71   : > { %v6195_v20 = vsel %vm374_vm6, %v6186_v46, 0  ;;  %v6198_v41 = vsel %vm374_vm6, %v6187_v47, 0  ;;  %v6431_v48 = vpop.permute.xlu2 %6430 }
 0xb72   : > { %6219 = vmatpush.bf16.msrb.mxu0 %v6195_v20 }
 0xb76   : > { %6271 = vmatpush.bf16.msra.mxu0 %v6207_v51 }
 0xb77   : > { %11455 = vmatmul.msk.bf16.vlgmr.msrb.gmra.mxu1 %vm370_vm7, %v14399_v36  ;;  %11457 = vmatmul.msk.bf16.vlgmr.msrb.gmra.mxu2 %vm370_vm7, %v11456_v15  ;;  %v6301_v58 = vpop.permute.xlu0 %6300  ;;  %v6303_v24 = vpop.permute.xlu1 %6302  ;;  %v11463_v36 = vld [vmem:[%s15788_s5 + $0xc0] sm:$0xf] }
 0xb78   : > { %6232 = vmatpush.bf16.msrb.mxu1 %v6198_v41  ;;  %11458 = vmatmul.msk.bf16.vlgmr.msrb.gmra.mxu3 %vm370_vm7, %v11456_v15  ;;  %v6312_v43 = vsel %vm15819_vm1, %v6303_v24, %v6305_v33  ;;  %v6310_v44 = vsel %vm15819_vm1, %v6299_v54, %v6301_v58  ;;  %v6311_v59 = vsel %vm15819_vm1, %v6301_v58, %v6303_v24  ;;  %v11477_v24 = vld [vmem:[%s15788_s5 + $0xc8] sm:$0xf] }
 0xb79   : > { %6245 = vmatpush.bf16.msrb.mxu2 %v6201_v5  ;;  %6258 = vmatpush.bf16.msrb.mxu3 %v6204_v49  ;;  %v6325_v61 = vsel %vm374_vm6, %v6312_v43, 0  ;;  %v6319_v13 = vsel %vm374_vm6, %v6310_v44, 0  ;;  %v6322_v4 = vsel %vm374_vm6, %v6311_v59, 0  ;;  %v6547_v18 = vpop.permute.xlu2 %6546 }
 0xb7e   : > { %11464 = vmatmul.msk.bf16.vlgmr.msrb.gmra.mxu0 %vm370_vm7, %v11463_v36 }
 0xb7f   : > { %v6307_v6 = vpop.permute.xlu0 %6306  ;;  %v6309_v19 = vpop.permute.xlu1 %6308  ;;  %6369 = vmatpush.bf16.msrb.mxu0 %v6325_v61 }
 0xb80   : > { %v6313_v54 = vsel %vm15819_vm1, %v6305_v33, %v6307_v6  ;;  %v6314_v40 = vsel %vm15819_vm1, %v6307_v6, %v6309_v19  ;;  %v6334_v25 = vsel %vm374_vm6, %v6309_v19, 0 }
 0xb81   : > { %v6328_v27 = vsel %vm374_vm6, %v6313_v54, 0  ;;  %v6331_v8 = vsel %vm374_vm6, %v6314_v40, 0  ;;  %v6433_v45 = vpop.permute.xlu2 %6432 }
 0xb82   : > { %v6438_v17 = vsel %vm15818_vm13, %v6431_v48, %v6433_v45  ;;  %v6458_v19 = vsel %vm374_vm6, %v6433_v45, 0 }
 0xb83   : > { %v6455_v50 = vsel %vm374_vm6, %v6438_v17, 0 }
 0xb87   : > { %11460 = vmatmul.msk.bf16.vlgmr.msra.gmra.mxu1 %vm370_vm7, %v11456_v15  ;;  %11461 = vmatmul.msk.bf16.vlgmr.msra.gmra.mxu2 %vm370_vm7, %v11456_v15  ;;  %v6427_v39 = vpop.permute.xlu0 %6426  ;;  %v6429_v31 = vpop.permute.xlu1 %6428 }
 0xb88   : > { %6284 = vmatpush.bf16.msra.mxu1 %v6210_v38  ;;  %11462 = vmatmul.msk.bf16.vlgmr.msra.gmra.mxu3 %vm370_vm7, %v11456_v15  ;;  %v6436_v46 = vsel %vm15818_vm13, %v6427_v39, %v6429_v31  ;;  %v6437_v20 = vsel %vm15818_vm13, %v6429_v31, %v6431_v48 }
 0xb89   : > { %6343 = vmatpush.bf16.msra.mxu2 %v6319_v13  ;;  %6356 = vmatpush.bf16.msra.mxu3 %v6322_v4  ;;  %v6449_v23 = vsel %vm374_vm6, %v6436_v46, 0  ;;  %v6452_v41 = vsel %vm374_vm6, %v6437_v20, 0  ;;  %v6553_v5 = vpop.permute.xlu2 %6552 }
 0xb8e   : > { %11468 = vmatmul.msk.bf16.vlgmr.msra.gmra.mxu0 %vm370_vm7, %v11463_v36 }
 0xb8f   : > { %v6423_v9 = vpop.permute.xlu0 %6422  ;;  %v6425_v42 = vpop.permute.xlu1 %6424 }
 0xb90   : > { %v6434_v35 = vsel %vm15818_vm13, %v6423_v9, %v6425_v42  ;;  %v6435_v1 = vsel %vm15818_vm13, %v6425_v42, %v6427_v39 }
 0xb91   : > { %v6443_v29 = vsel %vm374_vm6, %v6434_v35, 0  ;;  %v6446_v32 = vsel %vm374_vm6, %v6435_v1, 0  ;;  %v6679_v61 = vpop.permute.xlu2 %6678 }
 0xb92   : > { %6467 = vmatpush.bf16.msra.mxu0 %v6443_v29 }
 0xb97   : > { %11465 = vmatmul.msk.bf16.vlgmr.msrb.gmra.mxu1 %vm370_vm7, %v11463_v36  ;;  %11466 = vmatmul.msk.bf16.vlgmr.msrb.gmra.mxu2 %vm370_vm7, %v11463_v36  ;;  %v6549_v37 = vpop.permute.xlu0 %6548  ;;  %v6551_v15 = vpop.permute.xlu1 %6550 }
 0xb98   : > { %6382 = vmatpush.bf16.msrb.mxu1 %v6328_v27  ;;  %11467 = vmatmul.msk.bf16.vlgmr.msrb.gmra.mxu3 %vm370_vm7, %v11463_v36  ;;  %v6560_v58 = vsel %vm4224_vm2, %v6551_v15, %v6553_v5  ;;  %v6559_v6 = vsel %vm4224_vm2, %v6549_v37, %v6551_v15 }
 0xb99   : > { %6395 = vmatpush.bf16.msrb.mxu2 %v6331_v8  ;;  %6408 = vmatpush.bf16.msrb.mxu3 %v6334_v25  ;;  %v6573_v43 = vsel %vm374_vm6, %v6560_v58, 0  ;;  %v6570_v48 = vsel %vm374_vm6, %v6559_v6, 0  ;;  %v6795_v31 = vpop.permute.xlu2 %6794 }
 0xb9e   : > { %11473 = vmatmul.msk.bf16.vlgmr.msrb.gmra.mxu0 %vm370_vm7, %v11470_v12 }
 0xb9f   : > { %6519 = vmatpush.bf16.msrb.mxu0 %v6455_v50  ;;  %v6555_v47 = vpop.permute.xlu0 %6554  ;;  %v6557_v51 = vpop.permute.xlu1 %6556 }
 0xba0   : > { %v6562_v9 = vsel %vm4224_vm2, %v6555_v47, %v6557_v51  ;;  %v6582_v54 = vsel %vm374_vm6, %v6557_v51, 0 }
 0xba1   : > { %v6579_v29 = vsel %vm374_vm6, %v6562_v9, 0  ;;  %v6681_v40 = vpop.permute.xlu2 %6680 }
 0xba2   : > { %v6686_v25 = vsel %vm4349_vm4, %v6679_v61, %v6681_v40 }
 0xba3   : > { %v6703_v17 = vsel %vm374_vm6, %v6686_v25, 0 }
 0xba7   : > { %11469 = vmatmul.msk.bf16.vlgmr.msra.gmra.mxu1 %vm370_vm7, %v11463_v36  ;;  %11471 = vmatmul.msk.bf16.vlgmr.msra.gmra.mxu2 %vm370_vm7, %v11470_v12  ;;  %v6675_v49 = vpop.permute.xlu0 %6674  ;;  %v6677_v33 = vpop.permute.xlu1 %6676  ;;  %v6558_v36 = vsel %vm4224_vm2, %v6547_v18, %v6549_v37  ;;  %v6561_v18 = vsel %vm4224_vm2, %v6553_v5, %v6555_v47  ;;  %v11484_v37 = vld [vmem:[%s15788_s5 + $0xcc] sm:$0xf] }
 0xba8   : > { %6480 = vmatpush.bf16.msra.mxu1 %v6446_v32  ;;  %11472 = vmatmul.msk.bf16.vlgmr.msra.gmra.mxu3 %vm370_vm7, %v11470_v12  ;;  %v6567_v44 = vsel %vm374_vm6, %v6558_v36, 0  ;;  %v6576_v35 = vsel %vm374_vm6, %v6561_v18, 0  ;;  %v6684_v20 = vsel %vm4349_vm4, %v6675_v49, %v6677_v33  ;;  %v6685_v51 = vsel %vm4349_vm4, %v6677_v33, %v6679_v61  ;;  %v11491_v61 = vld [vmem:[%s15788_s5 + $0xd0] sm:$0xf] }
 0xba9   : > { %6493 = vmatpush.bf16.msra.mxu2 %v6449_v23  ;;  %6506 = vmatpush.bf16.msra.mxu3 %v6452_v41  ;;  %v6697_v23 = vsel %vm374_vm6, %v6684_v20, 0  ;;  %v6700_v41 = vsel %vm374_vm6, %v6685_v51, 0  ;;  %v6801_v58 = vpop.permute.xlu2 %6800 }
 0xbae   : > { %11478 = vmatmul.msk.bf16.vlgmr.msra.gmra.mxu0 %vm370_vm7, %v11477_v24 }
 0xbaf   : > { %6617 = vmatpush.bf16.msra.mxu0 %v6573_v43  ;;  %v6671_v59 = vpop.permute.xlu0 %6670  ;;  %v6673_v38 = vpop.permute.xlu1 %6672 }
 0xbb0   : > { %v6682_v13 = vsel %vm4349_vm4, %v6671_v59, %v6673_v38  ;;  %v6683_v1 = vsel %vm4349_vm4, %v6673_v38, %v6675_v49 }
 0xbb1   : > { %v6691_v4 = vsel %vm374_vm6, %v6682_v13, 0  ;;  %v6694_v32 = vsel %vm374_vm6, %v6683_v1, 0 }
 0xbb7   : > { %11474 = vmatmul.msk.bf16.vlgmr.msrb.gmra.mxu1 %vm370_vm7, %v11470_v12  ;;  %11475 = vmatmul.msk.bf16.vlgmr.msrb.gmra.mxu2 %vm370_vm7, %v11470_v12  ;;  %v6799_v5 = vpop.permute.xlu1 %6798 }
 0xbb8   : > { %6532 = vmatpush.bf16.msrb.mxu1 %v6458_v19  ;;  %11476 = vmatmul.msk.bf16.vlgmr.msrb.gmra.mxu3 %vm370_vm7, %v11470_v12 }
 0xbb9   : > { %6591 = vmatpush.bf16.msrb.mxu2 %v6567_v44  ;;  %6604 = vmatpush.bf16.msrb.mxu3 %v6570_v48  ;;  %v6797_v44 = vpop.permute.xlu0 %6796 }
 0xbba   : > { %v6806_v13 = vsel %vm4474_vm11, %v6795_v31, %v6797_v44  ;;  %v6807_v9 = vsel %vm4474_vm11, %v6797_v44, %v6799_v5 }
 0xbbb   : > { %v14519_v39 = vpop.f32.mrf.mxu0 }
 0xbbe   : > { %11482 = vmatmul.msk.bf16.vlgmr.msrb.gmra.mxu0 %vm370_vm7, %v11477_v24 }
 0xbbf   : > { %6715 = vmatpush.bf16.msrb.mxu0 %v6691_v4 }
 0xbc3   : > { %v5908_v42 = vpop.f32.mrf.mxu0 }
 0xbc4   : > { %v6706_v42 = vsel %vm374_vm6, %v6681_v40, 0  ;;  %v6803_v40 = vpop.permute.xlu0 %6802 }
 0xbc5   : > { %v6809_v1 = vsel %vm4474_vm11, %v6801_v58, %v6803_v40 }
 0xbc7   : > { %11479 = vmatmul.msk.bf16.vlgmr.msra.gmra.mxu1 %vm370_vm7, %v11477_v24  ;;  %11480 = vmatmul.msk.bf16.vlgmr.msra.gmra.mxu2 %vm370_vm7, %v11477_v24 }
 0xbc8   : > { %6630 = vmatpush.bf16.msra.mxu1 %v6576_v35  ;;  %11481 = vmatmul.msk.bf16.vlgmr.msra.gmra.mxu3 %vm370_vm7, %v11477_v24  ;;  %v6815_v35 = vsel %vm374_vm6, %v6806_v13, 0 }
 0xbc9   : > { %6643 = vmatpush.bf16.msra.mxu2 %v6579_v29  ;;  %6656 = vmatpush.bf16.msra.mxu3 %v6582_v54  ;;  %v5880_v27 = vpop.f32.mrf.mxu2  ;;  %v6818_v29 = vsel %vm374_vm6, %v6807_v9, 0 }
 0xbca   : > { %v5893_v8 = vpop.f32.mrf.mxu3 }
 0xbcb   : > { %v5979_v45 = vpop.f32.mrf.mxu0 }
 0xbcc   : > { %v14535_v15 = vadd.f32 %v5979_v45, %v5880_v27 }
 0xbce   : > { %11487 = vmatmul.msk.bf16.vlgmr.msra.gmra.mxu0 %vm370_vm7, %v11484_v37 }
 0xbcf   : > { %6767 = vmatpush.bf16.msra.mxu0 %v6703_v17 }
 0xbd1   : > { %v5882_v12 = vpop.f32.mrf.mxu2 }
 0xbd2   : > { %v5895_v50 = vpop.f32.mrf.mxu3  ;;  %v6805_v12 = vpop.permute.xlu1 %6804 }
 0xbd3   : > { %v5981_v47 = vpop.f32.mrf.mxu0 }
 0xbd4   : > { %v5919_v46 = vpop.f32.mrf.mxu1  ;;  %v6810_v47 = vsel %vm4474_vm11, %v6803_v40, %v6805_v12 }
 0xbd7   : > { %11483 = vmatmul.msk.bf16.vlgmr.msrb.gmra.mxu1 %vm370_vm7, %v11477_v24  ;;  %11485 = vmatmul.msk.bf16.vlgmr.msrb.gmra.mxu2 %vm370_vm7, %v11484_v37  ;;  %v6808_v24 = vsel %vm4474_vm11, %v6799_v5, %v6801_v58 }
 0xbd8   : > { %6728 = vmatpush.bf16.msrb.mxu1 %v6694_v32  ;;  %11486 = vmatmul.msk.bf16.vlgmr.msrb.gmra.mxu3 %vm370_vm7, %v11484_v37  ;;  %v6821_v19 = vsel %vm374_vm6, %v6808_v24, 0  ;;  %v11498_v24 = vld [vmem:[%s15788_s5 + $0xd4] sm:$0xf] }
 0xbd9   : > { %6741 = vmatpush.bf16.msrb.mxu2 %v6697_v23  ;;  %6754 = vmatpush.bf16.msrb.mxu3 %v6700_v41  ;;  %v6830_v23 = vsel %vm374_vm6, %v6805_v12, 0 }
 0xbda   : > { %v5932_v49 = vpop.f32.mrf.mxu2 }
 0xbdb   : > { %v5945_v33 = vpop.f32.mrf.mxu3  ;;  %v6031_v36 = vpop.f32.mrf.mxu0 }
 0xbdc   : > { %v5921_v43 = vpop.f32.mrf.mxu1  ;;  %v14552_v6 = vadd.f32 %v6031_v36, %v5932_v49 }
 0xbde   : > { %11492 = vmatmul.msk.bf16.vlgmr.msrb.gmra.mxu0 %vm370_vm7, %v11491_v61 }
 0xbdf   : > { %6865 = vmatpush.bf16.msrb.mxu0 %v6821_v19 }
 0xbe2   : > { %v5934_v48 = vpop.f32.mrf.mxu2 }
 0xbe3   : > { %v5947_v38 = vpop.f32.mrf.mxu3  ;;  %v6033_v18 = vpop.f32.mrf.mxu0 }
 0xbe4   : > { %v5992_v59 = vpop.f32.mrf.mxu1 }
 0xbe5   : > { %v5993_v4 = vadd.f32 %v5992_v59, %v5893_v8 }
 0xbe7   : > { %11488 = vmatmul.msk.bf16.vlgmr.msra.gmra.mxu1 %vm370_vm7, %v11484_v37  ;;  %11489 = vmatmul.msk.bf16.vlgmr.msra.gmra.mxu2 %vm370_vm7, %v11484_v37 }
 0xbe8   : > { %6780 = vmatpush.bf16.msra.mxu1 %v6706_v42  ;;  %11490 = vmatmul.msk.bf16.vlgmr.msra.gmra.mxu3 %vm370_vm7, %v11484_v37 }
 0xbe9   : > { %6839 = vmatpush.bf16.msra.mxu2 %v6815_v35  ;;  %6852 = vmatpush.bf16.msra.mxu3 %v6818_v29 }
 0xbea   : > { %v6005_v31 = vpop.f32.mrf.mxu2 }
 0xbeb   : > { %v6006_v27 = vadd.f32 %v6005_v31, %v14519_v39  ;;  %v6018_v8 = vpop.f32.mrf.mxu3  ;;  %v6123_v45 = vpop.f32.mrf.mxu0  ;;  %v6824_v39 = vsel %vm374_vm6, %v6809_v1, 0 }
 0xbec   : > { %v5994_v54 = vpop.f32.mrf.mxu1  ;;  %v6019_v25 = vadd.f32 %v6018_v8, %v5919_v46  ;;  %v6827_v46 = vsel %vm374_vm6, %v6810_v47, 0 }
 0xbed   : > { %v6168_v17 = vadd.f32 %v6123_v45, %v6006_v27 }
 0xbee   : > { %11496 = vmatmul.msk.bf16.vlgmr.msra.gmra.mxu0 %vm370_vm7, %v11491_v61 }
 0xbf2   : > { %v6007_v50 = vpop.f32.mrf.mxu2 }
 0xbf3   : > { %v6020_v20 = vpop.f32.mrf.mxu3  ;;  %v6125_v32 = vpop.f32.mrf.mxu0 }
 0xbf4   : > { %v6044_v37 = vpop.f32.mrf.mxu1 }
 0xbf5   : > { %v6045_v51 = vadd.f32 %v6044_v37, %v5945_v33 }
 0xbf7   : > { %11493 = vmatmul.msk.bf16.vlgmr.msrb.gmra.mxu1 %vm370_vm7, %v11491_v61  ;;  %11494 = vmatmul.msk.bf16.vlgmr.msrb.gmra.mxu2 %vm370_vm7, %v11491_v61 }
 0xbf8   : > { %6878 = vmatpush.bf16.msrb.mxu1 %v6824_v39  ;;  %11495 = vmatmul.msk.bf16.vlgmr.msrb.gmra.mxu3 %vm370_vm7, %v11491_v61 }
 0xbf9   : > { %6891 = vmatpush.bf16.msrb.mxu2 %v6827_v46  ;;  %6904 = vmatpush.bf16.msrb.mxu3 %v6830_v23 }
 0xbfa   : > { %v6097_v41 = vpop.f32.mrf.mxu2 }
 0xbfb   : > { %v6166_v58 = vadd.f32 %v6097_v41, %v14535_v15  ;;  %v6110_v49 = vpop.f32.mrf.mxu3  ;;  %v6221_v33 = vpop.f32.mrf.mxu0 }
 0xbfc   : > { %v6046_v5 = vpop.f32.mrf.mxu1  ;;  %v6167_v43 = vadd.f32 %v6110_v49, %v5993_v4 }
 0xbfd   : > { %v6290_v36 = vadd.f32 %v6221_v33, %v6166_v58 }
 0xbfe   : > { %11501 = vmatmul.msk.bf16.vlgmr.msrb.gmra.mxu0 %vm370_vm7, %v11498_v24 }
 0xc02   : > { %v6099_v19 = vpop.f32.mrf.mxu2 }
 0xc03   : > { %v6112_v48 = vpop.f32.mrf.mxu3  ;;  %v6223_v38 = vpop.f32.mrf.mxu0 }
 0xc04   : > { %v6136_v44 = vpop.f32.mrf.mxu1 }
 0xc05   : > { %v6169_v59 = vadd.f32 %v6136_v44, %v6019_v25 }
 0xc07   : > { %11497 = vmatmul.msk.bf16.vlgmr.msra.gmra.mxu1 %vm370_vm7, %v11491_v61  ;;  %11499 = vmatmul.msk.bf16.vlgmr.msra.gmra.mxu2 %vm370_vm7, %v11498_v24 }
 0xc08   : > { %11500 = vmatmul.msk.bf16.vlgmr.msra.gmra.mxu3 %vm370_vm7, %v11498_v24 }
 0xc0a   : > { %v6149_v15 = vpop.f32.mrf.mxu2 }
 0xc0b   : > { %v6170_v4 = vadd.f32 %v6149_v15, %v14552_v6  ;;  %v6162_v18 = vpop.f32.mrf.mxu3  ;;  %v6273_v42 = vpop.f32.mrf.mxu0 }
 0xc0c   : > { %v6138_v13 = vpop.f32.mrf.mxu1  ;;  %v6171_v9 = vadd.f32 %v6162_v18, %v6045_v51 }
 0xc0d   : > { %v6294_v35 = vadd.f32 %v6273_v42, %v6170_v4 }
 0xc12   : > { %v6151_v29 = vpop.f32.mrf.mxu2 }
 0xc13   : > { %v6164_v54 = vpop.f32.mrf.mxu3  ;;  %v6275_v8 = vpop.f32.mrf.mxu0 }
 0xc14   : > { %v6234_v31 = vpop.f32.mrf.mxu1 }
 0xc15   : > { %v6291_v27 = vadd.f32 %v6234_v31, %v6167_v43 }
 0xc17   : > { %11502 = vmatmul.msk.bf16.vlgmr.msrb.gmra.mxu1 %vm370_vm7, %v11498_v24  ;;  %11503 = vmatmul.msk.bf16.vlgmr.msrb.gmra.mxu2 %vm370_vm7, %v11498_v24 }
 0xc18   : > { %11504 = vmatmul.msk.bf16.vlgmr.msrb.gmra.mxu3 %vm370_vm7, %v11498_v24 }
 0xc1a   : > { %v6247_v61 = vpop.f32.mrf.mxu2 }
 0xc1b   : > { %v6292_v45 = vadd.f32 %v6247_v61, %v6168_v17  ;;  %v6260_v40 = vpop.f32.mrf.mxu3  ;;  %v6371_v12 = vpop.f32.mrf.mxu0 }
 0xc1c   : > { %v6236_v25 = vpop.f32.mrf.mxu1  ;;  %v6293_v6 = vadd.f32 %v6260_v40, %v6169_v59 }
 0xc1d   : > { %v6416_v50 = vadd.f32 %v6371_v12, %v6292_v45 }
 0xc22   : > { %v6249_v1 = vpop.f32.mrf.mxu2 }
 0xc23   : > { %v6262_v20 = vpop.f32.mrf.mxu3  ;;  %v6373_v51 = vpop.f32.mrf.mxu0 }
 0xc24   : > { %v6286_v37 = vpop.f32.mrf.mxu1 }
 0xc25   : > { %v6295_v47 = vadd.f32 %v6286_v37, %v6171_v9 }
 0xc2a   : > { %v6345_v32 = vpop.f32.mrf.mxu2 }
 0xc2b   : > { %v6414_v46 = vadd.f32 %v6345_v32, %v6290_v36  ;;  %v6358_v23 = vpop.f32.mrf.mxu3  ;;  %v6469_v5 = vpop.f32.mrf.mxu0 }
 0xc2c   : > { %v6288_v39 = vpop.f32.mrf.mxu1  ;;  %v6415_v41 = vadd.f32 %v6358_v23, %v6291_v27 }
 0xc2d   : > { %v6538_v58 = vadd.f32 %v6469_v5, %v6414_v46 }
 0xc32   : > { %v6347_v49 = vpop.f32.mrf.mxu2 }
 0xc33   : > { %v6360_v33 = vpop.f32.mrf.mxu3  ;;  %v6471_v24 = vpop.f32.mrf.mxu0 }
 0xc34   : > { %v6384_v43 = vpop.f32.mrf.mxu1 }
 0xc35   : > { %v6417_v17 = vadd.f32 %v6384_v43, %v6293_v6 }
 0xc3a   : > { %v6397_v19 = vpop.f32.mrf.mxu2 }
 0xc3b   : > { %v6418_v48 = vadd.f32 %v6397_v19, %v6294_v35  ;;  %v6410_v59 = vpop.f32.mrf.mxu3  ;;  %v6521_v15 = vpop.f32.mrf.mxu0 }
 0xc3c   : > { %v6386_v44 = vpop.f32.mrf.mxu1  ;;  %v6419_v38 = vadd.f32 %v6410_v59, %v6295_v47 }
 0xc3d   : > { %v14586_v13 = vadd.f32 %v6521_v15, %v6418_v48 }
 0xc42   : > { %v6399_v4 = vpop.f32.mrf.mxu2 }
 0xc43   : > { %v6412_v36 = vpop.f32.mrf.mxu3  ;;  %v6523_v42 = vpop.f32.mrf.mxu0 }
 0xc44   : > { %v6482_v18 = vpop.f32.mrf.mxu1 }
 0xc45   : > { %v6539_v9 = vadd.f32 %v6482_v18, %v6415_v41 }
 0xc4a   : > { %v6495_v29 = vpop.f32.mrf.mxu2 }
 0xc4b   : > { %v6540_v54 = vadd.f32 %v6495_v29, %v6416_v50  ;;  %v6508_v27 = vpop.f32.mrf.mxu3  ;;  %v6619_v61 = vpop.f32.mrf.mxu0 }
 0xc4c   : > { %v6484_v31 = vpop.f32.mrf.mxu1  ;;  %v6541_v8 = vadd.f32 %v6508_v27, %v6417_v17 }
 0xc4d   : > { %v6664_v25 = vadd.f32 %v6619_v61, %v6540_v54 }
 0xc52   : > { %v6497_v45 = vpop.f32.mrf.mxu2 }
 0xc53   : > { %v6510_v35 = vpop.f32.mrf.mxu3  ;;  %v6621_v12 = vpop.f32.mrf.mxu0 }
 0xc54   : > { %v6534_v40 = vpop.f32.mrf.mxu1 }
 0xc55   : > { %v6543_v6 = vadd.f32 %v6534_v40, %v6419_v38  ;;  %v6921_v40 = vpop.permute.xlu0 %6920 }
 0xc5a   : > { %v6593_v1 = vpop.f32.mrf.mxu2 }
 0xc5b   : > { %v6606_v20 = vpop.f32.mrf.mxu3  ;;  %v6717_v47 = vpop.f32.mrf.mxu0  ;;  %v6662_v18 = vadd.f32 %v6593_v1, %v6538_v58 }
 0xc5c   : > { %v6536_v37 = vpop.f32.mrf.mxu1  ;;  %v6663_v36 = vadd.f32 %v6606_v20, %v6539_v9 }
 0xc5d   : > { %v6786_v42 = vadd.f32 %v6717_v47, %v6662_v18 }
 0xc62   : > { %v6595_v51 = vpop.f32.mrf.mxu2 }
 0xc63   : > { %v6608_v39 = vpop.f32.mrf.mxu3  ;;  %v6719_v46 = vpop.f32.mrf.mxu0 }
 0xc64   : > { %v6632_v32 = vpop.f32.mrf.mxu1 }
 0xc65   : > { %v6665_v46 = vadd.f32 %v6632_v32, %v6541_v8 }
 0xc6a   : > { %v6645_v23 = vpop.f32.mrf.mxu2 }
 0xc6b   : > { %v6658_v50 = vpop.f32.mrf.mxu3  ;;  %v6769_v5 = vpop.f32.mrf.mxu0 }
 0xc6c   : > { %v6634_v41 = vpop.f32.mrf.mxu1 }
 0xc72   : > { %v6647_v49 = vpop.f32.mrf.mxu2 }
 0xc73   : > { %v6660_v33 = vpop.f32.mrf.mxu3  ;;  %v6771_v17 = vpop.f32.mrf.mxu0 }
 0xc74   : > { %v6730_v43 = vpop.f32.mrf.mxu1  ;;  %v6666_v17 = vadd.f32 %v6645_v23, %v14586_v13 }
 0xc75   : > { %v6787_v29 = vadd.f32 %v6730_v43, %v6663_v36 }
 0xc76   : > { %v6790_v32 = vadd.f32 %v6769_v5, %v6666_v17 }
 0xc7a   : > { %v6743_v24 = vpop.f32.mrf.mxu2 }
 0xc7b   : > { %v6756_v44 = vpop.f32.mrf.mxu3  ;;  %v6867_v48 = vpop.f32.mrf.mxu0  ;;  %v6788_v31 = vadd.f32 %v6743_v24, %v6664_v25 }
 0xc7c   : > { %v6732_v19 = vpop.f32.mrf.mxu1  ;;  %v6789_v33 = vadd.f32 %v6756_v44, %v6665_v46 }
 0xc7d   : > { %v6912_v37 = vadd.f32 %v6867_v48, %v6788_v31  ;;  %v6667_v48 = vadd.f32 %v6658_v50, %v6543_v6 }
 0xc7f   : > { %v6925_v58 = vadd.f32 %v6921_v40, %v6912_v37 }
 0xc81   : > { %v6931_v24 = vmax.f32 %v6925_v58, 0.0 }
 0xc82   : > { %v6745_v59 = vpop.f32.mrf.mxu2 }
 0xc83   : > { %v6758_v15 = vpop.f32.mrf.mxu3  ;;  %v6869_v4 = vpop.f32.mrf.mxu0  ;;  %v6937_v44 = vmul.f32 %v6931_v24, %v13898_v63 }
 0xc84   : > { %v6782_v38 = vpop.f32.mrf.mxu1 }
 0xc85   : > { %v6791_v59 = vadd.f32 %v6782_v38, %v6667_v48 }
 0xc8a   : > { %v6841_v54 = vpop.f32.mrf.mxu2 }
 0xc8b   : > { %v6910_v61 = vadd.f32 %v6841_v54, %v6786_v42  ;;  %v6854_v45 = vpop.f32.mrf.mxu3 }
 0xc8c   : > { %v6784_v27 = vpop.f32.mrf.mxu1  ;;  %v6911_v35 = vadd.f32 %v6854_v45, %v6787_v29 }
 0xc8d   : > { %v6923_v12 = vadd.f32 %v6921_v40, %v6910_v61 }
 0xc8e   : > { %v6924_v51 = vadd.f32 %v6921_v40, %v6911_v35 }
 0xc8f   : > { %v6929_v39 = vmax.f32 %v6923_v12, 0.0 }
 0xc90   : > { %v6930_v41 = vmax.f32 %v6924_v51, 0.0 }
 0xc91   : > { %v6935_v49 = vmul.f32 %v6929_v39, %v13894_v22 }
 0xc92   : > { %v6936_v9 = vmul.f32 %v6930_v41, %v13896_v60  ;;  %v6843_v1 = vpop.f32.mrf.mxu2 }
 0xc93   : > { %v6856_v20 = vpop.f32.mrf.mxu3 }
 0xc94   : > { %v6880_v25 = vpop.f32.mrf.mxu1  ;;  %v6941_v47 = vpack.c.bf16 %v6936_v9, %v6935_v49 }
 0xc95   : > { %v6913_v43 = vadd.f32 %v6880_v25, %v6789_v33 }
 0xc96   : > { %6947 = vrot.lane.b32.xlu1 %v6941_v47, %s15848_s10 }
 0xc97   : > { %v6926_v19 = vadd.f32 %v6921_v40, %v6913_v43 }
 0xc99   : > { %v6932_v8 = vmax.f32 %v6926_v19, 0.0 }
 0xc9a   : > { %v6893_v4 = vpop.f32.mrf.mxu2 }
 0xc9b   : > { %v6938_v15 = vmul.f32 %v6932_v8, %v13900_v7  ;;  %v6914_v18 = vadd.f32 %v6893_v4, %v6790_v32  ;;  %v6906_v36 = vpop.f32.mrf.mxu3 }
 0xc9c   : > { %v6882_v42 = vpop.f32.mrf.mxu1  ;;  %v6915_v31 = vadd.f32 %v6906_v36, %v6791_v59 }
 0xc9d   : > { %v6942_v29 = vpack.c.bf16 %v6938_v15, %v6937_v44  ;;  %v6927_v54 = vadd.f32 %v6921_v40, %v6914_v18  ;;  %v3421_v42 = vpack.c.bf16 %v13822_v11, %v13822_v11 }
 0xc9e   : > { %v6928_v13 = vadd.f32 %v6921_v40, %v6915_v31 }
 0xc9f   : > { %6949 = vrot.lane.b32.xlu2 %v6942_v29, %s15848_s10  ;;  %v6933_v23 = vmax.f32 %v6927_v54, 0.0 }
 0xca0   : > { %v6934_v27 = vmax.f32 %v6928_v13, 0.0 }
 0xca1   : > { %v6939_v6 = vmul.f32 %v6933_v23, %v13910_v3 }
 0xca2   : > { %v6940_v50 = vmul.f32 %v6934_v27, %v13912_v34  ;;  %v6895_v5 = vpop.f32.mrf.mxu2 }
 0xca3   : > { %v6908_v38 = vpop.f32.mrf.mxu3 }
 0xca4   : > { %v6943_v61 = vpack.c.bf16 %v6940_v50, %v6939_v6 }
 0xca6   : > { %6951 = vrot.lane.b32.xlu0 %v6943_v61, %s15848_s10 }
 0xcf9   : > { %v6950_v45 = vpop.permute.xlu2 %6949 }
 0xcfa   : > { %v6954_v12 = vrot.slane %v6950_v45, 4 }
 0xd08   : > { %v6948_v35 = vpop.permute.xlu1 %6947 }
 0xd09   : > { %v6953_v37 = vrot.slane %v6948_v35, 4 }
 0xd0b   : > { %v6956_v51 = vsel %vm2638_vm3, %v6953_v37, %v6948_v35  ;;  %v6957_v40 = vsel %vm374_vm6, %v6953_v37, %v6954_v12 }
 0xd0c   : > { %v6958_v39 = vsel %vm2638_vm3, %v6957_v40, %v6950_v45  ;;  %6964 = vst.msk [vmem:[#allocation5] sm:$0xff] %vm12834_vm10, %v6956_v51 }
 0xd0d   : > { %v6979_v46 = vunpack.c.l.b16 %v6958_v39  ;;  %v6980_v47 = vunpack.c.h.b16 %v6958_v39 }
 0xd0f   : > { %v14603_v41 = vpack.c.b16 %v6979_v46, %v6979_v46  ;;  %v14619_v24 = vpack.c.b16 %v6980_v47, %v6980_v47 }
 0xd11   : > { %6993 = vrot.lane.b32.xlu0 %v14603_v41, %s15842_s17  ;;  %v7118_v37 = vsel %vm374_vm6, %v14619_v24, 0  ;;  %v7115_v51 = vsel %vm374_vm6, %v14603_v41, 0 }
 0xd13   : > { %v6969_v49 = vld [vmem:[#allocation5] sm:$0xff] }
 0xd14   : > { %v6978_v33 = vunpack.c.h.b16 %v6969_v49  ;;  %v6977_v58 = vunpack.c.l.b16 %v6969_v49 }
 0xd16   : > { %v14607_v9 = vpack.c.b16 %v6978_v33, %v6978_v33  ;;  %v14609_v1 = vpack.c.b16 %v6977_v58, %v6977_v58 }
 0xd18   : > { %v6952_v25 = vpop.permute.xlu0 %6951  ;;  %6991 = vrot.lane.b32.xlu2 %v14607_v9, %s15842_s17  ;;  %6989 = vrot.lane.b32.xlu1 %v14609_v1, %s15842_s17  ;;  %v7109_v23 = vsel %vm374_vm6, %v14609_v1, 0  ;;  %v7112_v27 = vsel %vm374_vm6, %v14607_v9, 0 }
 0xd19   : > { %v6955_v20 = vrot.slane %v6952_v25, 4 }
 0xd1b   : > { %v6959_v43 = vsel %vm374_vm6, %v6954_v12, %v6955_v20 }
 0xd1c   : > { %v6960_v17 = vsel %vm2638_vm3, %v6959_v43, %v6952_v25 }
 0xd1d   : > { %6966 = vst.msk [vmem:[#allocation5 + $0x10] sm:$0xff] %vm12869_vm14, %v6960_v17 }
 0xd20   : > { %6995 = vrot.lane.b32.xlu1 %v14619_v24, %s15842_s17 }
 0xd24   : > { %v6971_v19 = vld [vmem:[#allocation5 + $0x10] sm:$0xff] }
 0xd25   : > { %v6982_v48 = vunpack.c.h.b16 %v6971_v19  ;;  %v6981_v8 = vunpack.c.l.b16 %v6971_v19 }
 0xd27   : > { %v14623_v32 = vpack.c.b16 %v6982_v48, %v6982_v48  ;;  %v14625_v59 = vpack.c.b16 %v6981_v8, %v6981_v8 }
 0xd28   : > { %7206 = vrot.lane.b32.xlu1 %v14609_v1, %s15843_s21 }
 0xd29   : > { %6999 = vrot.lane.b32.xlu0 %v14623_v32, %s15842_s17  ;;  %6997 = vrot.lane.b32.xlu2 %v14625_v59, %s15842_s17  ;;  %v7121_v6 = vsel %vm374_vm6, %v14625_v59, 0  ;;  %v7124_v50 = vsel %vm374_vm6, %v14623_v32, 0 }
 0xd30   : > { %7212 = vrot.lane.b32.xlu1 %v14619_v24, %s15843_s21 }
 0xd31   : > { %7210 = vrot.lane.b32.xlu0 %v14603_v41, %s15843_s21  ;;  %7208 = vrot.lane.b32.xlu2 %v14607_v9, %s15843_s21 }
 0xd38   : > { %7330 = vrot.lane.b32.xlu1 %v14609_v1, %s15844_s19 }
 0xd39   : > { %7216 = vrot.lane.b32.xlu0 %v14623_v32, %s15843_s21  ;;  %7214 = vrot.lane.b32.xlu2 %v14625_v59, %s15843_s21 }
 0xd40   : > { %7336 = vrot.lane.b32.xlu1 %v14619_v24, %s15844_s19 }
 0xd41   : > { %7334 = vrot.lane.b32.xlu0 %v14603_v41, %s15844_s19  ;;  %7332 = vrot.lane.b32.xlu2 %v14607_v9, %s15844_s19 }
 0xd48   : > { %7454 = vrot.lane.b32.xlu1 %v14609_v1, %s15845_s23 }
 0xd49   : > { %7340 = vrot.lane.b32.xlu0 %v14623_v32, %s15844_s19  ;;  %7338 = vrot.lane.b32.xlu2 %v14625_v59, %s15844_s19 }
 0xd50   : > { %7460 = vrot.lane.b32.xlu1 %v14619_v24, %s15845_s23 }
 0xd51   : > { %7458 = vrot.lane.b32.xlu0 %v14603_v41, %s15845_s23  ;;  %7456 = vrot.lane.b32.xlu2 %v14607_v9, %s15845_s23 }
 0xd58   : > { %7578 = vrot.lane.b32.xlu1 %v14609_v1, %s15835_s12 }
 0xd59   : > { %7464 = vrot.lane.b32.xlu0 %v14623_v32, %s15845_s23  ;;  %7462 = vrot.lane.b32.xlu2 %v14625_v59, %s15845_s23 }
 0xd60   : > { %7584 = vrot.lane.b32.xlu1 %v14619_v24, %s15835_s12 }
 0xd61   : > { %7582 = vrot.lane.b32.xlu0 %v14603_v41, %s15835_s12  ;;  %7580 = vrot.lane.b32.xlu2 %v14607_v9, %s15835_s12 }
 0xd68   : > { %7702 = vrot.lane.b32.xlu1 %v14609_v1, %s15846_s26 }
 0xd69   : > { %7588 = vrot.lane.b32.xlu0 %v14623_v32, %s15835_s12  ;;  %7586 = vrot.lane.b32.xlu2 %v14625_v59, %s15835_s12 }
 0xd70   : > { %7708 = vrot.lane.b32.xlu1 %v14619_v24, %s15846_s26 }
 0xd71   : > { %7706 = vrot.lane.b32.xlu0 %v14603_v41, %s15846_s26  ;;  %7704 = vrot.lane.b32.xlu2 %v14607_v9, %s15846_s26 }
 0xd72   : > { %v6992_v44 = vpop.permute.xlu2 %6991 }
 0xd78   : > { %7826 = vrot.lane.b32.xlu1 %v14609_v1, %s15847_s24 }
 0xd79   : > { %7830 = vrot.lane.b32.xlu0 %v14603_v41, %s15847_s24  ;;  %7710 = vrot.lane.b32.xlu2 %v14625_v59, %s15846_s26 }
 0xd80   : > { %2633 = vrot.lane.b32.xlu1 %v2629_v2, %s15848_s10 }
 0xd81   : > { %7712 = vrot.lane.b32.xlu0 %v14623_v32, %s15846_s26  ;;  %7828 = vrot.lane.b32.xlu2 %v14607_v9, %s15847_s24 }
 0xd83   : > { %v6998_v15 = vpop.permute.xlu2 %6997  ;;  %v6994_v4 = vpop.permute.xlu0 %6993 }
 0xd84   : > { %v7002_v18 = vsel %vm368_vm8, %v6992_v44, %v6994_v4 }
 0xd85   : > { %v7013_v36 = vsel %vm374_vm6, %v7002_v18, 0 }
 0xd86   : > { %7047 = vmatpush.bf16.msra.mxu1 %v7013_v36 }
 0xd88   : > { %3426 = vrot.lane.b32.xlu1 %v3421_v42, %s11994_s0 }
 0xd89   : > { %2635 = vrot.lane.b32.xlu0 %v2630_v62, %s15848_s10  ;;  %3424 = vrot.lane.b32.xlu2 %v3420_v52, %s11994_s0 }
 0xd8a   : > { %v6990_v2 = vpop.permute.xlu1 %6989  ;;  %11509 = vmatmul.msk.bf16.vlgmr.msra.gmra.mxu1 %vm370_vm7, %v11507_v14 }
 0xd8b   : > { %v7001_v11 = vsel %vm368_vm8, %v6990_v2, %v6992_v44  ;;  %v7209_v29 = vpop.permute.xlu2 %7208  ;;  %v11520_v2 = vld [vmem:[%s15788_s5 + $0xe0] sm:$0xf] }
 0xd8c   : > { %v7010_v16 = vsel %vm374_vm6, %v7001_v11, 0 }
 0xd8d   : > { %7034 = vmatpush.bf16.msra.mxu0 %v7010_v16 }
 0xd90   : > { %7836 = vrot.lane.b32.xlu1 %v14623_v32, %s15847_s24  ;;  %11508 = vmatmul.msk.bf16.vlgmr.msra.gmra.mxu0 %vm370_vm7, %v11507_v14 }
 0xd91   : > { %7834 = vrot.lane.b32.xlu0 %v14625_v59, %s15847_s24  ;;  %7832 = vrot.lane.b32.xlu2 %v14619_v24, %s15847_s24 }
 0xd92   : > { %v6996_v53 = vpop.permute.xlu1 %6995 }
 0xd93   : > { %v7003_v0 = vsel %vm368_vm8, %v6994_v4, %v6996_v53  ;;  %v7004_v52 = vsel %vm368_vm8, %v6996_v53, %v6998_v15  ;;  %v7215_v31 = vpop.permute.xlu2 %7214 }
 0xd94   : > { %v7016_v54 = vsel %vm374_vm6, %v7003_v0, 0  ;;  %v7019_v13 = vsel %vm374_vm6, %v7004_v52, 0 }
 0xd95   : > { %7060 = vmatpush.bf16.msra.mxu2 %v7016_v54  ;;  %7073 = vmatpush.bf16.msra.mxu3 %v7019_v13 }
 0xd98   : > { %11510 = vmatmul.msk.bf16.vlgmr.msra.gmra.mxu2 %vm370_vm7, %v11507_v14  ;;  %11511 = vmatmul.msk.bf16.vlgmr.msra.gmra.mxu3 %vm370_vm7, %v11507_v14 }
 0xd99   : > { %7133 = vmatpush.bf16.msrb.mxu2 %v7109_v23  ;;  %7146 = vmatpush.bf16.msrb.mxu3 %v7112_v27 }
 0xd9a   : > { %7954 = vrot.lane.b32.xlu1 %v14603_v41, %s11993_s22  ;;  %7952 = vrot.lane.b32.xlu0 %v14607_v9, %s11993_s22  ;;  %v7207_v5 = vpop.permute.xlu1 %7206 }
 0xd9b   : > { %7950 = vrot.lane.b32.xlu2 %v14609_v1, %s11993_s22  ;;  %v7000_v38 = vpop.permute.xlu0 %6999  ;;  %v7333_v35 = vpop.permute.xlu2 %7332  ;;  %v7218_v40 = vsel %vm448_vm9, %v7207_v5, %v7209_v29  ;;  %v11506_v1 = vld [vmem:[%s15788_s5 + $0xd8] sm:$0xf] }
 0xd9c   : > { %v7005_v61 = vsel %vm368_vm8, %v6998_v15, %v7000_v38  ;;  %v7025_v45 = vsel %vm374_vm6, %v7000_v38, 0  ;;  %v7227_v39 = vsel %vm374_vm6, %v7218_v40, 0 }
 0xd9d   : > { %7185 = vmatpush.bf16.msra.mxu2 %v7121_v6  ;;  %7198 = vmatpush.bf16.msra.mxu3 %v7124_v50  ;;  %v7022_v12 = vsel %vm374_vm6, %v7005_v61, 0 }
 0xd9e   : > { %7099 = vmatpush.bf16.msrb.mxu1 %v7025_v45  ;;  %7086 = vmatpush.bf16.msrb.mxu0 %v7022_v12 }
 0xda1   : > { %11513 = vmatmul.msk.bf16.vlgmr.msrb.gmra.mxu1 %vm370_vm7, %v11507_v14  ;;  %11512 = vmatmul.msk.bf16.vlgmr.msrb.gmra.mxu0 %vm370_vm7, %v11507_v14 }
 0xda2   : > { %7172 = vmatpush.bf16.msra.mxu1 %v7118_v37  ;;  %7159 = vmatpush.bf16.msra.mxu0 %v7115_v51  ;;  %v7213_v46 = vpop.permute.xlu1 %7212  ;;  %v11527_v51 = vld [vmem:[%s15788_s5 + $0xe4] sm:$0xf] }
 0xda3   : > { %7960 = vrot.lane.b32.xlu1 %v14623_v32, %s11993_s22  ;;  %7958 = vrot.lane.b32.xlu0 %v14625_v59, %s11993_s22  ;;  %v7211_v41 = vpop.permute.xlu0 %7210  ;;  %v7221_v33 = vsel %vm448_vm9, %v7213_v46, %v7215_v31  ;;  %v7339_v25 = vpop.permute.xlu2 %7338 }
 0xda4   : > { %7956 = vrot.lane.b32.xlu2 %v14619_v24, %s11993_s22  ;;  %v7219_v49 = vsel %vm448_vm9, %v7209_v29, %v7211_v41  ;;  %v7220_v58 = vsel %vm448_vm9, %v7211_v41, %v7213_v46  ;;  %v7236_v20 = vsel %vm374_vm6, %v7221_v33, 0 }
 0xda5   : > { %v7230_v9 = vsel %vm374_vm6, %v7219_v49, 0  ;;  %v7233_v47 = vsel %vm374_vm6, %v7220_v58, 0 }
 0xda6   : > { %7251 = vmatpush.bf16.msrb.mxu0 %v7227_v39  ;;  %7264 = vmatpush.bf16.msrb.mxu1 %v7230_v9 }
 0xda8   : > { %11514 = vmatmul.msk.bf16.vlgmr.msrb.gmra.mxu2 %vm370_vm7, %v11506_v1  ;;  %11515 = vmatmul.msk.bf16.vlgmr.msrb.gmra.mxu3 %vm370_vm7, %v11506_v1 }
 0xda9   : > { %7277 = vmatpush.bf16.msrb.mxu2 %v7233_v47  ;;  %7290 = vmatpush.bf16.msrb.mxu3 %v7236_v20 }
 0xdaa   : > { %v7331_v43 = vpop.permute.xlu1 %7330 }
 0xdab   : > { %v7217_v17 = vpop.permute.xlu0 %7216  ;;  %v7457_v48 = vpop.permute.xlu2 %7456  ;;  %v7342_v44 = vsel %vm3850_vm0, %v7331_v43, %v7333_v35 }
 0xdac   : > { %v7222_v24 = vsel %vm448_vm9, %v7215_v31, %v7217_v17  ;;  %v7242_v19 = vsel %vm374_vm6, %v7217_v17, 0  ;;  %v7351_v4 = vsel %vm374_vm6, %v7342_v44, 0 }
 0xdad   : > { %v7239_v8 = vsel %vm374_vm6, %v7222_v24, 0 }
 0xdb1   : > { %11517 = vmatmul.msk.bf16.vlgmr.msra.gmra.mxu1 %vm370_vm7, %v11506_v1  ;;  %11516 = vmatmul.msk.bf16.vlgmr.msra.gmra.mxu0 %vm370_vm7, %v11506_v1 }
 0xdb2   : > { %7316 = vmatpush.bf16.msra.mxu1 %v7242_v19  ;;  %v7337_v32 = vpop.permute.xlu1 %7336  ;;  %7303 = vmatpush.bf16.msra.mxu0 %v7239_v8 }
 0xdb3   : > { %v7335_v59 = vpop.permute.xlu0 %7334  ;;  %v7463_v36 = vpop.permute.xlu2 %7462  ;;  %v7345_v14 = vsel %vm3850_vm0, %v7337_v32, %v7339_v25 }
 0xdb4   : > { %v7343_v15 = vsel %vm3850_vm0, %v7333_v35, %v7335_v59  ;;  %v7344_v11 = vsel %vm3850_vm0, %v7335_v59, %v7337_v32  ;;  %v7360_v29 = vsel %vm374_vm6, %v7345_v14, 0  ;;  %v11534_v59 = vld [vmem:[%s15788_s5 + $0xe8] sm:$0xf] }
 0xdb5   : > { %v7354_v18 = vsel %vm374_vm6, %v7343_v15, 0  ;;  %v7357_v16 = vsel %vm374_vm6, %v7344_v11, 0 }
 0xdb8   : > { %11518 = vmatmul.msk.bf16.vlgmr.msra.gmra.mxu2 %vm370_vm7, %v11506_v1  ;;  %11519 = vmatmul.msk.bf16.vlgmr.msra.gmra.mxu3 %vm370_vm7, %v11506_v1 }
 0xdb9   : > { %7375 = vmatpush.bf16.msra.mxu2 %v7351_v4  ;;  %7388 = vmatpush.bf16.msra.mxu3 %v7354_v18 }
 0xdba   : > { %v7455_v42 = vpop.permute.xlu1 %7454 }
 0xdbb   : > { %v7341_v62 = vpop.permute.xlu0 %7340  ;;  %v7581_v52 = vpop.permute.xlu2 %7580  ;;  %v7466_v5 = vsel %vm15819_vm1, %v7455_v42, %v7457_v48 }
 0xdbc   : > { %v7346_v31 = vsel %vm3850_vm0, %v7339_v25, %v7341_v62  ;;  %v7366_v13 = vsel %vm374_vm6, %v7341_v62, 0  ;;  %v7475_v61 = vsel %vm374_vm6, %v7466_v5, 0 }
 0xdbd   : > { %v7363_v54 = vsel %vm374_vm6, %v7346_v31, 0 }
 0xdc1   : > { %11522 = vmatmul.msk.bf16.vlgmr.msrb.gmra.mxu1 %vm370_vm7, %v11520_v2  ;;  %11521 = vmatmul.msk.bf16.vlgmr.msrb.gmra.mxu0 %vm370_vm7, %v11520_v2 }
 0xdc2   : > { %7414 = vmatpush.bf16.msrb.mxu1 %v7360_v29  ;;  %v7461_v53 = vpop.permute.xlu1 %7460  ;;  %7401 = vmatpush.bf16.msrb.mxu0 %v7357_v16 }
 0xdc3   : > { %v7459_v0 = vpop.permute.xlu0 %7458  ;;  %v7587_v50 = vpop.permute.xlu2 %7586  ;;  %v7469_v12 = vsel %vm15819_vm1, %v7461_v53, %v7463_v36 }
 0xdc4   : > { %v7467_v6 = vsel %vm15819_vm1, %v7457_v48, %v7459_v0  ;;  %v7468_v37 = vsel %vm15819_vm1, %v7459_v0, %v7461_v53  ;;  %v7484_v40 = vsel %vm374_vm6, %v7469_v12, 0 }
 0xdc5   : > { %v7478_v38 = vsel %vm374_vm6, %v7467_v6, 0  ;;  %v7481_v39 = vsel %vm374_vm6, %v7468_v37, 0 }
 0xdc8   : > { %11523 = vmatmul.msk.bf16.vlgmr.msrb.gmra.mxu2 %vm370_vm7, %v11520_v2  ;;  %11524 = vmatmul.msk.bf16.vlgmr.msrb.gmra.mxu3 %vm370_vm7, %v11520_v2 }
 0xdc9   : > { %7427 = vmatpush.bf16.msrb.mxu2 %v7363_v54  ;;  %7440 = vmatpush.bf16.msrb.mxu3 %v7366_v13 }
 0xdca   : > { %v7579_v23 = vpop.permute.xlu1 %7578 }
 0xdcb   : > { %v7465_v27 = vpop.permute.xlu0 %7464  ;;  %v14810_v46 = vpop.permute.xlu2 %7704  ;;  %v7590_v47 = vsel %vm15818_vm13, %v7579_v23, %v7581_v52 }
 0xdcc   : > { %v7470_v33 = vsel %vm15819_vm1, %v7463_v36, %v7465_v27  ;;  %v7490_v58 = vsel %vm374_vm6, %v7465_v27, 0  ;;  %v7599_v17 = vsel %vm374_vm6, %v7590_v47, 0  ;;  %vm3438_vm1 = vmor %vm2644_vm5, %vm3437_vm12 }
 0xdcd   : > { %v7487_v9 = vsel %vm374_vm6, %v7470_v33, 0 }
 0xdd1   : > { %11526 = vmatmul.msk.bf16.vlgmr.msra.gmra.mxu1 %vm370_vm7, %v11520_v2  ;;  %11525 = vmatmul.msk.bf16.vlgmr.msra.gmra.mxu0 %vm370_vm7, %v11520_v2 }
 0xdd2   : > { %7512 = vmatpush.bf16.msra.mxu1 %v7478_v38  ;;  %v7585_v45 = vpop.permute.xlu1 %7584  ;;  %7499 = vmatpush.bf16.msra.mxu0 %v7475_v61 }
 0xdd3   : > { %v7583_v35 = vpop.permute.xlu0 %7582  ;;  %v14820_v1 = vpop.permute.xlu2 %7710  ;;  %v7593_v32 = vsel %vm15818_vm13, %v7585_v45, %v7587_v50 }
 0xdd4   : > { %v7591_v43 = vsel %vm15818_vm13, %v7581_v52, %v7583_v35  ;;  %v7592_v44 = vsel %vm15818_vm13, %v7583_v35, %v7585_v45  ;;  %v7608_v15 = vsel %vm374_vm6, %v7593_v32, 0 }
 0xdd5   : > { %v7602_v24 = vsel %vm374_vm6, %v7591_v43, 0  ;;  %v7605_v4 = vsel %vm374_vm6, %v7592_v44, 0 }
 0xdd8   : > { %11528 = vmatmul.msk.bf16.vlgmr.msra.gmra.mxu2 %vm370_vm7, %v11527_v51  ;;  %11529 = vmatmul.msk.bf16.vlgmr.msra.gmra.mxu3 %vm370_vm7, %v11527_v51 }
 0xdd9   : > { %7525 = vmatpush.bf16.msra.mxu2 %v7481_v39  ;;  %7538 = vmatpush.bf16.msra.mxu3 %v7484_v40  ;;  %v11541_v39 = vld [vmem:[%s15788_s5 + $0xec] sm:$0xf] }
 0xdda   : > { %v14814_v41 = vpop.permute.xlu1 %7702 }
 0xddb   : > { %v7589_v49 = vpop.permute.xlu0 %7588  ;;  %v14837_v8 = vpop.permute.xlu2 %7828  ;;  %v7714_v38 = vsel %vm4224_vm2, %v14814_v41, %v14810_v46 }
 0xddc   : > { %v7594_v62 = vsel %vm15818_vm13, %v7587_v50, %v7589_v49  ;;  %v7614_v29 = vsel %vm374_vm6, %v7589_v49, 0  ;;  %vm2647_vm13 = vcmask 707584   ;;  %v7723_v12 = vsel %vm374_vm6, %v7714_v38, 0 }
 0xddd   : > { %v7611_v11 = vsel %vm374_vm6, %v7594_v62, 0 }
 0xde1   : > { %11531 = vmatmul.msk.bf16.vlgmr.msrb.gmra.mxu1 %vm370_vm7, %v11527_v51  ;;  %11530 = vmatmul.msk.bf16.vlgmr.msrb.gmra.mxu0 %vm370_vm7, %v11527_v51 }
 0xde2   : > { %7564 = vmatpush.bf16.msrb.mxu1 %v7490_v58  ;;  %v14823_v25 = vpop.permute.xlu1 %7708  ;;  %7551 = vmatpush.bf16.msrb.mxu0 %v7487_v9 }
 0xde3   : > { %v14825_v20 = vpop.permute.xlu0 %7706  ;;  %v3425_v2 = vpop.permute.xlu2 %3424  ;;  %v7717_v37 = vsel %vm4224_vm2, %v14823_v25, %v14820_v1 }
 0xde4   : > { %v3428_v16 = vrot.slane %v3425_v2, 4  ;;  %v7715_v54 = vsel %vm4224_vm2, %v14810_v46, %v14825_v20  ;;  %v7732_v9 = vsel %vm374_vm6, %v7717_v37, 0 }
 0xde5   : > { %v7726_v61 = vsel %vm374_vm6, %v7715_v54, 0 }
 0xde6   : > { %v3431_v13 = vsel %vm3430_vm15, %v3428_v16, %v3425_v2 }
 0xde8   : > { %11532 = vmatmul.msk.bf16.vlgmr.msrb.gmra.mxu2 %vm370_vm7, %v11527_v51  ;;  %11533 = vmatmul.msk.bf16.vlgmr.msrb.gmra.mxu3 %vm370_vm7, %v11527_v51  ;;  %v7716_v51 = vsel %vm4224_vm2, %v14825_v20, %v14823_v25 }
 0xde9   : > { %7623 = vmatpush.bf16.msrb.mxu2 %v7599_v17  ;;  %7636 = vmatpush.bf16.msrb.mxu3 %v7602_v24  ;;  %v7729_v47 = vsel %vm374_vm6, %v7716_v51, 0 }
 0xdea   : > { %v14833_v19 = vpop.permute.xlu1 %7826 }
 0xdeb   : > { %v14835_v48 = vpop.permute.xlu0 %7830  ;;  %v7833_v2 = vpop.permute.xlu2 %7832 }
 0xdf1   : > { %11536 = vmatmul.msk.bf16.vlgmr.msra.gmra.mxu1 %vm370_vm7, %v11534_v59  ;;  %11535 = vmatmul.msk.bf16.vlgmr.msra.gmra.mxu0 %vm370_vm7, %v11534_v59 }
 0xdf2   : > { %7662 = vmatpush.bf16.msra.mxu1 %v7608_v15  ;;  %v2634_v18 = vpop.permute.xlu1 %2633  ;;  %7649 = vmatpush.bf16.msra.mxu0 %v7605_v4 }
 0xdf3   : > { %v2637_v36 = vrot.slane %v2634_v18, 4  ;;  %v14848_v42 = vpop.permute.xlu0 %7712 }
 0xdf4   : > { %v7718_v32 = vsel %vm4224_vm2, %v14820_v1, %v14848_v42  ;;  %v7738_v44 = vsel %vm374_vm6, %v14848_v42, 0  ;;  %v7838_v1 = vsel %vm4349_vm4, %v14833_v19, %v14837_v8 }
 0xdf5   : > { %v2639_v14 = vsel %vm2638_vm3, %v2637_v36, %v2634_v18  ;;  %v7735_v4 = vsel %vm374_vm6, %v7718_v32, 0  ;;  %v7839_v18 = vsel %vm4349_vm4, %v14837_v8, %v14835_v48  ;;  %v7847_v42 = vsel %vm374_vm6, %v7838_v1, 0 }
 0xdf6   : > { %2646 = vst.msk [vmem:[#allocation6] sm:$0xff] %vm12834_vm10, %v2639_v14  ;;  %v7850_v62 = vsel %vm374_vm6, %v7839_v18, 0 }
 0xdf8   : > { %11537 = vmatmul.msk.bf16.vlgmr.msra.gmra.mxu2 %vm370_vm7, %v11534_v59  ;;  %11538 = vmatmul.msk.bf16.vlgmr.msra.gmra.mxu3 %vm370_vm7, %v11534_v59 }
 0xdf9   : > { %7675 = vmatpush.bf16.msra.mxu2 %v7611_v11  ;;  %7688 = vmatpush.bf16.msra.mxu3 %v7614_v29 }
 0xdfa   : > { %v3427_v53 = vpop.permute.xlu1 %3426 }
 0xdfb   : > { %v3429_v0 = vrot.slane %v3427_v53, 4  ;;  %v2636_v52 = vpop.permute.xlu0 %2635 }
 0xdfc   : > { %v2640_v31 = vsel %vm2638_vm3, %v2637_v36, %v2636_v52 }
 0xdfd   : > { %v8131_v23 = vld [vmem:[#allocation6] sm:$0xff]  ;;  %v3433_v27 = vsel %vm374_vm6, %v3428_v16, %v3429_v0  ;;  %2648 = vst.msk [vmem:[#allocation6 + $0x8] sm:$0xf] %vm2647_vm13, %v2640_v31  ;;  %v11548_v16 = vld [vmem:[%s15788_s5 + $0xf0] sm:$0xf]  ;;  %vm15849_vm13 = vcmask 891904  }
 0xdfe   : > { %v8139_v6 = vunpack.c.l.b16 %v8131_v23  ;;  %v8140_v50 = vunpack.c.h.b16 %v8131_v23  ;;  %v3434_v5 = vsel %vm3430_vm15, %v3433_v27, %v3427_v53  ;;  %3439 = vst.msk [vmem:[#allocation6 + $0x8] sm:$0xff] %vm3438_vm1, %v3431_v13  ;;  %v7840_v53 = vsel %vm4349_vm4, %v14835_v48, %v7833_v2  ;;  %vm15850_vm5 = vmmov %vm15849_vm13 }
 0xdff   : > { %3442 = vst.msk [vmem:[#allocation6 + $0x10] sm:$0xff] %vm12869_vm14, %v3434_v5  ;;  %v7853_v54 = vsel %vm374_vm6, %v7840_v53, 0  ;;  %vm15851_vm1 = vmmov %vm15850_vm5 }
 0xe00   : > { %v14870_v45 = vpack.c.b16 %v8139_v6, %v8139_v6  ;;  %v14872_v35 = vpack.c.b16 %v8140_v50, %v8140_v50  ;;  %vm15852_vm12 = vmmov %vm15851_vm1 }
 0xe01   : > { %11540 = vmatmul.msk.bf16.vlgmr.msrb.gmra.mxu1 %vm370_vm7, %v11534_v59  ;;  %11539 = vmatmul.msk.bf16.vlgmr.msrb.gmra.mxu0 %vm370_vm7, %v11534_v59  ;;  %vm15853_vm15 = vmmov %vm15851_vm1 }
 0xe02   : > { %7760 = vmatpush.bf16.msrb.mxu1 %v7726_v61  ;;  %8153 = vrot.lane.b32.xlu0 %v14872_v35, %s15842_s17  ;;  %v7837_v52 = vpop.permute.xlu1 %7836  ;;  %v7951_v61 = vpop.permute.xlu2 %7950 }
 0xe03   : > { %7747 = vmatpush.bf16.msrb.mxu0 %v7723_v12  ;;  %8151 = vrot.lane.b32.xlu2 %v14870_v45, %s15842_s17  ;;  %v7835_v14 = vpop.permute.xlu0 %7834  ;;  %v7862_v50 = vsel %vm374_vm6, %v7837_v52, 0 }
 0xe04   : > { %v7841_v11 = vsel %vm4349_vm4, %v7833_v2, %v7835_v14  ;;  %v7842_v23 = vsel %vm4349_vm4, %v7835_v14, %v7837_v52 }
 0xe05   : > { %v8132_v40 = vld [vmem:[#allocation6 + $0x8] sm:$0xff]  ;;  %v7856_v31 = vsel %vm374_vm6, %v7841_v11, 0  ;;  %v7859_v5 = vsel %vm374_vm6, %v7842_v23, 0 }
 0xe06   : > { %v8133_v46 = vld [vmem:[#allocation6 + $0x10] sm:$0xff]  ;;  %v8141_v41 = vunpack.c.l.b16 %v8132_v40  ;;  %v8142_v49 = vunpack.c.h.b16 %v8132_v40 }
 0xe07   : > { %v8143_v33 = vunpack.c.l.b16 %v8133_v46  ;;  %v14890_v58 = vpop.f32.mrf.mxu1  ;;  %v8144_v20 = vunpack.c.h.b16 %v8133_v46 }
 0xe08   : > { %v14894_v43 = vpack.c.b16 %v8141_v41, %v8141_v41  ;;  %v14896_v17 = vpack.c.b16 %v8142_v49, %v8142_v49  ;;  %11542 = vmatmul.msk.bf16.vlgmr.msrb.gmra.mxu2 %vm370_vm7, %v11541_v39  ;;  %11543 = vmatmul.msk.bf16.vlgmr.msrb.gmra.mxu3 %vm370_vm7, %v11541_v39 }
 0xe09   : > { %v14900_v25 = vpack.c.b16 %v8143_v33, %v8143_v33  ;;  %7773 = vmatpush.bf16.msrb.mxu2 %v7729_v47  ;;  %7786 = vmatpush.bf16.msrb.mxu3 %v7732_v9  ;;  %v14913_v15 = vpack.c.b16 %v8144_v20, %v8144_v20 }
 0xe0a   : > { %8155 = vrot.lane.b32.xlu1 %v14894_v43, %s15842_s17 }
 0xe0b   : > { %8157 = vrot.lane.b32.xlu2 %v14896_v17, %s15842_s17  ;;  %8159 = vrot.lane.b32.xlu0 %v14900_v25, %s15842_s17 }
 0xe0c   : > { %v7953_v38 = vpop.permute.xlu0 %7952  ;;  %v7955_v12 = vpop.permute.xlu1 %7954 }
 0xe0d   : > { %v7036_v24 = vpop.f32.mrf.mxu0  ;;  %v7963_v46 = vsel %vm4474_vm11, %v7953_v38, %v7955_v12  ;;  %v7962_v33 = vsel %vm4474_vm11, %v7951_v61, %v7953_v38 }
 0xe0e   : > { %v7974_v47 = vsel %vm374_vm6, %v7963_v46, 0 }
 0xe0f   : > { %v7051_v59 = vpop.f32.mrf.mxu1 }
 0xe11   : > { %11545 = vmatmul.msk.bf16.vlgmr.msra.gmra.mxu1 %vm370_vm7, %v11541_v39  ;;  %11544 = vmatmul.msk.bf16.vlgmr.msra.gmra.mxu0 %vm370_vm7, %v11541_v39 }
 0xe12   : > { %7812 = vmatpush.bf16.msra.mxu1 %v7738_v44  ;;  %8161 = vrot.lane.b32.xlu1 %v14913_v15, %s15842_s17  ;;  %v7957_v44 = vpop.permute.xlu2 %7956 }
 0xe13   : > { %7799 = vmatpush.bf16.msra.mxu0 %v7735_v4  ;;  %8368 = vrot.lane.b32.xlu2 %v14870_v45, %s15843_s21  ;;  %v7964_v4 = vsel %vm4474_vm11, %v7955_v12, %v7957_v44 }
 0xe14   : > { %8370 = vrot.lane.b32.xlu0 %v14872_v35, %s15843_s21 }
 0xe15   : > { %v7038_v36 = vpop.f32.mrf.mxu0  ;;  %v7959_v32 = vpop.permute.xlu0 %7958 }
 0xe16   : > { %v7965_v1 = vsel %vm4474_vm11, %v7957_v44, %v7959_v32  ;;  %v11555_v36 = vld [vmem:[%s15788_s5 + $0xf4] sm:$0xf]  ;;  %v7961_v2 = vpop.permute.xlu1 %7960 }
 0xe17   : > { %v7980_v14 = vsel %vm374_vm6, %v7965_v1, 0 }
 0xe18   : > { %11546 = vmatmul.msk.bf16.vlgmr.msra.gmra.mxu2 %vm370_vm7, %v11541_v39  ;;  %11547 = vmatmul.msk.bf16.vlgmr.msra.gmra.mxu3 %vm370_vm7, %v11541_v39 }
 0xe19   : > { %7871 = vmatpush.bf16.msra.mxu2 %v7847_v42  ;;  %7884 = vmatpush.bf16.msra.mxu3 %v7850_v62  ;;  %v7977_v62 = vsel %vm374_vm6, %v7964_v4, 0 }
 0xe1a   : > { %8372 = vrot.lane.b32.xlu1 %v14894_v43, %s15843_s21 }
 0xe1b   : > { %8374 = vrot.lane.b32.xlu2 %v14896_v17, %s15843_s21  ;;  %v7062_v19 = vpop.f32.mrf.mxu2  ;;  %v7075_v8 = vpop.f32.mrf.mxu3 }
 0xe1c   : > { %8376 = vrot.lane.b32.xlu0 %v14900_v25, %s15843_s21 }
 0xe1e   : > { %v14941_v29 = vpop.f32.mrf.mxu1  ;;  %v14948_v0 = vpop.f32.mrf.mxu0 }
 0xe21   : > { %11550 = vmatmul.msk.bf16.vlgmr.msrb.gmra.mxu1 %vm370_vm7, %v11548_v16  ;;  %11549 = vmatmul.msk.bf16.vlgmr.msrb.gmra.mxu0 %vm370_vm7, %v11548_v16 }
 0xe22   : > { %7910 = vmatpush.bf16.msrb.mxu1 %v7856_v31  ;;  %8378 = vrot.lane.b32.xlu1 %v14913_v15, %s15843_s21  ;;  %v7966_v31 = vsel %vm4474_vm11, %v7959_v32, %v7961_v2 }
 0xe23   : > { %7897 = vmatpush.bf16.msrb.mxu0 %v7853_v54  ;;  %8492 = vrot.lane.b32.xlu2 %v14870_v45, %s15844_s19  ;;  %v7064_v48 = vpop.f32.mrf.mxu2  ;;  %v7077_v13 = vpop.f32.mrf.mxu3 }
 0xe24   : > { %8494 = vrot.lane.b32.xlu0 %v14872_v35, %s15844_s19  ;;  %v11569_v48 = vld [vmem:[%s15790_s7 + $0x38] sm:$0xff]  ;;  %v7986_v13 = vsel %vm374_vm6, %v7961_v2, 0 }
 0xe26   : > { %v7103_v27 = vpop.f32.mrf.mxu1  ;;  %v7090_v6 = vpop.f32.mrf.mxu0 }
 0xe28   : > { %11551 = vmatmul.msk.bf16.vlgmr.msrb.gmra.mxu2 %vm370_vm7, %v11548_v16  ;;  %11552 = vmatmul.msk.bf16.vlgmr.msrb.gmra.mxu3 %vm370_vm7, %v11548_v16 }
 0xe29   : > { %7923 = vmatpush.bf16.msrb.mxu2 %v7859_v5  ;;  %7936 = vmatpush.bf16.msrb.mxu3 %v7862_v50 }
 0xe2a   : > { %8496 = vrot.lane.b32.xlu1 %v14894_v43, %s15844_s19 }
 0xe2b   : > { %8498 = vrot.lane.b32.xlu2 %v14896_v17, %s15844_s19  ;;  %v7135_v37 = vpop.f32.mrf.mxu2  ;;  %v7148_v51 = vpop.f32.mrf.mxu3 }
 0xe2c   : > { %v7136_v40 = vadd.f32 %v7135_v37, %v7036_v24  ;;  %v7149_v39 = vadd.f32 %v7148_v51, %v14890_v58  ;;  %8500 = vrot.lane.b32.xlu0 %v14900_v25, %s15844_s19  ;;  %v7971_v24 = vsel %vm374_vm6, %v7962_v33, 0  ;;  %v11562_v51 = vld [vmem:[%s15788_s5 + $0xf8] sm:$0xf] }
 0xe2e   : > { %v7174_v41 = vpop.f32.mrf.mxu1  ;;  %v7161_v9 = vpop.f32.mrf.mxu0 }
 0xe2f   : > { %v7175_v49 = vadd.f32 %v7174_v41, %v7075_v8  ;;  %v7162_v20 = vadd.f32 %v7161_v9, %v7062_v19 }
 0xe31   : > { %11554 = vmatmul.msk.bf16.vlgmr.msra.gmra.mxu1 %vm370_vm7, %v11548_v16  ;;  %11553 = vmatmul.msk.bf16.vlgmr.msra.gmra.mxu0 %vm370_vm7, %v11548_v16 }
 0xe32   : > { %8008 = vmatpush.bf16.msra.mxu1 %v7974_v47  ;;  %8502 = vrot.lane.b32.xlu1 %v14913_v15, %s15844_s19 }
 0xe33   : > { %7995 = vmatpush.bf16.msra.mxu0 %v7971_v24  ;;  %8616 = vrot.lane.b32.xlu2 %v14870_v45, %s15845_s23  ;;  %v7137_v58 = vpop.f32.mrf.mxu2  ;;  %v7150_v59 = vpop.f32.mrf.mxu3 }
 0xe34   : > { %8618 = vrot.lane.b32.xlu0 %v14872_v35, %s15845_s23 }
 0xe36   : > { %v7176_v18 = vpop.f32.mrf.mxu1  ;;  %v7163_v42 = vpop.f32.mrf.mxu0 }
 0xe38   : > { %11556 = vmatmul.msk.bf16.vlgmr.msra.gmra.mxu2 %vm370_vm7, %v11555_v36  ;;  %11557 = vmatmul.msk.bf16.vlgmr.msra.gmra.mxu3 %vm370_vm7, %v11555_v36 }
 0xe39   : > { %8021 = vmatpush.bf16.msra.mxu2 %v7977_v62  ;;  %8034 = vmatpush.bf16.msra.mxu3 %v7980_v14 }
 0xe3a   : > { %8620 = vrot.lane.b32.xlu1 %v14894_v43, %s15845_s23 }
 0xe3b   : > { %8622 = vrot.lane.b32.xlu2 %v14896_v17, %s15845_s23  ;;  %v7187_v19 = vpop.f32.mrf.mxu2  ;;  %v7200_v8 = vpop.f32.mrf.mxu3 }
 0xe3c   : > { %v7188_v11 = vadd.f32 %v7187_v19, %v14948_v0  ;;  %v7201_v16 = vadd.f32 %v7200_v8, %v14941_v29  ;;  %8624 = vrot.lane.b32.xlu0 %v14900_v25, %s15845_s23  ;;  %v7983_v29 = vsel %vm374_vm6, %v7966_v31, 0 }
 0xe3e   : > { %v7266_v53 = vpop.f32.mrf.mxu1  ;;  %v7253_v54 = vpop.f32.mrf.mxu0 }
 0xe3f   : > { %v7323_v52 = vadd.f32 %v7266_v53, %v7149_v39  ;;  %v7322_v23 = vadd.f32 %v7253_v54, %v7136_v40 }
 0xe41   : > { %11559 = vmatmul.msk.bf16.vlgmr.msrb.gmra.mxu1 %vm370_vm7, %v11555_v36  ;;  %11558 = vmatmul.msk.bf16.vlgmr.msrb.gmra.mxu0 %vm370_vm7, %v11555_v36 }
 0xe42   : > { %8060 = vmatpush.bf16.msrb.mxu1 %v7986_v13  ;;  %8076 = vperm.xlu1 %11906, %v11569_v48  }
 0xe43   : > { %8047 = vmatpush.bf16.msrb.mxu0 %v7983_v29  ;;  %8626 = vrot.lane.b32.xlu2 %v14913_v15, %s15845_s23  ;;  %v7189_v0 = vpop.f32.mrf.mxu2  ;;  %v7202_v27 = vpop.f32.mrf.mxu3 }
 0xe44   : > { %8740 = vrot.lane.b32.xlu0 %v14870_v45, %s15835_s12  ;;  %v15057_v27 = vld [vmem:[%s15788_s5 + $0x100] sm:$0xf] }
 0xe46   : > { %v7268_v6 = vpop.f32.mrf.mxu1  ;;  %v7255_v50 = vpop.f32.mrf.mxu0 }
 0xe48   : > { %11560 = vmatmul.msk.bf16.vlgmr.msrb.gmra.mxu2 %vm370_vm7, %v11555_v36  ;;  %11561 = vmatmul.msk.bf16.vlgmr.msrb.gmra.mxu3 %vm370_vm7, %v11555_v36 }
 0xe4a   : > { %8742 = vrot.lane.b32.xlu1 %v14872_v35, %s15835_s12 }
 0xe4b   : > { %8744 = vrot.lane.b32.xlu2 %v14894_v43, %s15835_s12  ;;  %v7279_v5 = vpop.f32.mrf.mxu2  ;;  %v7292_v38 = vpop.f32.mrf.mxu3 }
 0xe4c   : > { %v7324_v61 = vadd.f32 %v7279_v5, %v7162_v20  ;;  %v7325_v12 = vadd.f32 %v7292_v38, %v7175_v49  ;;  %8746 = vrot.lane.b32.xlu0 %v14896_v17, %s15835_s12 }
 0xe4e   : > { %v7318_v37 = vpop.f32.mrf.mxu1  ;;  %v7305_v39 = vpop.f32.mrf.mxu0 }
 0xe4f   : > { %v7327_v40 = vadd.f32 %v7318_v37, %v7201_v16  ;;  %v7326_v46 = vadd.f32 %v7305_v39, %v7188_v11 }
 0xe51   : > { %11564 = vmatmul.msk.bf16.vlgmr.msra.gmra.mxu1 %vm370_vm7, %v11562_v51  ;;  %11563 = vmatmul.msk.bf16.vlgmr.msra.gmra.mxu0 %vm370_vm7, %v11562_v51 }
 0xe52   : > { %8748 = vrot.lane.b32.xlu1 %v14900_v25, %s15835_s12 }
 0xe53   : > { %8750 = vrot.lane.b32.xlu2 %v14913_v15, %s15835_s12  ;;  %v7281_v41 = vpop.f32.mrf.mxu2  ;;  %v7294_v49 = vpop.f32.mrf.mxu3 }
 0xe54   : > { %8864 = vrot.lane.b32.xlu0 %v14870_v45, %s15846_s26 }
 0xe56   : > { %v7320_v33 = vpop.f32.mrf.mxu1  ;;  %v7307_v9 = vpop.f32.mrf.mxu0 }
 0xe58   : > { %11565 = vmatmul.msk.bf16.vlgmr.msra.gmra.mxu2 %vm370_vm7, %v11562_v51  ;;  %11566 = vmatmul.msk.bf16.vlgmr.msra.gmra.mxu3 %vm370_vm7, %v11562_v51 }
 0xe5a   : > { %8866 = vrot.lane.b32.xlu1 %v14872_v35, %s15846_s26 }
 0xe5b   : > { %8868 = vrot.lane.b32.xlu2 %v14894_v43, %s15846_s26  ;;  %v7377_v47 = vpop.f32.mrf.mxu2  ;;  %v7390_v20 = vpop.f32.mrf.mxu3 }
 0xe5c   : > { %v7446_v24 = vadd.f32 %v7377_v47, %v7322_v23  ;;  %v7447_v32 = vadd.f32 %v7390_v20, %v7323_v52  ;;  %8870 = vrot.lane.b32.xlu0 %v14896_v17, %s15846_s26  ;;  %v8271_v20 = vsel %vm374_vm6, %v14870_v45, 0 }
 0xe5d   : > { %v8152_v53 = vpop.permute.xlu2 %8151 }
 0xe5e   : > { %v7416_v58 = vpop.f32.mrf.mxu1  ;;  %v7403_v44 = vpop.f32.mrf.mxu0 }
 0xe5f   : > { %v7449_v59 = vadd.f32 %v7416_v58, %v7325_v12  ;;  %v7448_v4 = vadd.f32 %v7403_v44, %v7324_v61  ;;  %v8283_v44 = vsel %vm374_vm6, %v14900_v25, 0 }
 0xe61   : > { %11568 = vmatmul.msk.bf16.vlgmr.msrb.gmra.mxu1 %vm370_vm7, %v11562_v51  ;;  %11567 = vmatmul.msk.bf16.vlgmr.msrb.gmra.mxu0 %vm370_vm7, %v11562_v51 }
 0xe62   : > { %8872 = vrot.lane.b32.xlu1 %v14900_v25, %s15846_s26 }
 0xe63   : > { %v7379_v1 = vpop.f32.mrf.mxu2  ;;  %v7392_v18 = vpop.f32.mrf.mxu3 }
 0xe65   : > { %v8158_v6 = vpop.permute.xlu2 %8157 }
 0xe66   : > { %v7418_v36 = vpop.f32.mrf.mxu1  ;;  %v7405_v42 = vpop.f32.mrf.mxu0 }
 0xe6a   : > { %8874 = vrot.lane.b32.xlu1 %v14913_v15, %s15846_s26 }
 0xe6b   : > { %v7429_v62 = vpop.f32.mrf.mxu2  ;;  %v7442_v14 = vpop.f32.mrf.mxu3 }
 0xe6c   : > { %v7450_v19 = vadd.f32 %v7429_v62, %v7326_v46  ;;  %v7451_v8 = vadd.f32 %v7442_v14, %v7327_v40 }
 0xe6d   : > { %v8369_v18 = vpop.permute.xlu2 %8368 }
 0xe6e   : > { %v7514_v2 = vpop.f32.mrf.mxu1  ;;  %v7501_v16 = vpop.f32.mrf.mxu0 }
 0xe6f   : > { %v15046_v11 = vadd.f32 %v7514_v2, %v7447_v32  ;;  %v15048_v52 = vadd.f32 %v7501_v16, %v7446_v24  ;;  %v8274_v32 = vsel %vm374_vm6, %v14872_v35, 0 }
 0xe72   : > { %8992 = vrot.lane.b32.xlu1 %v14894_v43, %s15847_s24 }
 0xe73   : > { %v7431_v31 = vpop.f32.mrf.mxu2  ;;  %v7444_v54 = vpop.f32.mrf.mxu3 }
 0xe74   : > { %v8154_v48 = vpop.permute.xlu0 %8153 }
 0xe75   : > { %v8163_v13 = vsel %vm368_vm8, %v8152_v53, %v8154_v48  ;;  %v8277_v53 = vsel %vm374_vm6, %v14894_v43, 0 }
 0xe76   : > { %v7516_v23 = vpop.f32.mrf.mxu1  ;;  %v8172_v29 = vsel %vm374_vm6, %v8163_v13, 0  ;;  %v7503_v0 = vpop.f32.mrf.mxu0 }
 0xe77   : > { %8196 = vmatpush.bf16.msrb.mxu2 %v8172_v29  ;;  %v8375_v0 = vpop.permute.xlu2 %8374 }
 0xe7a   : > { %8996 = vrot.lane.b32.xlu1 %v14900_v25, %s15847_s24  ;;  %11572 = vmatmul.msk.bf16.vlgmr.msrb.gmra.mxu2 %vm370_vm7, %v15057_v27 }
 0xe7b   : > { %v7527_v50 = vpop.f32.mrf.mxu2  ;;  %v7540_v5 = vpop.f32.mrf.mxu3 }
 0xe7c   : > { %v7572_v38 = vadd.f32 %v7527_v50, %v7448_v4  ;;  %v7573_v61 = vadd.f32 %v7540_v5, %v7449_v59  ;;  %v8156_v12 = vpop.permute.xlu1 %8155  ;;  %v8286_v4 = vsel %vm374_vm6, %v14913_v15, 0 }
 0xe7d   : > { %v8164_v37 = vsel %vm368_vm8, %v8154_v48, %v8156_v12  ;;  %v8165_v51 = vsel %vm368_vm8, %v8156_v12, %v8158_v6  ;;  %v8160_v40 = vpop.permute.xlu0 %8159 }
 0xe7e   : > { %v8175_v39 = vsel %vm374_vm6, %v8164_v37, 0  ;;  %v8178_v46 = vsel %vm374_vm6, %v8165_v51, 0  ;;  %v8166_v41 = vsel %vm368_vm8, %v8158_v6, %v8160_v40  ;;  %v7566_v49 = vpop.f32.mrf.mxu1  ;;  %v7553_v9 = vpop.f32.mrf.mxu0  ;;  %v11570_v37 = vld [vmem:[%s15788_s5 + $0xfc] sm:$0xf] }
 0xe7f   : > { %v8181_v33 = vsel %vm374_vm6, %v8166_v41, 0  ;;  %v15069_v47 = vadd.f32 %v7566_v49, %v7451_v8  ;;  %8209 = vmatpush.bf16.msrb.mxu3 %v8175_v39  ;;  %8222 = vmatpush.bf16.msra.mxu0 %v8178_v46  ;;  %v15073_v24 = vadd.f32 %v7553_v9, %v7450_v19  ;;  %v8280_v8 = vsel %vm374_vm6, %v14896_v17, 0 }
 0xe80   : > { %8235 = vmatpush.bf16.msra.mxu1 %v8181_v33 }
 0xe82   : > { %9114 = vrot.lane.b32.xlu1 %v14872_v35, %s11993_s22  ;;  %11573 = vmatmul.msk.bf16.vlgmr.msrb.gmra.mxu3 %vm370_vm7, %v15057_v27 }
 0xe83   : > { %8295 = vmatpush.bf16.msrb.mxu0 %v8271_v20  ;;  %v7529_v58 = vpop.f32.mrf.mxu2  ;;  %v7542_v59 = vpop.f32.mrf.mxu3  ;;  %11575 = vmatmul.msk.bf16.vlgmr.msra.gmra.mxu1 %vm370_vm7, %v15057_v27 }
 0xe84   : > { %8308 = vmatpush.bf16.msrb.mxu1 %v8274_v32  ;;  %11574 = vmatmul.msk.bf16.vlgmr.msra.gmra.mxu0 %vm370_vm7, %v15057_v27  ;;  %v8162_v1 = vpop.permute.xlu1 %8161  ;;  %v8493_v58 = vpop.permute.xlu2 %8492 }
 0xe85   : > { %v8167_v36 = vsel %vm368_vm8, %v8160_v40, %v8162_v1  ;;  %v8187_v42 = vsel %vm374_vm6, %v8162_v1, 0 }
 0xe86   : > { %v8184_v62 = vsel %vm374_vm6, %v8167_v36, 0  ;;  %v8371_v14 = vpop.permute.xlu0 %8370  ;;  %v7568_v19 = vpop.f32.mrf.mxu1  ;;  %8261 = vmatpush.bf16.msra.mxu3 %v8187_v42 }
 0xe87   : > { %8347 = vmatpush.bf16.msra.mxu0 %v8283_v44  ;;  %v8380_v2 = vsel %vm448_vm9, %v8369_v18, %v8371_v14  ;;  %v7555_v16 = vpop.f32.mrf.mxu0  ;;  %8248 = vmatpush.bf16.msra.mxu2 %v8184_v62 }
 0xe88   : > { %8360 = vmatpush.bf16.msra.mxu1 %v8286_v4  ;;  %v8389_v31 = vsel %vm374_vm6, %v8380_v2, 0 }
 0xe8a   : > { %8334 = vmatpush.bf16.msrb.mxu3 %v8280_v8  ;;  %9120 = vrot.lane.b32.xlu1 %v14900_v25, %s11993_s22 }
 0xe8b   : > { %8321 = vmatpush.bf16.msrb.mxu2 %v8277_v53  ;;  %v15102_v54 = vpop.f32.mrf.mxu2  ;;  %v15104_v48 = vpop.f32.mrf.mxu3 }
 0xe8c   : > { %11576 = vmatmul.msk.bf16.vlgmr.msra.gmra.mxu2 %vm370_vm7, %v15057_v27  ;;  %v8373_v13 = vpop.permute.xlu1 %8372  ;;  %v8499_v2 = vpop.permute.xlu2 %8498 }
 0xe8d   : > { %v8381_v6 = vsel %vm448_vm9, %v8371_v14, %v8373_v13  ;;  %v8382_v12 = vsel %vm448_vm9, %v8373_v13, %v8375_v0  ;;  %v11584_v13 = vld [vmem:[%s15788_s5 + $0x104] sm:$0xf] }
 0xe8e   : > { %v8377_v23 = vpop.permute.xlu0 %8376  ;;  %v7664_v29 = vpop.f32.mrf.mxu1  ;;  %v8392_v40 = vsel %vm374_vm6, %v8381_v6, 0  ;;  %v8395_v39 = vsel %vm374_vm6, %v8382_v12, 0 }
 0xe8f   : > { %8413 = vmatpush.bf16.msra.mxu2 %v8389_v31  ;;  %v7651_v50 = vpop.f32.mrf.mxu0  ;;  %v15107_v5 = vadd.f32 %v7664_v29, %v7573_v61  ;;  %v8383_v51 = vsel %vm448_vm9, %v8375_v0, %v8377_v23 }
 0xe90   : > { %v15110_v25 = vadd.f32 %v7651_v50, %v7572_v38  ;;  %v8398_v38 = vsel %vm374_vm6, %v8383_v51, 0 }
 0xe92   : > { %11577 = vmatmul.msk.bf16.vlgmr.msra.gmra.mxu3 %vm370_vm7, %v15057_v27 }
 0xe93   : > { %8426 = vmatpush.bf16.msra.mxu3 %v8392_v40  ;;  %v7627_v61 = vpop.f32.mrf.mxu2  ;;  %v7640_v46 = vpop.f32.mrf.mxu3  ;;  %11579 = vmatmul.msk.bf16.vlgmr.msrb.gmra.mxu1 %vm370_vm7, %v11570_v37 }
 0xe94   : > { %11578 = vmatmul.msk.bf16.vlgmr.msrb.gmra.mxu0 %vm370_vm7, %v11570_v37  ;;  %v8379_v41 = vpop.permute.xlu1 %8378  ;;  %8452 = vmatpush.bf16.msrb.mxu1 %v8398_v38 }
 0xe95   : > { %8439 = vmatpush.bf16.msrb.mxu0 %v8395_v39  ;;  %v8384_v33 = vsel %vm448_vm9, %v8377_v23, %v8379_v41  ;;  %v8404_v42 = vsel %vm374_vm6, %v8379_v41, 0  ;;  %v8617_v39 = vpop.permute.xlu2 %8616 }
 0xe96   : > { %v7666_v49 = vpop.f32.mrf.mxu1  ;;  %v8401_v27 = vsel %vm374_vm6, %v8384_v33, 0  ;;  %v8495_v59 = vpop.permute.xlu0 %8494 }
 0xe97   : > { %v7653_v9 = vpop.f32.mrf.mxu0  ;;  %v8504_v18 = vsel %vm3850_vm0, %v8493_v58, %v8495_v59 }
 0xe98   : > { %v8513_v62 = vsel %vm374_vm6, %v8504_v18, 0 }
 0xe9b   : > { %v15126_v20 = vpop.f32.mrf.mxu2  ;;  %v15128_v32 = vpop.f32.mrf.mxu3 }
 0xe9c   : > { %11580 = vmatmul.msk.bf16.vlgmr.msrb.gmra.mxu2 %vm370_vm7, %v11570_v37  ;;  %v8497_v44 = vpop.permute.xlu1 %8496 }
 0xe9d   : > { %8465 = vmatpush.bf16.msrb.mxu2 %v8401_v27  ;;  %v8505_v36 = vsel %vm3850_vm0, %v8495_v59, %v8497_v44  ;;  %v8506_v53 = vsel %vm3850_vm0, %v8497_v44, %v8499_v2 }
 0xe9e   : > { %v15130_v4 = vpop.f32.mrf.mxu1  ;;  %v8516_v8 = vsel %vm374_vm6, %v8505_v36, 0  ;;  %v8519_v23 = vsel %vm374_vm6, %v8506_v53, 0  ;;  %v8501_v29 = vpop.permute.xlu0 %8500 }
 0xe9f   : > { %v15132_v1 = vpop.f32.mrf.mxu0 }
 0xea2   : > { %11581 = vmatmul.msk.bf16.vlgmr.msrb.gmra.mxu3 %vm370_vm7, %v11570_v37 }
 0xea3   : > { %8478 = vmatpush.bf16.msrb.mxu3 %v8404_v42  ;;  %v7679_v14 = vpop.f32.mrf.mxu2  ;;  %v7692_v19 = vpop.f32.mrf.mxu3  ;;  %11583 = vmatmul.msk.bf16.vlgmr.msra.gmra.mxu1 %vm370_vm7, %v11570_v37 }
 0xea4   : > { %11582 = vmatmul.msk.bf16.vlgmr.msra.gmra.mxu0 %vm370_vm7, %v11570_v37  ;;  %8550 = vmatpush.bf16.msra.mxu1 %v8516_v8  ;;  %v8503_v50 = vpop.permute.xlu1 %8502  ;;  %v8507_v37 = vsel %vm3850_vm0, %v8499_v2, %v8501_v29  ;;  %v8623_v42 = vpop.permute.xlu2 %8622 }
 0xea5   : > { %8537 = vmatpush.bf16.msra.mxu0 %v8513_v62  ;;  %v8508_v40 = vsel %vm3850_vm0, %v8501_v29, %v8503_v50  ;;  %v8522_v61 = vsel %vm374_vm6, %v8507_v37, 0  ;;  %v8528_v49 = vsel %vm374_vm6, %v8503_v50, 0 }
 0xea6   : > { %v7764_v16 = vpop.f32.mrf.mxu1  ;;  %v8525_v46 = vsel %vm374_vm6, %v8508_v40, 0  ;;  %v8619_v33 = vpop.permute.xlu0 %8618 }
 0xea7   : > { %v7751_v31 = vpop.f32.mrf.mxu0  ;;  %v8628_v27 = vsel %vm15849_vm13, %v8617_v39, %v8619_v33  ;;  %v11591_v16 = vld [vmem:[%s15788_s5 + $0x108] sm:$0xf]  ;;  %vm15854_vm13 = vcmask 883712  }
 0xea8   : > { %v8637_v44 = vsel %vm374_vm6, %v8628_v27, 0 }
 0xeab   : > { %v15148_v0 = vpop.f32.mrf.mxu2  ;;  %v15150_v6 = vpop.f32.mrf.mxu3 }
 0xeac   : > { %11585 = vmatmul.msk.bf16.vlgmr.msra.gmra.mxu2 %vm370_vm7, %v11584_v13  ;;  %v8621_v59 = vpop.permute.xlu1 %8620  ;;  %v8627_v39 = vpop.permute.xlu2 %8626 }
 0xead   : > { %8563 = vmatpush.bf16.msra.mxu2 %v8519_v23  ;;  %v8629_v19 = vsel %vm15850_vm5, %v8619_v33, %v8621_v59  ;;  %v8630_v2 = vsel %vm15851_vm1, %v8621_v59, %v8623_v42  ;;  %vm15855_vm5 = vmmov %vm15854_vm13 }
 0xeae   : > { %v15152_v12 = vpop.f32.mrf.mxu1  ;;  %v8625_v62 = vpop.permute.xlu0 %8624  ;;  %v8640_v31 = vsel %vm374_vm6, %v8629_v19, 0  ;;  %v8643_v29 = vsel %vm374_vm6, %v8630_v2, 0  ;;  %vm15856_vm1 = vmmov %vm15855_vm5 }
 0xeaf   : > { %v15155_v51 = vpop.f32.mrf.mxu0  ;;  %v8631_v53 = vsel %vm15852_vm12, %v8623_v42, %v8625_v62  ;;  %vm15857_vm12 = vmmov %vm15856_vm1 }
 0xeb0   : > { %v8646_v40 = vsel %vm374_vm6, %v8631_v53, 0 }
 0xeb2   : > { %11586 = vmatmul.msk.bf16.vlgmr.msra.gmra.mxu3 %vm370_vm7, %v11584_v13 }
 0xeb3   : > { %8576 = vmatpush.bf16.msra.mxu3 %v8522_v61  ;;  %v7777_v38 = vpop.f32.mrf.mxu2  ;;  %v7790_v41 = vpop.f32.mrf.mxu3  ;;  %11588 = vmatmul.msk.bf16.vlgmr.msrb.gmra.mxu1 %vm370_vm7, %v11584_v13 }
 0xeb4   : > { %11587 = vmatmul.msk.bf16.vlgmr.msrb.gmra.mxu0 %vm370_vm7, %v11584_v13  ;;  %8602 = vmatpush.bf16.msrb.mxu1 %v8528_v49  ;;  %v15178_v23 = vpop.permute.xlu1 %8076  ;;  %v7694_v41 = vadd.f32 %v15102_v54, %v15048_v52  ;;  %v8745_v2 = vpop.permute.xlu2 %8744 }
 0xeb5   : > { %8589 = vmatpush.bf16.msrb.mxu0 %v8525_v46  ;;  %v8632_v46 = vsel %vm15853_vm15, %v8625_v62, %v8627_v39  ;;  %vm15858_vm15 = vmmov %vm15856_vm1 }
 0xeb6   : > { %v7816_v9 = vpop.f32.mrf.mxu1  ;;  %v8649_v49 = vsel %vm374_vm6, %v8632_v46, 0  ;;  %v8741_v33 = vpop.permute.xlu0 %8740  ;;  %v7818_v59 = vadd.f32 %v15132_v1, %v7694_v41 }
 0xeb7   : > { %v7803_v58 = vpop.f32.mrf.mxu0 }
 0xebb   : > { %v7873_v18 = vpop.f32.mrf.mxu2  ;;  %v7886_v36 = vpop.f32.mrf.mxu3 }
 0xebc   : > { %11589 = vmatmul.msk.bf16.vlgmr.msrb.gmra.mxu2 %vm370_vm7, %v11584_v13  ;;  %v7942_v62 = vadd.f32 %v7873_v18, %v7818_v59  ;;  %v7698_v59 = vadd.f32 %v15126_v20, %v15073_v24 }
 0xebd   : > { %8661 = vmatpush.bf16.msrb.mxu2 %v8637_v44  ;;  %v8743_v44 = vpop.permute.xlu1 %8742 }
 0xebe   : > { %v15167_v14 = vpop.f32.mrf.mxu1  ;;  %v8752_v52 = vsel %vm15854_vm13, %v8741_v33, %v8743_v44  ;;  %v8753_v53 = vsel %vm15855_vm5, %v8743_v44, %v8745_v2  ;;  %v15211_v33 = vld [vmem:[%s15788_s5 + $0x10c] sm:$0xf]  ;;  %v7822_v24 = vadd.f32 %v15155_v51, %v7698_v59 }
 0xebf   : > { %v15170_v8 = vpop.f32.mrf.mxu0  ;;  %v8761_v1 = vsel %vm374_vm6, %v8752_v52, 0 }
 0xec2   : > { %11590 = vmatmul.msk.bf16.vlgmr.msrb.gmra.mxu3 %vm370_vm7, %v11584_v13  ;;  %v7695_v13 = vadd.f32 %v15104_v48, %v15046_v11 }
 0xec3   : > { %8674 = vmatpush.bf16.msrb.mxu3 %v8640_v31  ;;  %v7875_v50 = vpop.f32.mrf.mxu2  ;;  %v7888_v37 = vpop.f32.mrf.mxu3  ;;  %11593 = vmatmul.msk.bf16.vlgmr.msra.gmra.mxu1 %vm370_vm7, %v11591_v16 }
 0xec4   : > { %11592 = vmatmul.msk.bf16.vlgmr.msra.gmra.mxu0 %vm370_vm7, %v11591_v16  ;;  %8700 = vmatpush.bf16.msra.mxu1 %v8646_v40  ;;  %v7819_v9 = vadd.f32 %v15130_v4, %v7695_v13  ;;  %v8652_v4 = vsel %vm374_vm6, %v8627_v39, 0  ;;  %v8764_v37 = vsel %vm374_vm6, %v8753_v53, 0  ;;  %v8747_v40 = vpop.permute.xlu0 %8746 }
 0xec5   : > { %8687 = vmatpush.bf16.msra.mxu0 %v8643_v29  ;;  %v8749_v46 = vpop.permute.xlu1 %8748 }
 0xec6   : > { %v7914_v61 = vpop.f32.mrf.mxu1  ;;  %v7943_v42 = vadd.f32 %v7886_v36, %v7819_v9 }
 0xec7   : > { %v7901_v38 = vpop.f32.mrf.mxu0 }
 0xecb   : > { %v7925_v27 = vpop.f32.mrf.mxu2  ;;  %v7938_v58 = vpop.f32.mrf.mxu3 }
 0xecc   : > { %11594 = vmatmul.msk.bf16.vlgmr.msra.gmra.mxu2 %vm370_vm7, %v11591_v16 }
 0xecd   : > { %8713 = vmatpush.bf16.msra.mxu2 %v8649_v49 }
 0xece   : > { %v8010_v19 = vpop.f32.mrf.mxu1 }
 0xecf   : > { %v7997_v11 = vpop.f32.mrf.mxu0  ;;  %v8067_v48 = vadd.f32 %v8010_v19, %v7943_v42 }
 0xed0   : > { %v8066_v54 = vadd.f32 %v7997_v11, %v7942_v62  ;;  %v8751_v11 = vpop.permute.xlu2 %8750 }
 0xed1   : > { %v8080_v31 = vadd.f32 %v15178_v23, %v8067_v48  ;;  %v8755_v48 = vsel %vm15857_vm12, %v8747_v40, %v8749_v46  ;;  %v8756_v52 = vsel %vm15858_vm15, %v8749_v46, %v8751_v11 }
 0xed2   : > { %v8079_v29 = vadd.f32 %v15178_v23, %v8066_v54  ;;  %11595 = vmatmul.msk.bf16.vlgmr.msra.gmra.mxu3 %vm370_vm7, %v11591_v16  ;;  %v8867_v54 = vpop.permute.xlu1 %8866 }
 0xed3   : > { %v8086_v18 = vadd.f32 %v8080_v31, %v14236_v57  ;;  %8726 = vmatpush.bf16.msra.mxu3 %v8652_v4  ;;  %v7927_v36 = vpop.f32.mrf.mxu2  ;;  %v7940_v50 = vpop.f32.mrf.mxu3  ;;  %11597 = vmatmul.msk.bf16.vlgmr.msrb.gmra.mxu1 %vm370_vm7, %v11591_v16  ;;  %v8754_v57 = vsel %vm15856_vm1, %v8745_v2, %v8747_v40 }
 0xed4   : > { %11596 = vmatmul.msk.bf16.vlgmr.msrb.gmra.mxu0 %vm370_vm7, %v11591_v16  ;;  %v8085_v61 = vadd.f32 %v8079_v29, %v14239_v21  ;;  %8798 = vmatpush.bf16.msrb.mxu1 %v8764_v37  ;;  %v7820_v21 = vadd.f32 %v15148_v0, %v15110_v25  ;;  %v7821_v16 = vadd.f32 %v15150_v6, %v15107_v5  ;;  %v8767_v44 = vsel %vm374_vm6, %v8754_v57, 0  ;;  %v8865_v4 = vpop.permute.xlu0 %8864 }
 0xed5   : > { %8785 = vmatpush.bf16.msrb.mxu0 %v8761_v1  ;;  %v8092_v39 = vmax.f32 %v8086_v18, 0.0  ;;  %v8773_v36 = vsel %vm374_vm6, %v8756_v52, 0  ;;  %v8776_v37 = vsel %vm374_vm6, %v8751_v11, 0 }
 0xed6   : > { %v8091_v38 = vmax.f32 %v8085_v61, 0.0  ;;  %v8012_v13 = vpop.f32.mrf.mxu1  ;;  %v7944_v42 = vadd.f32 %v15170_v8, %v7820_v21  ;;  %v7945_v62 = vadd.f32 %v15167_v14, %v7821_v16 }
 0xed7   : > { %v8098_v41 = vmul.f32 %v8092_v39, %v13896_v60  ;;  %v7999_v49 = vpop.f32.mrf.mxu0  ;;  %v7699_v60 = vadd.f32 %v15128_v32, %v15069_v47  ;;  %v7946_v32 = vadd.f32 %v7925_v27, %v7822_v24  ;;  %v8876_v13 = vsel %vm4224_vm2, %v8865_v4, %v8867_v54 }
 0xed8   : > { %v8097_v9 = vmul.f32 %v8091_v38, %v13894_v22  ;;  %v8869_v16 = vpop.permute.xlu2 %8868 }
 0xed9   : > { %v7823_v5 = vadd.f32 %v15152_v12, %v7699_v60 }
 0xeda   : > { %v8103_v25 = vpack.c.bf16 %v8098_v41, %v8097_v9  ;;  %v8873_v41 = vpop.permute.xlu1 %8872  ;;  %v8877_v9 = vsel %vm4224_vm2, %v8867_v54, %v8869_v16 }
 0xedb   : > { %v8023_v22 = vpop.f32.mrf.mxu2  ;;  %v8036_v0 = vpop.f32.mrf.mxu3  ;;  %v7947_v47 = vadd.f32 %v7938_v58, %v7823_v5  ;;  %v8770_v58 = vsel %vm374_vm6, %v8755_v48, 0  ;;  %v8888_v60 = vsel %vm374_vm6, %v8877_v9, 0 }
 0xedc   : > { %11599 = vmatmul.msk.bf16.vlgmr.msrb.gmra.mxu2 %vm370_vm7, %v15211_v33  ;;  %v8068_v20 = vadd.f32 %v8023_v22, %v7944_v42  ;;  %v8069_v6 = vadd.f32 %v8036_v0, %v7945_v62  ;;  %8109 = vrot.lane.b32.xlu2 %v8103_v25, %s15848_s10  ;;  %v8871_v21 = vpop.permute.xlu0 %8870 }
 0xedd   : > { %8811 = vmatpush.bf16.msrb.mxu2 %v8767_v44  ;;  %v8879_v59 = vsel %vm4224_vm2, %v8871_v21, %v8873_v41 }
 0xede   : > { %v8081_v8 = vadd.f32 %v15178_v23, %v8068_v20  ;;  %v8082_v14 = vadd.f32 %v15178_v23, %v8069_v6  ;;  %v8062_v19 = vpop.f32.mrf.mxu1  ;;  %v8894_v42 = vsel %vm374_vm6, %v8879_v59, 0 }
 0xedf   : > { %v8049_v12 = vpop.f32.mrf.mxu0  ;;  %v8071_v2 = vadd.f32 %v8062_v19, %v7947_v47 }
 0xee0   : > { %v8087_v51 = vadd.f32 %v8081_v8, %v14251_v26  ;;  %v8088_v53 = vadd.f32 %v8082_v14, %v14254_v28  ;;  %v8070_v31 = vadd.f32 %v8049_v12, %v7946_v32 }
 0xee1   : > { %v8084_v27 = vadd.f32 %v15178_v23, %v8071_v2 }
 0xee2   : > { %v8093_v29 = vmax.f32 %v8087_v51, 0.0  ;;  %v8094_v1 = vmax.f32 %v8088_v53, 0.0  ;;  %v8083_v18 = vadd.f32 %v15178_v23, %v8070_v31  ;;  %11600 = vmatmul.msk.bf16.vlgmr.msrb.gmra.mxu3 %vm370_vm7, %v15211_v33  ;;  %v8875_v62 = vpop.permute.xlu1 %8874 }
 0xee3   : > { %v8090_v50 = vadd.f32 %v8084_v27, %v14257_v30  ;;  %8824 = vmatpush.bf16.msrb.mxu3 %v8770_v58  ;;  %v8025_v26 = vpop.f32.mrf.mxu2  ;;  %v8038_v28 = vpop.f32.mrf.mxu3  ;;  %11602 = vmatmul.msk.bf16.vlgmr.msra.gmra.mxu1 %vm370_vm7, %v15211_v33  ;;  %v8900_v0 = vsel %vm374_vm6, %v8875_v62, 0 }
 0xee4   : > { %11601 = vmatmul.msk.bf16.vlgmr.msra.gmra.mxu0 %vm370_vm7, %v15211_v33  ;;  %v8099_v40 = vmul.f32 %v8093_v29, %v13898_v63  ;;  %v8100_v61 = vmul.f32 %v8094_v1, %v13900_v7  ;;  %v8089_v23 = vadd.f32 %v8083_v18, %v14260_v56  ;;  %8988 = vrot.lane.b32.xlu2 %v14870_v45, %s15847_s24  ;;  %v8885_v56 = vsel %vm374_vm6, %v8876_v13, 0 }
 0xee5   : > { %8837 = vmatpush.bf16.msra.mxu0 %v8773_v36  ;;  %v8096_v39 = vmax.f32 %v8090_v50, 0.0  ;;  %8850 = vmatpush.bf16.msra.mxu1 %v8776_v37 }
 0xee6   : > { %v8095_v30 = vmax.f32 %v8089_v23, 0.0  ;;  %v8104_v46 = vpack.c.bf16 %v8100_v61, %v8099_v40  ;;  %v8064_v38 = vpop.f32.mrf.mxu1 }
 0xee7   : > { %v8102_v63 = vmul.f32 %v8096_v39, %v13912_v34  ;;  %v8051_v57 = vpop.f32.mrf.mxu0  ;;  %v8878_v34 = vsel %vm4224_vm2, %v8869_v16, %v8871_v21 }
 0xee8   : > { %v8101_v7 = vmul.f32 %v8095_v30, %v13910_v3  ;;  %8111 = vrot.lane.b32.xlu0 %v8104_v46, %s15848_s10  ;;  %v11605_v3 = vld [vmem:[%s15788_s5 + $0x110] sm:$0xf]  ;;  %v8891_v44 = vsel %vm374_vm6, %v8878_v34, 0 }
 0xeea   : > { %v8105_v49 = vpack.c.bf16 %v8102_v63, %v8101_v7 }
 0xeec   : > { %11603 = vmatmul.msk.bf16.vlgmr.msra.gmra.mxu2 %vm370_vm7, %v15211_v33  ;;  %8113 = vrot.lane.b32.xlu2 %v8105_v49, %s15848_s10 }
 0xeed   : > { %8909 = vmatpush.bf16.msra.mxu2 %v8885_v56 }
 0xef0   : > { %8990 = vrot.lane.b32.xlu0 %v14872_v35, %s15847_s24  ;;  %v8880_v35 = vsel %vm4224_vm2, %v8873_v41, %v8875_v62 }
 0xef2   : > { %11604 = vmatmul.msk.bf16.vlgmr.msra.gmra.mxu3 %vm370_vm7, %v15211_v33  ;;  %v8897_v33 = vsel %vm374_vm6, %v8880_v35, 0 }
 0xef3   : > { %8922 = vmatpush.bf16.msra.mxu3 %v8888_v60  ;;  %11607 = vmatmul.msk.bf16.vlgmr.msrb.gmra.mxu1 %vm370_vm7, %v11605_v3 }
 0xef4   : > { %11606 = vmatmul.msk.bf16.vlgmr.msrb.gmra.mxu0 %vm370_vm7, %v11605_v3  ;;  %8998 = vrot.lane.b32.xlu2 %v14913_v15, %s15847_s24 }
 0xef5   : > { %8935 = vmatpush.bf16.msrb.mxu0 %v8891_v44  ;;  %8948 = vmatpush.bf16.msrb.mxu1 %v8894_v42 }
 0xef8   : > { %8994 = vrot.lane.b32.xlu0 %v14896_v17, %s15847_s24 }
 0xefc   : > { %11608 = vmatmul.msk.bf16.vlgmr.msrb.gmra.mxu2 %vm370_vm7, %v11605_v3  ;;  %9116 = vrot.lane.b32.xlu2 %v14894_v43, %s11993_s22 }
 0xefd   : > { %8961 = vmatpush.bf16.msrb.mxu2 %v8897_v33  ;;  %v8198_v25 = vpop.f32.mrf.mxu2 }
 0xf00   : > { %9112 = vrot.lane.b32.xlu0 %v14870_v45, %s11993_s22  ;;  %v8237_v22 = vpop.f32.mrf.mxu1  ;;  %v11612_v45 = vld [vmem:[%s15788_s5 + $0x114] sm:$0xf] }
 0xf01   : > { %v8224_v5 = vpop.f32.mrf.mxu0 }
 0xf02   : > { %11609 = vmatmul.msk.bf16.vlgmr.msrb.gmra.mxu3 %vm370_vm7, %v11605_v3 }
 0xf03   : > { %8974 = vmatpush.bf16.msrb.mxu3 %v8900_v0  ;;  %11611 = vmatmul.msk.bf16.vlgmr.msra.gmra.mxu1 %vm370_vm7, %v11605_v3 }
 0xf04   : > { %11610 = vmatmul.msk.bf16.vlgmr.msra.gmra.mxu0 %vm370_vm7, %v11605_v3  ;;  %9122 = vrot.lane.b32.xlu2 %v14913_v15, %s11993_s22 }
 0xf05   : > { %v8211_v24 = vpop.f32.mrf.mxu3  ;;  %v8200_v43 = vpop.f32.mrf.mxu2 }
 0xf08   : > { %9118 = vrot.lane.b32.xlu0 %v14896_v17, %s11993_s22  ;;  %v8239_v6 = vpop.f32.mrf.mxu1 }
 0xf09   : > { %v8226_v20 = vpop.f32.mrf.mxu0  ;;  %v8993_v6 = vpop.permute.xlu1 %8992 }
 0xf0c   : > { %11613 = vmatmul.msk.bf16.vlgmr.msra.gmra.mxu2 %vm370_vm7, %v11612_v45 }
 0xf0d   : > { %v8213_v47 = vpop.f32.mrf.mxu3 }
 0xf0f   : > { %v8250_v32 = vpop.f32.mrf.mxu2 }
 0xf10   : > { %v8310_v19 = vpop.f32.mrf.mxu1 }
 0xf11   : > { %v8297_v8 = vpop.f32.mrf.mxu0  ;;  %v8311_v15 = vadd.f32 %v8310_v19, %v8211_v24 }
 0xf12   : > { %v8298_v14 = vadd.f32 %v8297_v8, %v8198_v25  ;;  %11614 = vmatmul.msk.bf16.vlgmr.msra.gmra.mxu3 %vm370_vm7, %v11612_v45 }
 0xf13   : > { %11616 = vmatmul.msk.bf16.vlgmr.msrb.gmra.mxu1 %vm370_vm7, %v11612_v45 }
 0xf14   : > { %11615 = vmatmul.msk.bf16.vlgmr.msrb.gmra.mxu0 %vm370_vm7, %v11612_v45 }
 0xf15   : > { %v8263_v11 = vpop.f32.mrf.mxu3 }
 0xf17   : > { %v8252_v48 = vpop.f32.mrf.mxu2 }
 0xf18   : > { %v8312_v17 = vpop.f32.mrf.mxu1 }
 0xf19   : > { %v8299_v12 = vpop.f32.mrf.mxu0 }
 0xf1c   : > { %11617 = vmatmul.msk.bf16.vlgmr.msrb.gmra.mxu2 %vm370_vm7, %v11612_v45 }
 0xf1d   : > { %v8265_v2 = vpop.f32.mrf.mxu3 }
 0xf1e   : > { %v8997_v2 = vpop.permute.xlu1 %8996 }
 0xf1f   : > { %v8323_v52 = vpop.f32.mrf.mxu2 }
 0xf20   : > { %v8324_v54 = vadd.f32 %v8323_v52, %v8224_v5  ;;  %v8362_v31 = vpop.f32.mrf.mxu1 }
 0xf21   : > { %v8349_v51 = vpop.f32.mrf.mxu0  ;;  %v8363_v27 = vadd.f32 %v8362_v31, %v8263_v11 }
 0xf22   : > { %v8350_v53 = vadd.f32 %v8349_v51, %v8250_v32  ;;  %11618 = vmatmul.msk.bf16.vlgmr.msrb.gmra.mxu3 %vm370_vm7, %v11612_v45 }
 0xf25   : > { %v8336_v58 = vpop.f32.mrf.mxu3 }
 0xf26   : > { %v8337_v29 = vadd.f32 %v8336_v58, %v8237_v22 }
 0xf27   : > { %v8325_v4 = vpop.f32.mrf.mxu2 }
 0xf28   : > { %v8364_v18 = vpop.f32.mrf.mxu1 }
 0xf29   : > { %v8351_v1 = vpop.f32.mrf.mxu0 }
 0xf2d   : > { %v8338_v36 = vpop.f32.mrf.mxu3 }
 0xf2f   : > { %v8415_v50 = vpop.f32.mrf.mxu2 }
 0xf30   : > { %v8484_v26 = vadd.f32 %v8415_v50, %v8298_v14  ;;  %v8454_v40 = vpop.f32.mrf.mxu1 }
 0xf31   : > { %v8441_v28 = vpop.f32.mrf.mxu0  ;;  %v8487_v61 = vadd.f32 %v8454_v40, %v8337_v29 }
 0xf32   : > { %v8486_v37 = vadd.f32 %v8441_v28, %v8324_v54 }
 0xf35   : > { %v8428_v23 = vpop.f32.mrf.mxu3 }
 0xf36   : > { %v8110_v30 = vpop.permute.xlu2 %8109  ;;  %v8485_v46 = vadd.f32 %v8428_v23, %v8311_v15 }
 0xf37   : > { %v8417_v39 = vpop.f32.mrf.mxu2  ;;  %v8115_v38 = vrot.slane %v8110_v30, 4 }
 0xf38   : > { %v8456_v57 = vpop.f32.mrf.mxu1 }
 0xf39   : > { %v8443_v13 = vpop.f32.mrf.mxu0  ;;  %v8118_v63 = vsel %vm2638_vm3, %v8115_v38, %v8110_v30 }
 0xf3a   : > { %8126 = vst.msk [vmem:[#allocation4] sm:$0xff] %vm12834_vm10, %v8118_v63  ;;  %v11619_v13 = vld [vmem:[%s15788_s5 + $0x118] sm:$0xf] }
 0xf3d   : > { %v8430_v7 = vpop.f32.mrf.mxu3 }
 0xf3e   : > { %v8989_v42 = vpop.permute.xlu2 %8988 }
 0xf3f   : > { %v8467_v56 = vpop.f32.mrf.mxu2 }
 0xf40   : > { %v8488_v41 = vadd.f32 %v8467_v56, %v8350_v53  ;;  %v8552_v9 = vpop.f32.mrf.mxu1  ;;  %v9115_v56 = vpop.permute.xlu1 %9114 }
 0xf41   : > { %v8539_v49 = vpop.f32.mrf.mxu0  ;;  %v9236_v21 = vld [vmem:[#allocation4] sm:$0xff]  ;;  %v15307_v59 = vadd.f32 %v8552_v9, %v8485_v46 }
 0xf42   : > { %v8608_v16 = vadd.f32 %v8539_v49, %v8484_v26  ;;  %v9244_v34 = vunpack.c.l.b16 %v9236_v21  ;;  %v9245_v3 = vunpack.c.h.b16 %v9236_v21 }
 0xf44   : > { %v15309_v60 = vpack.c.b16 %v9244_v34, %v9244_v34  ;;  %v15311_v44 = vpack.c.b16 %v9245_v3, %v9245_v3 }
 0xf45   : > { %v8480_v62 = vpop.f32.mrf.mxu3 }
 0xf46   : > { %9258 = vrot.lane.b32.xlu1 %v15311_v44, %s15842_s17  ;;  %9256 = vrot.lane.b32.xlu0 %v15309_v60, %s15842_s17  ;;  %v8489_v55 = vadd.f32 %v8480_v62, %v8363_v27  ;;  %v8114_v0 = vpop.permute.xlu2 %8113 }
 0xf47   : > { %v8469_v35 = vpop.f32.mrf.mxu2  ;;  %v8117_v12 = vrot.slane %v8114_v0, 4 }
 0xf48   : > { %v8554_v25 = vpop.f32.mrf.mxu1 }
 0xf49   : > { %v8541_v33 = vpop.f32.mrf.mxu0 }
 0xf4d   : > { %v8482_v5 = vpop.f32.mrf.mxu3 }
 0xf4e   : > { %v8999_v19 = vpop.permute.xlu2 %8998 }
 0xf4f   : > { %v8565_v22 = vpop.f32.mrf.mxu2  ;;  %v9004_v28 = vsel %vm4349_vm4, %v8997_v2, %v8999_v19 }
 0xf50   : > { %v8610_v24 = vadd.f32 %v8565_v22, %v8486_v37  ;;  %v8604_v20 = vpop.f32.mrf.mxu1  ;;  %v9021_v46 = vsel %vm374_vm6, %v9004_v28, 0 }
 0xf51   : > { %v8591_v43 = vpop.f32.mrf.mxu0  ;;  %v15319_v47 = vadd.f32 %v8604_v20, %v8489_v55 }
 0xf52   : > { %v15317_v45 = vadd.f32 %v8591_v43, %v8488_v41 }
 0xf55   : > { %v8578_v32 = vpop.f32.mrf.mxu3 }
 0xf56   : > { %v8611_v14 = vadd.f32 %v8578_v32, %v8487_v61  ;;  %v15334_v37 = vpop.permute.xlu2 %9116 }
 0xf57   : > { %v8567_v8 = vpop.f32.mrf.mxu2  ;;  %v9125_v34 = vsel %vm4474_vm11, %v9115_v56, %v15334_v37 }
 0xf58   : > { %v8606_v11 = vpop.f32.mrf.mxu1  ;;  %v9136_v5 = vsel %vm374_vm6, %v9125_v34, 0 }
 0xf59   : > { %v8593_v15 = vpop.f32.mrf.mxu0 }
 0xf5a   : > { %v8112_v48 = vpop.permute.xlu0 %8111 }
 0xf5b   : > { %v8116_v17 = vrot.slane %v8112_v48, 4 }
 0xf5d   : > { %v8119_v52 = vsel %vm374_vm6, %v8115_v38, %v8116_v17  ;;  %v8121_v54 = vsel %vm374_vm6, %v8116_v17, %v8117_v12  ;;  %v8580_v51 = vpop.f32.mrf.mxu3  ;;  %v9024_v38 = vsel %vm374_vm6, %v8999_v19, 0 }
 0xf5e   : > { %v8120_v31 = vsel %vm2638_vm3, %v8119_v52, %v8112_v48  ;;  %v8122_v27 = vsel %vm2638_vm3, %v8121_v54, %v8114_v0  ;;  %v9123_v55 = vpop.permute.xlu2 %9122 }
 0xf5f   : > { %v8663_v53 = vpop.f32.mrf.mxu2  ;;  %v9246_v4 = vunpack.c.l.b16 %v8120_v31  ;;  %v9247_v29 = vunpack.c.h.b16 %v8120_v31  ;;  %8128 = vst.msk [vmem:[#allocation4 + $0x10] sm:$0xff] %vm12869_vm14, %v8122_v27  ;;  %v9148_v43 = vsel %vm374_vm6, %v9123_v55, 0 }
 0xf60   : > { %v8732_v58 = vadd.f32 %v8663_v53, %v8608_v16  ;;  %v8702_v26 = vpop.f32.mrf.mxu1 }
 0xf61   : > { %v8689_v1 = vpop.f32.mrf.mxu0  ;;  %v15327_v18 = vpack.c.b16 %v9246_v4, %v9246_v4  ;;  %v15329_v36 = vpack.c.b16 %v9247_v29, %v9247_v29  ;;  %v15336_v61 = vadd.f32 %v8702_v26, %v8611_v14 }
 0xf62   : > { %v15331_v50 = vadd.f32 %v8689_v1, %v8610_v24  ;;  %v8991_v40 = vpop.permute.xlu0 %8990 }
 0xf63   : > { %v9000_v23 = vsel %vm4349_vm4, %v8989_v42, %v8991_v40  ;;  %v9001_v10 = vsel %vm4349_vm4, %v8991_v40, %v8993_v6  ;;  %9260 = vrot.lane.b32.xlu2 %v15327_v18, %s15842_s17  ;;  %9262 = vrot.lane.b32.xlu0 %v15329_v36, %s15842_s17 }
 0xf64   : > { %v9009_v39 = vsel %vm374_vm6, %v9000_v23, 0  ;;  %v9012_v30 = vsel %vm374_vm6, %v9001_v10, 0 }
 0xf65   : > { %9033 = vmatpush.bf16.msra.mxu0 %v9009_v39  ;;  %9046 = vmatpush.bf16.msra.mxu1 %v9012_v30  ;;  %v8676_v63 = vpop.f32.mrf.mxu3 }
 0xf66   : > { %v8733_v7 = vadd.f32 %v8676_v63, %v15307_v59  ;;  %v9238_v41 = vld [vmem:[#allocation4 + $0x10] sm:$0xff] }
 0xf67   : > { %v8665_v57 = vpop.f32.mrf.mxu2  ;;  %v9248_v49 = vunpack.c.l.b16 %v9238_v41  ;;  %v9249_v21 = vunpack.c.h.b16 %v9238_v41 }
 0xf68   : > { %11620 = vmatmul.msk.bf16.vlgmr.msra.gmra.mxu0 %vm370_vm7, %v11619_v13  ;;  %11621 = vmatmul.msk.bf16.vlgmr.msra.gmra.mxu1 %vm370_vm7, %v11619_v13  ;;  %v8704_v9 = vpop.f32.mrf.mxu1 }
 0xf69   : > { %9085 = vmatpush.bf16.msrb.mxu0 %v9021_v46  ;;  %9098 = vmatpush.bf16.msrb.mxu1 %v9024_v38  ;;  %v8691_v16 = vpop.f32.mrf.mxu0  ;;  %v15356_v42 = vpack.c.b16 %v9248_v49, %v9248_v49  ;;  %v15358_v62 = vpack.c.b16 %v9249_v21, %v9249_v21 }
 0xf6a   : > { %v8995_v3 = vpop.permute.xlu0 %8994 }
 0xf6b   : > { %v9002_v59 = vsel %vm4349_vm4, %v8993_v6, %v8995_v3  ;;  %v9003_v35 = vsel %vm4349_vm4, %v8995_v3, %v8997_v2  ;;  %9473 = vrot.lane.b32.xlu0 %v15309_v60, %s15843_s21  ;;  %9264 = vrot.lane.b32.xlu1 %v15356_v42, %s15842_s17  ;;  %v9121_v6 = vpop.permute.xlu1 %9120 }
 0xf6c   : > { %v9015_v33 = vsel %vm374_vm6, %v9002_v59, 0  ;;  %v9018_v25 = vsel %vm374_vm6, %v9003_v35, 0  ;;  %9266 = vrot.lane.b32.xlu2 %v15358_v62, %s15842_s17  ;;  %v9128_v14 = vsel %vm4474_vm11, %v9121_v6, %v9123_v55 }
 0xf6d   : > { %9059 = vmatpush.bf16.msra.mxu2 %v9015_v33  ;;  %9072 = vmatpush.bf16.msra.mxu3 %v9018_v25  ;;  %v8678_v22 = vpop.f32.mrf.mxu3  ;;  %v9145_v48 = vsel %vm374_vm6, %v9128_v14, 0  ;;  %v9385_v14 = vsel %vm374_vm6, %v15329_v36, 0 }
 0xf6f   : > { %v8715_v0 = vpop.f32.mrf.mxu2 }
 0xf70   : > { %v8736_v24 = vadd.f32 %v8715_v0, %v15317_v45  ;;  %11622 = vmatmul.msk.bf16.vlgmr.msra.gmra.mxu2 %vm370_vm7, %v11619_v13  ;;  %11623 = vmatmul.msk.bf16.vlgmr.msra.gmra.mxu3 %vm370_vm7, %v11619_v13  ;;  %v8800_v8 = vpop.f32.mrf.mxu1 }
 0xf71   : > { %9170 = vmatpush.bf16.msrb.mxu3 %v9136_v5  ;;  %v8787_v20 = vpop.f32.mrf.mxu0  ;;  %v15376_v15 = vadd.f32 %v8800_v8, %v8733_v7 }
 0xf72   : > { %v8856_v32 = vadd.f32 %v8787_v20, %v8732_v58  ;;  %v9113_v19 = vpop.permute.xlu0 %9112 }
 0xf73   : > { %v9124_v11 = vsel %vm4474_vm11, %v9113_v19, %v9115_v56  ;;  %9479 = vrot.lane.b32.xlu0 %v15329_v36, %s15843_s21  ;;  %9475 = vrot.lane.b32.xlu1 %v15311_v44, %s15843_s21 }
 0xf74   : > { %v9133_v45 = vsel %vm374_vm6, %v9124_v11, 0  ;;  %9477 = vrot.lane.b32.xlu2 %v15327_v18, %s15843_s21 }
 0xf75   : > { %9222 = vmatpush.bf16.msra.mxu3 %v9148_v43  ;;  %9157 = vmatpush.bf16.msrb.mxu2 %v9133_v45  ;;  %v8728_v12 = vpop.f32.mrf.mxu3  ;;  %v11634_v43 = vld [vmem:[%s15788_s5 + $0x124] sm:$0xf]  ;;  %v9376_v45 = vsel %vm374_vm6, %v15309_v60, 0 }
 0xf76   : > { %v8737_v2 = vadd.f32 %v8728_v12, %v15319_v47  ;;  %v11626_v47 = vld [vmem:[%s15788_s5 + $0x11c] sm:$0xf] }
 0xf77   : > { %v8717_v17 = vpop.f32.mrf.mxu2 }
 0xf78   : > { %11624 = vmatmul.msk.bf16.vlgmr.msrb.gmra.mxu0 %vm370_vm7, %v11619_v13  ;;  %11625 = vmatmul.msk.bf16.vlgmr.msrb.gmra.mxu1 %vm370_vm7, %v11619_v13  ;;  %v8802_v54 = vpop.f32.mrf.mxu1 }
 0xf79   : > { %9209 = vmatpush.bf16.msra.mxu2 %v9145_v48  ;;  %v8789_v52 = vpop.f32.mrf.mxu0 }
 0xf7a   : > { %v9119_v51 = vpop.permute.xlu0 %9118 }
 0xf7b   : > { %v9126_v53 = vsel %vm4474_vm11, %v15334_v37, %v9119_v51  ;;  %v9127_v31 = vsel %vm4474_vm11, %v9119_v51, %v9121_v6  ;;  %9597 = vrot.lane.b32.xlu0 %v15309_v60, %s15844_s19  ;;  %9481 = vrot.lane.b32.xlu1 %v15356_v42, %s15843_s21  ;;  %v15522_v51 = vld [vmem:[%s15788_s5 + $0x120] sm:$0xf] }
 0xf7c   : > { %v9139_v27 = vsel %vm374_vm6, %v9126_v53, 0  ;;  %v9142_v58 = vsel %vm374_vm6, %v9127_v31, 0  ;;  %9483 = vrot.lane.b32.xlu2 %v15358_v62, %s15843_s21  ;;  %v9382_v53 = vsel %vm374_vm6, %v15327_v18, 0  ;;  %s311_s21 = sand.u32 1, %s11967_s28  }
 0xf7d   : > { %9183 = vmatpush.bf16.msra.mxu0 %v9139_v27  ;;  %9196 = vmatpush.bf16.msra.mxu1 %v9142_v58  ;;  %v8730_v4 = vpop.f32.mrf.mxu3  ;;  %v9391_v27 = vsel %vm374_vm6, %v15358_v62, 0  ;;  %s10358_s1 = scalar_lea.sflag [#allocation8], %s311_s21 }
 0xf7f   : > { %v8813_v29 = vpop.f32.mrf.mxu2 }
 0xf80   : > { %v8858_v1 = vadd.f32 %v8813_v29, %v15331_v50  ;;  %11627 = vmatmul.msk.bf16.vlgmr.msrb.gmra.mxu2 %vm370_vm7, %v11626_v47  ;;  %11628 = vmatmul.msk.bf16.vlgmr.msrb.gmra.mxu3 %vm370_vm7, %v11626_v47  ;;  %v8852_v37 = vpop.f32.mrf.mxu1 }
 0xf81   : > { %v8839_v26 = vpop.f32.mrf.mxu0  ;;  %v8861_v40 = vadd.f32 %v8852_v37, %v8737_v2 }
 0xf82   : > { %v8860_v28 = vadd.f32 %v8839_v26, %v8736_v24 }
 0xf83   : > { %9603 = vrot.lane.b32.xlu0 %v15329_v36, %s15844_s19  ;;  %9599 = vrot.lane.b32.xlu1 %v15311_v44, %s15844_s19 }
 0xf84   : > { %9601 = vrot.lane.b32.xlu2 %v15327_v18, %s15844_s19 }
 0xf85   : > { %v8826_v23 = vpop.f32.mrf.mxu3 }
 0xf86   : > { %v8859_v50 = vadd.f32 %v8826_v23, %v15336_v61 }
 0xf87   : > { %v8815_v10 = vpop.f32.mrf.mxu2 }
 0xf88   : > { %11629 = vmatmul.msk.bf16.vlgmr.msra.gmra.mxu0 %vm370_vm7, %v11626_v47  ;;  %11630 = vmatmul.msk.bf16.vlgmr.msra.gmra.mxu1 %vm370_vm7, %v11626_v47  ;;  %v8854_v30 = vpop.f32.mrf.mxu1 }
 0xf89   : > { %v8841_v39 = vpop.f32.mrf.mxu0 }
 0xf8b   : > { %9721 = vrot.lane.b32.xlu0 %v15309_v60, %s15845_s23  ;;  %9605 = vrot.lane.b32.xlu1 %v15356_v42, %s15844_s19 }
 0xf8c   : > { %9607 = vrot.lane.b32.xlu2 %v15358_v62, %s15844_s19  ;;  %s11844_s19 = smul.u32 48, %s311_s21 }
 0xf8d   : > { %v8828_v46 = vpop.f32.mrf.mxu3 }
 0xf8e   : > { %v15548_v46 = vld [vmem:[%s15788_s5 + $0x128] sm:$0xf] }
 0xf8f   : > { %v8911_v38 = vpop.f32.mrf.mxu2 }
 0xf90   : > { %v15422_v13 = vadd.f32 %v8911_v38, %v8856_v32  ;;  %11631 = vmatmul.msk.bf16.vlgmr.msra.gmra.mxu2 %vm370_vm7, %v11626_v47  ;;  %11632 = vmatmul.msk.bf16.vlgmr.msra.gmra.mxu3 %vm370_vm7, %v11626_v47  ;;  %v8950_v57 = vpop.f32.mrf.mxu1 }
 0xf91   : > { %v8937_v61 = vpop.f32.mrf.mxu0  ;;  %v15428_v7 = vadd.f32 %v8950_v57, %v8859_v50 }
 0xf92   : > { %v15426_v63 = vadd.f32 %v8937_v61, %v8858_v1 }
 0xf93   : > { %9727 = vrot.lane.b32.xlu0 %v15329_v36, %s15845_s23  ;;  %9723 = vrot.lane.b32.xlu1 %v15311_v44, %s15845_s23 }
 0xf94   : > { %9725 = vrot.lane.b32.xlu2 %v15327_v18, %s15845_s23 }
 0xf95   : > { %v8924_v56 = vpop.f32.mrf.mxu3 }
 0xf96   : > { %v15437_v49 = vadd.f32 %v8924_v56, %v15376_v15 }
 0xf97   : > { %v8913_v41 = vpop.f32.mrf.mxu2 }
 0xf98   : > { %v8952_v16 = vpop.f32.mrf.mxu1 }
 0xf99   : > { %v8939_v21 = vpop.f32.mrf.mxu0 }
 0xf9b   : > { %9845 = vrot.lane.b32.xlu0 %v15309_v60, %s15835_s12  ;;  %9729 = vrot.lane.b32.xlu1 %v15356_v42, %s15845_s23 }
 0xf9c   : > { %9731 = vrot.lane.b32.xlu2 %v15358_v62, %s15845_s23  ;;  %s15732_s23 = scalar_lea.vmem [#allocation7], %s11844_s19 }
 0xf9d   : > { %v8926_v9 = vpop.f32.mrf.mxu3  ;;  %s10371_s20 = sshll.u32 %s15732_s23, 4  ;;  %s10372_s20 = int_to_ptr.vmem [resolvable:$true] %s10371_s20 }
 0xf9f   : > { %v8963_v34 = vpop.f32.mrf.mxu2 }
 0xfa0   : > { %v15445_v3 = vadd.f32 %v8963_v34, %v8860_v28 }
 0xfa3   : > { %9851 = vrot.lane.b32.xlu0 %v15329_v36, %s15835_s12  ;;  %9847 = vrot.lane.b32.xlu1 %v15311_v44, %s15835_s12 }
 0xfa4   : > { %9849 = vrot.lane.b32.xlu2 %v15327_v18, %s15835_s12 }
 0xfa5   : > { %v8976_v59 = vpop.f32.mrf.mxu3 }
 0xfa6   : > { %v15453_v55 = vadd.f32 %v8976_v59, %v8861_v40 }
 0xfa7   : > { %v8965_v35 = vpop.f32.mrf.mxu2 }
 0xfab   : > { %9969 = vrot.lane.b32.xlu0 %v15309_v60, %s15846_s26  ;;  %9853 = vrot.lane.b32.xlu1 %v15356_v42, %s15835_s12 }
 0xfac   : > { %9855 = vrot.lane.b32.xlu2 %v15358_v62, %s15835_s12 }
 0xfad   : > { %v8978_v33 = vpop.f32.mrf.mxu3 }
 0xfb3   : > { %9975 = vrot.lane.b32.xlu0 %v15329_v36, %s15846_s26  ;;  %9971 = vrot.lane.b32.xlu1 %v15311_v44, %s15846_s26 }
 0xfb4   : > { %9973 = vrot.lane.b32.xlu2 %v15327_v18, %s15846_s26 }
 0xfb8   : > { %v9257_v25 = vpop.permute.xlu0 %9256  ;;  %v9259_v5 = vpop.permute.xlu1 %9258 }
 0xfb9   : > { %v9268_v22 = vsel %vm368_vm8, %v9257_v25, %v9259_v5 }
 0xfba   : > { %v9277_v0 = vsel %vm374_vm6, %v9268_v22, 0 }
 0xfbb   : > { %9301 = vmatpush.bf16.msrb.mxu0 %v9277_v0  ;;  %10093 = vrot.lane.b32.xlu0 %v15309_v60, %s15847_s24 }
 0xfbc   : > { %9977 = vrot.lane.b32.xlu1 %v15356_v42, %s15846_s26  ;;  %9979 = vrot.lane.b32.xlu2 %v15358_v62, %s15846_s26  ;;  %s11846_s26 = smul.u32 48, %s12061_s9 }
 0xfbd   : > { %v9261_v24 = vpop.permute.xlu2 %9260 }
 0xfbe   : > { %v9269_v20 = vsel %vm368_vm8, %v9259_v5, %v9261_v24  ;;  %11635 = vmatmul.msk.bf16.vlgmr.msrb.gmra.mxu0 %vm370_vm7, %v11634_v43  ;;  %s10369_s2 = scalar_lea.hbm %s15791_s8, %s11846_s26 }
 0xfbf   : > { %v9280_v6 = vsel %vm374_vm6, %v9269_v20, 0  ;;  %s10373_s9 = sshll.u32 %s10369_s2, 4  ;;  %s10374_s9 = int_to_ptr.hbm [resolvable:$true] %s10373_s9 }
 0xfc0   : > { %9314 = vmatpush.bf16.msrb.mxu1 %v9280_v6  ;;  %s11927_s13 = sshra.s32 %s10374_s9, 4  ;;  %s11928_s13 = int_to_ptr.hbm [resolvable:$true] %s11927_s13 }
 0xfc1   : > { %s11929_s10 = scalar_lea.hbm %s11928_s13, 48  ;;  %p11934_p0 = scmp.lt.s32.totalorder %s11928_s13, %s15791_s8 }
 0xfc2   : > { %p11930_p11 = scmp.ne.s32.totalorder %s11928_s13, %s11929_s10  ;;  %p11935_p1 = scmp.lt.s32.totalorder %s11933_s18, %s11929_s10 }
 0xfc3   : > { %10099 = vrot.lane.b32.xlu0 %v15329_v36, %s15847_s24  ;;  %11636 = vmatmul.msk.bf16.vlgmr.msrb.gmra.mxu1 %vm370_vm7, %v11634_v43 }
 0xfc4   : > { %10095 = vrot.lane.b32.xlu1 %v15311_v44, %s15847_s24  ;;  %10097 = vrot.lane.b32.xlu2 %v15327_v18, %s15847_s24  ;;  %p11931_p12 = pnand %p11930_p11, %p12078_p5  ;;  %p11936_p2 = por %p11935_p1, %p11934_p0 }
 0xfc6   : > { %v9267_v32 = vpop.permute.xlu2 %9266  ;;  %p11932_p13 = pneg %p11931_p12 }
 0xfc7   : > { %v9292_v8 = vsel %vm374_vm6, %v9267_v32, 0 }
 0xfc8   : > { %9366 = vmatpush.bf16.msra.mxu1 %v9292_v8  ;;  %p11937_p3 = pnand %p11936_p2, %p11932_p13 }
 0xfcb   : > { %10217 = vrot.lane.b32.xlu0 %v15309_v60, %s11993_s22 }
 0xfcc   : > { %9439 = vmatpush.bf16.msrb.mxu1 %v9385_v14  ;;  %10101 = vrot.lane.b32.xlu1 %v15356_v42, %s15847_s24 }
 0xfcd   : > { %10103 = vrot.lane.b32.xlu2 %v15358_v62, %s15847_s24 }
 0xfce   : > { %v9478_v48 = vpop.permute.xlu2 %9477 }
 0xfd3   : > { %10223 = vrot.lane.b32.xlu0 %v15329_v36, %s11993_s22  ;;  %11640 = vmatmul.msk.bf16.vlgmr.msra.gmra.mxu1 %vm370_vm7, %v11634_v43  ;;  %v9388_v36 = vsel %vm374_vm6, %v15356_v42, 0 }
 0xfd4   : > { %10219 = vrot.lane.b32.xlu1 %v15311_v44, %s11993_s22 }
 0xfd5   : > { %10221 = vrot.lane.b32.xlu2 %v15327_v18, %s11993_s22  ;;  %v9263_v19 = vpop.permute.xlu0 %9262 }
 0xfd6   : > { %v9270_v15 = vsel %vm368_vm8, %v9261_v24, %v9263_v19  ;;  %v9484_v31 = vpop.permute.xlu2 %9483 }
 0xfd7   : > { %v9283_v11 = vsel %vm374_vm6, %v9270_v15, 0 }
 0xfd8   : > { %9327 = vmatpush.bf16.msrb.mxu2 %v9283_v11 }
 0xfdb   : > { %11637 = vmatmul.msk.bf16.vlgmr.msrb.gmra.mxu2 %vm370_vm7, %v11634_v43 }
 0xfdc   : > { %9400 = vmatpush.bf16.msra.mxu2 %v9376_v45  ;;  %10225 = vrot.lane.b32.xlu1 %v15356_v42, %s11993_s22  ;;  %v9379_v42 = vsel %vm374_vm6, %v15311_v44, 0 }
 0xfdd   : > { %10227 = vrot.lane.b32.xlu2 %v15358_v62, %s11993_s22  ;;  %v9474_v12 = vpop.permute.xlu0 %9473  ;;  %v9265_v17 = vpop.permute.xlu1 %9264  ;;  %v9509_v62 = vsel %vm374_vm6, %v9484_v31, 0 }
 0xfde   : > { %v9271_v2 = vsel %vm368_vm8, %v9263_v19, %v9265_v17  ;;  %v9272_v60 = vsel %vm368_vm8, %v9265_v17, %v9267_v32  ;;  %v9602_v61 = vpop.permute.xlu2 %9601  ;;  %vm15859_vm8 = vcmask 891904  }
 0xfdf   : > { %v9286_v52 = vsel %vm374_vm6, %v9271_v2, 0  ;;  %v9289_v54 = vsel %vm374_vm6, %v9272_v60, 0  ;;  %vm15861_vm3 = vmmov %vm15859_vm8 }
 0xfe0   : > { %9452 = vmatpush.bf16.msrb.mxu2 %v9388_v36  ;;  %9340 = vmatpush.bf16.msrb.mxu3 %v9286_v52  ;;  %vm15862_vm10 = vmmov %vm15861_vm3 }
 0xfe1   : > { %9353 = vmatpush.bf16.msra.mxu0 %v9289_v54  ;;  %vm15863_vm14 = vmmov %vm15861_vm3 }
 0xfe3   : > { %11644 = vmatmul.msk.bf16.vlgmr.msrb.gmra.mxu1 %vm370_vm7, %v15522_v51  ;;  %11638 = vmatmul.msk.bf16.vlgmr.msrb.gmra.mxu3 %vm370_vm7, %v11634_v43 }
 0xfe4   : > { %9413 = vmatpush.bf16.msra.mxu3 %v9379_v42  ;;  %11639 = vmatmul.msk.bf16.vlgmr.msra.gmra.mxu0 %vm370_vm7, %v11634_v43 }
 0xfe5   : > { %9426 = vmatpush.bf16.msrb.mxu0 %v9382_v53  ;;  %v9035_v58 = vpop.f32.mrf.mxu0  ;;  %v9048_v47 = vpop.f32.mrf.mxu1 }
 0xfe6   : > { %v9104_v44 = vadd.f32 %v9035_v58, %v15422_v13  ;;  %v9105_v18 = vadd.f32 %v9048_v47, %v15437_v49  ;;  %v9476_v4 = vpop.permute.xlu1 %9475  ;;  %v9480_v29 = vpop.permute.xlu0 %9479 }
 0xfe7   : > { %v9485_v1 = vsel %vm448_vm9, %v9474_v12, %v9476_v4  ;;  %v9486_v26 = vsel %vm448_vm9, %v9476_v4, %v9478_v48  ;;  %v9487_v40 = vsel %vm448_vm9, %v9478_v48, %v9480_v29  ;;  %v9608_v0 = vpop.permute.xlu2 %9607  ;;  %v11654_v4 = vld [vmem:[%s15788_s5 + $0x12c] sm:$0xf] }
 0xfe8   : > { %9465 = vmatpush.bf16.msrb.mxu3 %v9391_v27  ;;  %v9494_v28 = vsel %vm374_vm6, %v9485_v1, 0  ;;  %v9497_v37 = vsel %vm374_vm6, %v9486_v26, 0  ;;  %v9500_v23 = vsel %vm374_vm6, %v9487_v40, 0 }
 0xfe9   : > { %9518 = vmatpush.bf16.msra.mxu0 %v9494_v28  ;;  %9531 = vmatpush.bf16.msra.mxu1 %v9497_v37  ;;  %v9633_v37 = vsel %vm374_vm6, %v9608_v0, 0 }
 0xfeb   : > { %11641 = vmatmul.msk.bf16.vlgmr.msra.gmra.mxu2 %vm370_vm7, %v15522_v51 }
 0xfec   : > { %9544 = vmatpush.bf16.msra.mxu2 %v9500_v23 }
 0xfed   : > { %9583 = vmatpush.bf16.msrb.mxu1 %v9509_v62  ;;  %v9037_v10 = vpop.f32.mrf.mxu0  ;;  %v9050_v50 = vpop.f32.mrf.mxu1 }
 0xfee   : > { %v9482_v39 = vpop.permute.xlu1 %9481  ;;  %v9598_v30 = vpop.permute.xlu0 %9597 }
 0xfef   : > { %v9488_v38 = vsel %vm448_vm9, %v9480_v29, %v9482_v39  ;;  %v9489_v13 = vsel %vm448_vm9, %v9482_v39, %v9484_v31  ;;  %v9726_v17 = vpop.permute.xlu2 %9725  ;;  %vm15860_vm9 = vmmov %vm15859_vm8 }
 0xff0   : > { %v9503_v41 = vsel %vm374_vm6, %v9488_v38, 0  ;;  %v9506_v49 = vsel %vm374_vm6, %v9489_v13, 0 }
 0xff3   : > { %v9061_v57 = vpop.f32.mrf.mxu2  ;;  %v9074_v56 = vpop.f32.mrf.mxu3  ;;  %11649 = vmatmul.msk.bf16.vlgmr.msra.gmra.mxu1 %vm370_vm7, %v15548_v46  ;;  %11642 = vmatmul.msk.bf16.vlgmr.msra.gmra.mxu3 %vm370_vm7, %v15522_v51 }
 0xff4   : > { %v9106_v21 = vadd.f32 %v9061_v57, %v15426_v63  ;;  %v9107_v16 = vadd.f32 %v9074_v56, %v15428_v7  ;;  %11643 = vmatmul.msk.bf16.vlgmr.msrb.gmra.mxu0 %vm370_vm7, %v15522_v51  ;;  %9557 = vmatpush.bf16.msra.mxu3 %v9503_v41 }
 0xff5   : > { %9570 = vmatpush.bf16.msrb.mxu0 %v9506_v49  ;;  %v9087_v9 = vpop.f32.mrf.mxu0  ;;  %v9100_v34 = vpop.f32.mrf.mxu1 }
 0xff6   : > { %v9108_v59 = vadd.f32 %v9087_v9, %v15445_v3  ;;  %v9109_v35 = vadd.f32 %v9100_v34, %v15453_v55  ;;  %v9600_v33 = vpop.permute.xlu1 %9599  ;;  %v9604_v63 = vpop.permute.xlu0 %9603 }
 0xff7   : > { %v9609_v25 = vsel %vm3850_vm0, %v9598_v30, %v9600_v33  ;;  %v9610_v6 = vsel %vm3850_vm0, %v9600_v33, %v9602_v61  ;;  %v9611_v32 = vsel %vm3850_vm0, %v9602_v61, %v9604_v63  ;;  %v9732_v1 = vpop.permute.xlu2 %9731 }
 0xff8   : > { %v9618_v7 = vsel %vm374_vm6, %v9609_v25, 0  ;;  %v9621_v15 = vsel %vm374_vm6, %v9610_v6, 0  ;;  %v9624_v11 = vsel %vm374_vm6, %v9611_v32, 0  ;;  %v9757_v10 = vsel %vm374_vm6, %v9732_v1, 0 }
 0xffb   : > { %v9063_v5 = vpop.f32.mrf.mxu2  ;;  %v9076_v22 = vpop.f32.mrf.mxu3  ;;  %11645 = vmatmul.msk.bf16.vlgmr.msrb.gmra.mxu2 %vm370_vm7, %v15522_v51 }
 0xffc   : > { %9642 = vmatpush.bf16.msrb.mxu2 %v9618_v7 }
 0xffd   : > { %v9089_v24 = vpop.f32.mrf.mxu0  ;;  %v9102_v43 = vpop.f32.mrf.mxu1 }
 0xffe   : > { %v9606_v20 = vpop.permute.xlu1 %9605  ;;  %v9722_v8 = vpop.permute.xlu0 %9721 }
 0xfff   : > { %v9612_v3 = vsel %vm3850_vm0, %v9604_v63, %v9606_v20  ;;  %v9613_v42 = vsel %vm3850_vm0, %v9606_v20, %v9608_v0  ;;  %v9850_v57 = vpop.permute.xlu2 %9849  ;;  %vm15864_vm0 = vmmov %vm15856_vm1 }
0x1000   : > { %v9627_v55 = vsel %vm374_vm6, %v9612_v3, 0  ;;  %vm15865_vm13 = vmmov %vm15864_vm0 }
0x1001   : > { %9681 = vmatpush.bf16.msra.mxu1 %v9627_v55  ;;  %vm15866_vm5 = vmmov %vm15864_vm0 }
0x1002   : > { %vm15867_vm1 = vmmov %vm15864_vm0 }
0x1003   : > { %v9159_v14 = vpop.f32.mrf.mxu2  ;;  %v9172_v19 = vpop.f32.mrf.mxu3  ;;  %11653 = vmatmul.msk.bf16.vlgmr.msrb.gmra.mxu1 %vm370_vm7, %v15548_v46  ;;  %11646 = vmatmul.msk.bf16.vlgmr.msrb.gmra.mxu3 %vm370_vm7, %v15522_v51  ;;  %v9630_v51 = vsel %vm374_vm6, %v9613_v42, 0  ;;  %vm15868_vm12 = vmmov %vm15864_vm0 }
0x1004   : > { %v15576_v45 = vadd.f32 %v9159_v14, %v9104_v44  ;;  %v15578_v48 = vadd.f32 %v9172_v19, %v9105_v18  ;;  %11648 = vmatmul.msk.bf16.vlgmr.msra.gmra.mxu0 %vm370_vm7, %v15548_v46  ;;  %9655 = vmatpush.bf16.msrb.mxu3 %v9621_v15  ;;  %v11668_v15 = vld [vmem:[%s15788_s5 + $0x134] sm:$0xf] }
0x1005   : > { %9668 = vmatpush.bf16.msra.mxu0 %v9624_v11  ;;  %v9185_v36 = vpop.f32.mrf.mxu0  ;;  %v9198_v12 = vpop.f32.mrf.mxu1 }
0x1006   : > { %v15584_v2 = vadd.f32 %v9185_v36, %v9106_v21  ;;  %v15586_v60 = vadd.f32 %v9198_v12, %v9107_v16  ;;  %v9724_v52 = vpop.permute.xlu1 %9723  ;;  %v9728_v58 = vpop.permute.xlu0 %9727 }
0x1007   : > { %v9734_v54 = vsel %vm15859_vm8, %v9724_v52, %v9726_v17  ;;  %v9733_v29 = vsel %vm15860_vm9, %v9722_v8, %v9724_v52  ;;  %v9735_v30 = vsel %vm15861_vm3, %v9726_v17, %v9728_v58 }
0x1008   : > { %v9745_v53 = vsel %vm374_vm6, %v9734_v54, 0  ;;  %v9742_v40 = vsel %vm374_vm6, %v9733_v29, 0  ;;  %v9748_v38 = vsel %vm374_vm6, %v9735_v30, 0 }
0x1009   : > { %9779 = vmatpush.bf16.msrb.mxu1 %v9745_v53 }
0x100b   : > { %v9161_v31 = vpop.f32.mrf.mxu2  ;;  %v9174_v27 = vpop.f32.mrf.mxu3  ;;  %11650 = vmatmul.msk.bf16.vlgmr.msra.gmra.mxu2 %vm370_vm7, %v15548_v46 }
0x100c   : > { %9694 = vmatpush.bf16.msra.mxu2 %v9630_v51 }
0x100d   : > { %v9200_v47 = vpop.f32.mrf.mxu1  ;;  %v9187_v44 = vpop.f32.mrf.mxu0 }
0x100e   : > { %v9730_v18 = vpop.permute.xlu1 %9729  ;;  %v9846_v39 = vpop.permute.xlu0 %9845 }
0x100f   : > { %v9736_v41 = vsel %vm15862_vm10, %v9728_v58, %v9730_v18  ;;  %v9737_v49 = vsel %vm15863_vm14, %v9730_v18, %v9732_v1  ;;  %v11675_v18 = vld [vmem:[%s15788_s5 + $0x138] sm:$0xf] }
0x1010   : > { %v9751_v9 = vsel %vm374_vm6, %v9736_v41, 0  ;;  %v9754_v34 = vsel %vm374_vm6, %v9737_v49, 0 }
0x1013   : > { %v9211_v26 = vpop.f32.mrf.mxu2  ;;  %v9224_v28 = vpop.f32.mrf.mxu3  ;;  %11658 = vmatmul.msk.bf16.vlgmr.msra.gmra.mxu1 %vm370_vm7, %v11654_v4  ;;  %11651 = vmatmul.msk.bf16.vlgmr.msra.gmra.mxu3 %vm370_vm7, %v15548_v46 }
0x1014   : > { %v15601_v62 = vadd.f32 %v9211_v26, %v9108_v59  ;;  %v15603_v23 = vadd.f32 %v9224_v28, %v9109_v35  ;;  %11652 = vmatmul.msk.bf16.vlgmr.msrb.gmra.mxu0 %vm370_vm7, %v15548_v46  ;;  %9707 = vmatpush.bf16.msra.mxu3 %v9633_v37  ;;  %v11661_v46 = vld [vmem:[%s15788_s5 + $0x130] sm:$0xf]  ;;  %v9856_v35 = vpop.permute.xlu2 %9855 }
0x1015   : > { %9766 = vmatpush.bf16.msrb.mxu0 %v9742_v40  ;;  %9831 = vmatpush.bf16.msra.mxu1 %v9757_v10  ;;  %v9881_v17 = vsel %vm374_vm6, %v9856_v35, 0 }
0x1016   : > { %v9848_v50 = vpop.permute.xlu1 %9847  ;;  %v9852_v21 = vpop.permute.xlu0 %9851 }
0x1017   : > { %v9857_v33 = vsel %vm15865_vm13, %v9846_v39, %v9848_v50  ;;  %v9858_v5 = vsel %vm15866_vm5, %v9848_v50, %v9850_v57  ;;  %v9859_v22 = vsel %vm15867_vm1, %v9850_v57, %v9852_v21 }
0x1018   : > { %v9866_v25 = vsel %vm374_vm6, %v9857_v33, 0  ;;  %v9869_v43 = vsel %vm374_vm6, %v9858_v5, 0  ;;  %v9872_v20 = vsel %vm374_vm6, %v9859_v22, 0 }
0x101b   : > { %11655 = vmatmul.msk.bf16.vlgmr.msrb.gmra.mxu2 %vm370_vm7, %v11654_v4  ;;  %v9213_v13 = vpop.f32.mrf.mxu2  ;;  %v9226_v61 = vpop.f32.mrf.mxu3 }
0x101c   : > { %9792 = vmatpush.bf16.msrb.mxu2 %v9748_v38  ;;  %v9974_v7 = vpop.permute.xlu2 %9973 }
0x101e   : > { %v9854_v56 = vpop.permute.xlu1 %9853  ;;  %v9970_v24 = vpop.permute.xlu0 %9969 }
0x101f   : > { %v9860_v16 = vsel %vm15864_vm0, %v9852_v21, %v9854_v56  ;;  %v9861_v55 = vsel %vm15868_vm12, %v9854_v56, %v9856_v35 }
0x1020   : > { %v9875_v59 = vsel %vm374_vm6, %v9860_v16, 0  ;;  %v9878_v6 = vsel %vm374_vm6, %v9861_v55, 0 }
0x1023   : > { %11663 = vmatmul.msk.bf16.vlgmr.msrb.gmra.mxu1 %vm370_vm7, %v11661_v46  ;;  %11656 = vmatmul.msk.bf16.vlgmr.msrb.gmra.mxu3 %vm370_vm7, %v11654_v4 }
0x1024   : > { %11657 = vmatmul.msk.bf16.vlgmr.msra.gmra.mxu0 %vm370_vm7, %v11654_v4  ;;  %9805 = vmatpush.bf16.msrb.mxu3 %v9751_v9  ;;  %v9980_v36 = vpop.permute.xlu2 %9979 }
0x1025   : > { %9818 = vmatpush.bf16.msra.mxu0 %v9754_v34  ;;  %9929 = vmatpush.bf16.msrb.mxu1 %v9875_v59  ;;  %v10005_v54 = vsel %vm374_vm6, %v9980_v36, 0 }
0x1026   : > { %v9972_v63 = vpop.permute.xlu1 %9971  ;;  %v9976_v14 = vpop.permute.xlu0 %9975 }
0x1027   : > { %v9982_v0 = vsel %vm4224_vm2, %v9972_v63, %v9974_v7  ;;  %v9981_v11 = vsel %vm4224_vm2, %v9970_v24, %v9972_v63  ;;  %v9983_v51 = vsel %vm4224_vm2, %v9974_v7, %v9976_v14 }
0x1028   : > { %v9993_v3 = vsel %vm374_vm6, %v9982_v0, 0  ;;  %v9990_v52 = vsel %vm374_vm6, %v9981_v11, 0  ;;  %v9996_v27 = vsel %vm374_vm6, %v9983_v51, 0 }
0x102b   : > { %11659 = vmatmul.msk.bf16.vlgmr.msra.gmra.mxu2 %vm370_vm7, %v11654_v4 }
0x102c   : > { %9890 = vmatpush.bf16.msra.mxu2 %v9866_v25  ;;  %v10098_v58 = vpop.permute.xlu2 %10097 }
0x102e   : > { %v9978_v32 = vpop.permute.xlu1 %9977  ;;  %v10094_v53 = vpop.permute.xlu0 %10093 }
0x102f   : > { %v9985_v29 = vsel %vm4224_vm2, %v9978_v32, %v9980_v36 }
0x1030   : > { %v10002_v37 = vsel %vm374_vm6, %v9985_v29, 0 }
0x1033   : > { %11667 = vmatmul.msk.bf16.vlgmr.msra.gmra.mxu1 %vm370_vm7, %v11661_v46  ;;  %11660 = vmatmul.msk.bf16.vlgmr.msra.gmra.mxu3 %vm370_vm7, %v11654_v4  ;;  %v9984_v4 = vsel %vm4224_vm2, %v9976_v14, %v9978_v32 }
0x1034   : > { %11662 = vmatmul.msk.bf16.vlgmr.msrb.gmra.mxu0 %vm370_vm7, %v11661_v46  ;;  %9903 = vmatpush.bf16.msra.mxu3 %v9869_v43  ;;  %v9999_v28 = vsel %vm374_vm6, %v9984_v4, 0  ;;  %v10104_v10 = vpop.permute.xlu2 %10103  ;;  %v11689_v4 = vld [vmem:[%s15788_s5 + $0x140] sm:$0xf] }
0x1035   : > { %9916 = vmatpush.bf16.msrb.mxu0 %v9872_v20  ;;  %10027 = vmatpush.bf16.msra.mxu1 %v9993_v3  ;;  %v11682_v20 = vld [vmem:[%s15788_s5 + $0x13c] sm:$0xf]  ;;  %v10129_v14 = vsel %vm374_vm6, %v10104_v10, 0 }
0x1036   : > { %v10096_v42 = vpop.permute.xlu1 %10095  ;;  %v10100_v1 = vpop.permute.xlu0 %10099 }
0x1037   : > { %v10105_v50 = vsel %vm4349_vm4, %v10094_v53, %v10096_v42  ;;  %v10106_v56 = vsel %vm4349_vm4, %v10096_v42, %v10098_v58 }
0x1038   : > { %v10114_v30 = vsel %vm374_vm6, %v10105_v50, 0  ;;  %v10117_v21 = vsel %vm374_vm6, %v10106_v56, 0 }
0x103b   : > { %11664 = vmatmul.msk.bf16.vlgmr.msrb.gmra.mxu2 %vm370_vm7, %v11661_v46  ;;  %v15640_v8 = vpop.f32.mrf.mxu0 }
0x103c   : > { %9942 = vmatpush.bf16.msrb.mxu2 %v9878_v6  ;;  %v10222_v57 = vpop.permute.xlu2 %10221 }
0x103e   : > { %v10102_v47 = vpop.permute.xlu1 %10101  ;;  %v10218_v5 = vpop.permute.xlu0 %10217 }
0x103f   : > { %v10108_v26 = vsel %vm4349_vm4, %v10100_v1, %v10102_v47  ;;  %v10109_v35 = vsel %vm4349_vm4, %v10102_v47, %v10104_v10 }
0x1040   : > { %v15642_v19 = vpop.f32.mrf.mxu1  ;;  %v10123_v40 = vsel %vm374_vm6, %v10108_v26, 0  ;;  %v10126_v7 = vsel %vm374_vm6, %v10109_v35, 0 }
0x1043   : > { %11672 = vmatmul.msk.bf16.vlgmr.msrb.gmra.mxu1 %vm370_vm7, %v11668_v15  ;;  %v9305_v12 = vpop.f32.mrf.mxu0  ;;  %11665 = vmatmul.msk.bf16.vlgmr.msrb.gmra.mxu3 %vm370_vm7, %v11661_v46 }
0x1044   : > { %11666 = vmatmul.msk.bf16.vlgmr.msra.gmra.mxu0 %vm370_vm7, %v11661_v46  ;;  %9955 = vmatpush.bf16.msrb.mxu3 %v9881_v17  ;;  %v10107_v46 = vsel %vm4349_vm4, %v10098_v58, %v10100_v1  ;;  %v10228_v6 = vpop.permute.xlu2 %10227 }
0x1045   : > { %10014 = vmatpush.bf16.msra.mxu0 %v9990_v52  ;;  %10079 = vmatpush.bf16.msrb.mxu1 %v10005_v54  ;;  %v10120_v16 = vsel %vm374_vm6, %v10107_v46, 0 }
0x1046   : > { %v10220_v13 = vpop.permute.xlu1 %10219  ;;  %v10224_v11 = vpop.permute.xlu0 %10223 }
0x1047   : > { %v10230_v49 = vsel %vm4474_vm11, %v10220_v13, %v10222_v57  ;;  %v10229_v3 = vsel %vm4474_vm11, %v10218_v5, %v10220_v13  ;;  %v10231_v17 = vsel %vm4474_vm11, %v10222_v57, %v10224_v11 }
0x1048   : > { %v9318_v31 = vpop.f32.mrf.mxu1  ;;  %v10241_v9 = vsel %vm374_vm6, %v10230_v49, 0  ;;  %v10244_v51 = vsel %vm374_vm6, %v10231_v17, 0 }
0x104b   : > { %11669 = vmatmul.msk.bf16.vlgmr.msra.gmra.mxu2 %vm370_vm7, %v11668_v15 }
0x104c   : > { %10040 = vmatpush.bf16.msra.mxu2 %v9996_v27 }
0x104e   : > { %v10226_v31 = vpop.permute.xlu1 %10225 }
0x104f   : > { %v10232_v29 = vsel %vm4474_vm11, %v10224_v11, %v10226_v31 }
0x1050   : > { %v15657_v44 = vpop.f32.mrf.mxu1 }
0x1053   : > { %11677 = vmatmul.msk.bf16.vlgmr.msra.gmra.mxu1 %vm370_vm7, %v11675_v18  ;;  %11670 = vmatmul.msk.bf16.vlgmr.msra.gmra.mxu3 %vm370_vm7, %v11668_v15 }
0x1054   : > { %11671 = vmatmul.msk.bf16.vlgmr.msrb.gmra.mxu0 %vm370_vm7, %v11668_v15  ;;  %10053 = vmatpush.bf16.msra.mxu3 %v9999_v28  ;;  %v10247_v28 = vsel %vm374_vm6, %v10232_v29, 0 }
0x1055   : > { %10066 = vmatpush.bf16.msrb.mxu0 %v10002_v37  ;;  %10177 = vmatpush.bf16.msra.mxu1 %v10123_v40 }
0x1058   : > { %v9370_v39 = vpop.f32.mrf.mxu1 }
0x105b   : > { %11673 = vmatmul.msk.bf16.vlgmr.msrb.gmra.mxu2 %vm370_vm7, %v11668_v15 }
0x105c   : > { %10138 = vmatpush.bf16.msrb.mxu2 %v10114_v30 }
0x105e   : > { %v9329_v38 = vpop.f32.mrf.mxu2 }
0x1060   : > { %v9441_v61 = vpop.f32.mrf.mxu1 }
0x1061   : > { %v9355_v41 = vpop.f32.mrf.mxu0 }
0x1063   : > { %11681 = vmatmul.msk.bf16.vlgmr.msrb.gmra.mxu1 %vm370_vm7, %v11675_v18  ;;  %11674 = vmatmul.msk.bf16.vlgmr.msrb.gmra.mxu3 %vm370_vm7, %v11668_v15  ;;  %v10238_v15 = vsel %vm374_vm6, %v10229_v3, 0 }
0x1064   : > { %11676 = vmatmul.msk.bf16.vlgmr.msra.gmra.mxu0 %vm370_vm7, %v11675_v18  ;;  %10151 = vmatpush.bf16.msrb.mxu3 %v10117_v21 }
0x1065   : > { %10164 = vmatpush.bf16.msra.mxu0 %v10120_v16  ;;  %10275 = vmatpush.bf16.msrb.mxu1 %v10241_v9 }
0x1066   : > { %v9331_v34 = vpop.f32.mrf.mxu2  ;;  %v9342_v59 = vpop.f32.mrf.mxu3 }
0x1067   : > { %v15684_v33 = vadd.f32 %v9441_v61, %v9342_v59 }
0x1068   : > { %v9443_v25 = vpop.f32.mrf.mxu1 }
0x1069   : > { %v9357_v63 = vpop.f32.mrf.mxu0 }
0x106b   : > { %11678 = vmatmul.msk.bf16.vlgmr.msra.gmra.mxu2 %vm370_vm7, %v11675_v18 }
0x106c   : > { %10190 = vmatpush.bf16.msra.mxu2 %v10126_v7 }
0x106e   : > { %v9402_v22 = vpop.f32.mrf.mxu2  ;;  %v9344_v0 = vpop.f32.mrf.mxu3 }
0x106f   : > { %v9403_v24 = vadd.f32 %v9402_v22, %v15640_v8  ;;  %v10253_v8 = vsel %vm374_vm6, %v10228_v6, 0 }
0x1070   : > { %v9533_v43 = vpop.f32.mrf.mxu1 }
0x1071   : > { %v9428_v55 = vpop.f32.mrf.mxu0 }
0x1072   : > { %v9429_v32 = vadd.f32 %v9428_v55, %v9329_v38 }
0x1073   : > { %11686 = vmatmul.msk.bf16.vlgmr.msra.gmra.mxu1 %vm370_vm7, %v11682_v20  ;;  %11679 = vmatmul.msk.bf16.vlgmr.msra.gmra.mxu3 %vm370_vm7, %v11675_v18 }
0x1074   : > { %11680 = vmatmul.msk.bf16.vlgmr.msrb.gmra.mxu0 %vm370_vm7, %v11675_v18  ;;  %10203 = vmatpush.bf16.msra.mxu3 %v10129_v14 }
0x1075   : > { %10262 = vmatpush.bf16.msrb.mxu0 %v10238_v15  ;;  %10327 = vmatpush.bf16.msra.mxu1 %v10253_v8 }
0x1076   : > { %v9404_v36 = vpop.f32.mrf.mxu2  ;;  %v9415_v12 = vpop.f32.mrf.mxu3 }
0x1077   : > { %v9416_v52 = vadd.f32 %v9415_v12, %v15642_v19  ;;  %v10233_v19 = vsel %vm4474_vm11, %v10226_v31, %v10228_v6 }
0x1078   : > { %v9535_v54 = vpop.f32.mrf.mxu1  ;;  %v10250_v37 = vsel %vm374_vm6, %v10233_v19, 0 }
0x1079   : > { %v9430_v42 = vpop.f32.mrf.mxu0  ;;  %v9590_v53 = vadd.f32 %v9533_v43, %v9416_v52 }
0x107b   : > { %11683 = vmatmul.msk.bf16.vlgmr.msrb.gmra.mxu2 %vm370_vm7, %v11682_v20 }
0x107c   : > { %10288 = vmatpush.bf16.msrb.mxu2 %v10244_v51 }
0x107e   : > { %v9454_v27 = vpop.f32.mrf.mxu2  ;;  %v9417_v58 = vpop.f32.mrf.mxu3 }
0x107f   : > { %v9455_v47 = vadd.f32 %v9454_v27, %v9355_v41 }
0x1080   : > { %v9585_v18 = vpop.f32.mrf.mxu1 }
0x1081   : > { %v9520_v1 = vpop.f32.mrf.mxu0 }
0x1082   : > { %v9589_v26 = vadd.f32 %v9520_v1, %v9403_v24 }
0x1083   : > { %11691 = vmatmul.msk.bf16.vlgmr.msrb.gmra.mxu1 %vm370_vm7, %v11689_v4  ;;  %11684 = vmatmul.msk.bf16.vlgmr.msrb.gmra.mxu3 %vm370_vm7, %v11682_v20 }
0x1084   : > { %11685 = vmatmul.msk.bf16.vlgmr.msra.gmra.mxu0 %vm370_vm7, %v11682_v20  ;;  %10301 = vmatpush.bf16.msrb.mxu3 %v10247_v28 }
0x1085   : > { %10314 = vmatpush.bf16.msra.mxu0 %v10250_v37 }
0x1086   : > { %v9456_v40 = vpop.f32.mrf.mxu2  ;;  %v9467_v10 = vpop.f32.mrf.mxu3 }
0x1087   : > { %v9468_v50 = vadd.f32 %v9467_v10, %v15657_v44 }
0x1088   : > { %v9587_v39 = vpop.f32.mrf.mxu1 }
0x1089   : > { %v9522_v30 = vpop.f32.mrf.mxu0  ;;  %v9594_v38 = vadd.f32 %v9585_v18, %v9468_v50 }
0x108b   : > { %11687 = vmatmul.msk.bf16.vlgmr.msra.gmra.mxu2 %vm370_vm7, %v11682_v20 }
0x108e   : > { %v9546_v13 = vpop.f32.mrf.mxu2  ;;  %v9469_v61 = vpop.f32.mrf.mxu3 }
0x108f   : > { %v9591_v57 = vadd.f32 %v9546_v13, %v9429_v32 }
0x1090   : > { %v9683_v56 = vpop.f32.mrf.mxu1 }
0x1091   : > { %v9572_v46 = vpop.f32.mrf.mxu0 }
0x1092   : > { %v9593_v41 = vadd.f32 %v9572_v46, %v9455_v47 }
0x1093   : > { %11695 = vmatmul.msk.bf16.vlgmr.msra.gmra.mxu1 %vm370_vm7, %v11689_v4  ;;  %11688 = vmatmul.msk.bf16.vlgmr.msra.gmra.mxu3 %vm370_vm7, %v11682_v20 }
0x1094   : > { %11690 = vmatmul.msk.bf16.vlgmr.msrb.gmra.mxu0 %vm370_vm7, %v11689_v4 }
0x1096   : > { %v9548_v49 = vpop.f32.mrf.mxu2  ;;  %v9559_v21 = vpop.f32.mrf.mxu3 }
0x1097   : > { %v9592_v44 = vadd.f32 %v9559_v21, %v15684_v33 }
0x1098   : > { %v9685_v16 = vpop.f32.mrf.mxu1 }
0x1099   : > { %v9574_v9 = vpop.f32.mrf.mxu0  ;;  %v9716_v34 = vadd.f32 %v9683_v56, %v9592_v44 }
0x109b   : > { %11692 = vmatmul.msk.bf16.vlgmr.msrb.gmra.mxu2 %vm370_vm7, %v11689_v4 }
0x109e   : > { %v9644_v59 = vpop.f32.mrf.mxu2  ;;  %v9561_v35 = vpop.f32.mrf.mxu3 }
0x109f   : > { %v9713_v25 = vadd.f32 %v9644_v59, %v9589_v26 }
0x10a0   : > { %v9781_v63 = vpop.f32.mrf.mxu1 }
0x10a1   : > { %v9670_v7 = vpop.f32.mrf.mxu0 }
0x10a2   : > { %v9715_v5 = vadd.f32 %v9670_v7, %v9591_v57 }
0x10a3   : > { %11693 = vmatmul.msk.bf16.vlgmr.msrb.gmra.mxu3 %vm370_vm7, %v11689_v4 }
0x10a4   : > { %11694 = vmatmul.msk.bf16.vlgmr.msra.gmra.mxu0 %vm370_vm7, %v11689_v4 }
0x10a6   : > { %v9646_v22 = vpop.f32.mrf.mxu2  ;;  %v9657_v0 = vpop.f32.mrf.mxu3 }
0x10a7   : > { %v9714_v24 = vadd.f32 %v9657_v0, %v9590_v53 }
0x10a8   : > { %v9783_v43 = vpop.f32.mrf.mxu1 }
0x10a9   : > { %v9672_v33 = vpop.f32.mrf.mxu0  ;;  %v9838_v20 = vadd.f32 %v9781_v63, %v9714_v24 }
0x10ae   : > { %v9696_v3 = vpop.f32.mrf.mxu2  ;;  %v9659_v55 = vpop.f32.mrf.mxu3 }
0x10af   : > { %v9717_v6 = vadd.f32 %v9696_v3, %v9593_v41 }
0x10b0   : > { %v9833_v32 = vpop.f32.mrf.mxu1 }
0x10b1   : > { %v9768_v14 = vpop.f32.mrf.mxu0 }
0x10b2   : > { %v9837_v15 = vadd.f32 %v9768_v14, %v9713_v25 }
0x10b6   : > { %v9698_v8 = vpop.f32.mrf.mxu2  ;;  %v9709_v11 = vpop.f32.mrf.mxu3 }
0x10b7   : > { %v9718_v36 = vadd.f32 %v9709_v11, %v9594_v38 }
0x10b8   : > { %v9835_v12 = vpop.f32.mrf.mxu1 }
0x10b9   : > { %v9770_v17 = vpop.f32.mrf.mxu0  ;;  %v15722_v52 = vadd.f32 %v9833_v32, %v9718_v36 }
0x10be   : > { %v9794_v54 = vpop.f32.mrf.mxu2  ;;  %v9711_v42 = vpop.f32.mrf.mxu3 }
0x10bf   : > { %v9839_v51 = vadd.f32 %v9794_v54, %v9715_v5 }
0x10c0   : > { %v9931_v53 = vpop.f32.mrf.mxu1 }
0x10c1   : > { %v9820_v31 = vpop.f32.mrf.mxu0 }
0x10c2   : > { %v15724_v27 = vadd.f32 %v9820_v31, %v9717_v6 }
0x10c6   : > { %v9796_v58 = vpop.f32.mrf.mxu2  ;;  %v9807_v47 = vpop.f32.mrf.mxu3 }
0x10c7   : > { %v9840_v18 = vadd.f32 %v9807_v47, %v9716_v34 }
0x10c8   : > { %v9933_v4 = vpop.f32.mrf.mxu1 }
0x10c9   : > { %v9822_v29 = vpop.f32.mrf.mxu0  ;;  %v15726_v19 = vadd.f32 %v9931_v53, %v9840_v18 }
0x10ce   : > { %v9892_v1 = vpop.f32.mrf.mxu2  ;;  %v9809_v26 = vpop.f32.mrf.mxu3 }
0x10cf   : > { %v9961_v14 = vadd.f32 %v9892_v1, %v9837_v15 }
0x10d0   : > { %v10029_v28 = vpop.f32.mrf.mxu1 }
0x10d1   : > { %v9918_v37 = vpop.f32.mrf.mxu0 }
0x10d2   : > { %v9963_v40 = vadd.f32 %v9918_v37, %v9839_v51 }
0x10d6   : > { %v9894_v10 = vpop.f32.mrf.mxu2  ;;  %v9905_v50 = vpop.f32.mrf.mxu3 }
0x10d7   : > { %v9962_v0 = vadd.f32 %v9905_v50, %v9838_v20 }
0x10d8   : > { %v10031_v39 = vpop.f32.mrf.mxu1 }
0x10d9   : > { %v9920_v30 = vpop.f32.mrf.mxu0  ;;  %v10086_v24 = vadd.f32 %v10029_v28, %v9962_v0 }
0x10de   : > { %v9944_v38 = vpop.f32.mrf.mxu2  ;;  %v9907_v13 = vpop.f32.mrf.mxu3 }
0x10df   : > { %v9965_v28 = vadd.f32 %v9944_v38, %v15724_v27 }
0x10e0   : > { %v10081_v61 = vpop.f32.mrf.mxu1 }
0x10e1   : > { %v10016_v57 = vpop.f32.mrf.mxu0 }
0x10e2   : > { %v10085_v11 = vadd.f32 %v10016_v57, %v9961_v14 }
0x10e6   : > { %v9946_v56 = vpop.f32.mrf.mxu2  ;;  %v9957_v46 = vpop.f32.mrf.mxu3 }
0x10e7   : > { %v9966_v51 = vadd.f32 %v9957_v46, %v15722_v52 }
0x10e8   : > { %v10083_v41 = vpop.f32.mrf.mxu1 }
0x10e9   : > { %v10018_v49 = vpop.f32.mrf.mxu0  ;;  %v10090_v15 = vadd.f32 %v10081_v61, %v9966_v51 }
0x10ee   : > { %v10042_v21 = vpop.f32.mrf.mxu2  ;;  %v9959_v44 = vpop.f32.mrf.mxu3 }
0x10ef   : > { %v10087_v26 = vadd.f32 %v10042_v21, %v9963_v40 }
0x10f0   : > { %v10179_v16 = vpop.f32.mrf.mxu1 }
0x10f1   : > { %v10068_v9 = vpop.f32.mrf.mxu0 }
0x10f2   : > { %v10089_v10 = vadd.f32 %v10068_v9, %v9965_v28 }
0x10f6   : > { %v10044_v34 = vpop.f32.mrf.mxu2  ;;  %v10055_v59 = vpop.f32.mrf.mxu3 }
0x10f7   : > { %v10088_v40 = vadd.f32 %v10055_v59, %v15726_v19 }
0x10f8   : > { %v10181_v35 = vpop.f32.mrf.mxu1 }
0x10f9   : > { %v10070_v25 = vpop.f32.mrf.mxu0  ;;  %v10212_v56 = vadd.f32 %v10179_v16, %v10088_v40 }
0x10fe   : > { %v10140_v63 = vpop.f32.mrf.mxu2  ;;  %v10057_v7 = vpop.f32.mrf.mxu3 }
0x10ff   : > { %v10209_v54 = vadd.f32 %v10140_v63, %v10085_v11 }
0x1100   : > { %v10277_v5 = vpop.f32.mrf.mxu1 }
0x1101   : > { %v10166_v22 = vpop.f32.mrf.mxu0 }
0x1102   : > { %v10211_v52 = vadd.f32 %v10166_v22, %v10087_v26 }
0x1106   : > { %v10142_v43 = vpop.f32.mrf.mxu2  ;;  %v10153_v33 = vpop.f32.mrf.mxu3 }
0x1107   : > { %v10210_v3 = vadd.f32 %v10153_v33, %v10086_v24 }
0x1108   : > { %v10279_v55 = vpop.f32.mrf.mxu1 }
0x1109   : > { %v10168_v6 = vpop.f32.mrf.mxu0  ;;  %v10334_v32 = vadd.f32 %v10277_v5, %v10210_v3 }
0x110b   : > { %v10340_v8 = vadd.f32 %v10334_v32, %v15578_v48 }
0x110d   : > { %v10346_v36 = vmax.f32 %v10340_v8, 0.0 }
0x110e   : > { %v10192_v12 = vpop.f32.mrf.mxu2  ;;  %v10155_v17 = vpop.f32.mrf.mxu3 }
0x110f   : > { %10352 = vst [vmem:[%s15732_s23 + $0x8] sm:$0xff] %v10346_v36  ;;  %v10213_v13 = vadd.f32 %v10192_v12, %v10089_v10 }
0x1110   : > { %v10329_v20 = vpop.f32.mrf.mxu1 }
0x1111   : > { %v10264_v42 = vpop.f32.mrf.mxu0 }
0x1112   : > { %v10333_v53 = vadd.f32 %v10264_v42, %v10209_v54 }
0x1114   : > { %v10339_v31 = vadd.f32 %v10333_v53, %v15576_v45 }
0x1116   : > { %v10345_v58 = vmax.f32 %v10339_v31, 0.0  ;;  %v10194_v48 = vpop.f32.mrf.mxu2  ;;  %v10205_v47 = vpop.f32.mrf.mxu3 }
0x1117   : > { %v10214_v18 = vadd.f32 %v10205_v47, %v10090_v15 }
0x1118   : > { %10351 = vst [vmem:[%s15732_s23] sm:$0xff] %v10345_v58  ;;  %v10331_v4 = vpop.f32.mrf.mxu1 }
0x1119   : > { %v10266_v29 = vpop.f32.mrf.mxu0  ;;  %v10338_v1 = vadd.f32 %v10329_v20, %v10214_v18 }
0x111b   : > { %v10344_v37 = vadd.f32 %v10338_v1, %v15603_v23 }
0x111d   : > { %v10350_v45 = vmax.f32 %v10344_v37, 0.0 }
0x111e   : > { %v10290_v50 = vpop.f32.mrf.mxu2  ;;  %v10207_v39 = vpop.f32.mrf.mxu3 }
0x111f   : > { %v10335_v30 = vadd.f32 %v10290_v50, %v10211_v52  ;;  %10356 = vst.msk [vmem:[%s15732_s23 + $0x28] sm:$0xff] %vm370_vm7, %v10350_v45 }
0x1121   : > { %v10316_v61 = vpop.f32.mrf.mxu0  ;;  %v10341_v57 = vadd.f32 %v10335_v30, %v15584_v2 }
0x1122   : > { %v10337_v27 = vadd.f32 %v10316_v61, %v10213_v13 }
0x1123   : > { %v10347_v23 = vmax.f32 %v10341_v57, 0.0 }
0x1124   : > { %v10343_v38 = vadd.f32 %v10337_v27, %v15601_v62 }
0x1125   : > { %10353 = vst [vmem:[%s15732_s23 + $0x10] sm:$0xff] %v10347_v23 }
0x1126   : > { %v10349_v46 = vmax.f32 %v10343_v38, 0.0  ;;  %v10292_v41 = vpop.f32.mrf.mxu2  ;;  %v10303_v49 = vpop.f32.mrf.mxu3 }
0x1127   : > { %v10336_v2 = vadd.f32 %v10303_v49, %v10212_v56 }
0x1128   : > { %10355 = vst [vmem:[%s15732_s23 + $0x20] sm:$0xff] %v10349_v46 }
0x1129   : > { %v10318_v19 = vpop.f32.mrf.mxu0  ;;  %v10342_v21 = vadd.f32 %v10336_v2, %v15586_v60 }
0x112b   : > { %v10348_v62 = vmax.f32 %v10342_v21, 0.0 }
0x112d   : > { %10354 = vst [vmem:[%s15732_s23 + $0x18] sm:$0xff] %v10348_v62 }
0x112e   : > { %v10305_v44 = vpop.f32.mrf.mxu3 }
0x112f   : > { %11940 = shalt.err (!%p11937_p3)
}
0x1130   : > { %11847 = dma.vmem_to_hbm [thread:$0]  (%p12078_p5), %s10372_s20, 768, %s10374_s9, %s10358_s1  }
0x1131 PF: > { %p11853_p4 = scmp.ge.s32.totalorder %s11975_s30, 2  ;;  %s10385_s12 = sand.u32 1, %s11963_s27  }
0x1132   : > { %s10386_s21 = scalar_lea.sflag [#allocation8], %s10385_s12 }
0x1133   : > { %p11850_p7 = pnand %p11853_p4, %p12082_p6 }
0x1135   : > { %p11851_p8 = pneg %p11850_p7 }
0x1137   : > { %11958 = dma.done.wait (%p11851_p8), %s10386_s21, 768  }
0x1138   : > { %11960 = vsyncadd (%p11851_p8), %s10386_s21, 4294966528  ;;  %p18_p9 = scmp.ge.s32.totalorder %s12065_s11, 4   ;;  %s15869_s27 = smov %s11967_s28 }
0x1139   : > { %s15870_s28 = smov %s11971_s29  ;;  %s15871_s29 = smov %s12076_s14 }
0x113a   : > { %s15872_s30 = smov %s12065_s11  ;;  %20 = sbr.rel (!%p18_p9) target bundleno = 8 (0x8), region = 187 }
0x113f   :  { %10392 = vsyncpa [#allocation8], 1 }
0x1140   :  { %10394 = vsyncpa [#allocation8 + $0x1], 1 }

</bundles_post_ra>
